<compile_context>
chip_gen: v5e
topology: v5e:2x2
jax: 0.10.0
libtpu: 0.0.40
codegen_flags: <defaults>
</compile_context>

<pallas_src>
import jax
import jax.numpy as jnp
from jax.experimental import pallas as pl
from jax.experimental.pallas import tpu as pltpu


# --------------------------- fused per-layer kernel --------------------------

def _make_layer_kernel(cfg):
    H, W = cfg["H"], cfg["W"]
    Cin, Cb = cfg["Cin"], cfg["Cb"]
    nf, ncls = cfg["nf"], cfg["ncls"]
    kws = cfg["kws"]                       # ((kh, kw), ...) for the 3 branches
    PL, PR = cfg["PL"], cfg["PR"]          # shared left/right replicate padding
    has_bn = cfg["has_bottleneck"]
    apply_in = cfg["apply_instnorm"]

    def kernel(*refs):
        it = iter(refs)
        x_ref = next(it)
        if has_bn:
            wbn_ref, bbn_ref = next(it), next(it)
        br_refs = [(next(it), next(it), next(it)) for _ in range(3)]
        wmp_ref, bmp_ref = next(it), next(it)
        wdw1_ref, w1_ref, b1_ref, w2_ref = next(it), next(it), next(it), next(it)
        xout_ref, head_ref = next(it), next(it)
        pad_ref = next(it)                                   # VMEM scratch

        x = x_ref[...].astype(jnp.float32)                   # (1,H,W,Cin)

        if apply_in:
            # LogTransform: InstanceNorm1d(affine=False) over the W axis.
            mean = jnp.mean(x, axis=2, keepdims=True)
            var = jnp.mean(jnp.square(x - mean), axis=2, keepdims=True)
            x = (x - mean) * jax.lax.rsqrt(var + 1e-5)

        if has_bn:
            # Bottleneck: depthwise-1x1 + pointwise + BN folded into one matmul.
            xb = jnp.maximum(
                jnp.dot(x.reshape(H * W, Cin), wbn_ref[...],
                        preferred_element_type=jnp.float32) + bbn_ref[...],
                0.0).reshape(1, H, W, Cb)
        else:
            xb = x                                           # Cb == Cin

        # Replicate-padded activation in VMEM scratch, shared by all branches
        # and the maxpool (replicate padding == -inf padding under max).
        pad_ref[:, :H, PL:PL + W, :] = xb
        pad_ref[:, :H, :PL, :] = jnp.broadcast_to(xb[:, :, :1, :], (1, H, PL, Cb))
        pad_ref[:, :H, PL + W:, :] = jnp.broadcast_to(xb[:, :, W - 1:, :],
                                                      (1, H, PR, Cb))
        pad_ref[:, H:, :, :] = pad_ref[:, H - 1:H, :, :]     # bottom replicate row

        outs = []
        for (wdw_ref, wpw_ref, bias_ref), (kh, kw) in zip(br_refs, kws):
            wdw = wdw_ref[...]                               # (kh*kw, Cb)
            off = PL - (kw - 1) // 2
            acc = jnp.zeros((1, H, W, Cb), jnp.float32)
            for i in range(kh):                              # depthwise taps
                for j in range(kw):
                    tap = pad_ref[:, i:i + H, off + j:off + j + W, :]
                    acc = acc + tap * wdw[i * kw + j]
            if Cb == 1:
                # Pointwise degenerates to a broadcast multiply.
                y = acc * wpw_ref[...] + bias_ref[...]
            else:
                y = (jnp.dot(acc.reshape(H * W, Cb), wpw_ref[...],
                             preferred_element_type=jnp.float32)
                     + bias_ref[...]).reshape(1, H, W, nf)
            outs.append(jnp.maximum(y, 0.0))

        # max_pool2d(kernel=(1,3), stride=1, padding=(0,1)) + 1x1 conv + BN + ReLU.
        m = pad_ref[:, :H, PL - 1:PL - 1 + W, :]
        m = jnp.maximum(m, pad_ref[:, :H, PL:PL + W, :])
        m = jnp.maximum(m, pad_ref[:, :H, PL + 1:PL + 1 + W, :])
        if Cb == 1:
            ymp = m * wmp_ref[...] + bmp_ref[...]
        else:
            ymp = (jnp.dot(m.reshape(H * W, Cb), wmp_ref[...],
                           preferred_element_type=jnp.float32)
                   + bmp_ref[...]).reshape(1, H, W, nf)
        outs.append(jnp.maximum(ymp, 0.0))

        xcat = jnp.concatenate(outs, axis=-1)                # (1,H,W,4*nf)
        xout_ref[...] = xcat.astype(xout_ref.dtype)

        # ---- fused FCNHead_Separable (weights shared across layers) ----
        # depthwise (H,1) conv with no padding collapses H -> 1 (sum over H).
        hacc = jnp.sum(xcat * wdw1_ref[...][None, :, None, :], axis=1)    # (1,W,4nf)
        y1 = jnp.maximum(
            jnp.dot(hacc.reshape(W, 4 * nf), w1_ref[...],
                    preferred_element_type=jnp.float32) + b1_ref[...], 0.0)
        logits = jnp.dot(y1, w2_ref[...], preferred_element_type=jnp.float32)
        head_ref[...] = jax.nn.softmax(logits, axis=-1).reshape(
            1, W, ncls).astype(head_ref.dtype)

    return kernel


def apply_layer(x, lp, hp, cfg):
    """x: (B,H,W,Cin) NHWC -> (x_next (B,H,W,4nf), head (B,W,ncls))."""
    B = x.shape[0]
    H, W = cfg["H"], cfg["W"]
    Cin, nf, ncls = cfg["Cin"], cfg["nf"], cfg["ncls"]

    inputs = [x]
    in_specs = [pl.BlockSpec((1, H, W, Cin), lambda b: (b, 0, 0, 0))]

    def add_w(arr):
        inputs.append(arr)
        in_specs.append(pl.BlockSpec(arr.shape, lambda b, _n=arr.ndim: (0,) * _n))

    if cfg["has_bottleneck"]:
        add_w(lp["bottleneck_w"]); add_w(lp["bottleneck_b"])
    for br in lp["branches"]:
        add_w(br["wdw"]); add_w(br["wpw"]); add_w(br["bias"])
    add_w(lp["mp_w"]); add_w(lp["mp_b"])
    add_w(hp["wdw1"]); add_w(hp["w1"]); add_w(hp["b1"]); add_w(hp["w2"])

    out_shape = (jax.ShapeDtypeStruct((B, H, W, 4 * nf), jnp.float32),
                 jax.ShapeDtypeStruct((B, W, ncls), jnp.float32))
    out_specs = (pl.BlockSpec((1, H, W, 4 * nf), lambda b: (b, 0, 0, 0)),
                 pl.BlockSpec((1, W, ncls), lambda b: (b, 0, 0)))
    scratch = [pltpu.VMEM((1, H + 1, W + cfg["PL"] + cfg["PR"], cfg["Cb"]),
                          jnp.float32)]

    return pl.pallas_call(
        _make_layer_kernel(cfg),
        out_shape=out_shape,
        grid_spec=pltpu.PrefetchScalarGridSpec(
            num_scalar_prefetch=0,
            grid=(B,),
            in_specs=in_specs,
            out_specs=out_specs,
            scratch_shapes=scratch),
        compiler_params=pltpu.CompilerParams(
            dimension_semantics=("parallel",),
            vmem_limit_bytes=32 * 1024 * 1024),
    )(*inputs)


# --------------------------- parameter init ----------------------------------

def _fold_bn(key, c):
    k1, k2, k3, k4 = jax.random.split(key, 4)
    gamma = jax.random.uniform(k1, (c,), minval=0.5, maxval=1.5)
    beta = 0.1 * jax.random.normal(k2, (c,))
    rmean = 0.1 * jax.random.normal(k3, (c,))
    rvar = jax.random.uniform(k4, (c,), minval=0.5, maxval=1.5)
    scale = gamma * jax.lax.rsqrt(rvar + 1e-5)
    bias = beta - rmean * scale
    return scale.astype(jnp.float32), bias.astype(jnp.float32)


def make_layer_cfg(in_ch, nb_filters, kernel_size, H, W, ncls,
                   apply_instnorm, bottleneck_size=32, use_bottleneck=True):
    has_bn = use_bottleneck and in_ch > bottleneck_size
    cb = bottleneck_size if has_bn else in_ch
    kws = tuple((2, kernel_size // (2 ** i)) for i in range(3))
    lpads = [(kw - 1) // 2 for _, kw in kws]
    rpads = [(kw - 1) - lp for (_, kw), lp in zip(kws, lpads)]
    return dict(H=H, W=W, Cin=in_ch, Cb=cb, nf=nb_filters, ncls=ncls,
                kws=kws, PL=max(max(lpads), 1), PR=max(max(rpads), 1),
                has_bottleneck=has_bn, apply_instnorm=apply_instnorm)


def init_inception(key, in_channels, nb_filters, kernel_size,
                   bottleneck_size=32, use_bottleneck=True):
    keys = jax.random.split(key, 14)
    p = {}
    cin = in_channels
    if use_bottleneck and in_channels > bottleneck_size:
        wdw = 0.2 * jax.random.normal(keys[0], (in_channels,), jnp.float32)
        wpw = 0.2 * jax.random.normal(keys[1], (in_channels, bottleneck_size),
                                      jnp.float32)
        scale, bias = _fold_bn(keys[2], bottleneck_size)
        # fold depthwise-1x1 (rows) and BN scale (cols) into the pointwise weight
        p["bottleneck_w"] = (wdw[:, None] * wpw) * scale[None, :]
        p["bottleneck_b"] = bias[None, :]
        cin = bottleneck_size
    p["branches"] = []
    for i in range(3):
        kh, kw = 2, kernel_size // (2 ** i)
        wdw = 0.2 * jax.random.normal(keys[3 + 3 * i], (kh * kw, cin), jnp.float32)
        wpw = 0.2 * jax.random.normal(keys[4 + 3 * i], (cin, nb_filters), jnp.float32)
        scale, bias = _fold_bn(keys[5 + 3 * i], nb_filters)
        p["branches"].append(dict(wdw=wdw, wpw=wpw * scale[None, :],
                                  bias=bias[None, :]))
    # conv1x1 branch: plain Conv2d(cin, nb_filters, 1x1) + BN (scale folded) + ReLU
    w = 0.2 * jax.random.normal(keys[12], (cin, nb_filters), jnp.float32)
    scale, bias = _fold_bn(keys[13], nb_filters)
    p["mp_w"] = w * scale[None, :]
    p["mp_b"] = bias[None, :]
    return p


def init_head(key, in_channels, nb_classes, dim_size):
    keys = jax.random.split(key, 5)
    mid = in_channels // 4
    wdw1 = 0.2 * jax.random.normal(keys[0], (dim_size, in_channels), jnp.float32)
    wpw1 = 0.2 * jax.random.normal(keys[1], (in_channels, mid), jnp.float32)
    scale1, bias1 = _fold_bn(keys[2], mid)
    wdw2 = 0.2 * jax.random.normal(keys[3], (mid,), jnp.float32)
    wpw2 = 0.2 * jax.random.normal(keys[4], (mid, nb_classes), jnp.float32)
    return dict(wdw1=wdw1,
                w1=wpw1 * scale1[None, :], b1=bias1[None, :],
                w2=wdw2[:, None] * wpw2)          # second sepconv has no BN


# ------------------------------ forward ---------------------------------------

def mssn2d_forward(x_nchw, params, cfgs):
    B, C, H, W = x_nchw.shape
    assert C == 1, "LogTransform implies a single input channel"
    x = x_nchw.reshape(B, H, W, 1)                # NHWC (exact: C == 1)
    heads = []
    for lp, cfg in zip(params["layers"], cfgs):
        x, h = apply_layer(x, lp, params["head"], cfg)
        heads.append(h)                           # (B, W, ncls)
    out = jnp.stack(heads, axis=0)                # (depth, B, W, ncls)
    return jnp.transpose(out, (0, 1, 3, 2))       # (depth, B, ncls, W)


# ------------------------------- main -----------------------------------------

if __name__ == "__main__":
    key = jax.random.PRNGKey(0)
    k_in, k_p = jax.random.split(key)

    # Small, module-consistent configuration.
    B, H, W = 2, 8, 16
    nb_filters, depth, kernel_size, nb_classes = 16, 2, 8, 2

    pkeys = jax.random.split(k_p, depth + 1)
    layers, cfgs = [], []
    in_ch = 1                                     # input_shape = (1, H, W)
    for d in range(depth):
        cfgs.append(make_layer_cfg(in_ch, nb_filters, kernel_size, H, W,
                                   nb_classes, apply_instnorm=(d == 0)))
        layers.append(init_inception(pkeys[d], in_ch, nb_filters, kernel_size))
        in_ch = nb_filters * 4
    head = init_head(pkeys[depth], in_ch, nb_classes, H)
    params = dict(layers=layers, head=head)

    x = jax.random.normal(k_in, (B, 1, H, W), jnp.float32)

    fwd = jax.jit(lambda xx: mssn2d_forward(xx, params, cfgs))
    out = jax.block_until_ready(fwd(x))

    assert out.shape == (depth, B, nb_classes, W), out.shape
    assert bool(jnp.all(jnp.isfinite(out)))
    # Softmax over the class axis must sum to 1.
    assert bool(jnp.allclose(jnp.sum(out, axis=2), 1.0, atol=1e-4))
    print("KERNEL_OK")
</pallas_src>

<mosaic_0001>
module attributes {stable_mosaic.version = 11 : i64} {
  func.func @kernel(%arg0: i32, %arg1: memref<1x8x16x64xf32, #tpu.memory_space<vmem>>, %arg2: memref<64x32xf32, #tpu.memory_space<vmem>>, %arg3: memref<1x32xf32, #tpu.memory_space<vmem>>, %arg4: memref<16x32xf32, #tpu.memory_space<vmem>>, %arg5: memref<32x16xf32, #tpu.memory_space<vmem>>, %arg6: memref<1x16xf32, #tpu.memory_space<vmem>>, %arg7: memref<8x32xf32, #tpu.memory_space<vmem>>, %arg8: memref<32x16xf32, #tpu.memory_space<vmem>>, %arg9: memref<1x16xf32, #tpu.memory_space<vmem>>, %arg10: memref<4x32xf32, #tpu.memory_space<vmem>>, %arg11: memref<32x16xf32, #tpu.memory_space<vmem>>, %arg12: memref<1x16xf32, #tpu.memory_space<vmem>>, %arg13: memref<32x16xf32, #tpu.memory_space<vmem>>, %arg14: memref<1x16xf32, #tpu.memory_space<vmem>>, %arg15: memref<8x64xf32, #tpu.memory_space<vmem>>, %arg16: memref<64x16xf32, #tpu.memory_space<vmem>>, %arg17: memref<1x16xf32, #tpu.memory_space<vmem>>, %arg18: memref<16x2xf32, #tpu.memory_space<vmem>>, %arg19: memref<1x8x16x64xf32, #tpu.memory_space<vmem>>, %arg20: memref<1x16x2xf32, #tpu.memory_space<vmem>>, %arg21: memref<1x9x23x32xf32, #tpu.memory_space<vmem>>) attributes {dimension_semantics = [#tpu.dimension_semantics<parallel>], iteration_bounds = array<i64: 2>, scalar_prefetch = 0 : i64, scratch_operands = 1 : i64, tpu.core_type = #tpu.core_type<tc>, window_params = [{transform_indices = @transform_0, window_bounds = array<i64: 1, 8, 16, 64>}, {pipeline_mode = #tpu.pipeline_mode<synchronous>, transform_indices = @transform_1, window_bounds = array<i64: 64, 32>}, {pipeline_mode = #tpu.pipeline_mode<synchronous>, transform_indices = @transform_2, window_bounds = array<i64: 1, 32>}, {pipeline_mode = #tpu.pipeline_mode<synchronous>, transform_indices = @transform_3, window_bounds = array<i64: 16, 32>}, {pipeline_mode = #tpu.pipeline_mode<synchronous>, transform_indices = @transform_4, window_bounds = array<i64: 32, 16>}, {pipeline_mode = #tpu.pipeline_mode<synchronous>, transform_indices = @transform_5, window_bounds = array<i64: 1, 16>}, {pipeline_mode = #tpu.pipeline_mode<synchronous>, transform_indices = @transform_6, window_bounds = array<i64: 8, 32>}, {pipeline_mode = #tpu.pipeline_mode<synchronous>, transform_indices = @transform_7, window_bounds = array<i64: 32, 16>}, {pipeline_mode = #tpu.pipeline_mode<synchronous>, transform_indices = @transform_8, window_bounds = array<i64: 1, 16>}, {pipeline_mode = #tpu.pipeline_mode<synchronous>, transform_indices = @transform_9, window_bounds = array<i64: 4, 32>}, {pipeline_mode = #tpu.pipeline_mode<synchronous>, transform_indices = @transform_10, window_bounds = array<i64: 32, 16>}, {pipeline_mode = #tpu.pipeline_mode<synchronous>, transform_indices = @transform_11, window_bounds = array<i64: 1, 16>}, {pipeline_mode = #tpu.pipeline_mode<synchronous>, transform_indices = @transform_12, window_bounds = array<i64: 32, 16>}, {pipeline_mode = #tpu.pipeline_mode<synchronous>, transform_indices = @transform_13, window_bounds = array<i64: 1, 16>}, {pipeline_mode = #tpu.pipeline_mode<synchronous>, transform_indices = @transform_14, window_bounds = array<i64: 8, 64>}, {pipeline_mode = #tpu.pipeline_mode<synchronous>, transform_indices = @transform_15, window_bounds = array<i64: 64, 16>}, {pipeline_mode = #tpu.pipeline_mode<synchronous>, transform_indices = @transform_16, window_bounds = array<i64: 1, 16>}, {pipeline_mode = #tpu.pipeline_mode<synchronous>, transform_indices = @transform_17, window_bounds = array<i64: 16, 2>}, {transform_indices = @transform_18, window_bounds = array<i64: 1, 8, 16, 64>}, {transform_indices = @transform_19, window_bounds = array<i64: 1, 16, 2>}]} {
    %c0 = arith.constant 0 : index
    %c0_0 = arith.constant 0 : index
    %c0_1 = arith.constant 0 : index
    %c0_2 = arith.constant 0 : index
    %0 = vector.load %arg1[%c0, %c0_0, %c0_1, %c0_2] : memref<1x8x16x64xf32, #tpu.memory_space<vmem>>, vector<1x8x16x64xf32>
    %1 = vector.shape_cast %0 : vector<1x8x16x64xf32> to vector<128x64xf32>
    %c0_3 = arith.constant 0 : index
    %c0_4 = arith.constant 0 : index
    %2 = vector.load %arg2[%c0_3, %c0_4] : memref<64x32xf32, #tpu.memory_space<vmem>>, vector<64x32xf32>
    %cst = arith.constant dense<0.000000e+00> : vector<128x32xf32>
    %3 = tpu.matmul %1, %2, %cst {dimension_numbers = #tpu.dot_dimension_numbers<[1], [0], [0], [1], [0, 0, 1, 1], [], []>} : vector<128x64xf32>, vector<64x32xf32>, vector<128x32xf32> -> vector<128x32xf32>
    %c0_5 = arith.constant 0 : index
    %c0_6 = arith.constant 0 : index
    %4 = vector.load %arg3[%c0_5, %c0_6] : memref<1x32xf32, #tpu.memory_space<vmem>>, vector<1x32xf32>
    %5 = vector.broadcast %4 : vector<1x32xf32> to vector<128x32xf32>
    %6 = arith.addf %3, %5 : vector<128x32xf32>
    %cst_7 = arith.constant 0.000000e+00 : f32
    %7 = vector.broadcast %cst_7 : f32 to vector<128x32xf32>
    %8 = arith.maximumf %6, %7 : vector<128x32xf32>
    %9 = vector.shape_cast %8 : vector<128x32xf32> to vector<1x8x16x32xf32>
    %c0_8 = arith.constant 0 : index
    %c0_9 = arith.constant 0 : index
    %c3 = arith.constant 3 : index
    %c0_10 = arith.constant 0 : index
    %10 = vector.load %arg21[%c0_8, %c0_9, %c3, %c0_10] : memref<1x9x23x32xf32, #tpu.memory_space<vmem>>, vector<1x8x16x32xf32>
    tpu.vector_store %arg21[%c0_8, %c0_9, %c3, %c0_10], %9 {strides = array<i32>} : memref<1x9x23x32xf32, #tpu.memory_space<vmem>>, vector<1x8x16x32xf32>,
    %11 = vector.extract_strided_slice %9 {offsets = [0, 0, 0, 0], sizes = [1, 8, 1, 32], strides = [1, 1, 1, 1]} : vector<1x8x16x32xf32> to vector<1x8x1x32xf32>
    %12 = vector.shape_cast %11 : vector<1x8x1x32xf32> to vector<1x8x1x32xf32>
    %13 = vector.broadcast %12 : vector<1x8x1x32xf32> to vector<1x8x3x32xf32>
    %c0_11 = arith.constant 0 : index
    %c0_12 = arith.constant 0 : index
    %c0_13 = arith.constant 0 : index
    %c0_14 = arith.constant 0 : index
    %14 = vector.load %arg21[%c0_11, %c0_12, %c0_13, %c0_14] : memref<1x9x23x32xf32, #tpu.memory_space<vmem>>, vector<1x8x3x32xf32>
    tpu.vector_store %arg21[%c0_11, %c0_12, %c0_13, %c0_14], %13 {strides = array<i32>} : memref<1x9x23x32xf32, #tpu.memory_space<vmem>>, vector<1x8x3x32xf32>,
    %15 = vector.extract_strided_slice %9 {offsets = [0, 0, 15, 0], sizes = [1, 8, 1, 32], strides = [1, 1, 1, 1]} : vector<1x8x16x32xf32> to vector<1x8x1x32xf32>
    %16 = vector.shape_cast %15 : vector<1x8x1x32xf32> to vector<1x8x1x32xf32>
    %17 = vector.broadcast %16 : vector<1x8x1x32xf32> to vector<1x8x4x32xf32>
    %c0_15 = arith.constant 0 : index
    %c0_16 = arith.constant 0 : index
    %c19 = arith.constant 19 : index
    %c0_17 = arith.constant 0 : index
    %18 = vector.load %arg21[%c0_15, %c0_16, %c19, %c0_17] : memref<1x9x23x32xf32, #tpu.memory_space<vmem>>, vector<1x8x4x32xf32>
    tpu.vector_store %arg21[%c0_15, %c0_16, %c19, %c0_17], %17 {strides = array<i32>} : memref<1x9x23x32xf32, #tpu.memory_space<vmem>>, vector<1x8x4x32xf32>,
    %c0_18 = arith.constant 0 : index
    %c7 = arith.constant 7 : index
    %c0_19 = arith.constant 0 : index
    %c0_20 = arith.constant 0 : index
    %19 = vector.load %arg21[%c0_18, %c7, %c0_19, %c0_20] : memref<1x9x23x32xf32, #tpu.memory_space<vmem>>, vector<1x1x23x32xf32>
    %c0_21 = arith.constant 0 : index
    %c8 = arith.constant 8 : index
    %c0_22 = arith.constant 0 : index
    %c0_23 = arith.constant 0 : index
    %20 = vector.load %arg21[%c0_21, %c8, %c0_22, %c0_23] : memref<1x9x23x32xf32, #tpu.memory_space<vmem>>, vector<1x1x23x32xf32>
    tpu.vector_store %arg21[%c0_21, %c8, %c0_22, %c0_23], %19 {strides = array<i32>} : memref<1x9x23x32xf32, #tpu.memory_space<vmem>>, vector<1x1x23x32xf32>,
    %c0_24 = arith.constant 0 : index
    %c0_25 = arith.constant 0 : index
    %21 = vector.load %arg4[%c0_24, %c0_25] : memref<16x32xf32, #tpu.memory_space<vmem>>, vector<16x32xf32>
    %cst_26 = arith.constant 0.000000e+00 : f32
    %22 = vector.broadcast %cst_26 : f32 to vector<1x8x16x32xf32>
    %c0_27 = arith.constant 0 : index
    %c0_28 = arith.constant 0 : index
    %c0_29 = arith.constant 0 : index
    %c0_30 = arith.constant 0 : index
    %23 = vector.load %arg21[%c0_27, %c0_28, %c0_29, %c0_30] : memref<1x9x23x32xf32, #tpu.memory_space<vmem>>, vector<1x8x16x32xf32>
    %24 = vector.extract_strided_slice %21 {offsets = [0, 0], sizes = [1, 32], strides = [1, 1]} : vector<16x32xf32> to vector<1x32xf32>
    %25 = vector.shape_cast %24 : vector<1x32xf32> to vector<32xf32>
    %26 = vector.shape_cast %25 : vector<32xf32> to vector<1x1x1x32xf32>
    %27 = vector.broadcast %26 : vector<1x1x1x32xf32> to vector<1x8x16x32xf32>
    %28 = arith.mulf %23, %27 : vector<1x8x16x32xf32>
    %29 = arith.addf %22, %28 : vector<1x8x16x32xf32>
    %c0_31 = arith.constant 0 : index
    %c0_32 = arith.constant 0 : index
    %c1 = arith.constant 1 : index
    %c0_33 = arith.constant 0 : index
    %30 = vector.load %arg21[%c0_31, %c0_32, %c1, %c0_33] : memref<1x9x23x32xf32, #tpu.memory_space<vmem>>, vector<1x8x16x32xf32>
    %31 = vector.extract_strided_slice %21 {offsets = [1, 0], sizes = [1, 32], strides = [1, 1]} : vector<16x32xf32> to vector<1x32xf32>
    %32 = vector.shape_cast %31 : vector<1x32xf32> to vector<32xf32>
    %33 = vector.shape_cast %32 : vector<32xf32> to vector<1x1x1x32xf32>
    %34 = vector.broadcast %33 : vector<1x1x1x32xf32> to vector<1x8x16x32xf32>
    %35 = arith.mulf %30, %34 : vector<1x8x16x32xf32>
    %36 = arith.addf %29, %35 : vector<1x8x16x32xf32>
    %c0_34 = arith.constant 0 : index
    %c0_35 = arith.constant 0 : index
    %c2 = arith.constant 2 : index
    %c0_36 = arith.constant 0 : index
    %37 = vector.load %arg21[%c0_34, %c0_35, %c2, %c0_36] : memref<1x9x23x32xf32, #tpu.memory_space<vmem>>, vector<1x8x16x32xf32>
    %38 = vector.extract_strided_slice %21 {offsets = [2, 0], sizes = [1, 32], strides = [1, 1]} : vector<16x32xf32> to vector<1x32xf32>
    %39 = vector.shape_cast %38 : vector<1x32xf32> to vector<32xf32>
    %40 = vector.shape_cast %39 : vector<32xf32> to vector<1x1x1x32xf32>
    %41 = vector.broadcast %40 : vector<1x1x1x32xf32> to vector<1x8x16x32xf32>
    %42 = arith.mulf %37, %41 : vector<1x8x16x32xf32>
    %43 = arith.addf %36, %42 : vector<1x8x16x32xf32>
    %c0_37 = arith.constant 0 : index
    %c0_38 = arith.constant 0 : index
    %c3_39 = arith.constant 3 : index
    %c0_40 = arith.constant 0 : index
    %44 = vector.load %arg21[%c0_37, %c0_38, %c3_39, %c0_40] : memref<1x9x23x32xf32, #tpu.memory_space<vmem>>, vector<1x8x16x32xf32>
    %45 = vector.extract_strided_slice %21 {offsets = [3, 0], sizes = [1, 32], strides = [1, 1]} : vector<16x32xf32> to vector<1x32xf32>
    %46 = vector.shape_cast %45 : vector<1x32xf32> to vector<32xf32>
    %47 = vector.shape_cast %46 : vector<32xf32> to vector<1x1x1x32xf32>
    %48 = vector.broadcast %47 : vector<1x1x1x32xf32> to vector<1x8x16x32xf32>
    %49 = arith.mulf %44, %48 : vector<1x8x16x32xf32>
    %50 = arith.addf %43, %49 : vector<1x8x16x32xf32>
    %c0_41 = arith.constant 0 : index
    %c0_42 = arith.constant 0 : index
    %c4 = arith.constant 4 : index
    %c0_43 = arith.constant 0 : index
    %51 = vector.load %arg21[%c0_41, %c0_42, %c4, %c0_43] : memref<1x9x23x32xf32, #tpu.memory_space<vmem>>, vector<1x8x16x32xf32>
    %52 = vector.extract_strided_slice %21 {offsets = [4, 0], sizes = [1, 32], strides = [1, 1]} : vector<16x32xf32> to vector<1x32xf32>
    %53 = vector.shape_cast %52 : vector<1x32xf32> to vector<32xf32>
    %54 = vector.shape_cast %53 : vector<32xf32> to vector<1x1x1x32xf32>
    %55 = vector.broadcast %54 : vector<1x1x1x32xf32> to vector<1x8x16x32xf32>
    %56 = arith.mulf %51, %55 : vector<1x8x16x32xf32>
    %57 = arith.addf %50, %56 : vector<1x8x16x32xf32>
    %c0_44 = arith.constant 0 : index
    %c0_45 = arith.constant 0 : index
    %c5 = arith.constant 5 : index
    %c0_46 = arith.constant 0 : index
    %58 = vector.load %arg21[%c0_44, %c0_45, %c5, %c0_46] : memref<1x9x23x32xf32, #tpu.memory_space<vmem>>, vector<1x8x16x32xf32>
    %59 = vector.extract_strided_slice %21 {offsets = [5, 0], sizes = [1, 32], strides = [1, 1]} : vector<16x32xf32> to vector<1x32xf32>
    %60 = vector.shape_cast %59 : vector<1x32xf32> to vector<32xf32>
    %61 = vector.shape_cast %60 : vector<32xf32> to vector<1x1x1x32xf32>
    %62 = vector.broadcast %61 : vector<1x1x1x32xf32> to vector<1x8x16x32xf32>
    %63 = arith.mulf %58, %62 : vector<1x8x16x32xf32>
    %64 = arith.addf %57, %63 : vector<1x8x16x32xf32>
    %c0_47 = arith.constant 0 : index
    %c0_48 = arith.constant 0 : index
    %c6 = arith.constant 6 : index
    %c0_49 = arith.constant 0 : index
    %65 = vector.load %arg21[%c0_47, %c0_48, %c6, %c0_49] : memref<1x9x23x32xf32, #tpu.memory_space<vmem>>, vector<1x8x16x32xf32>
    %66 = vector.extract_strided_slice %21 {offsets = [6, 0], sizes = [1, 32], strides = [1, 1]} : vector<16x32xf32> to vector<1x32xf32>
    %67 = vector.shape_cast %66 : vector<1x32xf32> to vector<32xf32>
    %68 = vector.shape_cast %67 : vector<32xf32> to vector<1x1x1x32xf32>
    %69 = vector.broadcast %68 : vector<1x1x1x32xf32> to vector<1x8x16x32xf32>
    %70 = arith.mulf %65, %69 : vector<1x8x16x32xf32>
    %71 = arith.addf %64, %70 : vector<1x8x16x32xf32>
    %c0_50 = arith.constant 0 : index
    %c0_51 = arith.constant 0 : index
    %c7_52 = arith.constant 7 : index
    %c0_53 = arith.constant 0 : index
    %72 = vector.load %arg21[%c0_50, %c0_51, %c7_52, %c0_53] : memref<1x9x23x32xf32, #tpu.memory_space<vmem>>, vector<1x8x16x32xf32>
    %73 = vector.extract_strided_slice %21 {offsets = [7, 0], sizes = [1, 32], strides = [1, 1]} : vector<16x32xf32> to vector<1x32xf32>
    %74 = vector.shape_cast %73 : vector<1x32xf32> to vector<32xf32>
    %75 = vector.shape_cast %74 : vector<32xf32> to vector<1x1x1x32xf32>
    %76 = vector.broadcast %75 : vector<1x1x1x32xf32> to vector<1x8x16x32xf32>
    %77 = arith.mulf %72, %76 : vector<1x8x16x32xf32>
    %78 = arith.addf %71, %77 : vector<1x8x16x32xf32>
    %c0_54 = arith.constant 0 : index
    %c1_55 = arith.constant 1 : index
    %c0_56 = arith.constant 0 : index
    %c0_57 = arith.constant 0 : index
    %79 = vector.load %arg21[%c0_54, %c1_55, %c0_56, %c0_57] : memref<1x9x23x32xf32, #tpu.memory_space<vmem>>, vector<1x8x16x32xf32>
    %80 = vector.extract_strided_slice %21 {offsets = [8, 0], sizes = [1, 32], strides = [1, 1]} : vector<16x32xf32> to vector<1x32xf32>
    %81 = vector.shape_cast %80 : vector<1x32xf32> to vector<32xf32>
    %82 = vector.shape_cast %81 : vector<32xf32> to vector<1x1x1x32xf32>
    %83 = vector.broadcast %82 : vector<1x1x1x32xf32> to vector<1x8x16x32xf32>
    %84 = arith.mulf %79, %83 : vector<1x8x16x32xf32>
    %85 = arith.addf %78, %84 : vector<1x8x16x32xf32>
    %c0_58 = arith.constant 0 : index
    %c1_59 = arith.constant 1 : index
    %c1_60 = arith.constant 1 : index
    %c0_61 = arith.constant 0 : index
    %86 = vector.load %arg21[%c0_58, %c1_59, %c1_60, %c0_61] : memref<1x9x23x32xf32, #tpu.memory_space<vmem>>, vector<1x8x16x32xf32>
    %87 = vector.extract_strided_slice %21 {offsets = [9, 0], sizes = [1, 32], strides = [1, 1]} : vector<16x32xf32> to vector<1x32xf32>
    %88 = vector.shape_cast %87 : vector<1x32xf32> to vector<32xf32>
    %89 = vector.shape_cast %88 : vector<32xf32> to vector<1x1x1x32xf32>
    %90 = vector.broadcast %89 : vector<1x1x1x32xf32> to vector<1x8x16x32xf32>
    %91 = arith.mulf %86, %90 : vector<1x8x16x32xf32>
    %92 = arith.addf %85, %91 : vector<1x8x16x32xf32>
    %c0_62 = arith.constant 0 : index
    %c1_63 = arith.constant 1 : index
    %c2_64 = arith.constant 2 : index
    %c0_65 = arith.constant 0 : index
    %93 = vector.load %arg21[%c0_62, %c1_63, %c2_64, %c0_65] : memref<1x9x23x32xf32, #tpu.memory_space<vmem>>, vector<1x8x16x32xf32>
    %94 = vector.extract_strided_slice %21 {offsets = [10, 0], sizes = [1, 32], strides = [1, 1]} : vector<16x32xf32> to vector<1x32xf32>
    %95 = vector.shape_cast %94 : vector<1x32xf32> to vector<32xf32>
    %96 = vector.shape_cast %95 : vector<32xf32> to vector<1x1x1x32xf32>
    %97 = vector.broadcast %96 : vector<1x1x1x32xf32> to vector<1x8x16x32xf32>
    %98 = arith.mulf %93, %97 : vector<1x8x16x32xf32>
    %99 = arith.addf %92, %98 : vector<1x8x16x32xf32>
    %c0_66 = arith.constant 0 : index
    %c1_67 = arith.constant 1 : index
    %c3_68 = arith.constant 3 : index
    %c0_69 = arith.constant 0 : index
    %100 = vector.load %arg21[%c0_66, %c1_67, %c3_68, %c0_69] : memref<1x9x23x32xf32, #tpu.memory_space<vmem>>, vector<1x8x16x32xf32>
    %101 = vector.extract_strided_slice %21 {offsets = [11, 0], sizes = [1, 32], strides = [1, 1]} : vector<16x32xf32> to vector<1x32xf32>
    %102 = vector.shape_cast %101 : vector<1x32xf32> to vector<32xf32>
    %103 = vector.shape_cast %102 : vector<32xf32> to vector<1x1x1x32xf32>
    %104 = vector.broadcast %103 : vector<1x1x1x32xf32> to vector<1x8x16x32xf32>
    %105 = arith.mulf %100, %104 : vector<1x8x16x32xf32>
    %106 = arith.addf %99, %105 : vector<1x8x16x32xf32>
    %c0_70 = arith.constant 0 : index
    %c1_71 = arith.constant 1 : index
    %c4_72 = arith.constant 4 : index
    %c0_73 = arith.constant 0 : index
    %107 = vector.load %arg21[%c0_70, %c1_71, %c4_72, %c0_73] : memref<1x9x23x32xf32, #tpu.memory_space<vmem>>, vector<1x8x16x32xf32>
    %108 = vector.extract_strided_slice %21 {offsets = [12, 0], sizes = [1, 32], strides = [1, 1]} : vector<16x32xf32> to vector<1x32xf32>
    %109 = vector.shape_cast %108 : vector<1x32xf32> to vector<32xf32>
    %110 = vector.shape_cast %109 : vector<32xf32> to vector<1x1x1x32xf32>
    %111 = vector.broadcast %110 : vector<1x1x1x32xf32> to vector<1x8x16x32xf32>
    %112 = arith.mulf %107, %111 : vector<1x8x16x32xf32>
    %113 = arith.addf %106, %112 : vector<1x8x16x32xf32>
    %c0_74 = arith.constant 0 : index
    %c1_75 = arith.constant 1 : index
    %c5_76 = arith.constant 5 : index
    %c0_77 = arith.constant 0 : index
    %114 = vector.load %arg21[%c0_74, %c1_75, %c5_76, %c0_77] : memref<1x9x23x32xf32, #tpu.memory_space<vmem>>, vector<1x8x16x32xf32>
    %115 = vector.extract_strided_slice %21 {offsets = [13, 0], sizes = [1, 32], strides = [1, 1]} : vector<16x32xf32> to vector<1x32xf32>
    %116 = vector.shape_cast %115 : vector<1x32xf32> to vector<32xf32>
    %117 = vector.shape_cast %116 : vector<32xf32> to vector<1x1x1x32xf32>
    %118 = vector.broadcast %117 : vector<1x1x1x32xf32> to vector<1x8x16x32xf32>
    %119 = arith.mulf %114, %118 : vector<1x8x16x32xf32>
    %120 = arith.addf %113, %119 : vector<1x8x16x32xf32>
    %c0_78 = arith.constant 0 : index
    %c1_79 = arith.constant 1 : index
    %c6_80 = arith.constant 6 : index
    %c0_81 = arith.constant 0 : index
    %121 = vector.load %arg21[%c0_78, %c1_79, %c6_80, %c0_81] : memref<1x9x23x32xf32, #tpu.memory_space<vmem>>, vector<1x8x16x32xf32>
    %122 = vector.extract_strided_slice %21 {offsets = [14, 0], sizes = [1, 32], strides = [1, 1]} : vector<16x32xf32> to vector<1x32xf32>
    %123 = vector.shape_cast %122 : vector<1x32xf32> to vector<32xf32>
    %124 = vector.shape_cast %123 : vector<32xf32> to vector<1x1x1x32xf32>
    %125 = vector.broadcast %124 : vector<1x1x1x32xf32> to vector<1x8x16x32xf32>
    %126 = arith.mulf %121, %125 : vector<1x8x16x32xf32>
    %127 = arith.addf %120, %126 : vector<1x8x16x32xf32>
    %c0_82 = arith.constant 0 : index
    %c1_83 = arith.constant 1 : index
    %c7_84 = arith.constant 7 : index
    %c0_85 = arith.constant 0 : index
    %128 = vector.load %arg21[%c0_82, %c1_83, %c7_84, %c0_85] : memref<1x9x23x32xf32, #tpu.memory_space<vmem>>, vector<1x8x16x32xf32>
    %129 = vector.extract_strided_slice %21 {offsets = [15, 0], sizes = [1, 32], strides = [1, 1]} : vector<16x32xf32> to vector<1x32xf32>
    %130 = vector.shape_cast %129 : vector<1x32xf32> to vector<32xf32>
    %131 = vector.shape_cast %130 : vector<32xf32> to vector<1x1x1x32xf32>
    %132 = vector.broadcast %131 : vector<1x1x1x32xf32> to vector<1x8x16x32xf32>
    %133 = arith.mulf %128, %132 : vector<1x8x16x32xf32>
    %134 = arith.addf %127, %133 : vector<1x8x16x32xf32>
    %135 = vector.shape_cast %134 : vector<1x8x16x32xf32> to vector<128x32xf32>
    %c0_86 = arith.constant 0 : index
    %c0_87 = arith.constant 0 : index
    %136 = vector.load %arg5[%c0_86, %c0_87] : memref<32x16xf32, #tpu.memory_space<vmem>>, vector<32x16xf32>
    %cst_88 = arith.constant dense<0.000000e+00> : vector<128x16xf32>
    %137 = tpu.matmul %135, %136, %cst_88 {dimension_numbers = #tpu.dot_dimension_numbers<[1], [0], [0], [1], [0, 0, 1, 1], [], []>} : vector<128x32xf32>, vector<32x16xf32>, vector<128x16xf32> -> vector<128x16xf32>
    %c0_89 = arith.constant 0 : index
    %c0_90 = arith.constant 0 : index
    %138 = vector.load %arg6[%c0_89, %c0_90] : memref<1x16xf32, #tpu.memory_space<vmem>>, vector<1x16xf32>
    %139 = vector.broadcast %138 : vector<1x16xf32> to vector<128x16xf32>
    %140 = arith.addf %137, %139 : vector<128x16xf32>
    %141 = vector.shape_cast %140 : vector<128x16xf32> to vector<1x8x16x16xf32>
    %cst_91 = arith.constant 0.000000e+00 : f32
    %142 = vector.broadcast %cst_91 : f32 to vector<1x8x16x16xf32>
    %143 = arith.maximumf %141, %142 : vector<1x8x16x16xf32>
    %c0_92 = arith.constant 0 : index
    %c0_93 = arith.constant 0 : index
    %144 = vector.load %arg7[%c0_92, %c0_93] : memref<8x32xf32, #tpu.memory_space<vmem>>, vector<8x32xf32>
    %cst_94 = arith.constant 0.000000e+00 : f32
    %145 = vector.broadcast %cst_94 : f32 to vector<1x8x16x32xf32>
    %c0_95 = arith.constant 0 : index
    %c0_96 = arith.constant 0 : index
    %c2_97 = arith.constant 2 : index
    %c0_98 = arith.constant 0 : index
    %146 = vector.load %arg21[%c0_95, %c0_96, %c2_97, %c0_98] : memref<1x9x23x32xf32, #tpu.memory_space<vmem>>, vector<1x8x16x32xf32>
    %147 = vector.extract_strided_slice %144 {offsets = [0, 0], sizes = [1, 32], strides = [1, 1]} : vector<8x32xf32> to vector<1x32xf32>
    %148 = vector.shape_cast %147 : vector<1x32xf32> to vector<32xf32>
    %149 = vector.shape_cast %148 : vector<32xf32> to vector<1x1x1x32xf32>
    %150 = vector.broadcast %149 : vector<1x1x1x32xf32> to vector<1x8x16x32xf32>
    %151 = arith.mulf %146, %150 : vector<1x8x16x32xf32>
    %152 = arith.addf %145, %151 : vector<1x8x16x32xf32>
    %c0_99 = arith.constant 0 : index
    %c0_100 = arith.constant 0 : index
    %c3_101 = arith.constant 3 : index
    %c0_102 = arith.constant 0 : index
    %153 = vector.load %arg21[%c0_99, %c0_100, %c3_101, %c0_102] : memref<1x9x23x32xf32, #tpu.memory_space<vmem>>, vector<1x8x16x32xf32>
    %154 = vector.extract_strided_slice %144 {offsets = [1, 0], sizes = [1, 32], strides = [1, 1]} : vector<8x32xf32> to vector<1x32xf32>
    %155 = vector.shape_cast %154 : vector<1x32xf32> to vector<32xf32>
    %156 = vector.shape_cast %155 : vector<32xf32> to vector<1x1x1x32xf32>
    %157 = vector.broadcast %156 : vector<1x1x1x32xf32> to vector<1x8x16x32xf32>
    %158 = arith.mulf %153, %157 : vector<1x8x16x32xf32>
    %159 = arith.addf %152, %158 : vector<1x8x16x32xf32>
    %c0_103 = arith.constant 0 : index
    %c0_104 = arith.constant 0 : index
    %c4_105 = arith.constant 4 : index
    %c0_106 = arith.constant 0 : index
    %160 = vector.load %arg21[%c0_103, %c0_104, %c4_105, %c0_106] : memref<1x9x23x32xf32, #tpu.memory_space<vmem>>, vector<1x8x16x32xf32>
    %161 = vector.extract_strided_slice %144 {offsets = [2, 0], sizes = [1, 32], strides = [1, 1]} : vector<8x32xf32> to vector<1x32xf32>
    %162 = vector.shape_cast %161 : vector<1x32xf32> to vector<32xf32>
    %163 = vector.shape_cast %162 : vector<32xf32> to vector<1x1x1x32xf32>
    %164 = vector.broadcast %163 : vector<1x1x1x32xf32> to vector<1x8x16x32xf32>
    %165 = arith.mulf %160, %164 : vector<1x8x16x32xf32>
    %166 = arith.addf %159, %165 : vector<1x8x16x32xf32>
    %c0_107 = arith.constant 0 : index
    %c0_108 = arith.constant 0 : index
    %c5_109 = arith.constant 5 : index
    %c0_110 = arith.constant 0 : index
    %167 = vector.load %arg21[%c0_107, %c0_108, %c5_109, %c0_110] : memref<1x9x23x32xf32, #tpu.memory_space<vmem>>, vector<1x8x16x32xf32>
    %168 = vector.extract_strided_slice %144 {offsets = [3, 0], sizes = [1, 32], strides = [1, 1]} : vector<8x32xf32> to vector<1x32xf32>
    %169 = vector.shape_cast %168 : vector<1x32xf32> to vector<32xf32>
    %170 = vector.shape_cast %169 : vector<32xf32> to vector<1x1x1x32xf32>
    %171 = vector.broadcast %170 : vector<1x1x1x32xf32> to vector<1x8x16x32xf32>
    %172 = arith.mulf %167, %171 : vector<1x8x16x32xf32>
    %173 = arith.addf %166, %172 : vector<1x8x16x32xf32>
    %c0_111 = arith.constant 0 : index
    %c1_112 = arith.constant 1 : index
    %c2_113 = arith.constant 2 : index
    %c0_114 = arith.constant 0 : index
    %174 = vector.load %arg21[%c0_111, %c1_112, %c2_113, %c0_114] : memref<1x9x23x32xf32, #tpu.memory_space<vmem>>, vector<1x8x16x32xf32>
    %175 = vector.extract_strided_slice %144 {offsets = [4, 0], sizes = [1, 32], strides = [1, 1]} : vector<8x32xf32> to vector<1x32xf32>
    %176 = vector.shape_cast %175 : vector<1x32xf32> to vector<32xf32>
    %177 = vector.shape_cast %176 : vector<32xf32> to vector<1x1x1x32xf32>
    %178 = vector.broadcast %177 : vector<1x1x1x32xf32> to vector<1x8x16x32xf32>
    %179 = arith.mulf %174, %178 : vector<1x8x16x32xf32>
    %180 = arith.addf %173, %179 : vector<1x8x16x32xf32>
    %c0_115 = arith.constant 0 : index
    %c1_116 = arith.constant 1 : index
    %c3_117 = arith.constant 3 : index
    %c0_118 = arith.constant 0 : index
    %181 = vector.load %arg21[%c0_115, %c1_116, %c3_117, %c0_118] : memref<1x9x23x32xf32, #tpu.memory_space<vmem>>, vector<1x8x16x32xf32>
    %182 = vector.extract_strided_slice %144 {offsets = [5, 0], sizes = [1, 32], strides = [1, 1]} : vector<8x32xf32> to vector<1x32xf32>
    %183 = vector.shape_cast %182 : vector<1x32xf32> to vector<32xf32>
    %184 = vector.shape_cast %183 : vector<32xf32> to vector<1x1x1x32xf32>
    %185 = vector.broadcast %184 : vector<1x1x1x32xf32> to vector<1x8x16x32xf32>
    %186 = arith.mulf %181, %185 : vector<1x8x16x32xf32>
    %187 = arith.addf %180, %186 : vector<1x8x16x32xf32>
    %c0_119 = arith.constant 0 : index
    %c1_120 = arith.constant 1 : index
    %c4_121 = arith.constant 4 : index
    %c0_122 = arith.constant 0 : index
    %188 = vector.load %arg21[%c0_119, %c1_120, %c4_121, %c0_122] : memref<1x9x23x32xf32, #tpu.memory_space<vmem>>, vector<1x8x16x32xf32>
    %189 = vector.extract_strided_slice %144 {offsets = [6, 0], sizes = [1, 32], strides = [1, 1]} : vector<8x32xf32> to vector<1x32xf32>
    %190 = vector.shape_cast %189 : vector<1x32xf32> to vector<32xf32>
    %191 = vector.shape_cast %190 : vector<32xf32> to vector<1x1x1x32xf32>
    %192 = vector.broadcast %191 : vector<1x1x1x32xf32> to vector<1x8x16x32xf32>
    %193 = arith.mulf %188, %192 : vector<1x8x16x32xf32>
    %194 = arith.addf %187, %193 : vector<1x8x16x32xf32>
    %c0_123 = arith.constant 0 : index
    %c1_124 = arith.constant 1 : index
    %c5_125 = arith.constant 5 : index
    %c0_126 = arith.constant 0 : index
    %195 = vector.load %arg21[%c0_123, %c1_124, %c5_125, %c0_126] : memref<1x9x23x32xf32, #tpu.memory_space<vmem>>, vector<1x8x16x32xf32>
    %196 = vector.extract_strided_slice %144 {offsets = [7, 0], sizes = [1, 32], strides = [1, 1]} : vector<8x32xf32> to vector<1x32xf32>
    %197 = vector.shape_cast %196 : vector<1x32xf32> to vector<32xf32>
    %198 = vector.shape_cast %197 : vector<32xf32> to vector<1x1x1x32xf32>
    %199 = vector.broadcast %198 : vector<1x1x1x32xf32> to vector<1x8x16x32xf32>
    %200 = arith.mulf %195, %199 : vector<1x8x16x32xf32>
    %201 = arith.addf %194, %200 : vector<1x8x16x32xf32>
    %202 = vector.shape_cast %201 : vector<1x8x16x32xf32> to vector<128x32xf32>
    %c0_127 = arith.constant 0 : index
    %c0_128 = arith.constant 0 : index
    %203 = vector.load %arg8[%c0_127, %c0_128] : memref<32x16xf32, #tpu.memory_space<vmem>>, vector<32x16xf32>
    %cst_129 = arith.constant dense<0.000000e+00> : vector<128x16xf32>
    %204 = tpu.matmul %202, %203, %cst_129 {dimension_numbers = #tpu.dot_dimension_numbers<[1], [0], [0], [1], [0, 0, 1, 1], [], []>} : vector<128x32xf32>, vector<32x16xf32>, vector<128x16xf32> -> vector<128x16xf32>
    %c0_130 = arith.constant 0 : index
    %c0_131 = arith.constant 0 : index
    %205 = vector.load %arg9[%c0_130, %c0_131] : memref<1x16xf32, #tpu.memory_space<vmem>>, vector<1x16xf32>
    %206 = vector.broadcast %205 : vector<1x16xf32> to vector<128x16xf32>
    %207 = arith.addf %204, %206 : vector<128x16xf32>
    %208 = vector.shape_cast %207 : vector<128x16xf32> to vector<1x8x16x16xf32>
    %cst_132 = arith.constant 0.000000e+00 : f32
    %209 = vector.broadcast %cst_132 : f32 to vector<1x8x16x16xf32>
    %210 = arith.maximumf %208, %209 : vector<1x8x16x16xf32>
    %c0_133 = arith.constant 0 : index
    %c0_134 = arith.constant 0 : index
    %211 = vector.load %arg10[%c0_133, %c0_134] : memref<4x32xf32, #tpu.memory_space<vmem>>, vector<4x32xf32>
    %cst_135 = arith.constant 0.000000e+00 : f32
    %212 = vector.broadcast %cst_135 : f32 to vector<1x8x16x32xf32>
    %c0_136 = arith.constant 0 : index
    %c0_137 = arith.constant 0 : index
    %c3_138 = arith.constant 3 : index
    %c0_139 = arith.constant 0 : index
    %213 = vector.load %arg21[%c0_136, %c0_137, %c3_138, %c0_139] : memref<1x9x23x32xf32, #tpu.memory_space<vmem>>, vector<1x8x16x32xf32>
    %214 = vector.extract_strided_slice %211 {offsets = [0, 0], sizes = [1, 32], strides = [1, 1]} : vector<4x32xf32> to vector<1x32xf32>
    %215 = vector.shape_cast %214 : vector<1x32xf32> to vector<32xf32>
    %216 = vector.shape_cast %215 : vector<32xf32> to vector<1x1x1x32xf32>
    %217 = vector.broadcast %216 : vector<1x1x1x32xf32> to vector<1x8x16x32xf32>
    %218 = arith.mulf %213, %217 : vector<1x8x16x32xf32>
    %219 = arith.addf %212, %218 : vector<1x8x16x32xf32>
    %c0_140 = arith.constant 0 : index
    %c0_141 = arith.constant 0 : index
    %c4_142 = arith.constant 4 : index
    %c0_143 = arith.constant 0 : index
    %220 = vector.load %arg21[%c0_140, %c0_141, %c4_142, %c0_143] : memref<1x9x23x32xf32, #tpu.memory_space<vmem>>, vector<1x8x16x32xf32>
    %221 = vector.extract_strided_slice %211 {offsets = [1, 0], sizes = [1, 32], strides = [1, 1]} : vector<4x32xf32> to vector<1x32xf32>
    %222 = vector.shape_cast %221 : vector<1x32xf32> to vector<32xf32>
    %223 = vector.shape_cast %222 : vector<32xf32> to vector<1x1x1x32xf32>
    %224 = vector.broadcast %223 : vector<1x1x1x32xf32> to vector<1x8x16x32xf32>
    %225 = arith.mulf %220, %224 : vector<1x8x16x32xf32>
    %226 = arith.addf %219, %225 : vector<1x8x16x32xf32>
    %c0_144 = arith.constant 0 : index
    %c1_145 = arith.constant 1 : index
    %c3_146 = arith.constant 3 : index
    %c0_147 = arith.constant 0 : index
    %227 = vector.load %arg21[%c0_144, %c1_145, %c3_146, %c0_147] : memref<1x9x23x32xf32, #tpu.memory_space<vmem>>, vector<1x8x16x32xf32>
    %228 = vector.extract_strided_slice %211 {offsets = [2, 0], sizes = [1, 32], strides = [1, 1]} : vector<4x32xf32> to vector<1x32xf32>
    %229 = vector.shape_cast %228 : vector<1x32xf32> to vector<32xf32>
    %230 = vector.shape_cast %229 : vector<32xf32> to vector<1x1x1x32xf32>
    %231 = vector.broadcast %230 : vector<1x1x1x32xf32> to vector<1x8x16x32xf32>
    %232 = arith.mulf %227, %231 : vector<1x8x16x32xf32>
    %233 = arith.addf %226, %232 : vector<1x8x16x32xf32>
    %c0_148 = arith.constant 0 : index
    %c1_149 = arith.constant 1 : index
    %c4_150 = arith.constant 4 : index
    %c0_151 = arith.constant 0 : index
    %234 = vector.load %arg21[%c0_148, %c1_149, %c4_150, %c0_151] : memref<1x9x23x32xf32, #tpu.memory_space<vmem>>, vector<1x8x16x32xf32>
    %235 = vector.extract_strided_slice %211 {offsets = [3, 0], sizes = [1, 32], strides = [1, 1]} : vector<4x32xf32> to vector<1x32xf32>
    %236 = vector.shape_cast %235 : vector<1x32xf32> to vector<32xf32>
    %237 = vector.shape_cast %236 : vector<32xf32> to vector<1x1x1x32xf32>
    %238 = vector.broadcast %237 : vector<1x1x1x32xf32> to vector<1x8x16x32xf32>
    %239 = arith.mulf %234, %238 : vector<1x8x16x32xf32>
    %240 = arith.addf %233, %239 : vector<1x8x16x32xf32>
    %241 = vector.shape_cast %240 : vector<1x8x16x32xf32> to vector<128x32xf32>
    %c0_152 = arith.constant 0 : index
    %c0_153 = arith.constant 0 : index
    %242 = vector.load %arg11[%c0_152, %c0_153] : memref<32x16xf32, #tpu.memory_space<vmem>>, vector<32x16xf32>
    %cst_154 = arith.constant dense<0.000000e+00> : vector<128x16xf32>
    %243 = tpu.matmul %241, %242, %cst_154 {dimension_numbers = #tpu.dot_dimension_numbers<[1], [0], [0], [1], [0, 0, 1, 1], [], []>} : vector<128x32xf32>, vector<32x16xf32>, vector<128x16xf32> -> vector<128x16xf32>
    %c0_155 = arith.constant 0 : index
    %c0_156 = arith.constant 0 : index
    %244 = vector.load %arg12[%c0_155, %c0_156] : memref<1x16xf32, #tpu.memory_space<vmem>>, vector<1x16xf32>
    %245 = vector.broadcast %244 : vector<1x16xf32> to vector<128x16xf32>
    %246 = arith.addf %243, %245 : vector<128x16xf32>
    %247 = vector.shape_cast %246 : vector<128x16xf32> to vector<1x8x16x16xf32>
    %cst_157 = arith.constant 0.000000e+00 : f32
    %248 = vector.broadcast %cst_157 : f32 to vector<1x8x16x16xf32>
    %249 = arith.maximumf %247, %248 : vector<1x8x16x16xf32>
    %c0_158 = arith.constant 0 : index
    %c0_159 = arith.constant 0 : index
    %c2_160 = arith.constant 2 : index
    %c0_161 = arith.constant 0 : index
    %250 = vector.load %arg21[%c0_158, %c0_159, %c2_160, %c0_161] : memref<1x9x23x32xf32, #tpu.memory_space<vmem>>, vector<1x8x16x32xf32>
    %c0_162 = arith.constant 0 : index
    %c0_163 = arith.constant 0 : index
    %c3_164 = arith.constant 3 : index
    %c0_165 = arith.constant 0 : index
    %251 = vector.load %arg21[%c0_162, %c0_163, %c3_164, %c0_165] : memref<1x9x23x32xf32, #tpu.memory_space<vmem>>, vector<1x8x16x32xf32>
    %252 = arith.maximumf %250, %251 : vector<1x8x16x32xf32>
    %c0_166 = arith.constant 0 : index
    %c0_167 = arith.constant 0 : index
    %c4_168 = arith.constant 4 : index
    %c0_169 = arith.constant 0 : index
    %253 = vector.load %arg21[%c0_166, %c0_167, %c4_168, %c0_169] : memref<1x9x23x32xf32, #tpu.memory_space<vmem>>, vector<1x8x16x32xf32>
    %254 = arith.maximumf %252, %253 : vector<1x8x16x32xf32>
    %255 = vector.shape_cast %254 : vector<1x8x16x32xf32> to vector<128x32xf32>
    %c0_170 = arith.constant 0 : index
    %c0_171 = arith.constant 0 : index
    %256 = vector.load %arg13[%c0_170, %c0_171] : memref<32x16xf32, #tpu.memory_space<vmem>>, vector<32x16xf32>
    %cst_172 = arith.constant dense<0.000000e+00> : vector<128x16xf32>
    %257 = tpu.matmul %255, %256, %cst_172 {dimension_numbers = #tpu.dot_dimension_numbers<[1], [0], [0], [1], [0, 0, 1, 1], [], []>} : vector<128x32xf32>, vector<32x16xf32>, vector<128x16xf32> -> vector<128x16xf32>
    %c0_173 = arith.constant 0 : index
    %c0_174 = arith.constant 0 : index
    %258 = vector.load %arg14[%c0_173, %c0_174] : memref<1x16xf32, #tpu.memory_space<vmem>>, vector<1x16xf32>
    %259 = vector.broadcast %258 : vector<1x16xf32> to vector<128x16xf32>
    %260 = arith.addf %257, %259 : vector<128x16xf32>
    %261 = vector.shape_cast %260 : vector<128x16xf32> to vector<1x8x16x16xf32>
    %cst_175 = arith.constant 0.000000e+00 : f32
    %262 = vector.broadcast %cst_175 : f32 to vector<1x8x16x16xf32>
    %263 = arith.maximumf %261, %262 : vector<1x8x16x16xf32>
    %264 = tpu.concatenate %143, %210, %249, %263 in 3 : vector<1x8x16x16xf32>, vector<1x8x16x16xf32>, vector<1x8x16x16xf32>, vector<1x8x16x16xf32> -> vector<1x8x16x64xf32>
    %c0_176 = arith.constant 0 : index
    %c0_177 = arith.constant 0 : index
    %c0_178 = arith.constant 0 : index
    %c0_179 = arith.constant 0 : index
    %265 = vector.load %arg19[%c0_176, %c0_177, %c0_178, %c0_179] : memref<1x8x16x64xf32, #tpu.memory_space<vmem>>, vector<1x8x16x64xf32>
    tpu.vector_store %arg19[%c0_176, %c0_177, %c0_178, %c0_179], %264 {strides = array<i32>} : memref<1x8x16x64xf32, #tpu.memory_space<vmem>>, vector<1x8x16x64xf32>,
    %c0_180 = arith.constant 0 : index
    %c0_181 = arith.constant 0 : index
    %266 = vector.load %arg15[%c0_180, %c0_181] : memref<8x64xf32, #tpu.memory_space<vmem>>, vector<8x64xf32>
    %267 = vector.shape_cast %266 : vector<8x64xf32> to vector<1x8x1x64xf32>
    %268 = vector.broadcast %267 : vector<1x8x1x64xf32> to vector<1x8x16x64xf32>
    %269 = arith.mulf %264, %268 : vector<1x8x16x64xf32>
    %cst_182 = arith.constant dense<0.000000e+00> : vector<1x16x64xf32>
    %270 = vector.multi_reduction <add>, %269, %cst_182 [1] : vector<1x8x16x64xf32> to vector<1x16x64xf32>
    %271 = vector.shape_cast %270 : vector<1x16x64xf32> to vector<16x64xf32>
    %c0_183 = arith.constant 0 : index
    %c0_184 = arith.constant 0 : index
    %272 = vector.load %arg16[%c0_183, %c0_184] : memref<64x16xf32, #tpu.memory_space<vmem>>, vector<64x16xf32>
    %cst_185 = arith.constant dense<0.000000e+00> : vector<16x16xf32>
    %273 = tpu.matmul %271, %272, %cst_185 {dimension_numbers = #tpu.dot_dimension_numbers<[1], [0], [0], [1], [0, 0, 1, 1], [], []>} : vector<16x64xf32>, vector<64x16xf32>, vector<16x16xf32> -> vector<16x16xf32>
    %c0_186 = arith.constant 0 : index
    %c0_187 = arith.constant 0 : index
    %274 = vector.load %arg17[%c0_186, %c0_187] : memref<1x16xf32, #tpu.memory_space<vmem>>, vector<1x16xf32>
    %275 = vector.broadcast %274 : vector<1x16xf32> to vector<16x16xf32>
    %276 = arith.addf %273, %275 : vector<16x16xf32>
    %cst_188 = arith.constant 0.000000e+00 : f32
    %277 = vector.broadcast %cst_188 : f32 to vector<16x16xf32>
    %278 = arith.maximumf %276, %277 : vector<16x16xf32>
    %c0_189 = arith.constant 0 : index
    %c0_190 = arith.constant 0 : index
    %279 = vector.load %arg18[%c0_189, %c0_190] : memref<16x2xf32, #tpu.memory_space<vmem>>, vector<16x2xf32>
    %cst_191 = arith.constant dense<0.000000e+00> : vector<16x2xf32>
    %280 = tpu.matmul %278, %279, %cst_191 {dimension_numbers = #tpu.dot_dimension_numbers<[1], [0], [0], [1], [0, 0, 1, 1], [], []>} : vector<16x16xf32>, vector<16x2xf32>, vector<16x2xf32> -> vector<16x2xf32>
    %cst_192 = arith.constant dense<0xFF800000> : vector<16xf32>
    %281 = vector.multi_reduction <maximumf>, %280, %cst_192 [1] : vector<16x2xf32> to vector<16xf32>
    %cst_193 = arith.constant 0xFF800000 : f32
    %282 = vector.broadcast %cst_193 : f32 to vector<16xf32>
    %283 = arith.maximumf %282, %281 : vector<16xf32>
    %284 = vector.shape_cast %283 : vector<16xf32> to vector<16x1xf32>
    %285 = vector.broadcast %284 : vector<16x1xf32> to vector<16x2xf32>
    %286 = arith.subf %280, %285 : vector<16x2xf32>
    %287 = math.exp %286 : vector<16x2xf32>
    %cst_194 = arith.constant dense<0.000000e+00> : vector<16xf32>
    %288 = vector.multi_reduction <add>, %287, %cst_194 [1] : vector<16x2xf32> to vector<16xf32>
    %289 = vector.shape_cast %288 : vector<16xf32> to vector<16x1xf32>
    %290 = vector.broadcast %289 : vector<16x1xf32> to vector<16x2xf32>
    %291 = arith.divf %287, %290 : vector<16x2xf32>
    %292 = vector.shape_cast %291 : vector<16x2xf32> to vector<1x16x2xf32>
    %c0_195 = arith.constant 0 : index
    %c0_196 = arith.constant 0 : index
    %c0_197 = arith.constant 0 : index
    %293 = vector.load %arg20[%c0_195, %c0_196, %c0_197] : memref<1x16x2xf32, #tpu.memory_space<vmem>>, vector<1x16x2xf32>
    tpu.vector_store %arg20[%c0_195, %c0_196, %c0_197], %292 {strides = array<i32>} : memref<1x16x2xf32, #tpu.memory_space<vmem>>, vector<1x16x2xf32>,
    return
  }
  func.func @transform_0(%arg0: i32) -> (i32, i32, i32, i32) {
    %c0_i32 = arith.constant 0 : i32
    %c0_i32_0 = arith.constant 0 : i32
    %c0_i32_1 = arith.constant 0 : i32
    %c0_i32_2 = arith.constant 0 : i32
    return %arg0, %c0_i32, %c0_i32_0, %c0_i32_1 : i32, i32, i32, i32
  }
  func.func @transform_1(%arg0: i32) -> (i32, i32) {
    %c0_i32 = arith.constant 0 : i32
    %c0_i32_0 = arith.constant 0 : i32
    %c0_i32_1 = arith.constant 0 : i32
    return %c0_i32, %c0_i32_0 : i32, i32
  }
  func.func @transform_2(%arg0: i32) -> (i32, i32) {
    %c0_i32 = arith.constant 0 : i32
    %c0_i32_0 = arith.constant 0 : i32
    %c0_i32_1 = arith.constant 0 : i32
    return %c0_i32, %c0_i32_0 : i32, i32
  }
  func.func @transform_3(%arg0: i32) -> (i32, i32) {
    %c0_i32 = arith.constant 0 : i32
    %c0_i32_0 = arith.constant 0 : i32
    %c0_i32_1 = arith.constant 0 : i32
    return %c0_i32, %c0_i32_0 : i32, i32
  }
  func.func @transform_4(%arg0: i32) -> (i32, i32) {
    %c0_i32 = arith.constant 0 : i32
    %c0_i32_0 = arith.constant 0 : i32
    %c0_i32_1 = arith.constant 0 : i32
    return %c0_i32, %c0_i32_0 : i32, i32
  }
  func.func @transform_5(%arg0: i32) -> (i32, i32) {
    %c0_i32 = arith.constant 0 : i32
    %c0_i32_0 = arith.constant 0 : i32
    %c0_i32_1 = arith.constant 0 : i32
    return %c0_i32, %c0_i32_0 : i32, i32
  }
  func.func @transform_6(%arg0: i32) -> (i32, i32) {
    %c0_i32 = arith.constant 0 : i32
    %c0_i32_0 = arith.constant 0 : i32
    %c0_i32_1 = arith.constant 0 : i32
    return %c0_i32, %c0_i32_0 : i32, i32
  }
  func.func @transform_7(%arg0: i32) -> (i32, i32) {
    %c0_i32 = arith.constant 0 : i32
    %c0_i32_0 = arith.constant 0 : i32
    %c0_i32_1 = arith.constant 0 : i32
    return %c0_i32, %c0_i32_0 : i32, i32
  }
  func.func @transform_8(%arg0: i32) -> (i32, i32) {
    %c0_i32 = arith.constant 0 : i32
    %c0_i32_0 = arith.constant 0 : i32
    %c0_i32_1 = arith.constant 0 : i32
    return %c0_i32, %c0_i32_0 : i32, i32
  }
  func.func @transform_9(%arg0: i32) -> (i32, i32) {
    %c0_i32 = arith.constant 0 : i32
    %c0_i32_0 = arith.constant 0 : i32
    %c0_i32_1 = arith.constant 0 : i32
    return %c0_i32, %c0_i32_0 : i32, i32
  }
  func.func @transform_10(%arg0: i32) -> (i32, i32) {
    %c0_i32 = arith.constant 0 : i32
    %c0_i32_0 = arith.constant 0 : i32
    %c0_i32_1 = arith.constant 0 : i32
    return %c0_i32, %c0_i32_0 : i32, i32
  }
  func.func @transform_11(%arg0: i32) -> (i32, i32) {
    %c0_i32 = arith.constant 0 : i32
    %c0_i32_0 = arith.constant 0 : i32
    %c0_i32_1 = arith.constant 0 : i32
    return %c0_i32, %c0_i32_0 : i32, i32
  }
  func.func @transform_12(%arg0: i32) -> (i32, i32) {
    %c0_i32 = arith.constant 0 : i32
    %c0_i32_0 = arith.constant 0 : i32
    %c0_i32_1 = arith.constant 0 : i32
    return %c0_i32, %c0_i32_0 : i32, i32
  }
  func.func @transform_13(%arg0: i32) -> (i32, i32) {
    %c0_i32 = arith.constant 0 : i32
    %c0_i32_0 = arith.constant 0 : i32
    %c0_i32_1 = arith.constant 0 : i32
    return %c0_i32, %c0_i32_0 : i32, i32
  }
  func.func @transform_14(%arg0: i32) -> (i32, i32) {
    %c0_i32 = arith.constant 0 : i32
    %c0_i32_0 = arith.constant 0 : i32
    %c0_i32_1 = arith.constant 0 : i32
    return %c0_i32, %c0_i32_0 : i32, i32
  }
  func.func @transform_15(%arg0: i32) -> (i32, i32) {
    %c0_i32 = arith.constant 0 : i32
    %c0_i32_0 = arith.constant 0 : i32
    %c0_i32_1 = arith.constant 0 : i32
    return %c0_i32, %c0_i32_0 : i32, i32
  }
  func.func @transform_16(%arg0: i32) -> (i32, i32) {
    %c0_i32 = arith.constant 0 : i32
    %c0_i32_0 = arith.constant 0 : i32
    %c0_i32_1 = arith.constant 0 : i32
    return %c0_i32, %c0_i32_0 : i32, i32
  }
  func.func @transform_17(%arg0: i32) -> (i32, i32) {
    %c0_i32 = arith.constant 0 : i32
    %c0_i32_0 = arith.constant 0 : i32
    %c0_i32_1 = arith.constant 0 : i32
    return %c0_i32, %c0_i32_0 : i32, i32
  }
  func.func @transform_18(%arg0: i32) -> (i32, i32, i32, i32) {
    %c0_i32 = arith.constant 0 : i32
    %c0_i32_0 = arith.constant 0 : i32
    %c0_i32_1 = arith.constant 0 : i32
    %c0_i32_2 = arith.constant 0 : i32
    return %arg0, %c0_i32, %c0_i32_0, %c0_i32_1 : i32, i32, i32, i32
  }
  func.func @transform_19(%arg0: i32) -> (i32, i32, i32) {
    %c0_i32 = arith.constant 0 : i32
    %c0_i32_0 = arith.constant 0 : i32
    %c0_i32_1 = arith.constant 0 : i32
    return %arg0, %c0_i32, %c0_i32_0 : i32, i32, i32
  }
}

module attributes {stable_mosaic.version = 11 : i64} {
  func.func @kernel(%arg0: i32, %arg1: memref<1x8x16x1xf32, #tpu.memory_space<vmem>>, %arg2: memref<16x1xf32, #tpu.memory_space<vmem>>, %arg3: memref<1x16xf32, #tpu.memory_space<vmem>>, %arg4: memref<1x16xf32, #tpu.memory_space<vmem>>, %arg5: memref<8x1xf32, #tpu.memory_space<vmem>>, %arg6: memref<1x16xf32, #tpu.memory_space<vmem>>, %arg7: memref<1x16xf32, #tpu.memory_space<vmem>>, %arg8: memref<4x1xf32, #tpu.memory_space<vmem>>, %arg9: memref<1x16xf32, #tpu.memory_space<vmem>>, %arg10: memref<1x16xf32, #tpu.memory_space<vmem>>, %arg11: memref<1x16xf32, #tpu.memory_space<vmem>>, %arg12: memref<1x16xf32, #tpu.memory_space<vmem>>, %arg13: memref<8x64xf32, #tpu.memory_space<vmem>>, %arg14: memref<64x16xf32, #tpu.memory_space<vmem>>, %arg15: memref<1x16xf32, #tpu.memory_space<vmem>>, %arg16: memref<16x2xf32, #tpu.memory_space<vmem>>, %arg17: memref<1x8x16x64xf32, #tpu.memory_space<vmem>>, %arg18: memref<1x16x2xf32, #tpu.memory_space<vmem>>, %arg19: memref<1x9x23x1xf32, #tpu.memory_space<vmem>>) attributes {dimension_semantics = [#tpu.dimension_semantics<parallel>], iteration_bounds = array<i64: 2>, scalar_prefetch = 0 : i64, scratch_operands = 1 : i64, tpu.core_type = #tpu.core_type<tc>, window_params = [{transform_indices = @transform_0, window_bounds = array<i64: 1, 8, 16, 1>}, {pipeline_mode = #tpu.pipeline_mode<synchronous>, transform_indices = @transform_1, window_bounds = array<i64: 16, 1>}, {pipeline_mode = #tpu.pipeline_mode<synchronous>, transform_indices = @transform_2, window_bounds = array<i64: 1, 16>}, {pipeline_mode = #tpu.pipeline_mode<synchronous>, transform_indices = @transform_3, window_bounds = array<i64: 1, 16>}, {pipeline_mode = #tpu.pipeline_mode<synchronous>, transform_indices = @transform_4, window_bounds = array<i64: 8, 1>}, {pipeline_mode = #tpu.pipeline_mode<synchronous>, transform_indices = @transform_5, window_bounds = array<i64: 1, 16>}, {pipeline_mode = #tpu.pipeline_mode<synchronous>, transform_indices = @transform_6, window_bounds = array<i64: 1, 16>}, {pipeline_mode = #tpu.pipeline_mode<synchronous>, transform_indices = @transform_7, window_bounds = array<i64: 4, 1>}, {pipeline_mode = #tpu.pipeline_mode<synchronous>, transform_indices = @transform_8, window_bounds = array<i64: 1, 16>}, {pipeline_mode = #tpu.pipeline_mode<synchronous>, transform_indices = @transform_9, window_bounds = array<i64: 1, 16>}, {pipeline_mode = #tpu.pipeline_mode<synchronous>, transform_indices = @transform_10, window_bounds = array<i64: 1, 16>}, {pipeline_mode = #tpu.pipeline_mode<synchronous>, transform_indices = @transform_11, window_bounds = array<i64: 1, 16>}, {pipeline_mode = #tpu.pipeline_mode<synchronous>, transform_indices = @transform_12, window_bounds = array<i64: 8, 64>}, {pipeline_mode = #tpu.pipeline_mode<synchronous>, transform_indices = @transform_13, window_bounds = array<i64: 64, 16>}, {pipeline_mode = #tpu.pipeline_mode<synchronous>, transform_indices = @transform_14, window_bounds = array<i64: 1, 16>}, {pipeline_mode = #tpu.pipeline_mode<synchronous>, transform_indices = @transform_15, window_bounds = array<i64: 16, 2>}, {transform_indices = @transform_16, window_bounds = array<i64: 1, 8, 16, 64>}, {transform_indices = @transform_17, window_bounds = array<i64: 1, 16, 2>}]} {
    %c0 = arith.constant 0 : index
    %c0_0 = arith.constant 0 : index
    %c0_1 = arith.constant 0 : index
    %c0_2 = arith.constant 0 : index
    %0 = vector.load %arg1[%c0, %c0_0, %c0_1, %c0_2] : memref<1x8x16x1xf32, #tpu.memory_space<vmem>>, vector<1x8x16x1xf32>
    %cst = arith.constant dense<0.000000e+00> : vector<1x8x1xf32>
    %1 = vector.multi_reduction <add>, %0, %cst [2] : vector<1x8x16x1xf32> to vector<1x8x1xf32>
    %2 = vector.shape_cast %1 : vector<1x8x1xf32> to vector<1x8x1x1xf32>
    %cst_3 = arith.constant 1.600000e+01 : f32
    %3 = vector.broadcast %cst_3 : f32 to vector<1x8x1x1xf32>
    %4 = arith.divf %2, %3 : vector<1x8x1x1xf32>
    %5 = vector.broadcast %4 : vector<1x8x1x1xf32> to vector<1x8x16x1xf32>
    %6 = arith.subf %0, %5 : vector<1x8x16x1xf32>
    %7 = arith.mulf %6, %6 : vector<1x8x16x1xf32>
    %cst_4 = arith.constant dense<0.000000e+00> : vector<1x8x1xf32>
    %8 = vector.multi_reduction <add>, %7, %cst_4 [2] : vector<1x8x16x1xf32> to vector<1x8x1xf32>
    %9 = vector.shape_cast %8 : vector<1x8x1xf32> to vector<1x8x1x1xf32>
    %cst_5 = arith.constant 1.600000e+01 : f32
    %10 = vector.broadcast %cst_5 : f32 to vector<1x8x1x1xf32>
    %11 = arith.divf %9, %10 : vector<1x8x1x1xf32>
    %12 = vector.broadcast %4 : vector<1x8x1x1xf32> to vector<1x8x16x1xf32>
    %13 = arith.subf %0, %12 : vector<1x8x16x1xf32>
    %cst_6 = arith.constant 9.99999974E-6 : f32
    %14 = vector.broadcast %cst_6 : f32 to vector<1x8x1x1xf32>
    %15 = arith.addf %11, %14 : vector<1x8x1x1xf32>
    %16 = math.rsqrt %15 : vector<1x8x1x1xf32>
    %17 = vector.broadcast %16 : vector<1x8x1x1xf32> to vector<1x8x16x1xf32>
    %18 = arith.mulf %13, %17 : vector<1x8x16x1xf32>
    %c0_7 = arith.constant 0 : index
    %c0_8 = arith.constant 0 : index
    %c3 = arith.constant 3 : index
    %c0_9 = arith.constant 0 : index
    %19 = vector.load %arg19[%c0_7, %c0_8, %c3, %c0_9] : memref<1x9x23x1xf32, #tpu.memory_space<vmem>>, vector<1x8x16x1xf32>
    tpu.vector_store %arg19[%c0_7, %c0_8, %c3, %c0_9], %18 {strides = array<i32>} : memref<1x9x23x1xf32, #tpu.memory_space<vmem>>, vector<1x8x16x1xf32>,
    %20 = vector.extract_strided_slice %18 {offsets = [0, 0, 0, 0], sizes = [1, 8, 1, 1], strides = [1, 1, 1, 1]} : vector<1x8x16x1xf32> to vector<1x8x1x1xf32>
    %21 = vector.shape_cast %20 : vector<1x8x1x1xf32> to vector<1x8x1x1xf32>
    %22 = vector.broadcast %21 : vector<1x8x1x1xf32> to vector<1x8x3x1xf32>
    %c0_10 = arith.constant 0 : index
    %c0_11 = arith.constant 0 : index
    %c0_12 = arith.constant 0 : index
    %c0_13 = arith.constant 0 : index
    %23 = vector.load %arg19[%c0_10, %c0_11, %c0_12, %c0_13] : memref<1x9x23x1xf32, #tpu.memory_space<vmem>>, vector<1x8x3x1xf32>
    tpu.vector_store %arg19[%c0_10, %c0_11, %c0_12, %c0_13], %22 {strides = array<i32>} : memref<1x9x23x1xf32, #tpu.memory_space<vmem>>, vector<1x8x3x1xf32>,
    %24 = vector.extract_strided_slice %18 {offsets = [0, 0, 15, 0], sizes = [1, 8, 1, 1], strides = [1, 1, 1, 1]} : vector<1x8x16x1xf32> to vector<1x8x1x1xf32>
    %25 = vector.shape_cast %24 : vector<1x8x1x1xf32> to vector<1x8x1x1xf32>
    %26 = vector.broadcast %25 : vector<1x8x1x1xf32> to vector<1x8x4x1xf32>
    %c0_14 = arith.constant 0 : index
    %c0_15 = arith.constant 0 : index
    %c19 = arith.constant 19 : index
    %c0_16 = arith.constant 0 : index
    %27 = vector.load %arg19[%c0_14, %c0_15, %c19, %c0_16] : memref<1x9x23x1xf32, #tpu.memory_space<vmem>>, vector<1x8x4x1xf32>
    tpu.vector_store %arg19[%c0_14, %c0_15, %c19, %c0_16], %26 {strides = array<i32>} : memref<1x9x23x1xf32, #tpu.memory_space<vmem>>, vector<1x8x4x1xf32>,
    %c0_17 = arith.constant 0 : index
    %c7 = arith.constant 7 : index
    %c0_18 = arith.constant 0 : index
    %c0_19 = arith.constant 0 : index
    %28 = vector.load %arg19[%c0_17, %c7, %c0_18, %c0_19] : memref<1x9x23x1xf32, #tpu.memory_space<vmem>>, vector<1x1x23x1xf32>
    %c0_20 = arith.constant 0 : index
    %c8 = arith.constant 8 : index
    %c0_21 = arith.constant 0 : index
    %c0_22 = arith.constant 0 : index
    %29 = vector.load %arg19[%c0_20, %c8, %c0_21, %c0_22] : memref<1x9x23x1xf32, #tpu.memory_space<vmem>>, vector<1x1x23x1xf32>
    tpu.vector_store %arg19[%c0_20, %c8, %c0_21, %c0_22], %28 {strides = array<i32>} : memref<1x9x23x1xf32, #tpu.memory_space<vmem>>, vector<1x1x23x1xf32>,
    %c0_23 = arith.constant 0 : index
    %c0_24 = arith.constant 0 : index
    %30 = vector.load %arg2[%c0_23, %c0_24] : memref<16x1xf32, #tpu.memory_space<vmem>>, vector<16x1xf32>
    %cst_25 = arith.constant 0.000000e+00 : f32
    %31 = vector.broadcast %cst_25 : f32 to vector<1x8x16x1xf32>
    %c0_26 = arith.constant 0 : index
    %c0_27 = arith.constant 0 : index
    %c0_28 = arith.constant 0 : index
    %c0_29 = arith.constant 0 : index
    %32 = vector.load %arg19[%c0_26, %c0_27, %c0_28, %c0_29] : memref<1x9x23x1xf32, #tpu.memory_space<vmem>>, vector<1x8x16x1xf32>
    %33 = vector.extract_strided_slice %30 {offsets = [0, 0], sizes = [1, 1], strides = [1, 1]} : vector<16x1xf32> to vector<1x1xf32>
    %34 = vector.shape_cast %33 : vector<1x1xf32> to vector<1xf32>
    %35 = vector.shape_cast %34 : vector<1xf32> to vector<1x1x1x1xf32>
    %36 = vector.broadcast %35 : vector<1x1x1x1xf32> to vector<1x8x16x1xf32>
    %37 = arith.mulf %32, %36 : vector<1x8x16x1xf32>
    %38 = arith.addf %31, %37 : vector<1x8x16x1xf32>
    %c0_30 = arith.constant 0 : index
    %c0_31 = arith.constant 0 : index
    %c1 = arith.constant 1 : index
    %c0_32 = arith.constant 0 : index
    %39 = vector.load %arg19[%c0_30, %c0_31, %c1, %c0_32] : memref<1x9x23x1xf32, #tpu.memory_space<vmem>>, vector<1x8x16x1xf32>
    %40 = vector.extract_strided_slice %30 {offsets = [1, 0], sizes = [1, 1], strides = [1, 1]} : vector<16x1xf32> to vector<1x1xf32>
    %41 = vector.shape_cast %40 : vector<1x1xf32> to vector<1xf32>
    %42 = vector.shape_cast %41 : vector<1xf32> to vector<1x1x1x1xf32>
    %43 = vector.broadcast %42 : vector<1x1x1x1xf32> to vector<1x8x16x1xf32>
    %44 = arith.mulf %39, %43 : vector<1x8x16x1xf32>
    %45 = arith.addf %38, %44 : vector<1x8x16x1xf32>
    %c0_33 = arith.constant 0 : index
    %c0_34 = arith.constant 0 : index
    %c2 = arith.constant 2 : index
    %c0_35 = arith.constant 0 : index
    %46 = vector.load %arg19[%c0_33, %c0_34, %c2, %c0_35] : memref<1x9x23x1xf32, #tpu.memory_space<vmem>>, vector<1x8x16x1xf32>
    %47 = vector.extract_strided_slice %30 {offsets = [2, 0], sizes = [1, 1], strides = [1, 1]} : vector<16x1xf32> to vector<1x1xf32>
    %48 = vector.shape_cast %47 : vector<1x1xf32> to vector<1xf32>
    %49 = vector.shape_cast %48 : vector<1xf32> to vector<1x1x1x1xf32>
    %50 = vector.broadcast %49 : vector<1x1x1x1xf32> to vector<1x8x16x1xf32>
    %51 = arith.mulf %46, %50 : vector<1x8x16x1xf32>
    %52 = arith.addf %45, %51 : vector<1x8x16x1xf32>
    %c0_36 = arith.constant 0 : index
    %c0_37 = arith.constant 0 : index
    %c3_38 = arith.constant 3 : index
    %c0_39 = arith.constant 0 : index
    %53 = vector.load %arg19[%c0_36, %c0_37, %c3_38, %c0_39] : memref<1x9x23x1xf32, #tpu.memory_space<vmem>>, vector<1x8x16x1xf32>
    %54 = vector.extract_strided_slice %30 {offsets = [3, 0], sizes = [1, 1], strides = [1, 1]} : vector<16x1xf32> to vector<1x1xf32>
    %55 = vector.shape_cast %54 : vector<1x1xf32> to vector<1xf32>
    %56 = vector.shape_cast %55 : vector<1xf32> to vector<1x1x1x1xf32>
    %57 = vector.broadcast %56 : vector<1x1x1x1xf32> to vector<1x8x16x1xf32>
    %58 = arith.mulf %53, %57 : vector<1x8x16x1xf32>
    %59 = arith.addf %52, %58 : vector<1x8x16x1xf32>
    %c0_40 = arith.constant 0 : index
    %c0_41 = arith.constant 0 : index
    %c4 = arith.constant 4 : index
    %c0_42 = arith.constant 0 : index
    %60 = vector.load %arg19[%c0_40, %c0_41, %c4, %c0_42] : memref<1x9x23x1xf32, #tpu.memory_space<vmem>>, vector<1x8x16x1xf32>
    %61 = vector.extract_strided_slice %30 {offsets = [4, 0], sizes = [1, 1], strides = [1, 1]} : vector<16x1xf32> to vector<1x1xf32>
    %62 = vector.shape_cast %61 : vector<1x1xf32> to vector<1xf32>
    %63 = vector.shape_cast %62 : vector<1xf32> to vector<1x1x1x1xf32>
    %64 = vector.broadcast %63 : vector<1x1x1x1xf32> to vector<1x8x16x1xf32>
    %65 = arith.mulf %60, %64 : vector<1x8x16x1xf32>
    %66 = arith.addf %59, %65 : vector<1x8x16x1xf32>
    %c0_43 = arith.constant 0 : index
    %c0_44 = arith.constant 0 : index
    %c5 = arith.constant 5 : index
    %c0_45 = arith.constant 0 : index
    %67 = vector.load %arg19[%c0_43, %c0_44, %c5, %c0_45] : memref<1x9x23x1xf32, #tpu.memory_space<vmem>>, vector<1x8x16x1xf32>
    %68 = vector.extract_strided_slice %30 {offsets = [5, 0], sizes = [1, 1], strides = [1, 1]} : vector<16x1xf32> to vector<1x1xf32>
    %69 = vector.shape_cast %68 : vector<1x1xf32> to vector<1xf32>
    %70 = vector.shape_cast %69 : vector<1xf32> to vector<1x1x1x1xf32>
    %71 = vector.broadcast %70 : vector<1x1x1x1xf32> to vector<1x8x16x1xf32>
    %72 = arith.mulf %67, %71 : vector<1x8x16x1xf32>
    %73 = arith.addf %66, %72 : vector<1x8x16x1xf32>
    %c0_46 = arith.constant 0 : index
    %c0_47 = arith.constant 0 : index
    %c6 = arith.constant 6 : index
    %c0_48 = arith.constant 0 : index
    %74 = vector.load %arg19[%c0_46, %c0_47, %c6, %c0_48] : memref<1x9x23x1xf32, #tpu.memory_space<vmem>>, vector<1x8x16x1xf32>
    %75 = vector.extract_strided_slice %30 {offsets = [6, 0], sizes = [1, 1], strides = [1, 1]} : vector<16x1xf32> to vector<1x1xf32>
    %76 = vector.shape_cast %75 : vector<1x1xf32> to vector<1xf32>
    %77 = vector.shape_cast %76 : vector<1xf32> to vector<1x1x1x1xf32>
    %78 = vector.broadcast %77 : vector<1x1x1x1xf32> to vector<1x8x16x1xf32>
    %79 = arith.mulf %74, %78 : vector<1x8x16x1xf32>
    %80 = arith.addf %73, %79 : vector<1x8x16x1xf32>
    %c0_49 = arith.constant 0 : index
    %c0_50 = arith.constant 0 : index
    %c7_51 = arith.constant 7 : index
    %c0_52 = arith.constant 0 : index
    %81 = vector.load %arg19[%c0_49, %c0_50, %c7_51, %c0_52] : memref<1x9x23x1xf32, #tpu.memory_space<vmem>>, vector<1x8x16x1xf32>
    %82 = vector.extract_strided_slice %30 {offsets = [7, 0], sizes = [1, 1], strides = [1, 1]} : vector<16x1xf32> to vector<1x1xf32>
    %83 = vector.shape_cast %82 : vector<1x1xf32> to vector<1xf32>
    %84 = vector.shape_cast %83 : vector<1xf32> to vector<1x1x1x1xf32>
    %85 = vector.broadcast %84 : vector<1x1x1x1xf32> to vector<1x8x16x1xf32>
    %86 = arith.mulf %81, %85 : vector<1x8x16x1xf32>
    %87 = arith.addf %80, %86 : vector<1x8x16x1xf32>
    %c0_53 = arith.constant 0 : index
    %c1_54 = arith.constant 1 : index
    %c0_55 = arith.constant 0 : index
    %c0_56 = arith.constant 0 : index
    %88 = vector.load %arg19[%c0_53, %c1_54, %c0_55, %c0_56] : memref<1x9x23x1xf32, #tpu.memory_space<vmem>>, vector<1x8x16x1xf32>
    %89 = vector.extract_strided_slice %30 {offsets = [8, 0], sizes = [1, 1], strides = [1, 1]} : vector<16x1xf32> to vector<1x1xf32>
    %90 = vector.shape_cast %89 : vector<1x1xf32> to vector<1xf32>
    %91 = vector.shape_cast %90 : vector<1xf32> to vector<1x1x1x1xf32>
    %92 = vector.broadcast %91 : vector<1x1x1x1xf32> to vector<1x8x16x1xf32>
    %93 = arith.mulf %88, %92 : vector<1x8x16x1xf32>
    %94 = arith.addf %87, %93 : vector<1x8x16x1xf32>
    %c0_57 = arith.constant 0 : index
    %c1_58 = arith.constant 1 : index
    %c1_59 = arith.constant 1 : index
    %c0_60 = arith.constant 0 : index
    %95 = vector.load %arg19[%c0_57, %c1_58, %c1_59, %c0_60] : memref<1x9x23x1xf32, #tpu.memory_space<vmem>>, vector<1x8x16x1xf32>
    %96 = vector.extract_strided_slice %30 {offsets = [9, 0], sizes = [1, 1], strides = [1, 1]} : vector<16x1xf32> to vector<1x1xf32>
    %97 = vector.shape_cast %96 : vector<1x1xf32> to vector<1xf32>
    %98 = vector.shape_cast %97 : vector<1xf32> to vector<1x1x1x1xf32>
    %99 = vector.broadcast %98 : vector<1x1x1x1xf32> to vector<1x8x16x1xf32>
    %100 = arith.mulf %95, %99 : vector<1x8x16x1xf32>
    %101 = arith.addf %94, %100 : vector<1x8x16x1xf32>
    %c0_61 = arith.constant 0 : index
    %c1_62 = arith.constant 1 : index
    %c2_63 = arith.constant 2 : index
    %c0_64 = arith.constant 0 : index
    %102 = vector.load %arg19[%c0_61, %c1_62, %c2_63, %c0_64] : memref<1x9x23x1xf32, #tpu.memory_space<vmem>>, vector<1x8x16x1xf32>
    %103 = vector.extract_strided_slice %30 {offsets = [10, 0], sizes = [1, 1], strides = [1, 1]} : vector<16x1xf32> to vector<1x1xf32>
    %104 = vector.shape_cast %103 : vector<1x1xf32> to vector<1xf32>
    %105 = vector.shape_cast %104 : vector<1xf32> to vector<1x1x1x1xf32>
    %106 = vector.broadcast %105 : vector<1x1x1x1xf32> to vector<1x8x16x1xf32>
    %107 = arith.mulf %102, %106 : vector<1x8x16x1xf32>
    %108 = arith.addf %101, %107 : vector<1x8x16x1xf32>
    %c0_65 = arith.constant 0 : index
    %c1_66 = arith.constant 1 : index
    %c3_67 = arith.constant 3 : index
    %c0_68 = arith.constant 0 : index
    %109 = vector.load %arg19[%c0_65, %c1_66, %c3_67, %c0_68] : memref<1x9x23x1xf32, #tpu.memory_space<vmem>>, vector<1x8x16x1xf32>
    %110 = vector.extract_strided_slice %30 {offsets = [11, 0], sizes = [1, 1], strides = [1, 1]} : vector<16x1xf32> to vector<1x1xf32>
    %111 = vector.shape_cast %110 : vector<1x1xf32> to vector<1xf32>
    %112 = vector.shape_cast %111 : vector<1xf32> to vector<1x1x1x1xf32>
    %113 = vector.broadcast %112 : vector<1x1x1x1xf32> to vector<1x8x16x1xf32>
    %114 = arith.mulf %109, %113 : vector<1x8x16x1xf32>
    %115 = arith.addf %108, %114 : vector<1x8x16x1xf32>
    %c0_69 = arith.constant 0 : index
    %c1_70 = arith.constant 1 : index
    %c4_71 = arith.constant 4 : index
    %c0_72 = arith.constant 0 : index
    %116 = vector.load %arg19[%c0_69, %c1_70, %c4_71, %c0_72] : memref<1x9x23x1xf32, #tpu.memory_space<vmem>>, vector<1x8x16x1xf32>
    %117 = vector.extract_strided_slice %30 {offsets = [12, 0], sizes = [1, 1], strides = [1, 1]} : vector<16x1xf32> to vector<1x1xf32>
    %118 = vector.shape_cast %117 : vector<1x1xf32> to vector<1xf32>
    %119 = vector.shape_cast %118 : vector<1xf32> to vector<1x1x1x1xf32>
    %120 = vector.broadcast %119 : vector<1x1x1x1xf32> to vector<1x8x16x1xf32>
    %121 = arith.mulf %116, %120 : vector<1x8x16x1xf32>
    %122 = arith.addf %115, %121 : vector<1x8x16x1xf32>
    %c0_73 = arith.constant 0 : index
    %c1_74 = arith.constant 1 : index
    %c5_75 = arith.constant 5 : index
    %c0_76 = arith.constant 0 : index
    %123 = vector.load %arg19[%c0_73, %c1_74, %c5_75, %c0_76] : memref<1x9x23x1xf32, #tpu.memory_space<vmem>>, vector<1x8x16x1xf32>
    %124 = vector.extract_strided_slice %30 {offsets = [13, 0], sizes = [1, 1], strides = [1, 1]} : vector<16x1xf32> to vector<1x1xf32>
    %125 = vector.shape_cast %124 : vector<1x1xf32> to vector<1xf32>
    %126 = vector.shape_cast %125 : vector<1xf32> to vector<1x1x1x1xf32>
    %127 = vector.broadcast %126 : vector<1x1x1x1xf32> to vector<1x8x16x1xf32>
    %128 = arith.mulf %123, %127 : vector<1x8x16x1xf32>
    %129 = arith.addf %122, %128 : vector<1x8x16x1xf32>
    %c0_77 = arith.constant 0 : index
    %c1_78 = arith.constant 1 : index
    %c6_79 = arith.constant 6 : index
    %c0_80 = arith.constant 0 : index
    %130 = vector.load %arg19[%c0_77, %c1_78, %c6_79, %c0_80] : memref<1x9x23x1xf32, #tpu.memory_space<vmem>>, vector<1x8x16x1xf32>
    %131 = vector.extract_strided_slice %30 {offsets = [14, 0], sizes = [1, 1], strides = [1, 1]} : vector<16x1xf32> to vector<1x1xf32>
    %132 = vector.shape_cast %131 : vector<1x1xf32> to vector<1xf32>
    %133 = vector.shape_cast %132 : vector<1xf32> to vector<1x1x1x1xf32>
    %134 = vector.broadcast %133 : vector<1x1x1x1xf32> to vector<1x8x16x1xf32>
    %135 = arith.mulf %130, %134 : vector<1x8x16x1xf32>
    %136 = arith.addf %129, %135 : vector<1x8x16x1xf32>
    %c0_81 = arith.constant 0 : index
    %c1_82 = arith.constant 1 : index
    %c7_83 = arith.constant 7 : index
    %c0_84 = arith.constant 0 : index
    %137 = vector.load %arg19[%c0_81, %c1_82, %c7_83, %c0_84] : memref<1x9x23x1xf32, #tpu.memory_space<vmem>>, vector<1x8x16x1xf32>
    %138 = vector.extract_strided_slice %30 {offsets = [15, 0], sizes = [1, 1], strides = [1, 1]} : vector<16x1xf32> to vector<1x1xf32>
    %139 = vector.shape_cast %138 : vector<1x1xf32> to vector<1xf32>
    %140 = vector.shape_cast %139 : vector<1xf32> to vector<1x1x1x1xf32>
    %141 = vector.broadcast %140 : vector<1x1x1x1xf32> to vector<1x8x16x1xf32>
    %142 = arith.mulf %137, %141 : vector<1x8x16x1xf32>
    %143 = arith.addf %136, %142 : vector<1x8x16x1xf32>
    %c0_85 = arith.constant 0 : index
    %c0_86 = arith.constant 0 : index
    %144 = vector.load %arg3[%c0_85, %c0_86] : memref<1x16xf32, #tpu.memory_space<vmem>>, vector<1x16xf32>
    %145 = vector.shape_cast %144 : vector<1x16xf32> to vector<1x1x1x16xf32>
    %146 = vector.broadcast %143 : vector<1x8x16x1xf32> to vector<1x8x16x16xf32>
    %147 = vector.broadcast %145 : vector<1x1x1x16xf32> to vector<1x8x16x16xf32>
    %148 = arith.mulf %146, %147 : vector<1x8x16x16xf32>
    %c0_87 = arith.constant 0 : index
    %c0_88 = arith.constant 0 : index
    %149 = vector.load %arg4[%c0_87, %c0_88] : memref<1x16xf32, #tpu.memory_space<vmem>>, vector<1x16xf32>
    %150 = vector.shape_cast %149 : vector<1x16xf32> to vector<1x1x1x16xf32>
    %151 = vector.broadcast %150 : vector<1x1x1x16xf32> to vector<1x8x16x16xf32>
    %152 = arith.addf %148, %151 : vector<1x8x16x16xf32>
    %cst_89 = arith.constant 0.000000e+00 : f32
    %153 = vector.broadcast %cst_89 : f32 to vector<1x8x16x16xf32>
    %154 = arith.maximumf %152, %153 : vector<1x8x16x16xf32>
    %c0_90 = arith.constant 0 : index
    %c0_91 = arith.constant 0 : index
    %155 = vector.load %arg5[%c0_90, %c0_91] : memref<8x1xf32, #tpu.memory_space<vmem>>, vector<8x1xf32>
    %cst_92 = arith.constant 0.000000e+00 : f32
    %156 = vector.broadcast %cst_92 : f32 to vector<1x8x16x1xf32>
    %c0_93 = arith.constant 0 : index
    %c0_94 = arith.constant 0 : index
    %c2_95 = arith.constant 2 : index
    %c0_96 = arith.constant 0 : index
    %157 = vector.load %arg19[%c0_93, %c0_94, %c2_95, %c0_96] : memref<1x9x23x1xf32, #tpu.memory_space<vmem>>, vector<1x8x16x1xf32>
    %158 = vector.extract_strided_slice %155 {offsets = [0, 0], sizes = [1, 1], strides = [1, 1]} : vector<8x1xf32> to vector<1x1xf32>
    %159 = vector.shape_cast %158 : vector<1x1xf32> to vector<1xf32>
    %160 = vector.shape_cast %159 : vector<1xf32> to vector<1x1x1x1xf32>
    %161 = vector.broadcast %160 : vector<1x1x1x1xf32> to vector<1x8x16x1xf32>
    %162 = arith.mulf %157, %161 : vector<1x8x16x1xf32>
    %163 = arith.addf %156, %162 : vector<1x8x16x1xf32>
    %c0_97 = arith.constant 0 : index
    %c0_98 = arith.constant 0 : index
    %c3_99 = arith.constant 3 : index
    %c0_100 = arith.constant 0 : index
    %164 = vector.load %arg19[%c0_97, %c0_98, %c3_99, %c0_100] : memref<1x9x23x1xf32, #tpu.memory_space<vmem>>, vector<1x8x16x1xf32>
    %165 = vector.extract_strided_slice %155 {offsets = [1, 0], sizes = [1, 1], strides = [1, 1]} : vector<8x1xf32> to vector<1x1xf32>
    %166 = vector.shape_cast %165 : vector<1x1xf32> to vector<1xf32>
    %167 = vector.shape_cast %166 : vector<1xf32> to vector<1x1x1x1xf32>
    %168 = vector.broadcast %167 : vector<1x1x1x1xf32> to vector<1x8x16x1xf32>
    %169 = arith.mulf %164, %168 : vector<1x8x16x1xf32>
    %170 = arith.addf %163, %169 : vector<1x8x16x1xf32>
    %c0_101 = arith.constant 0 : index
    %c0_102 = arith.constant 0 : index
    %c4_103 = arith.constant 4 : index
    %c0_104 = arith.constant 0 : index
    %171 = vector.load %arg19[%c0_101, %c0_102, %c4_103, %c0_104] : memref<1x9x23x1xf32, #tpu.memory_space<vmem>>, vector<1x8x16x1xf32>
    %172 = vector.extract_strided_slice %155 {offsets = [2, 0], sizes = [1, 1], strides = [1, 1]} : vector<8x1xf32> to vector<1x1xf32>
    %173 = vector.shape_cast %172 : vector<1x1xf32> to vector<1xf32>
    %174 = vector.shape_cast %173 : vector<1xf32> to vector<1x1x1x1xf32>
    %175 = vector.broadcast %174 : vector<1x1x1x1xf32> to vector<1x8x16x1xf32>
    %176 = arith.mulf %171, %175 : vector<1x8x16x1xf32>
    %177 = arith.addf %170, %176 : vector<1x8x16x1xf32>
    %c0_105 = arith.constant 0 : index
    %c0_106 = arith.constant 0 : index
    %c5_107 = arith.constant 5 : index
    %c0_108 = arith.constant 0 : index
    %178 = vector.load %arg19[%c0_105, %c0_106, %c5_107, %c0_108] : memref<1x9x23x1xf32, #tpu.memory_space<vmem>>, vector<1x8x16x1xf32>
    %179 = vector.extract_strided_slice %155 {offsets = [3, 0], sizes = [1, 1], strides = [1, 1]} : vector<8x1xf32> to vector<1x1xf32>
    %180 = vector.shape_cast %179 : vector<1x1xf32> to vector<1xf32>
    %181 = vector.shape_cast %180 : vector<1xf32> to vector<1x1x1x1xf32>
    %182 = vector.broadcast %181 : vector<1x1x1x1xf32> to vector<1x8x16x1xf32>
    %183 = arith.mulf %178, %182 : vector<1x8x16x1xf32>
    %184 = arith.addf %177, %183 : vector<1x8x16x1xf32>
    %c0_109 = arith.constant 0 : index
    %c1_110 = arith.constant 1 : index
    %c2_111 = arith.constant 2 : index
    %c0_112 = arith.constant 0 : index
    %185 = vector.load %arg19[%c0_109, %c1_110, %c2_111, %c0_112] : memref<1x9x23x1xf32, #tpu.memory_space<vmem>>, vector<1x8x16x1xf32>
    %186 = vector.extract_strided_slice %155 {offsets = [4, 0], sizes = [1, 1], strides = [1, 1]} : vector<8x1xf32> to vector<1x1xf32>
    %187 = vector.shape_cast %186 : vector<1x1xf32> to vector<1xf32>
    %188 = vector.shape_cast %187 : vector<1xf32> to vector<1x1x1x1xf32>
    %189 = vector.broadcast %188 : vector<1x1x1x1xf32> to vector<1x8x16x1xf32>
    %190 = arith.mulf %185, %189 : vector<1x8x16x1xf32>
    %191 = arith.addf %184, %190 : vector<1x8x16x1xf32>
    %c0_113 = arith.constant 0 : index
    %c1_114 = arith.constant 1 : index
    %c3_115 = arith.constant 3 : index
    %c0_116 = arith.constant 0 : index
    %192 = vector.load %arg19[%c0_113, %c1_114, %c3_115, %c0_116] : memref<1x9x23x1xf32, #tpu.memory_space<vmem>>, vector<1x8x16x1xf32>
    %193 = vector.extract_strided_slice %155 {offsets = [5, 0], sizes = [1, 1], strides = [1, 1]} : vector<8x1xf32> to vector<1x1xf32>
    %194 = vector.shape_cast %193 : vector<1x1xf32> to vector<1xf32>
    %195 = vector.shape_cast %194 : vector<1xf32> to vector<1x1x1x1xf32>
    %196 = vector.broadcast %195 : vector<1x1x1x1xf32> to vector<1x8x16x1xf32>
    %197 = arith.mulf %192, %196 : vector<1x8x16x1xf32>
    %198 = arith.addf %191, %197 : vector<1x8x16x1xf32>
    %c0_117 = arith.constant 0 : index
    %c1_118 = arith.constant 1 : index
    %c4_119 = arith.constant 4 : index
    %c0_120 = arith.constant 0 : index
    %199 = vector.load %arg19[%c0_117, %c1_118, %c4_119, %c0_120] : memref<1x9x23x1xf32, #tpu.memory_space<vmem>>, vector<1x8x16x1xf32>
    %200 = vector.extract_strided_slice %155 {offsets = [6, 0], sizes = [1, 1], strides = [1, 1]} : vector<8x1xf32> to vector<1x1xf32>
    %201 = vector.shape_cast %200 : vector<1x1xf32> to vector<1xf32>
    %202 = vector.shape_cast %201 : vector<1xf32> to vector<1x1x1x1xf32>
    %203 = vector.broadcast %202 : vector<1x1x1x1xf32> to vector<1x8x16x1xf32>
    %204 = arith.mulf %199, %203 : vector<1x8x16x1xf32>
    %205 = arith.addf %198, %204 : vector<1x8x16x1xf32>
    %c0_121 = arith.constant 0 : index
    %c1_122 = arith.constant 1 : index
    %c5_123 = arith.constant 5 : index
    %c0_124 = arith.constant 0 : index
    %206 = vector.load %arg19[%c0_121, %c1_122, %c5_123, %c0_124] : memref<1x9x23x1xf32, #tpu.memory_space<vmem>>, vector<1x8x16x1xf32>
    %207 = vector.extract_strided_slice %155 {offsets = [7, 0], sizes = [1, 1], strides = [1, 1]} : vector<8x1xf32> to vector<1x1xf32>
    %208 = vector.shape_cast %207 : vector<1x1xf32> to vector<1xf32>
    %209 = vector.shape_cast %208 : vector<1xf32> to vector<1x1x1x1xf32>
    %210 = vector.broadcast %209 : vector<1x1x1x1xf32> to vector<1x8x16x1xf32>
    %211 = arith.mulf %206, %210 : vector<1x8x16x1xf32>
    %212 = arith.addf %205, %211 : vector<1x8x16x1xf32>
    %c0_125 = arith.constant 0 : index
    %c0_126 = arith.constant 0 : index
    %213 = vector.load %arg6[%c0_125, %c0_126] : memref<1x16xf32, #tpu.memory_space<vmem>>, vector<1x16xf32>
    %214 = vector.shape_cast %213 : vector<1x16xf32> to vector<1x1x1x16xf32>
    %215 = vector.broadcast %212 : vector<1x8x16x1xf32> to vector<1x8x16x16xf32>
    %216 = vector.broadcast %214 : vector<1x1x1x16xf32> to vector<1x8x16x16xf32>
    %217 = arith.mulf %215, %216 : vector<1x8x16x16xf32>
    %c0_127 = arith.constant 0 : index
    %c0_128 = arith.constant 0 : index
    %218 = vector.load %arg7[%c0_127, %c0_128] : memref<1x16xf32, #tpu.memory_space<vmem>>, vector<1x16xf32>
    %219 = vector.shape_cast %218 : vector<1x16xf32> to vector<1x1x1x16xf32>
    %220 = vector.broadcast %219 : vector<1x1x1x16xf32> to vector<1x8x16x16xf32>
    %221 = arith.addf %217, %220 : vector<1x8x16x16xf32>
    %cst_129 = arith.constant 0.000000e+00 : f32
    %222 = vector.broadcast %cst_129 : f32 to vector<1x8x16x16xf32>
    %223 = arith.maximumf %221, %222 : vector<1x8x16x16xf32>
    %c0_130 = arith.constant 0 : index
    %c0_131 = arith.constant 0 : index
    %224 = vector.load %arg8[%c0_130, %c0_131] : memref<4x1xf32, #tpu.memory_space<vmem>>, vector<4x1xf32>
    %cst_132 = arith.constant 0.000000e+00 : f32
    %225 = vector.broadcast %cst_132 : f32 to vector<1x8x16x1xf32>
    %c0_133 = arith.constant 0 : index
    %c0_134 = arith.constant 0 : index
    %c3_135 = arith.constant 3 : index
    %c0_136 = arith.constant 0 : index
    %226 = vector.load %arg19[%c0_133, %c0_134, %c3_135, %c0_136] : memref<1x9x23x1xf32, #tpu.memory_space<vmem>>, vector<1x8x16x1xf32>
    %227 = vector.extract_strided_slice %224 {offsets = [0, 0], sizes = [1, 1], strides = [1, 1]} : vector<4x1xf32> to vector<1x1xf32>
    %228 = vector.shape_cast %227 : vector<1x1xf32> to vector<1xf32>
    %229 = vector.shape_cast %228 : vector<1xf32> to vector<1x1x1x1xf32>
    %230 = vector.broadcast %229 : vector<1x1x1x1xf32> to vector<1x8x16x1xf32>
    %231 = arith.mulf %226, %230 : vector<1x8x16x1xf32>
    %232 = arith.addf %225, %231 : vector<1x8x16x1xf32>
    %c0_137 = arith.constant 0 : index
    %c0_138 = arith.constant 0 : index
    %c4_139 = arith.constant 4 : index
    %c0_140 = arith.constant 0 : index
    %233 = vector.load %arg19[%c0_137, %c0_138, %c4_139, %c0_140] : memref<1x9x23x1xf32, #tpu.memory_space<vmem>>, vector<1x8x16x1xf32>
    %234 = vector.extract_strided_slice %224 {offsets = [1, 0], sizes = [1, 1], strides = [1, 1]} : vector<4x1xf32> to vector<1x1xf32>
    %235 = vector.shape_cast %234 : vector<1x1xf32> to vector<1xf32>
    %236 = vector.shape_cast %235 : vector<1xf32> to vector<1x1x1x1xf32>
    %237 = vector.broadcast %236 : vector<1x1x1x1xf32> to vector<1x8x16x1xf32>
    %238 = arith.mulf %233, %237 : vector<1x8x16x1xf32>
    %239 = arith.addf %232, %238 : vector<1x8x16x1xf32>
    %c0_141 = arith.constant 0 : index
    %c1_142 = arith.constant 1 : index
    %c3_143 = arith.constant 3 : index
    %c0_144 = arith.constant 0 : index
    %240 = vector.load %arg19[%c0_141, %c1_142, %c3_143, %c0_144] : memref<1x9x23x1xf32, #tpu.memory_space<vmem>>, vector<1x8x16x1xf32>
    %241 = vector.extract_strided_slice %224 {offsets = [2, 0], sizes = [1, 1], strides = [1, 1]} : vector<4x1xf32> to vector<1x1xf32>
    %242 = vector.shape_cast %241 : vector<1x1xf32> to vector<1xf32>
    %243 = vector.shape_cast %242 : vector<1xf32> to vector<1x1x1x1xf32>
    %244 = vector.broadcast %243 : vector<1x1x1x1xf32> to vector<1x8x16x1xf32>
    %245 = arith.mulf %240, %244 : vector<1x8x16x1xf32>
    %246 = arith.addf %239, %245 : vector<1x8x16x1xf32>
    %c0_145 = arith.constant 0 : index
    %c1_146 = arith.constant 1 : index
    %c4_147 = arith.constant 4 : index
    %c0_148 = arith.constant 0 : index
    %247 = vector.load %arg19[%c0_145, %c1_146, %c4_147, %c0_148] : memref<1x9x23x1xf32, #tpu.memory_space<vmem>>, vector<1x8x16x1xf32>
    %248 = vector.extract_strided_slice %224 {offsets = [3, 0], sizes = [1, 1], strides = [1, 1]} : vector<4x1xf32> to vector<1x1xf32>
    %249 = vector.shape_cast %248 : vector<1x1xf32> to vector<1xf32>
    %250 = vector.shape_cast %249 : vector<1xf32> to vector<1x1x1x1xf32>
    %251 = vector.broadcast %250 : vector<1x1x1x1xf32> to vector<1x8x16x1xf32>
    %252 = arith.mulf %247, %251 : vector<1x8x16x1xf32>
    %253 = arith.addf %246, %252 : vector<1x8x16x1xf32>
    %c0_149 = arith.constant 0 : index
    %c0_150 = arith.constant 0 : index
    %254 = vector.load %arg9[%c0_149, %c0_150] : memref<1x16xf32, #tpu.memory_space<vmem>>, vector<1x16xf32>
    %255 = vector.shape_cast %254 : vector<1x16xf32> to vector<1x1x1x16xf32>
    %256 = vector.broadcast %253 : vector<1x8x16x1xf32> to vector<1x8x16x16xf32>
    %257 = vector.broadcast %255 : vector<1x1x1x16xf32> to vector<1x8x16x16xf32>
    %258 = arith.mulf %256, %257 : vector<1x8x16x16xf32>
    %c0_151 = arith.constant 0 : index
    %c0_152 = arith.constant 0 : index
    %259 = vector.load %arg10[%c0_151, %c0_152] : memref<1x16xf32, #tpu.memory_space<vmem>>, vector<1x16xf32>
    %260 = vector.shape_cast %259 : vector<1x16xf32> to vector<1x1x1x16xf32>
    %261 = vector.broadcast %260 : vector<1x1x1x16xf32> to vector<1x8x16x16xf32>
    %262 = arith.addf %258, %261 : vector<1x8x16x16xf32>
    %cst_153 = arith.constant 0.000000e+00 : f32
    %263 = vector.broadcast %cst_153 : f32 to vector<1x8x16x16xf32>
    %264 = arith.maximumf %262, %263 : vector<1x8x16x16xf32>
    %c0_154 = arith.constant 0 : index
    %c0_155 = arith.constant 0 : index
    %c2_156 = arith.constant 2 : index
    %c0_157 = arith.constant 0 : index
    %265 = vector.load %arg19[%c0_154, %c0_155, %c2_156, %c0_157] : memref<1x9x23x1xf32, #tpu.memory_space<vmem>>, vector<1x8x16x1xf32>
    %c0_158 = arith.constant 0 : index
    %c0_159 = arith.constant 0 : index
    %c3_160 = arith.constant 3 : index
    %c0_161 = arith.constant 0 : index
    %266 = vector.load %arg19[%c0_158, %c0_159, %c3_160, %c0_161] : memref<1x9x23x1xf32, #tpu.memory_space<vmem>>, vector<1x8x16x1xf32>
    %267 = arith.maximumf %265, %266 : vector<1x8x16x1xf32>
    %c0_162 = arith.constant 0 : index
    %c0_163 = arith.constant 0 : index
    %c4_164 = arith.constant 4 : index
    %c0_165 = arith.constant 0 : index
    %268 = vector.load %arg19[%c0_162, %c0_163, %c4_164, %c0_165] : memref<1x9x23x1xf32, #tpu.memory_space<vmem>>, vector<1x8x16x1xf32>
    %269 = arith.maximumf %267, %268 : vector<1x8x16x1xf32>
    %c0_166 = arith.constant 0 : index
    %c0_167 = arith.constant 0 : index
    %270 = vector.load %arg11[%c0_166, %c0_167] : memref<1x16xf32, #tpu.memory_space<vmem>>, vector<1x16xf32>
    %271 = vector.shape_cast %270 : vector<1x16xf32> to vector<1x1x1x16xf32>
    %272 = vector.broadcast %269 : vector<1x8x16x1xf32> to vector<1x8x16x16xf32>
    %273 = vector.broadcast %271 : vector<1x1x1x16xf32> to vector<1x8x16x16xf32>
    %274 = arith.mulf %272, %273 : vector<1x8x16x16xf32>
    %c0_168 = arith.constant 0 : index
    %c0_169 = arith.constant 0 : index
    %275 = vector.load %arg12[%c0_168, %c0_169] : memref<1x16xf32, #tpu.memory_space<vmem>>, vector<1x16xf32>
    %276 = vector.shape_cast %275 : vector<1x16xf32> to vector<1x1x1x16xf32>
    %277 = vector.broadcast %276 : vector<1x1x1x16xf32> to vector<1x8x16x16xf32>
    %278 = arith.addf %274, %277 : vector<1x8x16x16xf32>
    %cst_170 = arith.constant 0.000000e+00 : f32
    %279 = vector.broadcast %cst_170 : f32 to vector<1x8x16x16xf32>
    %280 = arith.maximumf %278, %279 : vector<1x8x16x16xf32>
    %281 = tpu.concatenate %154, %223, %264, %280 in 3 : vector<1x8x16x16xf32>, vector<1x8x16x16xf32>, vector<1x8x16x16xf32>, vector<1x8x16x16xf32> -> vector<1x8x16x64xf32>
    %c0_171 = arith.constant 0 : index
    %c0_172 = arith.constant 0 : index
    %c0_173 = arith.constant 0 : index
    %c0_174 = arith.constant 0 : index
    %282 = vector.load %arg17[%c0_171, %c0_172, %c0_173, %c0_174] : memref<1x8x16x64xf32, #tpu.memory_space<vmem>>, vector<1x8x16x64xf32>
    tpu.vector_store %arg17[%c0_171, %c0_172, %c0_173, %c0_174], %281 {strides = array<i32>} : memref<1x8x16x64xf32, #tpu.memory_space<vmem>>, vector<1x8x16x64xf32>,
    %c0_175 = arith.constant 0 : index
    %c0_176 = arith.constant 0 : index
    %283 = vector.load %arg13[%c0_175, %c0_176] : memref<8x64xf32, #tpu.memory_space<vmem>>, vector<8x64xf32>
    %284 = vector.shape_cast %283 : vector<8x64xf32> to vector<1x8x1x64xf32>
    %285 = vector.broadcast %284 : vector<1x8x1x64xf32> to vector<1x8x16x64xf32>
    %286 = arith.mulf %281, %285 : vector<1x8x16x64xf32>
    %cst_177 = arith.constant dense<0.000000e+00> : vector<1x16x64xf32>
    %287 = vector.multi_reduction <add>, %286, %cst_177 [1] : vector<1x8x16x64xf32> to vector<1x16x64xf32>
    %288 = vector.shape_cast %287 : vector<1x16x64xf32> to vector<16x64xf32>
    %c0_178 = arith.constant 0 : index
    %c0_179 = arith.constant 0 : index
    %289 = vector.load %arg14[%c0_178, %c0_179] : memref<64x16xf32, #tpu.memory_space<vmem>>, vector<64x16xf32>
    %cst_180 = arith.constant dense<0.000000e+00> : vector<16x16xf32>
    %290 = tpu.matmul %288, %289, %cst_180 {dimension_numbers = #tpu.dot_dimension_numbers<[1], [0], [0], [1], [0, 0, 1, 1], [], []>} : vector<16x64xf32>, vector<64x16xf32>, vector<16x16xf32> -> vector<16x16xf32>
    %c0_181 = arith.constant 0 : index
    %c0_182 = arith.constant 0 : index
    %291 = vector.load %arg15[%c0_181, %c0_182] : memref<1x16xf32, #tpu.memory_space<vmem>>, vector<1x16xf32>
    %292 = vector.broadcast %291 : vector<1x16xf32> to vector<16x16xf32>
    %293 = arith.addf %290, %292 : vector<16x16xf32>
    %cst_183 = arith.constant 0.000000e+00 : f32
    %294 = vector.broadcast %cst_183 : f32 to vector<16x16xf32>
    %295 = arith.maximumf %293, %294 : vector<16x16xf32>
    %c0_184 = arith.constant 0 : index
    %c0_185 = arith.constant 0 : index
    %296 = vector.load %arg16[%c0_184, %c0_185] : memref<16x2xf32, #tpu.memory_space<vmem>>, vector<16x2xf32>
    %cst_186 = arith.constant dense<0.000000e+00> : vector<16x2xf32>
    %297 = tpu.matmul %295, %296, %cst_186 {dimension_numbers = #tpu.dot_dimension_numbers<[1], [0], [0], [1], [0, 0, 1, 1], [], []>} : vector<16x16xf32>, vector<16x2xf32>, vector<16x2xf32> -> vector<16x2xf32>
    %cst_187 = arith.constant dense<0xFF800000> : vector<16xf32>
    %298 = vector.multi_reduction <maximumf>, %297, %cst_187 [1] : vector<16x2xf32> to vector<16xf32>
    %cst_188 = arith.constant 0xFF800000 : f32
    %299 = vector.broadcast %cst_188 : f32 to vector<16xf32>
    %300 = arith.maximumf %299, %298 : vector<16xf32>
    %301 = vector.shape_cast %300 : vector<16xf32> to vector<16x1xf32>
    %302 = vector.broadcast %301 : vector<16x1xf32> to vector<16x2xf32>
    %303 = arith.subf %297, %302 : vector<16x2xf32>
    %304 = math.exp %303 : vector<16x2xf32>
    %cst_189 = arith.constant dense<0.000000e+00> : vector<16xf32>
    %305 = vector.multi_reduction <add>, %304, %cst_189 [1] : vector<16x2xf32> to vector<16xf32>
    %306 = vector.shape_cast %305 : vector<16xf32> to vector<16x1xf32>
    %307 = vector.broadcast %306 : vector<16x1xf32> to vector<16x2xf32>
    %308 = arith.divf %304, %307 : vector<16x2xf32>
    %309 = vector.shape_cast %308 : vector<16x2xf32> to vector<1x16x2xf32>
    %c0_190 = arith.constant 0 : index
    %c0_191 = arith.constant 0 : index
    %c0_192 = arith.constant 0 : index
    %310 = vector.load %arg18[%c0_190, %c0_191, %c0_192] : memref<1x16x2xf32, #tpu.memory_space<vmem>>, vector<1x16x2xf32>
    tpu.vector_store %arg18[%c0_190, %c0_191, %c0_192], %309 {strides = array<i32>} : memref<1x16x2xf32, #tpu.memory_space<vmem>>, vector<1x16x2xf32>,
    return
  }
  func.func @transform_0(%arg0: i32) -> (i32, i32, i32, i32) {
    %c0_i32 = arith.constant 0 : i32
    %c0_i32_0 = arith.constant 0 : i32
    %c0_i32_1 = arith.constant 0 : i32
    %c0_i32_2 = arith.constant 0 : i32
    return %arg0, %c0_i32, %c0_i32_0, %c0_i32_1 : i32, i32, i32, i32
  }
  func.func @transform_1(%arg0: i32) -> (i32, i32) {
    %c0_i32 = arith.constant 0 : i32
    %c0_i32_0 = arith.constant 0 : i32
    %c0_i32_1 = arith.constant 0 : i32
    return %c0_i32, %c0_i32_0 : i32, i32
  }
  func.func @transform_2(%arg0: i32) -> (i32, i32) {
    %c0_i32 = arith.constant 0 : i32
    %c0_i32_0 = arith.constant 0 : i32
    %c0_i32_1 = arith.constant 0 : i32
    return %c0_i32, %c0_i32_0 : i32, i32
  }
  func.func @transform_3(%arg0: i32) -> (i32, i32) {
    %c0_i32 = arith.constant 0 : i32
    %c0_i32_0 = arith.constant 0 : i32
    %c0_i32_1 = arith.constant 0 : i32
    return %c0_i32, %c0_i32_0 : i32, i32
  }
  func.func @transform_4(%arg0: i32) -> (i32, i32) {
    %c0_i32 = arith.constant 0 : i32
    %c0_i32_0 = arith.constant 0 : i32
    %c0_i32_1 = arith.constant 0 : i32
    return %c0_i32, %c0_i32_0 : i32, i32
  }
  func.func @transform_5(%arg0: i32) -> (i32, i32) {
    %c0_i32 = arith.constant 0 : i32
    %c0_i32_0 = arith.constant 0 : i32
    %c0_i32_1 = arith.constant 0 : i32
    return %c0_i32, %c0_i32_0 : i32, i32
  }
  func.func @transform_6(%arg0: i32) -> (i32, i32) {
    %c0_i32 = arith.constant 0 : i32
    %c0_i32_0 = arith.constant 0 : i32
    %c0_i32_1 = arith.constant 0 : i32
    return %c0_i32, %c0_i32_0 : i32, i32
  }
  func.func @transform_7(%arg0: i32) -> (i32, i32) {
    %c0_i32 = arith.constant 0 : i32
    %c0_i32_0 = arith.constant 0 : i32
    %c0_i32_1 = arith.constant 0 : i32
    return %c0_i32, %c0_i32_0 : i32, i32
  }
  func.func @transform_8(%arg0: i32) -> (i32, i32) {
    %c0_i32 = arith.constant 0 : i32
    %c0_i32_0 = arith.constant 0 : i32
    %c0_i32_1 = arith.constant 0 : i32
    return %c0_i32, %c0_i32_0 : i32, i32
  }
  func.func @transform_9(%arg0: i32) -> (i32, i32) {
    %c0_i32 = arith.constant 0 : i32
    %c0_i32_0 = arith.constant 0 : i32
    %c0_i32_1 = arith.constant 0 : i32
    return %c0_i32, %c0_i32_0 : i32, i32
  }
  func.func @transform_10(%arg0: i32) -> (i32, i32) {
    %c0_i32 = arith.constant 0 : i32
    %c0_i32_0 = arith.constant 0 : i32
    %c0_i32_1 = arith.constant 0 : i32
    return %c0_i32, %c0_i32_0 : i32, i32
  }
  func.func @transform_11(%arg0: i32) -> (i32, i32) {
    %c0_i32 = arith.constant 0 : i32
    %c0_i32_0 = arith.constant 0 : i32
    %c0_i32_1 = arith.constant 0 : i32
    return %c0_i32, %c0_i32_0 : i32, i32
  }
  func.func @transform_12(%arg0: i32) -> (i32, i32) {
    %c0_i32 = arith.constant 0 : i32
    %c0_i32_0 = arith.constant 0 : i32
    %c0_i32_1 = arith.constant 0 : i32
    return %c0_i32, %c0_i32_0 : i32, i32
  }
  func.func @transform_13(%arg0: i32) -> (i32, i32) {
    %c0_i32 = arith.constant 0 : i32
    %c0_i32_0 = arith.constant 0 : i32
    %c0_i32_1 = arith.constant 0 : i32
    return %c0_i32, %c0_i32_0 : i32, i32
  }
  func.func @transform_14(%arg0: i32) -> (i32, i32) {
    %c0_i32 = arith.constant 0 : i32
    %c0_i32_0 = arith.constant 0 : i32
    %c0_i32_1 = arith.constant 0 : i32
    return %c0_i32, %c0_i32_0 : i32, i32
  }
  func.func @transform_15(%arg0: i32) -> (i32, i32) {
    %c0_i32 = arith.constant 0 : i32
    %c0_i32_0 = arith.constant 0 : i32
    %c0_i32_1 = arith.constant 0 : i32
    return %c0_i32, %c0_i32_0 : i32, i32
  }
  func.func @transform_16(%arg0: i32) -> (i32, i32, i32, i32) {
    %c0_i32 = arith.constant 0 : i32
    %c0_i32_0 = arith.constant 0 : i32
    %c0_i32_1 = arith.constant 0 : i32
    %c0_i32_2 = arith.constant 0 : i32
    return %arg0, %c0_i32, %c0_i32_0, %c0_i32_1 : i32, i32, i32, i32
  }
  func.func @transform_17(%arg0: i32) -> (i32, i32, i32) {
    %c0_i32 = arith.constant 0 : i32
    %c0_i32_0 = arith.constant 0 : i32
    %c0_i32_1 = arith.constant 0 : i32
    return %arg0, %c0_i32, %c0_i32_0 : i32, i32, i32
  }
}

</mosaic_0001>

<bundles_post_ra>
// kernel: _lambda_.3
= control target key start
LH: loop header
LB: loop body
LE: loop exit
PB: predicated region body
PF: predicated region fallthrough
CT: control target
= control target key end

     0   :  { %s5500_s0 = inlined_call_operand.vmem [shape: f32[2,8,16,64], index: 0, kind: input, shape index: {}]   ;;  %s5501_s1 = inlined_call_operand.vmem [shape: f32[64,32], index: 1, kind: input, shape index: {}]   ;;  %s5502_s2 = inlined_call_operand.hbm [shape: f32[1,32], index: 2, kind: input, shape index: {}]   ;;  %s5503_s3 = inlined_call_operand.vmem [shape: f32[16,32], index: 3, kind: input, shape index: {}]   ;;  %s5504_s4 = inlined_call_operand.vmem [shape: f32[32,16], index: 4, kind: input, shape index: {}]   ;;  %s5505_s5 = inlined_call_operand.vmem [shape: f32[1,16], index: 5, kind: input, shape index: {}]   ;;  %s5506_s6 = inlined_call_operand.hbm [shape: f32[8,32], index: 6, kind: input, shape index: {}]   ;;  %s5507_s7 = inlined_call_operand.vmem [shape: f32[32,16], index: 7, kind: input, shape index: {}]   ;;  %s5508_s8 = inlined_call_operand.vmem [shape: f32[1,16], index: 8, kind: input, shape index: {}]   ;;  %s5509_s9 = inlined_call_operand.vmem [shape: f32[4,32], index: 9, kind: input, shape index: {}]   ;;  %s5510_s10 = inlined_call_operand.vmem [shape: f32[32,16], index: 10, kind: input, shape index: {}]   ;;  %s5511_s11 = inlined_call_operand.vmem [shape: f32[1,16], index: 11, kind: input, shape index: {}]   ;;  %s5512_s12 = inlined_call_operand.vmem [shape: f32[32,16], index: 12, kind: input, shape index: {}]   ;;  %s5513_s13 = inlined_call_operand.vmem [shape: f32[1,16], index: 13, kind: input, shape index: {}]   ;;  %s5514_s14 = inlined_call_operand.vmem [shape: f32[8,64], index: 14, kind: input, shape index: {}]   ;;  %s5515_s15 = inlined_call_operand.vmem [shape: f32[64,16], index: 15, kind: input, shape index: {}]   ;;  %s5516_s16 = inlined_call_operand.vmem [shape: f32[1,16], index: 16, kind: input, shape index: {}]   ;;  %s5517_s17 = inlined_call_operand.vmem [shape: f32[16,2], index: 17, kind: input, shape index: {}]   ;;  %s5518_s18 = inlined_call_operand.hbm [shape: f32[2,8,16,64], index: 18, kind: output, shape index: {0}]   ;;  %s5519_s19 = inlined_call_operand.vmem [shape: f32[2,16,2], index: 19, kind: output, shape index: {1}]  }
   0x1   :  { %5532 = sst [smem:[#allocation20_spill]] %s5500_s0 }
   0x2   :  { %5533 = sst [smem:[#allocation21_spill]] %s5501_s1 }
   0x3   :  { %5534 = sst [smem:[#allocation22_spill]] %s5502_s2 }
   0x4   :  { %5535 = sst [smem:[#allocation23_spill]] %s5503_s3 }
   0x5   :  { %5536 = sst [smem:[#allocation24_spill]] %s5504_s4 }
   0x6   :  { %5537 = sst [smem:[#allocation25_spill]] %s5505_s5 }
   0x7   :  { %5538 = sst [smem:[#allocation26_spill]] %s5506_s6 }
   0x8   :  { %5539 = sst [smem:[#allocation27_spill]] %s5507_s7 }
   0x9   :  { %25 = vsyncpa [#allocation4], 0 }
   0xa   :  { %26 = vsyncpa [#allocation7], 0 }
   0xb   :  { %27 = vsyncpa [#allocation5], 0 }
   0xc   :  { %29 = vsyncpa [#allocation5 + $0x1], 0  ;;  %s3707_s0 = smov 0   ;;  %s3709_s30 = smov 0  }
   0xd   :  { %s3711_s20 = smov 0   ;;  %s3713_s21 = smov 0  }
   0xe LB: > { %5540 = sst [smem:[#allocation12_spill]] %s3586_s0  ;;  %s3728_s1 = sadd.s32 4294967295, %s3598_s21   ;;  %s3598_s21 = sphi %s3713_s21, %s5566_s21   ;;  %s3594_s20 = sphi %s3711_s20, %s5568_s20   ;;  %s3590_s30 = sphi %s3709_s30, %s5570_s30   ;;  %s3586_s0 = sphi %s3707_s0, %s5569_s0  }
   0xf   : > { %5541 = sst [smem:[#allocation13_spill]] %s3594_s20  ;;  %s3214_s22 = sadd.s32 4294967294, %s3598_s21  }
  0x10   : > { %5542 = sst [smem:[#allocation14_spill]] %s3598_s21  ;;  %s3732_s2 = sadd.s32 1, %s3598_s21  }
  0x11   : > { %5543 = sst [smem:[#allocation15_spill]] %s3732_s2  ;;  %s425_s23 = sadd.s32 1, %s3594_s20 }
  0x12   : > { %s422_s24 = ssub.s32 %s3598_s21, %s3732_s2  ;;  %p435_p0 = scmp.ne.s32.totalorder %s3594_s20, %s3590_s30 }
  0x13   : > { %p423_p1 = scmp.eq.s32.totalorder %s422_s24, 0  ;;  %p436_p2 = scmp.eq.s32.totalorder %s3728_s1, 1 }
  0x14   : > { %p441_p3 = scmp.ne.s32.totalorder %s3590_s30, %s3586_s0  ;;  %p442_p4 = scmp.eq.s32.totalorder %s3214_s22, 1 }
  0x15   : > { %s3743_s25 = scalar_select %p423_p1, %s3594_s20, %s425_s23  }
  0x16   : > { %p3745_p5 = por %p436_p2, %p435_p0  ;;  %p3749_p6 = por %p442_p4, %p441_p3 }
  0x17   : > { %5544 = sst [smem:[#allocation16_spill]] %s3743_s25  ;;  %p3215_p7 = scmp.ge.s32.totalorder %s3598_s21, 1 }
  0x18   : > { %s5546_s26 = scalar_select %p3749_p6, 1, 0 }
  0x19   : > { %p475_p8 = scmp.lt.s32.totalorder %s3598_s21, 3  ;;  %p3348_p9 = scmp.eq.s32.totalorder %s3728_s1, 0 }
  0x1a   : > { %5547 = sst [smem:[#allocation17_spill]] %s5546_s26  ;;  %s3600_s24 = smov [#allocation3]  }
  0x1b   : > { %p3756_p10 = pnand %p3215_p7, %p475_p8  ;;  %s5549_s22 = sld [smem:[#allocation22_spill]] }
  0x1c   : > { %s492_s25 = sshll.u32 %s3600_s24, 4  ;;  %s5550_s6 = sld [smem:[#allocation26_spill]]  ;;  %s493_s25 = int_to_ptr.vmem [resolvable:$true] %s492_s25 }
  0x1d   : > { %p3337_p11 = pneg %p3756_p10  ;;  %s3601_s0 = smov [#allocation6]  }
  0x1e   : > { %s513_s21 = sshll.u32 %s3601_s0, 4  ;;  %s514_s21 = int_to_ptr.vmem [resolvable:$true] %s513_s21 }
  0x1f   : > { %p3338_p12 = pnand %p3348_p9, %p3337_p11 }
  0x20   : > { %567 = sbr.rel (%p3756_p10) target bundleno = 1302 (0x516), region = 92 }
  0x21   : > { %s490_s23 = sshll.u32 %s5549_s22, 4  ;;  %s491_s23 = int_to_ptr.hbm [resolvable:$true] %s490_s23 }
  0x22   : > { %s511_s26 = sshll.u32 %s5550_s6, 4  ;;  %s512_s26 = int_to_ptr.hbm [resolvable:$true] %s511_s26 }
  0x23   : > { %3340 = dma.hbm_to_vmem [thread:$0]  (!%p3338_p12), %s491_s23, 16, %s493_s25, [#allocation4]  }
  0x24   : > { %3343 = dma.hbm_to_vmem [thread:$0]  (!%p3338_p12), %s512_s26, 128, %s514_s21, [#allocation7]  }
  0x25   : > { %3573 = dma.done.wait (%p3348_p9), [#allocation4], 16  }
  0x26   : > { %3575 = vsyncadd (%p3348_p9), [#allocation4], 4294967280 }
  0x27   : > { %3577 = dma.done.wait (%p3348_p9), [#allocation7], 128  }
  0x28   : > { %3579 = vsyncadd (%p3348_p9), [#allocation7], 4294967168  ;;  %p634_p13 = scmp.lt.s32.totalorder %s3728_s1, 1  ;;  %s5551_s21 = sld [smem:[#allocation21_spill]]  ;;  %vm672_vm0 = vcmask 523264   ;;  %v2324_v27 = vld [vmem:[%s5510_s10 + $0x18] sm:$0xff] }
  0x29   : > { %s5553_s22 = sld [smem:[#allocation20_spill]]  ;;  %v3846_v24 = vld [vmem:[#allocation3] ss:$0 sm:$0xff]  ;;  %vm802_vm1 = vcmask 261120   ;;  %2389 = vmatpush.msra.mxu3 %v2324_v27  ;;  %v2323_v29 = vld [vmem:[%s5510_s10 + $0x10] sm:$0xff]  ;;  %vm827_vm2 = vcmask 256000  }
  0x2a   : > { %s3794_s23 = scalar_select %p634_p13, %s3728_s1, 1  ;;  %v2322_v31 = vld [vmem:[%s5510_s10 + $0x8] sm:$0xff]  ;;  %v2321_v32 = vld [vmem:[%s5510_s10] sm:$0xff]  ;;  %vm844_vm3 = vcmask 257024   ;;  %vm860_vm4 = vcmask 260096   ;;  %vm2819_vm5 = vcmask 130048  }
  0x2b   : > { %2390 = vmatpush.msra.mxu3 %v2323_v29  ;;  %s5554_s0 = sld [smem:[#allocation23_spill]]  ;;  %s3604_s29 = smov 16   ;;  %vm2852_vm6 = vcmask 392192   ;;  %vm3030_vm7 = vcmask 15360  }
  0x2c   : > { %s3316_s20 = sshll.u32 %s3794_s23, 7  ;;  %s5556_s4 = sld [smem:[#allocation24_spill]] }
  0x2d   : > { %2391 = vmatpush.msra.mxu3 %v2322_v31  ;;  %s5557_s7 = sld [smem:[#allocation27_spill]]  ;;  %s624_s28 = sand.u32 1, %s3590_s30  }
  0x2e   : > { %s5552_s2 = smov %s5551_s21  ;;  %v667_v0 = vld [vmem:[%s5551_s21 + $0x38] sm:$0xff]  ;;  %s5562_s5 = sld [smem:[#allocation25_spill]] }
  0x2f   : > { %v666_v1 = vld [vmem:[%s5552_s2 + $0x30] sm:$0xff]  ;;  %729 = vmatpush.msra.mxu0 %v667_v0  ;;  %v665_v2 = vld [vmem:[%s5552_s2 + $0x28] sm:$0xff]  ;;  %v664_v3 = vld [vmem:[%s5552_s2 + $0x20] sm:$0xff]  ;;  %s3809_s6 = scalar_lea.vmem %s5553_s22, %s3316_s20  ;;  %2392 = vmatpush.msra.mxu3 %v2321_v32  ;;  %s3602_s20 = smov 32  }
  0x30   : > { %v663_v4 = vld [vmem:[%s5552_s2 + $0x18] sm:$0xff]  ;;  %v662_v5 = vld [vmem:[%s5552_s2 + $0x10] sm:$0xff]  ;;  %v661_v6 = vld [vmem:[%s5552_s2 + $0x8] sm:$0xff]  ;;  %s3222_s22 = sshll.u32 %s624_s28, 7 }
  0x31   : > { %730 = vmatpush.msra.mxu0 %v666_v1  ;;  %v660_v7 = vld [vmem:[%s5552_s2] sm:$0xff]  ;;  %v645_v9 = vld [vmem:[%s3809_s6 + $0x8] sm:$0xff]  ;;  %v646_v10 = vld [vmem:[%s3809_s6 + $0x10] sm:$0xff]  ;;  %s5555_s25 = smov %s5554_s0  ;;  %s5250_s27 = scalar_lea.vmem [#allocation8], %s3222_s22 }
  0x32   : > { %v644_v8 = vld [vmem:[%s3809_s6] sm:$0xff]  ;;  %v647_v11 = vld [vmem:[%s3809_s6 + $0x18] sm:$0xff]  ;;  %v649_v13 = vld [vmem:[%s3809_s6 + $0x28] sm:$0xff]  ;;  %s3082_s22 = scalar_lea.sflag [#allocation5], %s624_s28 }
  0x33   : > { %731 = vmatpush.msra.mxu0 %v665_v2  ;;  %v648_v12 = vld [vmem:[%s3809_s6 + $0x20] sm:$0xff]  ;;  %v650_v14 = vld [vmem:[%s3809_s6 + $0x30] sm:$0xff]  ;;  %v651_v15 = vld [vmem:[%s3809_s6 + $0x38] sm:$0xff] }
  0x34   : > { %v652_v16 = vld [vmem:[%s3809_s6 + $0x40] sm:$0xff]  ;;  %v653_v17 = vld [vmem:[%s3809_s6 + $0x48] sm:$0xff]  ;;  %v654_v18 = vld [vmem:[%s3809_s6 + $0x50] sm:$0xff] }
  0x35   : > { %732 = vmatpush.msra.mxu0 %v664_v3  ;;  %v655_v19 = vld [vmem:[%s3809_s6 + $0x58] sm:$0xff]  ;;  %v656_v20 = vld [vmem:[%s3809_s6 + $0x60] sm:$0xff]  ;;  %v657_v21 = vld [vmem:[%s3809_s6 + $0x68] sm:$0xff] }
  0x36   : > { %v658_v22 = vld [vmem:[%s3809_s6 + $0x70] sm:$0xff]  ;;  %v659_v23 = vld [vmem:[%s3809_s6 + $0x78] sm:$0xff]  ;;  %v862_v35 = vld [vmem:[%s5554_s0] sm:$0xff]  ;;  %s3603_s6 = smov 48   ;;  %s3099_s0 = sshll.u32 %s5250_s27, 4  ;;  %s3100_s0 = int_to_ptr.vmem [resolvable:$true] %s3099_s0 }
  0x37   : > { %733 = vmatpush.msra.mxu0 %v663_v4  ;;  %v1652_v36 = vld [vmem:[%s5556_s4 + $0x18] sm:$0xff]  ;;  %v3870_v38 = vperm.slane %v862_v35, 0  ;;  %v3872_v39 = vperm.slane %v862_v35, 1  ;;  %v1651_v40 = vld [vmem:[%s5556_s4 + $0x10] sm:$0xff]  ;;  %v3878_v42 = vperm.slane %v862_v35, 2  ;;  %v3885_v48 = vperm.slane %v862_v35, 3 }
  0x38   : > { %3319 = vmatpush.msra.mxu1 %v1652_v36  ;;  %3320 = vmatpush.msra.mxu2 %v1652_v36  ;;  %v1650_v49 = vld [vmem:[%s5556_s4 + $0x8] sm:$0xff]  ;;  %v1649_v52 = vld [vmem:[%s5556_s4] sm:$0xff]  ;;  %v3898_v56 = vperm.slane %v862_v35, 4  ;;  %v3902_v60 = vperm.slane %v862_v35, 5  ;;  %v3904_v63 = vperm.slane %v862_v35, 6 }
  0x39   : > { %734 = vmatpush.msra.mxu0 %v662_v5 }
  0x3a   : > { %3321 = vmatpush.msra.mxu1 %v1651_v40  ;;  %3322 = vmatpush.msra.mxu2 %v1651_v40 }
  0x3b   : > { %735 = vmatpush.msra.mxu0 %v661_v6 }
  0x3c   : > { %3323 = vmatpush.msra.mxu1 %v1650_v49  ;;  %3324 = vmatpush.msra.mxu2 %v1650_v49 }
  0x3d   : > { %736 = vmatpush.msra.mxu0 %v660_v7 }
  0x3e   : > { %3227 = vmatmul.msk.f32.vlgmr.msra.gmra.mxu0 %vm672_vm0, %v644_v8  ;;  %3325 = vmatpush.msra.mxu1 %v1649_v52 }
  0x3f   : > { %1717 = vmatpush.msrb.mxu0 %v1652_v36  ;;  %3326 = vmatpush.msra.mxu2 %v1649_v52 }
  0x41   : > { %1718 = vmatpush.msrb.mxu0 %v1651_v40 }
  0x43   : > { %1719 = vmatpush.msrb.mxu0 %v1650_v49 }
  0x45   : > { %1720 = vmatpush.msrb.mxu0 %v1649_v52 }
  0x46   : > { %3228 = vmatmul.msk.f32.gmra.mxu0 %vm672_vm0, %v645_v9  ;;  %v2188_v9 = vld [vmem:[%s5509_s9] sm:$0xf] }
  0x47   : > { %v3940_v32 = vperm.slane %v2188_v9, 2 }
  0x4e   : > { %3229 = vmatmul.msk.f32.gmra.mxu0 %vm672_vm0, %v646_v10 }
  0x56   : > { %3230 = vmatmul.msk.f32.gmra.mxu0 %vm672_vm0, %v647_v11 }
  0x5e   : > { %3231 = vmatmul.msk.f32.gmra.mxu0 %vm672_vm0, %v648_v12 }
  0x66   : > { %3232 = vmatmul.msk.f32.gmra.mxu0 %vm672_vm0, %v649_v13 }
  0x6e   : > { %3233 = vmatmul.msk.f32.gmra.mxu0 %vm672_vm0, %v650_v14  ;;  %v3918_v14 = vperm.slane %v862_v35, 7 }
  0x76   : > { %3234 = vmatmul.msk.f32.gmra.mxu0 %vm672_vm0, %v651_v15 }
  0x7e   : > { %3235 = vmatmul.msk.f32.gmra.mxu0 %vm672_vm0, %v652_v16  ;;  %v863_v16 = vld [vmem:[%s5555_s25 + $0x8] sm:$0xff] }
  0x7f   : > { %v3938_v31 = vperm.slane %v863_v16, 3  ;;  %v3950_v40 = vperm.slane %v863_v16, 2 }
  0x86   : > { %3236 = vmatmul.msk.f32.gmra.mxu0 %vm672_vm0, %v653_v17 }
  0x8e   : > { %3237 = vmatmul.msk.f32.gmra.mxu0 %vm672_vm0, %v654_v18 }
  0x96   : > { %3238 = vmatmul.msk.f32.gmra.mxu0 %vm672_vm0, %v655_v19 }
  0x9e   : > { %3239 = vmatmul.msk.f32.gmra.mxu0 %vm672_vm0, %v656_v20 }
  0xa6   : > { %3240 = vmatmul.msk.f32.gmra.mxu0 %vm672_vm0, %v657_v21 }
  0xae   : > { %3241 = vmatmul.msk.f32.gmra.mxu0 %vm672_vm0, %v658_v22  ;;  %v3928_v22 = vperm.slane %v2188_v9, 0 }
  0xb6   : > { %3242 = vmatmul.msk.f32.gmra.mxu0 %vm672_vm0, %v659_v23  ;;  %v3930_v23 = vperm.slane %v2188_v9, 1 }
  0xbb   : > { %v738_v25 = vpop.f32.mrf.mxu0 }
  0xbc   : > { %v739_v26 = vadd.f32 %v3846_v24, %v738_v25 }
  0xbe   : > { %v786_v28 = vmax.f32 %v739_v26, 0.0 }
  0xc0   : > { %803 = vst.msk [vmem:[#allocation2 + $0x3] sm:$0xff] %vm802_vm1, %v786_v28  ;;  %v819_v30 = vperm.slane %v786_v28, 0  ;;  %v3934_v28 = vperm.slane %v863_v16, 0 }
  0xc2   : > { %828 = vst.msk [vmem:[#allocation2] sm:$0x7] %vm827_vm2, %v819_v30 }
  0xc3   : > { %v741_v33 = vpop.f32.mrf.mxu0 }
  0xc4   : > { %v742_v34 = vadd.f32 %v3846_v24, %v741_v33 }
  0xc6   : > { %v787_v37 = vmax.f32 %v742_v34, 0.0 }
  0xc7   : > { %v3890_v51 = vld [vmem:[#allocation2 + $0x3] sm:$0xff] }
  0xc8   : > { %804 = vst.msk [vmem:[#allocation2 + $0xb] sm:$0xff] %vm802_vm1, %v787_v37  ;;  %v836_v41 = vperm.slane %v787_v37, 7  ;;  %v1028_v59 = vmul.f32 %v3885_v48, %v3890_v51  ;;  %v3948_v37 = vperm.slane %v863_v16, 1 }
  0xc9   : > { %v864_v43 = vld [vmem:[#allocation2] sm:$0xff] }
  0xca   : > { %v913_v44 = vld [vmem:[#allocation2 + $0x1] sm:$0xff]  ;;  %845 = vst.msk [vmem:[#allocation2 + $0x13] sm:$0xf] %vm844_vm3, %v836_v41  ;;  %v881_v46 = vmul.f32 %v3870_v38, %v864_v43 }
  0xcb   : > { %v3880_v45 = vld [vmem:[#allocation2 + $0x2] sm:$0xff]  ;;  %v930_v47 = vmul.f32 %v3872_v39, %v913_v44  ;;  %v744_v50 = vpop.f32.mrf.mxu0 }
  0xcc   : > { %v745_v53 = vadd.f32 %v3846_v24, %v744_v50  ;;  %v979_v55 = vmul.f32 %v3878_v42, %v3880_v45  ;;  %v2458_v25 = vmax.f32 %v3880_v45, %v3890_v51  ;;  %v3952_v45 = vperm.slane %v863_v16, 4 }
  0xcd   : > { %v946_v54 = vadd.f32 %v930_v47, %v881_v46  ;;  %v3954_v46 = vperm.slane %v2188_v9, 3 }
  0xce   : > { %v788_v57 = vmax.f32 %v745_v53, 0.0 }
  0xcf   : > { %v995_v58 = vadd.f32 %v979_v55, %v946_v54  ;;  %v1060_v61 = vld [vmem:[#allocation2 + $0x4] sm:$0xff]  ;;  %v3963_v55 = vperm.slane %v863_v16, 5 }
  0xd0   : > { %v1109_v62 = vld [vmem:[#allocation2 + $0x5] sm:$0xff]  ;;  %805 = vst.msk [vmem:[#allocation2 + $0x1b] sm:$0xff] %vm802_vm1, %v788_v57  ;;  %v820_v0 = vperm.slane %v788_v57, 0  ;;  %v1077_v2 = vmul.f32 %v3898_v56, %v1060_v61  ;;  %v3944_v34 = vmax.f32 %v2458_v25, %v1060_v61  ;;  %v2223_v54 = vmul.f32 %v3930_v23, %v1060_v61 }
  0xd1   : > { %v1044_v1 = vadd.f32 %v1028_v59, %v995_v58  ;;  %v1158_v3 = vld [vmem:[#allocation2 + $0x6] sm:$0xff]  ;;  %v1126_v8 = vmul.f32 %v3902_v60, %v1109_v62  ;;  %v1159_v57 = vld [vmem:[#allocation2 + $0xe] sm:$0xff]  ;;  %v2190_v61 = vmul.f32 %v3928_v22, %v3890_v51 }
  0xd2   : > { %v865_v4 = vld [vmem:[#allocation2 + $0x8] sm:$0xff]  ;;  %829 = vst.msk [vmem:[#allocation2 + $0x18] sm:$0x7] %vm827_vm2, %v820_v0  ;;  %v1175_v13 = vmul.f32 %v3904_v63, %v1158_v3 }
  0xd3   : > { %v914_v5 = vld [vmem:[#allocation2 + $0x9] sm:$0xff]  ;;  %v1093_v7 = vadd.f32 %v1077_v2, %v1044_v1  ;;  %v882_v10 = vmul.f32 %v3870_v38, %v865_v4  ;;  %v747_v12 = vpop.f32.mrf.mxu0 }
  0xd4   : > { %v3908_v6 = vld [vmem:[#allocation2 + $0xa] sm:$0xff]  ;;  %v931_v11 = vmul.f32 %v3872_v39, %v914_v5  ;;  %v748_v15 = vadd.f32 %v3846_v24, %v747_v12 }
  0xd5   : > { %v1142_v17 = vadd.f32 %v1126_v8, %v1093_v7  ;;  %v980_v19 = vmul.f32 %v3878_v42, %v3908_v6  ;;  %v3926_v20 = vld [vmem:[#allocation2 + $0xb] sm:$0xff]  ;;  %v3970_v7 = vperm.slane %v863_v16, 6 }
  0xd6   : > { %v947_v18 = vadd.f32 %v931_v11, %v882_v10  ;;  %v1207_v21 = vld [vmem:[#allocation2 + $0x7] sm:$0xff]  ;;  %v789_v26 = vmax.f32 %v748_v15, 0.0  ;;  %v1029_v33 = vmul.f32 %v3885_v48, %v3926_v20  ;;  %v1176_v10 = vmul.f32 %v3904_v63, %v1159_v57 }
  0xd7   : > { %v1191_v27 = vadd.f32 %v1175_v13, %v1142_v17  ;;  %v3936_v30 = vld [vmem:[#allocation2 + $0xc] sm:$0xff]  ;;  %v1224_v36 = vmul.f32 %v3918_v14, %v1207_v21  ;;  %v3960_v53 = vld [vmem:[#allocation2 + $0x1b] sm:$0xff]  ;;  %v3980_v21 = vperm.slane %v863_v16, 7 }
  0xd8   : > { %v996_v29 = vadd.f32 %v980_v19, %v947_v18  ;;  %806 = vst.msk [vmem:[#allocation2 + $0x23] sm:$0xff] %vm802_vm1, %v789_v26  ;;  %v837_v35 = vperm.slane %v789_v26, 7  ;;  %v1110_v41 = vld [vmem:[#allocation2 + $0xd] sm:$0xff]  ;;  %v1078_v49 = vmul.f32 %v3898_v56, %v3936_v30  ;;  %v2256_v8 = vmul.f32 %v3940_v32, %v3960_v53 }
  0xd9   : > { %v1257_v43 = vld [vmem:[#allocation2 + $0x18] sm:$0xff]  ;;  %v1240_v50 = vadd.f32 %v1224_v36, %v1191_v27  ;;  %v1127_v0 = vmul.f32 %v3902_v60, %v1110_v41  ;;  %v2224_v15 = vmul.f32 %v3930_v23, %v3936_v30  ;;  %v1208_v17 = vld [vmem:[#allocation2 + $0xf] sm:$0xff]  ;;  %v2239_v19 = vadd.f32 %v2223_v54, %v2190_v61 }
  0xda   : > { %v1306_v44 = vld [vmem:[#allocation2 + $0x19] sm:$0xff]  ;;  %v1045_v47 = vadd.f32 %v1029_v33, %v996_v29  ;;  %846 = vst.msk [vmem:[#allocation2 + $0x2b] sm:$0xf] %vm844_vm3, %v837_v35  ;;  %v1274_v52 = vmul.f32 %v3934_v28, %v1257_v43  ;;  %v883_v1 = vmul.f32 %v1257_v43, %v3870_v38  ;;  %v1421_v29 = vmul.f32 %v3938_v31, %v3960_v53 }
  0xdb   : > { %v750_v58 = vpop.f32.mrf.mxu0  ;;  %v1355_v59 = vld [vmem:[#allocation2 + $0x1a] sm:$0xff]  ;;  %v932_v2 = vmul.f32 %v1306_v44, %v3872_v39  ;;  %v1323_v5 = vmul.f32 %v3948_v37, %v1306_v44  ;;  %v2191_v35 = vmul.f32 %v3928_v22, %v3926_v20  ;;  %v2272_v41 = vadd.f32 %v2256_v8, %v2239_v19 }
  0xdc   : > { %v1094_v62 = vadd.f32 %v1078_v49, %v1045_v47  ;;  %v751_v3 = vadd.f32 %v3846_v24, %v750_v58  ;;  %v1290_v4 = vadd.f32 %v1274_v52, %v1240_v50  ;;  %v1372_v13 = vmul.f32 %v3950_v40, %v1355_v59 }
  0xdd   : > { %v948_v51 = vadd.f32 %v932_v2, %v883_v1  ;;  %v1225_v44 = vmul.f32 %v3918_v14, %v1208_v17  ;;  %v981_v47 = vmul.f32 %v1355_v59, %v3878_v42  ;;  %v2240_v54 = vadd.f32 %v2224_v15, %v2191_v35 }
  0xde   : > { %v1143_v9 = vadd.f32 %v1127_v0, %v1094_v62  ;;  %v790_v11 = vmax.f32 %v751_v3, 0.0  ;;  %v1339_v12 = vadd.f32 %v1323_v5, %v1290_v4  ;;  %v2192_v15 = vmul.f32 %v3928_v22, %v3960_v53 }
  0xdf   : > { %v1453_v18 = vld [vmem:[#allocation2 + $0x1c] sm:$0xff]  ;;  %v997_v59 = vadd.f32 %v981_v47, %v948_v51 }
  0xe0   : > { %v1192_v25 = vadd.f32 %v1176_v10, %v1143_v9  ;;  %807 = vst.msk [vmem:[#allocation2 + $0x33] sm:$0xff] %vm802_vm1, %v790_v11  ;;  %v821_v26 = vperm.slane %v790_v11, 0  ;;  %v1388_v27 = vadd.f32 %v1372_v13, %v1339_v12  ;;  %v3985_v33 = vld [vmem:[#allocation2 + $0x23] sm:$0xff]  ;;  %v2289_v16 = vmul.f32 %v3954_v46, %v1453_v18 }
  0xe1   : > { %v3989_v36 = vld [vmem:[#allocation2 + $0x20] sm:$0xff]  ;;  %v1470_v50 = vmul.f32 %v3952_v45, %v1453_v18  ;;  %v2257_v57 = vmul.f32 %v3940_v32, %v3985_v33  ;;  %v1030_v9 = vmul.f32 %v3960_v53, %v3885_v48 }
  0xe2   : > { %v1502_v43 = vld [vmem:[#allocation2 + $0x1d] sm:$0xff]  ;;  %830 = vst.msk [vmem:[#allocation2 + $0x30] sm:$0x7] %vm827_vm2, %v821_v26  ;;  %v1437_v49 = vadd.f32 %v1421_v29, %v1388_v27  ;;  %v2305_v0 = vadd.f32 %v2289_v16, %v2272_v41  ;;  %v1241_v2 = vadd.f32 %v1225_v44, %v1192_v25  ;;  %v1275_v3 = vmul.f32 %v3934_v28, %v3989_v36  ;;  %v4014_v29 = vld [vmem:[#allocation2 + $0x25] sm:$0xff] }
  0xe3   : > { %v1551_v52 = vld [vmem:[#allocation2 + $0x1e] sm:$0xff]  ;;  %v753_v62 = vpop.f32.mrf.mxu0  ;;  %v1519_v61 = vmul.f32 %v3963_v55, %v1502_v43  ;;  %v2273_v25 = vadd.f32 %v2257_v57, %v2240_v54  ;;  %v1046_v35 = vadd.f32 %v1030_v9, %v997_v59  ;;  %v1079_v41 = vmul.f32 %v1453_v18, %v3898_v56 }
  0xe4   : > { %v1307_v58 = vld [vmem:[#allocation2 + $0x21] sm:$0xff]  ;;  %v754_v4 = vadd.f32 %v3846_v24, %v753_v62  ;;  %v1486_v5 = vadd.f32 %v1470_v50, %v1437_v49  ;;  %3275 = vmatmul.msk.f32.vlgmr.msra.gmra.mxu3 %vm802_vm1, %v2305_v0  ;;  %v1568_v10 = vmul.f32 %v3970_v7, %v1551_v52  ;;  %v1291_v12 = vadd.f32 %v1275_v3, %v1241_v2 }
  0xe5   : > { %v3998_v1 = vld [vmem:[#allocation2 + $0x24] sm:$0xff]  ;;  %v1324_v13 = vmul.f32 %v3948_v37, %v1307_v58  ;;  %v2225_v49 = vmul.f32 %v3930_v23, %v1453_v18  ;;  %v1422_v50 = vmul.f32 %v3938_v31, %v3985_v33  ;;  %v1095_v57 = vadd.f32 %v1079_v41, %v1046_v35 }
  0xe6   : > { %v1356_v8 = vld [vmem:[#allocation2 + $0x22] sm:$0xff]  ;;  %v791_v17 = vmax.f32 %v754_v4, 0.0  ;;  %v1535_v19 = vadd.f32 %v1519_v61, %v1486_v5  ;;  %v2290_v51 = vmul.f32 %v3954_v46, %v3998_v1  ;;  %v1128_v62 = vmul.f32 %v1502_v43, %v3902_v60 }
  0xe7   : > { %v1600_v11 = vld [vmem:[#allocation2 + $0x1f] sm:$0xff]  ;;  %v1340_v26 = vadd.f32 %v1324_v13, %v1291_v12  ;;  %v1373_v27 = vmul.f32 %v3950_v40, %v1356_v8  ;;  %v4019_v47 = vld [vmem:[#allocation2 + $0x33] sm:$0xff]  ;;  %v1471_v2 = vmul.f32 %v3952_v45, %v3998_v1  ;;  %v1520_v59 = vmul.f32 %v3963_v55, %v4014_v29  ;;  %v4046_v35 = vld [vmem:[#allocation2 + $0x27] sm:$0xff] }
  0xe8   : > { %808 = vst.msk [vmem:[#allocation2 + $0x3b] sm:$0xff] %vm802_vm1, %v791_v17  ;;  %v838_v16 = vperm.slane %v791_v17, 7  ;;  %v1584_v44 = vadd.f32 %v1568_v10, %v1535_v19  ;;  %v1617_v53 = vmul.f32 %v3980_v21, %v1600_v11  ;;  %v2306_v3 = vadd.f32 %v2290_v51, %v2273_v25  ;;  %v4037_v12 = vld [vmem:[#allocation2 + $0x26] sm:$0xff] }
  0xe9   : > { %v1389_v54 = vadd.f32 %v1373_v27, %v1340_v26  ;;  %v4030_v4 = vld [vmem:[#allocation2 + $0x30] sm:$0xff]  ;;  %v1144_v61 = vadd.f32 %v1128_v62, %v1095_v57  ;;  %v2258_v9 = vmul.f32 %v3940_v32, %v4019_v47  ;;  %v1177_v43 = vmul.f32 %v1551_v52, %v3904_v63 }
  0xea   : > { %847 = vst.msk [vmem:[#allocation2 + $0x43] sm:$0xf] %vm844_vm3, %v838_v16  ;;  %v1633_v0 = vadd.f32 %v1617_v53, %v1584_v44  ;;  %v2241_v13 = vadd.f32 %v2225_v49, %v2192_v15  ;;  %v884_v17 = vmul.f32 %v3989_v36, %v3870_v38  ;;  %v933_v19 = vmul.f32 %v1307_v58, %v3872_v39  ;;  %v1308_v41 = vld [vmem:[#allocation2 + $0x31] sm:$0xff] }
  0xeb   : > { %v756_v18 = vpop.f32.mrf.mxu0  ;;  %v1438_v5 = vadd.f32 %v1422_v50, %v1389_v54  ;;  %v1193_v51 = vadd.f32 %v1177_v43, %v1144_v61  ;;  %v1226_v26 = vmul.f32 %v1600_v11, %v3918_v14  ;;  %v1276_v52 = vmul.f32 %v3934_v28, %v4030_v4  ;;  %v1357_v50 = vld [vmem:[#allocation2 + $0x32] sm:$0xff] }
  0xec   : > { %v757_v10 = vadd.f32 %v3846_v24, %v756_v18  ;;  %3243 = vmatmul.msk.f32.vlgmr.msrb.gmra.mxu0 %vm802_vm1, %v1633_v0  ;;  %3276 = vmatmul.msk.f32.gmra.mxu3 %vm802_vm1, %v2306_v3  ;;  %v949_v16 = vadd.f32 %v933_v19, %v884_v17  ;;  %v1569_v36 = vmul.f32 %v3970_v7, %v4037_v12 }
  0xed   : > { %v1487_v25 = vadd.f32 %v1471_v2, %v1438_v5  ;;  %v2274_v58 = vadd.f32 %v2258_v9, %v2241_v13  ;;  %v1242_v53 = vadd.f32 %v1226_v26, %v1193_v51  ;;  %v982_v54 = vmul.f32 %v1356_v8, %v3878_v42 }
  0xee   : > { %v792_v27 = vmax.f32 %v757_v10, 0.0  ;;  %v2226_v62 = vmul.f32 %v3930_v23, %v3998_v1  ;;  %v1618_v2 = vmul.f32 %v3980_v21, %v4046_v35  ;;  %v1031_v61 = vmul.f32 %v3985_v33, %v3885_v48 }
  0xef   : > { %v1536_v15 = vadd.f32 %v1520_v59, %v1487_v25  ;;  %v4050_v44 = vld [vmem:[#allocation2 + $0x34] sm:$0xff]  ;;  %v1292_v3 = vadd.f32 %v1276_v52, %v1242_v53  ;;  %v1325_v59 = vmul.f32 %v3948_v37, %v1308_v41  ;;  %v998_v5 = vadd.f32 %v982_v54, %v949_v16 }
  0xf0   : > { %809 = vst.msk [vmem:[#allocation2 + $0x4b] sm:$0xff] %vm802_vm1, %v792_v27  ;;  %v822_v49 = vperm.slane %v792_v27, 0  ;;  %v2291_v11 = vmul.f32 %v3954_v46, %v4050_v44  ;;  %v4056_v57 = vld [vmem:[#allocation2 + $0x3b] sm:$0xff]  ;;  %v2193_v8 = vmul.f32 %v3928_v22, %v3985_v33  ;;  %v1374_v13 = vmul.f32 %v3950_v40, %v1357_v50 }
  0xf1   : > { %v1585_v0 = vadd.f32 %v1569_v36, %v1536_v15  ;;  %v1341_v10 = vadd.f32 %v1325_v59, %v1292_v3  ;;  %v4069_v17 = vld [vmem:[#allocation2 + $0x3c] sm:$0xff]  ;;  %v2259_v19 = vmul.f32 %v3940_v32, %v4056_v57  ;;  %v1047_v52 = vadd.f32 %v1031_v61, %v998_v5 }
  0xf2   : > { %831 = vst.msk [vmem:[#allocation2 + $0x48] sm:$0x7] %vm827_vm2, %v822_v49  ;;  %v2307_v18 = vadd.f32 %v2291_v11, %v2274_v58  ;;  %v4074_v51 = vld [vmem:[#allocation2 + $0x35] sm:$0xff]  ;;  %v1080_v33 = vmul.f32 %v3998_v1, %v3898_v56  ;;  %v2242_v27 = vadd.f32 %v2226_v62, %v2193_v8  ;;  %v1423_v16 = vmul.f32 %v3938_v31, %v4019_v47 }
  0xf3   : > { %v759_v9 = vpop.f32.mrf.mxu0  ;;  %v1634_v43 = vadd.f32 %v1618_v2, %v1585_v0  ;;  %v4076_v26 = vld [vmem:[#allocation2 + $0x36] sm:$0xff]  ;;  %v1390_v15 = vadd.f32 %v1374_v13, %v1341_v10  ;;  %v1129_v58 = vmul.f32 %v4014_v29, %v3902_v60  ;;  %v2292_v1 = vmul.f32 %v3954_v46, %v4069_v17 }
  0xf4   : > { %v760_v25 = vadd.f32 %v3846_v24, %v759_v9  ;;  %3277 = vmatmul.msk.f32.gmra.mxu3 %vm802_vm1, %v2307_v18  ;;  %v4084_v36 = vld [vmem:[#allocation2 + $0x37] sm:$0xff]  ;;  %v1096_v49 = vadd.f32 %v1080_v33, %v1047_v52  ;;  %v2275_v11 = vadd.f32 %v2259_v19, %v2242_v27  ;;  %v1472_v54 = vmul.f32 %v3952_v45, %v4050_v44 }
  0xf5   : > { %3244 = vmatmul.msk.f32.gmra.mxu0 %vm802_vm1, %v1634_v43  ;;  %v1439_v62 = vadd.f32 %v1423_v16, %v1390_v15  ;;  %v1521_v0 = vmul.f32 %v3963_v55, %v4074_v51  ;;  %v1570_v2 = vmul.f32 %v3970_v7, %v4076_v26  ;;  %v1260_v3 = vld [vmem:[#allocation2 + $0x38] sm:$0xff]  ;;  %v1619_v59 = vmul.f32 %v3980_v21, %v4084_v36 }
  0xf6   : > { %v793_v53 = vmax.f32 %v760_v25, 0.0  ;;  %v1145_v18 = vadd.f32 %v1129_v58, %v1096_v49  ;;  %v1178_v5 = vmul.f32 %v4037_v12, %v3904_v63  ;;  %v1424_v8 = vmul.f32 %v3938_v31, %v4056_v57  ;;  %v1309_v27 = vld [vmem:[#allocation2 + $0x39] sm:$0xff] }
  0xf7   : > { %v1488_v61 = vadd.f32 %v1472_v54, %v1439_v62  ;;  %v885_v9 = vmul.f32 %v4030_v4, %v3870_v38  ;;  %v934_v43 = vmul.f32 %v1308_v41, %v3872_v39  ;;  %v2308_v10 = vadd.f32 %v2292_v1, %v2275_v11  ;;  %v4110_v52 = vld [vmem:[#allocation2 + $0x4b] sm:$0xff]  ;;  %v4121_v1 = vld [vmem:[#allocation2 + $0x3d] sm:$0xff] }
  0xf8   : > { %810 = vst.msk [vmem:[#allocation2 + $0x53] sm:$0xff] %vm802_vm1, %v793_v53  ;;  %v839_v29 = vperm.slane %v793_v53, 7  ;;  %v1194_v13 = vadd.f32 %v1178_v5, %v1145_v18  ;;  %v1227_v19 = vmul.f32 %v4046_v35, %v3918_v14  ;;  %v1277_v25 = vmul.f32 %v3934_v28, %v1260_v3  ;;  %v1358_v53 = vld [vmem:[#allocation2 + $0x3a] sm:$0xff] }
  0xf9   : > { %v1537_v33 = vadd.f32 %v1521_v0, %v1488_v61  ;;  %v950_v16 = vadd.f32 %v934_v43, %v885_v9  ;;  %v983_v15 = vmul.f32 %v1357_v50, %v3878_v42  ;;  %v1032_v4 = vmul.f32 %v4019_v47, %v3885_v48  ;;  %v4123_v54 = vld [vmem:[#allocation2 + $0x3e] sm:$0xff] }
  0xfa   : > { %848 = vst.msk [vmem:[#allocation2 + $0x5b] sm:$0xf] %vm844_vm3, %v839_v29  ;;  %v1243_v58 = vadd.f32 %v1227_v19, %v1194_v13  ;;  %v1081_v35 = vmul.f32 %v4050_v44, %v3898_v56  ;;  %v2227_v49 = vmul.f32 %v3930_v23, %v4050_v44  ;;  %v2194_v62 = vmul.f32 %v3928_v22, %v4019_v47  ;;  %v4133_v9 = vld [vmem:[#allocation2 + $0x3f] sm:$0xff] }
  0xfb   : > { %v762_v12 = vpop.f32.mrf.mxu0  ;;  %v1586_v11 = vadd.f32 %v1570_v2, %v1537_v33  ;;  %v999_v50 = vadd.f32 %v983_v15, %v950_v16  ;;  %v2260_v0 = vmul.f32 %v3940_v32, %v4110_v52  ;;  %v1473_v18 = vmul.f32 %v3952_v45, %v4069_v17 }
  0xfc   : > { %v763_v41 = vadd.f32 %v3846_v24, %v762_v12  ;;  %3278 = vmatmul.msk.f32.gmra.mxu3 %vm802_vm1, %v2308_v10  ;;  %v1293_v5 = vadd.f32 %v1277_v25, %v1243_v58  ;;  %v1326_v44 = vmul.f32 %v3948_v37, %v1309_v27  ;;  %v1375_v61 = vmul.f32 %v3950_v40, %v1358_v53  ;;  %v1261_v58 = vld [vmem:[#allocation2 + $0x48] sm:$0xff] }
  0xfd   : > { %v1635_v2 = vadd.f32 %v1619_v59, %v1586_v11  ;;  %v1048_v43 = vadd.f32 %v1032_v4, %v999_v50  ;;  %v2243_v13 = vadd.f32 %v2227_v49, %v2194_v62  ;;  %v1522_v12 = vmul.f32 %v3963_v55, %v4121_v1  ;;  %v1310_v49 = vld [vmem:[#allocation2 + $0x49] sm:$0xff] }
  0xfe   : > { %v794_v29 = vmax.f32 %v763_v41, 0.0  ;;  %v1342_v19 = vadd.f32 %v1326_v44, %v1293_v5  ;;  %v1571_v25 = vmul.f32 %v3970_v7, %v4123_v54  ;;  %v1130_v33 = vmul.f32 %v4074_v51, %v3902_v60 }
  0xff   : > { %v4135_v10 = vld [vmem:[#allocation2 + $0x4c] sm:$0xff]  ;;  %3245 = vmatmul.msk.f32.gmra.mxu0 %vm802_vm1, %v1635_v2  ;;  %v1097_v59 = vadd.f32 %v1081_v35, %v1048_v43  ;;  %v2276_v16 = vadd.f32 %v2260_v0, %v2243_v13  ;;  %v1620_v41 = vmul.f32 %v3980_v21, %v4133_v9  ;;  %v886_v11 = vmul.f32 %v1260_v3, %v3870_v38 }
 0x100   : > { %811 = vst.msk [vmem:[#allocation2 + $0x63] sm:$0xff] %vm802_vm1, %v794_v29  ;;  %v823_v47 = vperm.slane %v794_v29, 0  ;;  %v2293_v15 = vmul.f32 %v3954_v46, %v4135_v10  ;;  %v1391_v4 = vadd.f32 %v1375_v61, %v1342_v19  ;;  %v935_v50 = vmul.f32 %v1309_v27, %v3872_v39  ;;  %v4158_v43 = vld [vmem:[#allocation2 + $0x53] sm:$0xff] }
 0x101   : > { %v1146_v62 = vadd.f32 %v1130_v33, %v1097_v59  ;;  %v1425_v51 = vmul.f32 %v3938_v31, %v4110_v52  ;;  %v1179_v29 = vmul.f32 %v4076_v26, %v3904_v63  ;;  %v984_v61 = vmul.f32 %v1358_v53, %v3878_v42  ;;  %v1359_v59 = vld [vmem:[#allocation2 + $0x4a] sm:$0xff]  ;;  %v4167_v53 = vld [vmem:[#allocation2 + $0x54] sm:$0xff] }
 0x102   : > { %832 = vst.msk [vmem:[#allocation2 + $0x60] sm:$0x7] %vm827_vm2, %v823_v47  ;;  %v2309_v0 = vadd.f32 %v2293_v15, %v2276_v16  ;;  %v1440_v44 = vadd.f32 %v1424_v8, %v1391_v4  ;;  %v951_v2 = vadd.f32 %v935_v50, %v886_v11  ;;  %v1228_v27 = vmul.f32 %v4084_v36, %v3918_v14  ;;  %v4176_v50 = vld [vmem:[#allocation2 + $0x4d] sm:$0xff] }
 0x103   : > { %v765_v35 = vpop.f32.mrf.mxu0  ;;  %v1195_v3 = vadd.f32 %v1179_v29, %v1146_v62  ;;  %v1278_v13 = vmul.f32 %v3934_v28, %v1261_v58  ;;  %v1327_v47 = vmul.f32 %v3948_v37, %v1310_v49  ;;  %v1033_v8 = vmul.f32 %v4056_v57, %v3885_v48 }
 0x104   : > { %v766_v5 = vadd.f32 %v3846_v24, %v765_v35  ;;  %3279 = vmatmul.msk.f32.gmra.mxu3 %vm802_vm1, %v2309_v0  ;;  %v1489_v26 = vadd.f32 %v1473_v18, %v1440_v44  ;;  %v1000_v33 = vadd.f32 %v984_v61, %v951_v2  ;;  %v2195_v15 = vmul.f32 %v3928_v22, %v4056_v57  ;;  %v4178_v35 = vld [vmem:[#allocation2 + $0x4e] sm:$0xff] }
 0x105   : > { %v1244_v16 = vadd.f32 %v1228_v27, %v1195_v3  ;;  %v2228_v36 = vmul.f32 %v3930_v23, %v4069_v17  ;;  %v2261_v4 = vmul.f32 %v3940_v32, %v4158_v43  ;;  %v1082_v0 = vmul.f32 %v4069_v17, %v3898_v56 }
 0x106   : > { %v795_v19 = vmax.f32 %v766_v5, 0.0  ;;  %v1538_v11 = vadd.f32 %v1522_v12, %v1489_v26  ;;  %v1049_v62 = vadd.f32 %v1033_v8, %v1000_v33  ;;  %v1376_v57 = vmul.f32 %v3950_v40, %v1359_v59  ;;  %v4194_v33 = vld [vmem:[#allocation2 + $0x50] sm:$0xff] }
 0x107   : > { %v1294_v29 = vadd.f32 %v1278_v13, %v1244_v16  ;;  %v2244_v5 = vadd.f32 %v2228_v36, %v2195_v15  ;;  %v2294_v44 = vmul.f32 %v3954_v46, %v4167_v53  ;;  %v1474_v12 = vmul.f32 %v3952_v45, %v4135_v10  ;;  %v4197_v16 = vld [vmem:[#allocation2 + $0x4f] sm:$0xff] }
 0x108   : > { %812 = vst.msk [vmem:[#allocation2 + $0x6b] sm:$0xff] %vm802_vm1, %v795_v19  ;;  %v840_v18 = vperm.slane %v795_v19, 7  ;;  %v1587_v2 = vadd.f32 %v1571_v25, %v1538_v11  ;;  %v1098_v61 = vadd.f32 %v1082_v0, %v1049_v62  ;;  %v1131_v3 = vmul.f32 %v4121_v1, %v3902_v60 }
 0x109   : > { %v1343_v19 = vadd.f32 %v1327_v47, %v1294_v29  ;;  %v1523_v17 = vmul.f32 %v3963_v55, %v4176_v50  ;;  %v1572_v13 = vmul.f32 %v3970_v7, %v4178_v35  ;;  %v2277_v26 = vadd.f32 %v2261_v4, %v2244_v5  ;;  %v2493_v4 = vld [vmem:[%s5512_s12 + $0x18] sm:$0xff] }
 0x10a   : > { %849 = vst.msk [vmem:[#allocation2 + $0x73] sm:$0xf] %vm844_vm3, %v840_v18  ;;  %v1636_v8 = vadd.f32 %v1620_v41, %v1587_v2  ;;  %v1147_v15 = vadd.f32 %v1131_v3, %v1098_v61  ;;  %v1180_v1 = vmul.f32 %v4123_v54, %v3904_v63  ;;  %v887_v18 = vmul.f32 %v1261_v58, %v3870_v38 }
 0x10b   : > { %v768_v27 = vpop.f32.mrf.mxu0  ;;  %v1392_v36 = vadd.f32 %v1376_v57, %v1343_v19  ;;  %v2310_v47 = vadd.f32 %v2294_v44, %v2277_v26  ;;  %v936_v11 = vmul.f32 %v1310_v49, %v3872_v39  ;;  %v1229_v0 = vmul.f32 %v4133_v9, %v3918_v14  ;;  %2558 = vmatpush.msrb.mxu1 %v2493_v4  ;;  %v1311_v49 = vld [vmem:[#allocation2 + $0x51] sm:$0xff]  ;;  %v4215_v44 = vld [vmem:[#allocation2 + $0x63] sm:$0xff] }
 0x10c   : > { %v769_v25 = vadd.f32 %v3846_v24, %v768_v27  ;;  %3246 = vmatmul.msk.f32.gmra.mxu0 %vm802_vm1, %v1636_v8  ;;  %v1196_v62 = vadd.f32 %v1180_v1, %v1147_v15  ;;  %v1279_v54 = vmul.f32 %v3934_v28, %v4194_v33  ;;  %v1621_v58 = vmul.f32 %v3980_v21, %v4197_v16  ;;  %v1360_v19 = vld [vmem:[#allocation2 + $0x52] sm:$0xff] }
 0x10d   : > { %v1441_v29 = vadd.f32 %v1425_v51, %v1392_v36  ;;  %3280 = vmatmul.msk.f32.gmra.mxu3 %vm802_vm1, %v2310_v47  ;;  %v952_v57 = vadd.f32 %v936_v11, %v887_v18  ;;  %v985_v5 = vmul.f32 %v1359_v59, %v3878_v42  ;;  %v1034_v61 = vmul.f32 %v4110_v52, %v3885_v48  ;;  %v4234_v47 = vld [vmem:[#allocation2 + $0x55] sm:$0xff] }
 0x10e   : > { %v796_v41 = vmax.f32 %v769_v25, 0.0  ;;  %v1245_v9 = vadd.f32 %v1229_v0, %v1196_v62  ;;  %v1083_v51 = vmul.f32 %v4135_v10, %v3898_v56  ;;  %v2196_v59 = vmul.f32 %v3928_v22, %v4110_v52  ;;  %v4236_v18 = vld [vmem:[#allocation2 + $0x56] sm:$0xff] }
 0x10f   : > { %v4222_v3 = vld [vmem:[#allocation2 + $0x64] sm:$0xff]  ;;  %v1490_v27 = vadd.f32 %v1474_v12, %v1441_v29  ;;  %v1001_v26 = vadd.f32 %v985_v5, %v952_v57  ;;  %v2229_v8 = vmul.f32 %v3930_v23, %v4135_v10  ;;  %v1426_v25 = vmul.f32 %v3938_v31, %v4158_v43 }
 0x110   : > { %813 = vst.msk [vmem:[#allocation2 + $0x7b] sm:$0xff] %vm802_vm1, %v796_v41  ;;  %v824_v2 = vperm.slane %v796_v41, 0  ;;  %v1295_v15 = vadd.f32 %v1279_v54, %v1245_v9  ;;  %v1328_v1 = vmul.f32 %v3948_v37, %v1311_v49  ;;  %v2262_v36 = vmul.f32 %v3940_v32, %v4215_v44 }
 0x111   : > { %v1539_v12 = vadd.f32 %v1523_v17, %v1490_v27  ;;  %v1050_v11 = vadd.f32 %v1034_v61, %v1001_v26  ;;  %v2245_v4 = vadd.f32 %v2229_v8, %v2196_v59  ;;  %v2295_v10 = vmul.f32 %v3954_v46, %v4222_v3  ;;  %v4250_v26 = vld [vmem:[#allocation2 + $0x60] sm:$0xff]  ;;  %v4252_v8 = vld [vmem:[#allocation2 + $0x57] sm:$0xff] }
 0x112   : > { %833 = vst.msk [vmem:[#allocation2 + $0x78] sm:$0x7] %vm827_vm2, %v824_v2  ;;  %v1475_v41 = vmul.f32 %v3952_v45, %v4167_v53  ;;  %v1344_v62 = vadd.f32 %v1328_v1, %v1295_v15  ;;  %v1377_v0 = vmul.f32 %v3950_v40, %v1360_v19  ;;  %v1132_v57 = vmul.f32 %v4176_v50, %v3902_v60 }
 0x113   : > { %v771_v52 = vpop.f32.mrf.mxu0  ;;  %v1588_v29 = vadd.f32 %v1572_v13, %v1539_v12  ;;  %v1099_v17 = vadd.f32 %v1083_v51, %v1050_v11  ;;  %v2278_v5 = vadd.f32 %v2262_v36, %v2245_v4  ;;  %v1524_v9 = vmul.f32 %v3963_v55, %v4234_v47  ;;  %v1312_v36 = vld [vmem:[#allocation2 + $0x61] sm:$0xff] }
 0x114   : > { %v772_v54 = vadd.f32 %v3846_v24, %v771_v52  ;;  %v1393_v2 = vadd.f32 %v1377_v0, %v1344_v62  ;;  %v1573_v61 = vmul.f32 %v3970_v7, %v4236_v18  ;;  %v1181_v51 = vmul.f32 %v4178_v35, %v3904_v63  ;;  %v4272_v62 = vld [vmem:[#allocation2 + $0x6c] sm:$0xff] }
 0x115   : > { %v1637_v59 = vadd.f32 %v1621_v58, %v1588_v29  ;;  %v1148_v15 = vadd.f32 %v1132_v57, %v1099_v17  ;;  %v2311_v13 = vadd.f32 %v2295_v10, %v2278_v5  ;;  %v888_v12 = vmul.f32 %v4194_v33, %v3870_v38  ;;  %v4270_v10 = vld [vmem:[#allocation2 + $0x6b] sm:$0xff]  ;;  %v1361_v5 = vld [vmem:[#allocation2 + $0x62] sm:$0xff] }
 0x116   : > { %v797_v27 = vmax.f32 %v772_v54, 0.0  ;;  %v1442_v50 = vadd.f32 %v1426_v25, %v1393_v2  ;;  %v937_v52 = vmul.f32 %v1311_v49, %v3872_v39  ;;  %v1230_v11 = vmul.f32 %v4197_v16, %v3918_v14 }
 0x117   : > { %3247 = vmatmul.msk.f32.gmra.mxu0 %vm802_vm1, %v1637_v59  ;;  %3281 = vmatmul.msk.f32.gmra.mxu3 %vm802_vm1, %v2311_v13  ;;  %v1197_v58 = vadd.f32 %v1181_v51, %v1148_v15  ;;  %v1280_v35 = vmul.f32 %v3934_v28, %v4250_v26  ;;  %v1622_v4 = vmul.f32 %v3980_v21, %v4252_v8 }
 0x118   : > { %814 = vst.msk [vmem:[#allocation2 + $0x83] sm:$0xff] %vm802_vm1, %v797_v27  ;;  %v841_v1 = vperm.slane %v797_v27, 7  ;;  %v1491_v25 = vadd.f32 %v1475_v41, %v1442_v50  ;;  %v953_v33 = vadd.f32 %v937_v52, %v888_v12  ;;  %v986_v49 = vmul.f32 %v1360_v19, %v3878_v42 }
 0x119   : > { %v1246_v54 = vadd.f32 %v1230_v11, %v1197_v58  ;;  %v1329_v16 = vmul.f32 %v3948_v37, %v1312_v36  ;;  %v1035_v29 = vmul.f32 %v4158_v43, %v3885_v48  ;;  %v2197_v41 = vmul.f32 %v3928_v22, %v4158_v43 }
 0x11a   : > { %850 = vst.msk [vmem:[#allocation2 + $0x8b] sm:$0xf] %vm844_vm3, %v841_v1  ;;  %v1540_v17 = vadd.f32 %v1524_v9, %v1491_v25  ;;  %v1002_v2 = vadd.f32 %v986_v49, %v953_v33  ;;  %v2230_v19 = vmul.f32 %v3930_v23, %v4167_v53  ;;  %v1084_v59 = vmul.f32 %v4167_v53, %v3898_v56  ;;  %v4288_v9 = vld [vmem:[#allocation2 + $0x65] sm:$0xff] }
 0x11b   : > { %v774_v0 = vpop.f32.mrf.mxu0  ;;  %v1296_v27 = vadd.f32 %v1280_v35, %v1246_v54  ;;  %v2263_v15 = vmul.f32 %v3940_v32, %v4270_v10  ;;  %v2296_v13 = vmul.f32 %v3954_v46, %v4272_v62  ;;  %v1378_v52 = vmul.f32 %v3950_v40, %v1361_v5  ;;  %v4294_v35 = vld [vmem:[#allocation2 + $0x66] sm:$0xff] }
 0x11c   : > { %v775_v57 = vadd.f32 %v3846_v24, %v774_v0  ;;  %v1589_v51 = vadd.f32 %v1573_v61, %v1540_v17  ;;  %v1051_v50 = vadd.f32 %v1035_v29, %v1002_v2  ;;  %v2246_v1 = vadd.f32 %v2230_v19, %v2197_v41 }
 0x11d   : > { %v1345_v12 = vadd.f32 %v1329_v16, %v1296_v27  ;;  %v1133_v58 = vmul.f32 %v4234_v47, %v3902_v60  ;;  %v1427_v61 = vmul.f32 %v3938_v31, %v4215_v44  ;;  %v1476_v49 = vmul.f32 %v3952_v45, %v4222_v3  ;;  %v4302_v16 = vld [vmem:[#allocation2 + $0x68] sm:$0xff]  ;;  %v2492_v27 = vld [vmem:[%s5512_s12 + $0x10] sm:$0xff] }
 0x11e   : > { %v798_v43 = vmax.f32 %v775_v57, 0.0  ;;  %v1638_v11 = vadd.f32 %v1622_v4, %v1589_v51  ;;  %v1100_v25 = vadd.f32 %v1084_v59, %v1051_v50  ;;  %v2279_v33 = vadd.f32 %v2263_v15, %v2246_v1  ;;  %v4322_v51 = vld [vmem:[#allocation2 + $0x7b] sm:$0xff]  ;;  %2559 = vmatpush.msrb.mxu1 %v2492_v27 }
 0x11f   : > { %v1394_v0 = vadd.f32 %v1378_v52, %v1345_v12  ;;  %v1525_v54 = vmul.f32 %v3963_v55, %v4288_v9  ;;  %v1182_v29 = vmul.f32 %v4236_v18, %v3904_v63  ;;  %v1574_v17 = vmul.f32 %v3970_v7, %v4294_v35 }
 0x120   : > { %815 = vst.msk [vmem:[#allocation2 + $0x93] sm:$0xff] %vm802_vm1, %v798_v43  ;;  %v825_v53 = vperm.slane %v798_v43, 0  ;;  %3248 = vmatmul.msk.f32.vlgmr.msra.gmra.mxu1 %vm802_vm1, %v1638_v11  ;;  %v1149_v47 = vadd.f32 %v1133_v58, %v1100_v25  ;;  %v2312_v4 = vadd.f32 %v2296_v13, %v2279_v33  ;;  %v889_v2 = vmul.f32 %v4250_v26, %v3870_v38  ;;  %v1606_v43 = vld [vmem:[#allocation2 + $0x67] sm:$0xff]  ;;  %v4329_v58 = vld [vmem:[#allocation2 + $0x7c] sm:$0xff] }
 0x121   : > { %v1443_v41 = vadd.f32 %v1427_v61, %v1394_v0  ;;  %v938_v19 = vmul.f32 %v1312_v36, %v3872_v39  ;;  %v1231_v18 = vmul.f32 %v4252_v8, %v3918_v14  ;;  %v1281_v13 = vmul.f32 %v3934_v28, %v4302_v16  ;;  %v1313_v36 = vld [vmem:[#allocation2 + $0x69] sm:$0xff] }
 0x122   : > { %834 = vst.msk [vmem:[#allocation2 + $0x90] sm:$0x7] %vm827_vm2, %v825_v53  ;;  %3282 = vmatmul.msk.f32.gmra.mxu3 %vm802_vm1, %v2312_v4  ;;  %v1198_v15 = vadd.f32 %v1182_v29, %v1149_v47  ;;  %v987_v1 = vmul.f32 %v1361_v5, %v3878_v42  ;;  %v1036_v12 = vmul.f32 %v4215_v44, %v3885_v48  ;;  %v1362_v25 = vld [vmem:[#allocation2 + $0x6a] sm:$0xff] }
 0x123   : > { %v777_v57 = vpop.f32.mrf.mxu0  ;;  %v1492_v26 = vadd.f32 %v1476_v49, %v1443_v41  ;;  %v954_v50 = vadd.f32 %v938_v19, %v889_v2  ;;  %v1085_v8 = vmul.f32 %v4222_v3, %v3898_v56  ;;  %v2198_v11 = vmul.f32 %v3928_v22, %v4215_v44 }
 0x124   : > { %v778_v59 = vadd.f32 %v3846_v24, %v777_v57  ;;  %v1247_v52 = vadd.f32 %v1231_v18, %v1198_v15  ;;  %v2231_v5 = vmul.f32 %v3930_v23, %v4222_v3  ;;  %v2264_v61 = vmul.f32 %v3940_v32, %v4322_v51 }
 0x125   : > { %v1541_v53 = vadd.f32 %v1525_v54, %v1492_v26  ;;  %v1003_v33 = vadd.f32 %v987_v1, %v954_v50  ;;  %v1623_v49 = vmul.f32 %v3980_v21, %v1606_v43  ;;  %v1330_v4 = vmul.f32 %v3948_v37, %v1313_v36  ;;  %v3406_v1 = vld [vmem:[#allocation3] ss:$0 sm:$0xff] }
 0x126   : > { %v799_v24 = vmax.f32 %v778_v59, 0.0  ;;  %v1297_v47 = vadd.f32 %v1281_v13, %v1247_v52  ;;  %v2247_v44 = vadd.f32 %v2231_v5, %v2198_v11  ;;  %v2297_v54 = vmul.f32 %v3954_v46, %v4329_v58  ;;  %v1509_v59 = vld [vmem:[#allocation2 + $0x6d] sm:$0xff]  ;;  %v4354_v52 = vld [vmem:[#allocation2 + $0x78] sm:$0xff] }
 0x127   : > { %v1590_v29 = vadd.f32 %v1574_v17, %v1541_v53  ;;  %v1052_v41 = vadd.f32 %v1036_v12, %v1003_v33  ;;  %v1428_v3 = vmul.f32 %v3938_v31, %v4270_v10  ;;  %v1379_v2 = vmul.f32 %v3950_v40, %v1362_v25  ;;  %v1558_v11 = vld [vmem:[#allocation2 + $0x6e] sm:$0xff] }
 0x128   : > { %816 = vst.msk [vmem:[#allocation2 + $0x9b] sm:$0xff] %vm802_vm1, %v799_v24  ;;  %v842_v0 = vperm.slane %v799_v24, 7  ;;  %v1346_v57 = vadd.f32 %v1330_v4, %v1297_v47  ;;  %v2459_v19 = vmax.f32 %v3908_v6, %v3926_v20  ;;  %v1134_v17 = vmul.f32 %v4288_v9, %v3902_v60  ;;  %v2491_v5 = vld [vmem:[%s5512_s12 + $0x8] sm:$0xff] }
 0x129   : > { %v1639_v27 = vadd.f32 %v1623_v49, %v1590_v29  ;;  %v1101_v15 = vadd.f32 %v1085_v8, %v1052_v41  ;;  %v2280_v18 = vadd.f32 %v2264_v61, %v2247_v44  ;;  %v1477_v26 = vmul.f32 %v3952_v45, %v4272_v62  ;;  %2560 = vmatpush.msrb.mxu1 %v2491_v5  ;;  %v4369_v41 = vld [vmem:[#allocation2 + $0x83] sm:$0xff] }
 0x12a   : > { %851 = vst.msk [vmem:[#allocation2 + $0xa3] sm:$0xf] %vm844_vm3, %v842_v0  ;;  %v1395_v50 = vadd.f32 %v1379_v2, %v1346_v57  ;;  %v1183_v24 = vmul.f32 %v4294_v35, %v3904_v63  ;;  %v890_v9 = vmul.f32 %v4302_v16, %v3870_v38  ;;  %v939_v33 = vmul.f32 %v1313_v36, %v3872_v39  ;;  %v1314_v16 = vld [vmem:[#allocation2 + $0x79] sm:$0xff]  ;;  %v4375_v57 = vld [vmem:[#allocation2 + $0x84] sm:$0xff]  ;;  %v1607_v2 = vld [vmem:[#allocation2 + $0x6f] sm:$0xff] }
 0x12b   : > { %v780_v13 = vpop.f32.mrf.mxu0  ;;  %3249 = vmatmul.msk.f32.gmra.mxu1 %vm802_vm1, %v1639_v27  ;;  %v1150_v8 = vadd.f32 %v1134_v17, %v1101_v15  ;;  %v2313_v53 = vadd.f32 %v2297_v54, %v2280_v18  ;;  %v1526_v49 = vmul.f32 %v3963_v55, %v1509_v59  ;;  %v1232_v0 = vmul.f32 %v1606_v43, %v3918_v14  ;;  %v1363_v15 = vld [vmem:[#allocation2 + $0x7a] sm:$0xff] }
 0x12c   : > { %v781_v12 = vadd.f32 %v3406_v1, %v780_v13  ;;  %v1444_v61 = vadd.f32 %v1428_v3, %v1395_v50  ;;  %v1282_v4 = vmul.f32 %v3934_v28, %v4354_v52  ;;  %v955_v29 = vadd.f32 %v939_v33, %v890_v9 }
 0x12d   : > { %3283 = vmatmul.msk.f32.gmra.mxu3 %vm802_vm1, %v2313_v53  ;;  %v1199_v47 = vadd.f32 %v1183_v24, %v1150_v8  ;;  %v988_v36 = vmul.f32 %v1362_v25, %v3878_v42  ;;  %v1575_v54 = vmul.f32 %v3970_v7, %v1558_v11  ;;  %v1037_v43 = vmul.f32 %v4270_v10, %v3885_v48 }
 0x12e   : > { %v800_v35 = vmax.f32 %v781_v12, 0.0  ;;  %v1493_v44 = vadd.f32 %v1477_v26, %v1444_v61  ;;  %v2199_v25 = vmul.f32 %v3928_v22, %v4270_v10  ;;  %v2232_v18 = vmul.f32 %v3930_v23, %v4272_v62 }
 0x12f   : > { %v1248_v27 = vadd.f32 %v1232_v0, %v1199_v47  ;;  %v1004_v17 = vadd.f32 %v988_v36, %v955_v29  ;;  %v1331_v26 = vmul.f32 %v3948_v37, %v1314_v16  ;;  %v1086_v50 = vmul.f32 %v4272_v62, %v3898_v56 }
 0x130   : > { %817 = vst.msk [vmem:[#allocation2 + $0xab] sm:$0xff] %vm802_vm1, %v800_v35  ;;  %v826_v3 = vperm.slane %v800_v35, 0  ;;  %v1542_v13 = vadd.f32 %v1526_v49, %v1493_v44  ;;  %v2265_v12 = vmul.f32 %v3940_v32, %v4369_v41  ;;  %v2248_v53 = vadd.f32 %v2232_v18, %v2199_v25  ;;  %v1266_v44 = vld [vmem:[#allocation2 + $0x80] sm:$0xff] }
 0x131   : > { %v1298_v24 = vadd.f32 %v1282_v4, %v1248_v27  ;;  %v1053_v8 = vadd.f32 %v1037_v43, %v1004_v17  ;;  %v2298_v10 = vmul.f32 %v3954_v46, %v4375_v57  ;;  %v1624_v5 = vmul.f32 %v3980_v21, %v1607_v2  ;;  %v1510_v43 = vld [vmem:[#allocation2 + $0x7d] sm:$0xff] }
 0x132   : > { %835 = vst.msk [vmem:[#allocation2 + $0xa8] sm:$0x7] %vm827_vm2, %v826_v3  ;;  %v1591_v33 = vadd.f32 %v1575_v54, %v1542_v13  ;;  %v1380_v61 = vmul.f32 %v3950_v40, %v1363_v15  ;;  %v1135_v62 = vmul.f32 %v1509_v59, %v3902_v60  ;;  %v2281_v47 = vadd.f32 %v2265_v12, %v2248_v53 }
 0x133   : > { %v783_v9 = vpop.f32.mrf.mxu0  ;;  %v1347_v35 = vadd.f32 %v1331_v26, %v1298_v24  ;;  %v1102_v0 = vadd.f32 %v1086_v50, %v1053_v8  ;;  %v1429_v4 = vmul.f32 %v3938_v31, %v4322_v51  ;;  %v4398_v54 = vmax.f32 %v2459_v19, %v3936_v30  ;;  %v4415_v50 = vld [vmem:[#allocation2 + $0x93] sm:$0xff]  ;;  %v1315_v24 = vld [vmem:[#allocation2 + $0x81] sm:$0xff] }
 0x134   : > { %v784_v49 = vadd.f32 %v3406_v1, %v783_v9  ;;  %v1640_v29 = vadd.f32 %v1624_v5, %v1591_v33  ;;  %v4400_v1 = vld [vmem:[#allocation2 + $0x7e] sm:$0xff]  ;;  %v2314_v17 = vadd.f32 %v2298_v10, %v2281_v47  ;;  %v1184_v59 = vmul.f32 %v1558_v11, %v3904_v63  ;;  %v4428_v5 = vld [vmem:[#allocation2 + $0x94] sm:$0xff] }
 0x135   : > { %v1396_v3 = vadd.f32 %v1380_v61, %v1347_v35  ;;  %v1151_v27 = vadd.f32 %v1135_v62, %v1102_v0  ;;  %v1478_v25 = vmul.f32 %v3952_v45, %v4329_v58  ;;  %v891_v6 = vmul.f32 %v4354_v52, %v3870_v38  ;;  %v4430_v61 = vld [vmem:[#allocation2 + $0x82] sm:$0xff] }
 0x136   : > { %v801_v36 = vmax.f32 %v784_v49, 0.0  ;;  %3250 = vmatmul.msk.f32.gmra.mxu1 %vm802_vm1, %v1640_v29  ;;  %v940_v20 = vmul.f32 %v1314_v16, %v3872_v39  ;;  %3284 = vmatmul.msk.f32.gmra.mxu3 %vm802_vm1, %v2314_v17  ;;  %v1233_v11 = vmul.f32 %v1607_v2, %v3918_v14  ;;  %v1283_v26 = vmul.f32 %v3934_v28, %v1266_v44  ;;  %v1608_v16 = vld [vmem:[#allocation2 + $0x7f] sm:$0xff] }
 0x137   : > { %v1445_v19 = vadd.f32 %v1429_v4, %v1396_v3  ;;  %v1200_v13 = vadd.f32 %v1184_v59, %v1151_v27  ;;  %v1527_v12 = vmul.f32 %v3963_v55, %v1510_v43  ;;  %v1576_v52 = vmul.f32 %v3970_v7, %v4400_v1 }
 0x138   : > { %818 = vst.msk [vmem:[#allocation2 + $0xb3] sm:$0xff] %vm802_vm1, %v801_v36  ;;  %v843_v18 = vperm.slane %v801_v36, 7  ;;  %v956_v8 = vadd.f32 %v940_v20, %v891_v6  ;;  %v989_v53 = vmul.f32 %v1363_v15, %v3878_v42  ;;  %v1038_v9 = vmul.f32 %v4322_v51, %v3885_v48  ;;  %v1511_v6 = vld [vmem:[#allocation2 + $0x85] sm:$0xff] }
 0x139   : > { %v4410_v30 = vld [vmem:[#allocation2 + $0xa8] sm:$0xff]  ;;  %v1494_v10 = vadd.f32 %v1478_v25, %v1445_v19  ;;  %v1249_v2 = vadd.f32 %v1233_v11, %v1200_v13  ;;  %v1087_v33 = vmul.f32 %v4329_v58, %v3898_v56  ;;  %v2200_v35 = vmul.f32 %v3928_v22, %v4322_v51 }
 0x13a   : > { %858 = vst.msk [vmem:[#allocation2 + $0xc0] sm:$0xff] %vm802_vm1, %v4410_v30  ;;  %v1005_v49 = vadd.f32 %v989_v53, %v956_v8  ;;  %v2233_v15 = vmul.f32 %v3930_v23, %v4329_v58  ;;  %v2266_v0 = vmul.f32 %v3940_v32, %v4415_v50  ;;  %v1625_v47 = vmul.f32 %v3980_v21, %v1608_v16  ;;  %v2490_v53 = vld [vmem:[%s5512_s12] sm:$0xff] }
 0x13b   : > { %852 = vst.msk [vmem:[#allocation2 + $0xbb] sm:$0xf] %vm844_vm3, %v843_v18  ;;  %v1543_v62 = vadd.f32 %v1527_v12, %v1494_v10  ;;  %v1299_v29 = vadd.f32 %v1283_v26, %v1249_v2  ;;  %v1332_v4 = vmul.f32 %v3948_v37, %v1315_v24  ;;  %v1430_v36 = vmul.f32 %v3938_v31, %v4369_v41  ;;  %v1267_v12 = vld [vmem:[#allocation2 + $0x90] sm:$0xff]  ;;  %v2054_v10 = vld [vmem:[%s5557_s7 + $0x18] sm:$0xff] }
 0x13c   : > { %v1054_v3 = vadd.f32 %v1038_v9, %v1005_v49  ;;  %v2249_v27 = vadd.f32 %v2233_v15, %v2200_v35  ;;  %v2299_v51 = vmul.f32 %v3954_v46, %v4428_v5  ;;  %v1479_v58 = vmul.f32 %v3952_v45, %v4375_v57  ;;  %2561 = vmatpush.msrb.mxu1 %v2490_v53 }
 0x13d   : > { %v1592_v17 = vadd.f32 %v1576_v52, %v1543_v62  ;;  %v1348_v25 = vadd.f32 %v1332_v4, %v1299_v29  ;;  %v1381_v18 = vmul.f32 %v3950_v40, %v4430_v61  ;;  %v1136_v19 = vmul.f32 %v1510_v43, %v3902_v60  ;;  %2119 = vmatpush.msrb.mxu2 %v2054_v10  ;;  %v4475_v4 = vld [vmem:[#allocation2 + $0x9c] sm:$0xff] }
 0x13e   : > { %v1103_v20 = vadd.f32 %v1087_v33, %v1054_v3  ;;  %v2282_v13 = vadd.f32 %v2266_v0, %v2249_v27  ;;  %v892_v52 = vmul.f32 %v1266_v44, %v3870_v38  ;;  %v941_v8 = vmul.f32 %v1315_v24, %v3872_v39  ;;  %v1560_v24 = vld [vmem:[#allocation2 + $0x86] sm:$0xff]  ;;  %v4468_v0 = vld [vmem:[#allocation2 + $0x9b] sm:$0xff]  ;;  %v1316_v27 = vld [vmem:[#allocation2 + $0x91] sm:$0xff] }
 0x13f   : > { %v4446_v59 = vld [vmem:[#allocation2 + $0xb0] sm:$0xff]  ;;  %v1641_v11 = vadd.f32 %v1625_v47, %v1592_v17  ;;  %v1397_v26 = vadd.f32 %v1381_v18, %v1348_v25  ;;  %v1528_v9 = vmul.f32 %v3963_v55, %v1511_v6  ;;  %v1185_v49 = vmul.f32 %v4400_v1, %v3904_v63  ;;  %v1609_v3 = vld [vmem:[#allocation2 + $0x87] sm:$0xff] }
 0x140   : > { %859 = vst.msk [vmem:[#allocation2 + $0xc8] sm:$0xff] %vm802_vm1, %v4446_v59  ;;  %v1152_v43 = vadd.f32 %v1136_v19, %v1103_v20  ;;  %v2315_v33 = vadd.f32 %v2299_v51, %v2282_v13  ;;  %v957_v35 = vadd.f32 %v941_v8, %v892_v52  ;;  %v990_v15 = vmul.f32 %v4430_v61, %v3878_v42 }
 0x141   : > { %3251 = vmatmul.msk.f32.gmra.mxu1 %vm802_vm1, %v1641_v11  ;;  %v1446_v44 = vadd.f32 %v1430_v36, %v1397_v26  ;;  %v1234_v47 = vmul.f32 %v1608_v16, %v3918_v14  ;;  %v1284_v1 = vmul.f32 %v3934_v28, %v1267_v12  ;;  %v1039_v29 = vmul.f32 %v4369_v41, %v3885_v48 }
 0x142   : > { %v856_v2 = vld [vmem:[#allocation2 + $0xb8] sm:$0x7f]  ;;  %3285 = vmatmul.msk.f32.gmra.mxu3 %vm802_vm1, %v2315_v33  ;;  %v1201_v62 = vadd.f32 %v1185_v49, %v1152_v43  ;;  %v1006_v51 = vadd.f32 %v990_v15, %v957_v35  ;;  %v2201_v17 = vmul.f32 %v3928_v22, %v4369_v41  ;;  %v2234_v25 = vmul.f32 %v3930_v23, %v4375_v57 }
 0x143   : > { %861 = vst.msk [vmem:[#allocation2 + $0xd0] sm:$0x7f] %vm860_vm4, %v856_v2  ;;  %v1495_v36 = vadd.f32 %v1479_v58, %v1446_v44  ;;  %v1577_v18 = vmul.f32 %v3970_v7, %v1560_v24  ;;  %v1088_v20 = vmul.f32 %v4375_v57, %v3898_v56  ;;  %v2267_v19 = vmul.f32 %v3940_v32, %v4468_v0  ;;  %v4486_v58 = vld [vmem:[#allocation2 + $0x92] sm:$0xff]  ;;  %v4495_v49 = vld [vmem:[#allocation6] sm:$0xff] }
 0x144   : > { %v1250_v16 = vadd.f32 %v1234_v47, %v1201_v62  ;;  %v1055_v11 = vadd.f32 %v1039_v29, %v1006_v51  ;;  %v2250_v26 = vadd.f32 %v2234_v25, %v2201_v17  ;;  %v2300_v41 = vmul.f32 %v3954_v46, %v4475_v4  ;;  %v1268_v33 = vld [vmem:[#allocation2 + $0x98] sm:$0xff] }
 0x145   : > { %v1544_v13 = vadd.f32 %v1528_v9, %v1495_v36  ;;  %v1626_v52 = vmul.f32 %v3980_v21, %v1609_v3  ;;  %v1431_v8 = vmul.f32 %v3938_v31, %v4415_v50  ;;  %v1333_v10 = vmul.f32 %v3948_v37, %v1316_v27 }
 0x146   : > { %v1300_v53 = vadd.f32 %v1284_v1, %v1250_v16  ;;  %v1104_v2 = vadd.f32 %v1088_v20, %v1055_v11  ;;  %v1137_v43 = vmul.f32 %v1511_v6, %v3902_v60  ;;  %v2283_v9 = vadd.f32 %v2267_v19, %v2250_v26  ;;  %v2053_v6 = vld [vmem:[%s5557_s7 + $0x10] sm:$0xff]  ;;  %v1317_v19 = vld [vmem:[#allocation2 + $0x99] sm:$0xff] }
 0x147   : > { %v1593_v57 = vadd.f32 %v1577_v18, %v1544_v13  ;;  %v1382_v35 = vmul.f32 %v3950_v40, %v4486_v58  ;;  %v1186_v15 = vmul.f32 %v1560_v24, %v3904_v63  ;;  %v893_v62 = vmul.f32 %v1267_v12, %v3870_v38  ;;  %v4509_v24 = vld [vmem:[#allocation2 + $0xab] sm:$0xff]  ;;  %2120 = vmatpush.msrb.mxu2 %v2053_v6  ;;  %v1561_v16 = vld [vmem:[#allocation2 + $0x96] sm:$0xff] }
 0x148   : > { %v1349_v44 = vadd.f32 %v1333_v10, %v1300_v53  ;;  %v1153_v1 = vadd.f32 %v1137_v43, %v1104_v2  ;;  %v2316_v29 = vadd.f32 %v2300_v41, %v2283_v9  ;;  %v942_v36 = vmul.f32 %v1316_v27, %v3872_v39  ;;  %v1512_v27 = vld [vmem:[#allocation2 + $0x95] sm:$0xff] }
 0x149   : > { %v1642_v47 = vadd.f32 %v1626_v52, %v1593_v57  ;;  %v1480_v51 = vmul.f32 %v3952_v45, %v4428_v5  ;;  %v1235_v25 = vmul.f32 %v1609_v3, %v3918_v14  ;;  %v1285_v18 = vmul.f32 %v3934_v28, %v1268_v33  ;;  %v4522_v52 = vld [vmem:[#allocation2 + $0xac] sm:$0xff]  ;;  %v1610_v10 = vld [vmem:[#allocation2 + $0x97] sm:$0xff] }
 0x14a   : > { %v1398_v17 = vadd.f32 %v1382_v35, %v1349_v44  ;;  %v4512_v12 = vperm.slane %v4495_v49, 1  ;;  %3286 = vmatmul.msk.f32.gmra.mxu3 %vm802_vm1, %v2316_v29  ;;  %v1202_v20 = vadd.f32 %v1186_v15, %v1153_v1  ;;  %v958_v13 = vadd.f32 %v942_v36, %v893_v62  ;;  %5558 = vst [vmem:[#allocation18_spill] sm:$0xff] %v4522_v52  ;;  %v4526_v2 = vld [vmem:[#allocation2 + $0x9a] sm:$0xff] }
 0x14b   : > { %3252 = vmatmul.msk.f32.gmra.mxu1 %vm802_vm1, %v1642_v47  ;;  %v991_v3 = vmul.f32 %v4486_v58, %v3878_v42  ;;  %v1040_v26 = vmul.f32 %v4415_v50, %v3885_v48  ;;  %v1089_v41 = vmul.f32 %v4428_v5, %v3898_v56  ;;  %v2202_v53 = vmul.f32 %v3928_v22, %v4415_v50 }
 0x14c   : > { %v1447_v11 = vadd.f32 %v1431_v8, %v1398_v17  ;;  %v1251_v57 = vadd.f32 %v1235_v25, %v1202_v20  ;;  %v2235_v9 = vmul.f32 %v3930_v23, %v4428_v5  ;;  %v2268_v8 = vmul.f32 %v3940_v32, %v4509_v24  ;;  %v1513_v25 = vld [vmem:[#allocation2 + $0x9d] sm:$0xff] }
 0x14d   : > { %v1007_v43 = vadd.f32 %v991_v3, %v958_v13  ;;  %v1529_v35 = vmul.f32 %v3963_v55, %v1512_v27  ;;  %v1578_v15 = vmul.f32 %v3970_v7, %v1561_v16  ;;  %v1334_v62 = vmul.f32 %v3948_v37, %v1317_v19 }
 0x14e   : > { %v1496_v44 = vadd.f32 %v1480_v51, %v1447_v11  ;;  %v1301_v47 = vadd.f32 %v1285_v18, %v1251_v57  ;;  %v2251_v1 = vadd.f32 %v2235_v9, %v2202_v53  ;;  %v2301_v29 = vmul.f32 %v3954_v46, %v4522_v52  ;;  %v2052_v57 = vld [vmem:[%s5557_s7 + $0x8] sm:$0xff] }
 0x14f   : > { %v1056_v50 = vadd.f32 %v1040_v26, %v1007_v43  ;;  %v1627_v6 = vmul.f32 %v3980_v21, %v1610_v10  ;;  %v1432_v5 = vmul.f32 %v3938_v31, %v4468_v0  ;;  %v1383_v51 = vmul.f32 %v3950_v40, %v4526_v2  ;;  %2121 = vmatpush.msrb.mxu2 %v2052_v57 }
 0x150   : > { %v1545_v36 = vadd.f32 %v1529_v35, %v1496_v44  ;;  %v1350_v17 = vadd.f32 %v1334_v62, %v1301_v47  ;;  %v1138_v13 = vmul.f32 %v1512_v27, %v3902_v60  ;;  %v2284_v18 = vadd.f32 %v2268_v8, %v2251_v1  ;;  %v1562_v35 = vld [vmem:[#allocation2 + $0x9e] sm:$0xff]  ;;  %v4554_v62 = vld [vmem:[#allocation2 + $0xb3] sm:$0xff] }
 0x151   : > { %v1105_v20 = vadd.f32 %v1089_v41, %v1056_v50  ;;  %v1481_v11 = vmul.f32 %v3952_v45, %v4475_v4  ;;  %v894_v26 = vmul.f32 %v1268_v33, %v3870_v38  ;;  %v943_v53 = vmul.f32 %v1317_v19, %v3872_v39  ;;  %v4560_v1 = vld [vmem:[#allocation2 + $0xb4] sm:$0xff] }
 0x152   : > { %v1594_v3 = vadd.f32 %v1578_v15, %v1545_v36  ;;  %v1399_v43 = vadd.f32 %v1383_v51, %v1350_v17  ;;  %v2317_v44 = vadd.f32 %v2301_v29, %v2284_v18  ;;  %v1187_v41 = vmul.f32 %v1561_v16, %v3904_v63  ;;  %v1611_v29 = vld [vmem:[#allocation2 + $0x9f] sm:$0xff]  ;;  %v1318_v36 = vld [vmem:[#allocation2 + $0xa9] sm:$0xff] }
 0x153   : > { %v1154_v9 = vadd.f32 %v1138_v13, %v1105_v20  ;;  %v1530_v8 = vmul.f32 %v3963_v55, %v1513_v25  ;;  %v959_v15 = vadd.f32 %v943_v53, %v894_v26  ;;  %v992_v33 = vmul.f32 %v4526_v2, %v3878_v42 }
 0x154   : > { %v1643_v27 = vadd.f32 %v1627_v6, %v1594_v3  ;;  %v1448_v19 = vadd.f32 %v1432_v5, %v1399_v43  ;;  %3287 = vmatmul.msk.f32.gmra.mxu3 %vm802_vm1, %v2317_v44  ;;  %v1236_v50 = vmul.f32 %v1610_v10, %v3918_v14  ;;  %v1286_v16 = vmul.f32 %v3934_v28, %v4410_v30  ;;  %v4572_v3 = vld [vmem:[#allocation2 + $0xaa] sm:$0xff] }
 0x155   : > { %v1203_v47 = vadd.f32 %v1187_v41, %v1154_v9  ;;  %v1008_v6 = vadd.f32 %v992_v33, %v959_v15  ;;  %v1041_v51 = vmul.f32 %v4468_v0, %v3885_v48  ;;  %v2203_v5 = vmul.f32 %v3928_v22, %v4468_v0 }
 0x156   : > { %3253 = vmatmul.msk.f32.gmra.mxu1 %vm802_vm1, %v1643_v27  ;;  %v2236_v17 = vmul.f32 %v3930_v23, %v4475_v4  ;;  %v1497_v10 = vadd.f32 %v1481_v11, %v1448_v19  ;;  %v1579_v20 = vmul.f32 %v3970_v7, %v1562_v35  ;;  %v2269_v18 = vmul.f32 %v3940_v32, %v4554_v62 }
 0x157   : > { %v1252_v13 = vadd.f32 %v1236_v50, %v1203_v47  ;;  %v1057_v26 = vadd.f32 %v1041_v51, %v1008_v6  ;;  %v1090_v53 = vmul.f32 %v4475_v4, %v3898_v56  ;;  %v2302_v43 = vmul.f32 %v3954_v46, %v4560_v1 }
 0x158   : > { %v2252_v57 = vadd.f32 %v2236_v17, %v2203_v5  ;;  %v1546_v9 = vadd.f32 %v1530_v8, %v1497_v10  ;;  %v1628_v44 = vmul.f32 %v3980_v21, %v1611_v29  ;;  %v1335_v41 = vmul.f32 %v3948_v37, %v1318_v36  ;;  %v2051_v10 = vld [vmem:[%s5557_s7] sm:$0xff] }
 0x159   : > { %v1302_v11 = vadd.f32 %v1286_v16, %v1252_v13  ;;  %v1433_v27 = vmul.f32 %v3938_v31, %v4509_v24  ;;  %v1106_v15 = vadd.f32 %v1090_v53, %v1057_v26  ;;  %v1139_v33 = vmul.f32 %v1513_v25, %v3902_v60  ;;  %2122 = vmatpush.msrb.mxu2 %v2051_v10 }
 0x15a   : > { %v2285_v19 = vadd.f32 %v2269_v18, %v2252_v57  ;;  %v1595_v47 = vadd.f32 %v1579_v20, %v1546_v9  ;;  %v1384_v6 = vmul.f32 %v3950_v40, %v4572_v3  ;;  %v1188_v51 = vmul.f32 %v1562_v35, %v3904_v63  ;;  %v1319_v9 = vld [vmem:[#allocation2 + $0xb1] sm:$0xff] }
 0x15b   : > { %v1351_v50 = vadd.f32 %v1335_v41, %v1302_v11  ;;  %v1155_v8 = vadd.f32 %v1139_v33, %v1106_v15  ;;  %v895_v16 = vmul.f32 %v3870_v38, %v4410_v30  ;;  %v944_v17 = vmul.f32 %v1318_v36, %v3872_v39  ;;  %v4600_v30 = vld [vmem:[#allocation2 + $0xad] sm:$0xff] }
 0x15c   : > { %v2318_v5 = vadd.f32 %v2302_v43, %v2285_v19  ;;  %v1644_v25 = vadd.f32 %v1628_v44, %v1595_v47  ;;  %v1237_v20 = vmul.f32 %v1611_v29, %v3918_v14  ;;  %v1287_v18 = vmul.f32 %v3934_v28, %v4446_v59  ;;  %5559 = vst [vmem:[#allocation19_spill] sm:$0xff] %v4600_v30  ;;  %v4605_v29 = vld [vmem:[#allocation2 + $0xc3] sm:$0xff]  ;;  %v1563_v11 = vld [vmem:[#allocation2 + $0xae] sm:$0xff] }
 0x15d   : > { %v1400_v13 = vadd.f32 %v1384_v6, %v1351_v50  ;;  %v4596_v35 = vperm.slane %v4495_v49, 2  ;;  %v1204_v36 = vadd.f32 %v1188_v51, %v1155_v8  ;;  %v960_v26 = vadd.f32 %v944_v17, %v895_v16  ;;  %v4614_v15 = vld [vmem:[#allocation2 + $0xb2] sm:$0xff]  ;;  %v4622_v6 = vld [vmem:[#allocation2 + $0xc4] sm:$0xff] }
 0x15e   : > { %3291 = vmatmul.msk.f32.vlgmr.msrb.gmra.mxu1 %vm802_vm1, %v3944_v34  ;;  %3288 = vmatmul.msk.f32.gmra.mxu3 %vm802_vm1, %v2318_v5  ;;  %v993_v53 = vmul.f32 %v4572_v3, %v3878_v42  ;;  %v1482_v57 = vmul.f32 %v3952_v45, %v4522_v52  ;;  %v1042_v34 = vmul.f32 %v4509_v24, %v3885_v48  ;;  %v4627_v8 = vperm.slane %v4495_v49, 0  ;;  %v1612_v5 = vld [vmem:[#allocation2 + $0xaf] sm:$0xff] }
 0x15f   : > { %3254 = vmatmul.msk.f32.vlgmr.msra.gmra.mxu2 %vm802_vm1, %v1644_v25  ;;  %v1449_v43 = vadd.f32 %v1433_v27, %v1400_v13  ;;  %v1091_v44 = vmul.f32 %v4522_v52, %v3898_v56  ;;  %v1253_v41 = vadd.f32 %v1237_v20, %v1204_v36  ;;  %v2204_v19 = vmul.f32 %v3928_v22, %v4509_v24 }
 0x160   : > { %v1009_v33 = vadd.f32 %v993_v53, %v960_v26  ;;  %v2237_v47 = vmul.f32 %v3930_v23, %v4522_v52  ;;  %v1531_v27 = vmul.f32 %v3963_v55, %v4600_v30  ;;  %v2270_v51 = vmul.f32 %v3940_v32, %v4605_v29 }
 0x161   : > { %v1498_v50 = vadd.f32 %v1482_v57, %v1449_v43  ;;  %v1303_v16 = vadd.f32 %v1287_v18, %v1253_v41  ;;  %v1336_v17 = vmul.f32 %v3948_v37, %v1319_v9  ;;  %v1580_v20 = vmul.f32 %v3970_v7, %v1563_v11  ;;  %v4635_v57 = vld [vmem:[#allocation2 + $0xb5] sm:$0xff] }
 0x162   : > { %v1058_v10 = vadd.f32 %v1042_v34, %v1009_v33  ;;  %v2253_v25 = vadd.f32 %v2237_v47, %v2204_v19  ;;  %v1385_v36 = vmul.f32 %v3950_v40, %v4614_v15  ;;  %v1140_v26 = vmul.f32 %v4600_v30, %v3902_v60  ;;  %v4644_v47 = vld [vmem:[#allocation2 + $0xb6] sm:$0xff] }
 0x163   : > { %v1547_v13 = vadd.f32 %v1531_v27, %v1498_v50  ;;  %v1352_v53 = vadd.f32 %v1336_v17, %v1303_v16  ;;  %v2303_v18 = vmul.f32 %v3954_v46, %v4622_v6  ;;  %v1629_v34 = vmul.f32 %v3980_v21, %v1612_v5  ;;  %v1271_v16 = vld [vmem:[#allocation2 + $0xc0] sm:$0xff] }
 0x164   : > { %v1107_v43 = vadd.f32 %v1091_v44, %v1058_v10  ;;  %v2286_v52 = vadd.f32 %v2270_v51, %v2253_v25  ;;  %v1434_v33 = vmul.f32 %v3938_v31, %v4554_v62  ;;  %v1483_v19 = vmul.f32 %v3952_v45, %v4560_v1 }
 0x165   : > { %v1596_v41 = vadd.f32 %v1580_v20, %v1547_v13  ;;  %v1401_v50 = vadd.f32 %v1385_v36, %v1352_v53  ;;  %v1189_v51 = vmul.f32 %v1563_v11, %v3904_v63  ;;  %v1532_v10 = vmul.f32 %v3963_v55, %v4635_v57  ;;  %v4658_v36 = vld [vmem:[#allocation2 + $0xcb] sm:$0xff]  ;;  %v4663_v53 = vld [vmem:[#allocation2 + $0x1a] sm:$0xff] }
 0x166   : > { %3292 = vmatmul.msk.f32.gmra.mxu1 %vm802_vm1, %v4398_v54  ;;  %v1156_v44 = vadd.f32 %v1140_v26, %v1107_v43  ;;  %v2319_v27 = vadd.f32 %v2303_v18, %v2286_v52  ;;  %v896_v25 = vmul.f32 %v3870_v38, %v4446_v59  ;;  %v945_v13 = vmul.f32 %v1319_v9, %v3872_v39  ;;  %v4661_v26 = vld [vmem:[#allocation2 + $0x1b] sm:$0xff] }
 0x167   : > { %v1645_v17 = vadd.f32 %v1629_v34, %v1596_v41  ;;  %v2394_v20 = vpop.f32.mrf.mxu3  ;;  %v1450_v30 = vadd.f32 %v1434_v33, %v1401_v50  ;;  %v1581_v54 = vmul.f32 %v3970_v7, %v4644_v47  ;;  %v1238_v11 = vmul.f32 %v1612_v5, %v3918_v14  ;;  %v1320_v59 = vld [vmem:[#allocation2 + $0xc1] sm:$0xff]  ;;  %v1613_v5 = vld [vmem:[#allocation2 + $0xb7] sm:$0xff] }
 0x168   : > { %3289 = vmatmul.msk.f32.gmra.mxu3 %vm802_vm1, %v2319_v27  ;;  %v1205_v52 = vadd.f32 %v1189_v51, %v1156_v44  ;;  %v2460_v38 = vmax.f32 %v4663_v53, %v4661_v26  ;;  %v1288_v39 = vmul.f32 %v3934_v28, %v1271_v16  ;;  %v961_v9 = vadd.f32 %v945_v13, %v896_v25  ;;  %v4670_v34 = vld [vmem:[#allocation2 + $0xc2] sm:$0xff] }
 0x169   : > { %3255 = vmatmul.msk.f32.gmra.mxu2 %vm802_vm1, %v1645_v17  ;;  %v994_v43 = vmul.f32 %v4614_v15, %v3878_v42  ;;  %v1499_v18 = vadd.f32 %v1483_v19, %v1450_v30  ;;  %v2205_v33 = vmul.f32 %v3928_v22, %v4554_v62  ;;  %v2238_v50 = vmul.f32 %v3930_v23, %v4560_v1  ;;  %v4676_v44 = vld [vmem:[#allocation2 + $0x1c] sm:$0xff]  ;;  %v4681_v42 = vld [vmem:[#allocation2 + $0xcc] sm:$0xff] }
 0x16a   : > { %v1254_v41 = vadd.f32 %v1238_v11, %v1205_v52  ;;  %v2476_v27 = vmax.f32 %v2460_v38, %v4676_v44  ;;  %v1043_v16 = vmul.f32 %v4554_v62, %v3885_v48  ;;  %v2271_v30 = vmul.f32 %v3940_v32, %v4658_v36  ;;  %v4694_v48 = vld [vmem:[%s5511_s11] ss:$0 sm:$0xff] }
 0x16b   : > { %v1010_v51 = vadd.f32 %v994_v43, %v961_v9  ;;  %v1548_v19 = vadd.f32 %v1532_v10, %v1499_v18  ;;  %v1337_v22 = vmul.f32 %v3948_v37, %v1320_v59  ;;  %v2254_v25 = vadd.f32 %v2238_v50, %v2205_v33  ;;  %v3410_v59 = vld [vmem:[#allocation2 + $0x3] sm:$0xff] }
 0x16c   : > { %v1304_v17 = vadd.f32 %v1288_v39, %v1254_v41  ;;  %v1630_v23 = vmul.f32 %v3980_v21, %v1613_v5  ;;  %v1386_v13 = vmul.f32 %v3950_v40, %v4670_v34  ;;  %v1092_v11 = vmul.f32 %v4560_v1, %v3898_v56 }
 0x16d   : > { %v1059_v52 = vadd.f32 %v1043_v16, %v1010_v51  ;;  %v1597_v32 = vadd.f32 %v1581_v54, %v1548_v19  ;;  %v2287_v38 = vadd.f32 %v2271_v30, %v2254_v25  ;;  %v2304_v39 = vmul.f32 %v3954_v46, %v4681_v42  ;;  %v4706_v51 = vld [vmem:[#allocation2 + $0x22] sm:$0xff] }
 0x16e   : > { %3293 = vmatmul.msk.f32.gmra.mxu1 %vm802_vm1, %v2476_v27  ;;  %v1353_v10 = vadd.f32 %v1337_v22, %v1304_v17  ;;  %v1821_v9 = vmul.f32 %v3410_v59, %v4512_v12  ;;  %v1435_v43 = vmul.f32 %v3938_v31, %v4605_v29  ;;  %v1141_v18 = vmul.f32 %v4635_v57, %v3902_v60  ;;  %v4704_v27 = vld [vmem:[#allocation2 + $0x23] sm:$0xff] }
 0x16f   : > { %v1108_v56 = vadd.f32 %v1092_v11, %v1059_v52  ;;  %v2397_v41 = vpop.f32.mrf.mxu3  ;;  %v1646_v33 = vadd.f32 %v1630_v23, %v1597_v32  ;;  %v2320_v50 = vadd.f32 %v2304_v39, %v2287_v38  ;;  %v2461_v46 = vmax.f32 %v4706_v51, %v4704_v27  ;;  %v3413_v16 = vld [vmem:[#allocation2 + $0x4] sm:$0xff] }
 0x170   : > { %v1402_v54 = vadd.f32 %v1386_v13, %v1353_v10  ;;  %v1854_v30 = vmul.f32 %v3413_v16, %v4596_v35  ;;  %v4711_v19 = vld [vmem:[#allocation2 + $0xc5] sm:$0xff]  ;;  %v1190_v60 = vmul.f32 %v4644_v47, %v3904_v63  ;;  %v2395_v22 = vadd.f32 %v4694_v48, %v2394_v20 }
 0x171   : > { %v1157_v17 = vadd.f32 %v1141_v18, %v1108_v56  ;;  %3256 = vmatmul.msk.f32.gmra.mxu2 %vm802_vm1, %v1646_v33  ;;  %v1484_v25 = vmul.f32 %v3952_v45, %v4622_v6  ;;  %3290 = vmatmul.msk.f32.gmra.mxu3 %vm802_vm1, %v2320_v50  ;;  %v1272_v13 = vld [vmem:[#allocation2 + $0xc8] sm:$0xff]  ;;  %v1239_v38 = vmul.f32 %v1613_v5, %v3918_v14 }
 0x172   : > { %v1451_v23 = vadd.f32 %v1435_v43, %v1402_v54  ;;  %v3414_v52 = vld [vmem:[#allocation2 + $0x2] sm:$0xff]  ;;  %v2442_v39 = vmax.f32 %v2395_v22, 0.0  ;;  %v1533_v47 = vmul.f32 %v3963_v55, %v4711_v19  ;;  %v1289_v54 = vmul.f32 %v3934_v28, %v1272_v13  ;;  %v4732_v16 = vld [vmem:[#allocation2 + $0xca] sm:$0xff] }
 0x173   : > { %v1788_v11 = vmul.f32 %v3414_v52, %v4627_v8  ;;  %v1565_v32 = vld [vmem:[#allocation2 + $0xc6] sm:$0xff]  ;;  %v1206_v10 = vadd.f32 %v1190_v60, %v1157_v17  ;;  %v2398_v14 = vadd.f32 %v4694_v48, %v2397_v41  ;;  %v1387_v41 = vmul.f32 %v3950_v40, %v4732_v16 }
 0x174   : > { %v1500_v63 = vadd.f32 %v1484_v25, %v1451_v23  ;;  %v4724_v20 = vld [vmem:[#allocation2 + $0x24] sm:$0xff]  ;;  %2707 = vrot.lane.b32.xlu1 %v2442_v39, %s3602_s20  ;;  %v1582_v50 = vmul.f32 %v3970_v7, %v1565_v32  ;;  %v4739_v13 = vperm.slane %v4495_v49, 3 }
 0x175   : > { %v2477_v59 = vmax.f32 %v2461_v46, %v4724_v20  ;;  %v1321_v43 = vld [vmem:[#allocation2 + $0xc9] sm:$0xff]  ;;  %v1837_v56 = vadd.f32 %v1821_v9, %v1788_v11  ;;  %v1255_v33 = vadd.f32 %v1239_v38, %v1206_v10  ;;  %v2443_v60 = vmax.f32 %v2398_v14, 0.0  ;;  %v4744_v11 = vld [vmem:[#allocation2 + $0x33] sm:$0xff] }
 0x176   : > { %v1614_v18 = vld [vmem:[#allocation2 + $0xc7] sm:$0xff]  ;;  %v1549_v5 = vadd.f32 %v1533_v47, %v1500_v63  ;;  %v1338_v9 = vmul.f32 %v3948_v37, %v1321_v43  ;;  %v4746_v37 = vld [vmem:[#allocation2 + $0x32] sm:$0xff]  ;;  %v4751_v10 = vperm.slane %v4495_v49, 4 }
 0x177   : > { %3294 = vmatmul.msk.f32.gmra.mxu1 %vm802_vm1, %v2477_v59  ;;  %v1870_v17 = vadd.f32 %v1854_v30, %v1837_v56  ;;  %v1305_v46 = vadd.f32 %v1289_v54, %v1255_v33  ;;  %v2400_v22 = vpop.f32.mrf.mxu3  ;;  %v1631_v28 = vmul.f32 %v3980_v21, %v1614_v18  ;;  %2709 = vrot.lane.b32.xlu0 %v2443_v60, %s3602_s20  ;;  %v4753_v38 = vld [vmem:[#allocation2 + $0xcd] sm:$0xff] }
 0x178   : > { %v1598_v25 = vadd.f32 %v1582_v50, %v1549_v5  ;;  %v1436_v30 = vmul.f32 %v3938_v31, %v4658_v36  ;;  %v2462_v32 = vmax.f32 %v4746_v37, %v4744_v11  ;;  %v3418_v39 = vld [vmem:[#allocation2 + $0xa] sm:$0xff]  ;;  %v2401_v31 = vadd.f32 %v4694_v48, %v2400_v22  ;;  %v4759_v43 = vld [vmem:[#allocation2 + $0x34] sm:$0xff] }
 0x179   : > { %v1354_v23 = vadd.f32 %v1338_v9, %v1305_v46  ;;  %v1789_v63 = vmul.f32 %v3418_v39, %v4627_v8  ;;  %v3419_v47 = vld [vmem:[#allocation2 + $0xb] sm:$0xff]  ;;  %v1485_v18 = vmul.f32 %v3952_v45, %v4681_v42  ;;  %v1534_v14 = vmul.f32 %v3963_v55, %v4753_v38 }
 0x17a   : > { %v1647_v52 = vadd.f32 %v1631_v28, %v1598_v25  ;;  %v1822_v59 = vmul.f32 %v3419_v47, %v4512_v12  ;;  %v2478_v56 = vmax.f32 %v2462_v32, %v4759_v43  ;;  %v2444_v54 = vmax.f32 %v2401_v31, 0.0  ;;  %v1566_v5 = vld [vmem:[#allocation2 + $0xce] sm:$0xff]  ;;  %v3421_v50 = vld [vmem:[#allocation2 + $0x5] sm:$0xff] }
 0x17b   : > { %v1403_v40 = vadd.f32 %v1387_v41, %v1354_v23  ;;  %v1887_v46 = vmul.f32 %v3421_v50, %v4739_v13  ;;  %v1920_v60 = vmul.f32 %v4663_v53, %v4751_v10  ;;  %v3422_v25 = vld [vmem:[#allocation2 + $0xc] sm:$0xff]  ;;  %v4773_v23 = vperm.slane %v4495_v49, 5  ;;  %v4775_v41 = vld [vmem:[#allocation2 + $0x3b] sm:$0xff] }
 0x17c   : > { %3257 = vmatmul.msk.f32.gmra.mxu2 %vm802_vm1, %v1647_v52  ;;  %v1838_v22 = vadd.f32 %v1822_v59, %v1789_v63  ;;  %v1855_v28 = vmul.f32 %v3422_v25, %v4596_v35  ;;  %2711 = vrot.lane.b32.xlu1 %v2444_v54, %s3602_s20  ;;  %v1615_v55 = vld [vmem:[#allocation2 + $0xcf] sm:$0xff]  ;;  %v4777_v52 = vld [vmem:[#allocation2 + $0x3a] sm:$0xff]  ;;  %v4782_v32 = vperm.slane %v4495_v49, 6  ;;  %v1583_v39 = vmul.f32 %v3970_v7, %v1566_v5 }
 0x17d   : > { %v1452_v33 = vadd.f32 %v1436_v30, %v1403_v40  ;;  %v2463_v30 = vmax.f32 %v4777_v52, %v4775_v41  ;;  %v1903_v63 = vadd.f32 %v1887_v46, %v1870_v17  ;;  %v1632_v31 = vmul.f32 %v3980_v21, %v1615_v55  ;;  %v4789_v54 = vld [vmem:[#allocation2 + $0x3c] sm:$0xff]  ;;  %v3426_v17 = vld [vmem:[#allocation2 + $0xd] sm:$0xff] }
 0x17e   : > { %v1888_v5 = vmul.f32 %v3426_v17, %v4739_v13  ;;  %v1921_v21 = vmul.f32 %v4706_v51, %v4751_v10  ;;  %v4798_v46 = vperm.slane %v4495_v49, 7  ;;  %v1823_v49 = vmul.f32 %v4661_v26, %v4512_v12 }
 0x17f   : > { %3295 = vmatmul.msk.f32.gmra.mxu1 %vm802_vm1, %v2478_v56  ;;  %v1501_v9 = vadd.f32 %v1485_v18, %v1452_v33  ;;  %v2403_v45 = vpop.f32.mrf.mxu3  ;;  %v1936_v56 = vadd.f32 %v1920_v60, %v1903_v63  ;;  %v1871_v18 = vadd.f32 %v1855_v28, %v1838_v22  ;;  %v1953_v33 = vmul.f32 %v4661_v26, %v4773_v23 }
 0x180   : > { %v2404_v47 = vadd.f32 %v4694_v48, %v2403_v45  ;;  %v2479_v50 = vmax.f32 %v2463_v30, %v4789_v54  ;;  %v1790_v22 = vmul.f32 %v4663_v53, %v4627_v8  ;;  %v4813_v53 = vld [vmem:[#allocation2 + $0x4b] sm:$0xff]  ;;  %v1791_v26 = vmul.f32 %v4706_v51, %v4627_v8 }
 0x181   : > { %v1550_v40 = vadd.f32 %v1534_v14, %v1501_v9  ;;  %v1986_v14 = vmul.f32 %v4676_v44, %v4782_v32  ;;  %v1969_v9 = vadd.f32 %v1953_v33, %v1936_v56  ;;  %v1904_v60 = vadd.f32 %v1888_v5, %v1871_v18  ;;  %v4823_v33 = vld [vmem:[#allocation2 + $0x4c] sm:$0xff] }
 0x182   : > { %v2445_v25 = vmax.f32 %v2404_v47, 0.0  ;;  %v1954_v47 = vmul.f32 %v4704_v27, %v4773_v23  ;;  %v1839_v56 = vadd.f32 %v1823_v49, %v1790_v22  ;;  %v1987_v17 = vmul.f32 %v4724_v20, %v4782_v32  ;;  %v3433_v49 = vld [vmem:[#allocation2 + $0x25] sm:$0xff] }
 0x183   : > { %v1599_v59 = vadd.f32 %v1583_v39, %v1550_v40  ;;  %v2002_v55 = vadd.f32 %v1986_v14, %v1969_v9  ;;  %v1937_v30 = vadd.f32 %v1921_v21, %v1904_v60  ;;  %v1856_v40 = vmul.f32 %v4676_v44, %v4596_v35  ;;  %v3427_v39 = vld [vmem:[#allocation2 + $0x1d] sm:$0xff]  ;;  %v4836_v9 = vld [vmem:[#allocation2 + $0x53] sm:$0xff] }
 0x184   : > { %2713 = vrot.lane.b32.xlu1 %v2445_v25, %s3602_s20  ;;  %v2019_v63 = vmul.f32 %v3427_v39, %v4798_v46  ;;  %v1824_v44 = vmul.f32 %v4704_v27, %v4512_v12  ;;  %v1889_v5 = vmul.f32 %v3427_v39, %v4739_v13  ;;  %v1922_v27 = vmul.f32 %v4746_v37, %v4751_v10  ;;  %v4838_v60 = vld [vmem:[#allocation2 + $0x52] sm:$0xff] }
 0x185   : > { %v1648_v7 = vadd.f32 %v1632_v31, %v1599_v59  ;;  %v4815_v59 = vld [vmem:[#allocation2 + $0x4a] sm:$0xff]  ;;  %v1970_v14 = vadd.f32 %v1954_v47, %v1937_v30  ;;  %v1857_v21 = vmul.f32 %v4724_v20, %v4596_v35  ;;  %v2465_v22 = vmax.f32 %v4838_v60, %v4836_v9 }
 0x186   : > { %v2464_v31 = vmax.f32 %v4815_v59, %v4813_v53  ;;  %v2035_v25 = vadd.f32 %v2019_v63, %v2002_v55  ;;  %v1840_v51 = vadd.f32 %v1824_v44, %v1791_v26  ;;  %v1955_v47 = vmul.f32 %v4744_v11, %v4773_v23 }
 0x187   : > { %3296 = vmatmul.msk.f32.gmra.mxu1 %vm802_vm1, %v2479_v50  ;;  %3258 = vmatmul.msk.f32.gmra.mxu2 %vm802_vm1, %v1648_v7  ;;  %v2406_v28 = vpop.f32.mrf.mxu3  ;;  %v1872_v7 = vadd.f32 %v1856_v40, %v1839_v56  ;;  %v2020_v40 = vmul.f32 %v3433_v49, %v4798_v46  ;;  %v1988_v44 = vmul.f32 %v4759_v43, %v4782_v32 }
 0x188   : > { %v2407_v45 = vadd.f32 %v4694_v48, %v2406_v28  ;;  %v2480_v50 = vmax.f32 %v2464_v31, %v4823_v33  ;;  %v1873_v63 = vadd.f32 %v1857_v21, %v1840_v51  ;;  %v4846_v31 = vld [vmem:[#allocation2 + $0x54] sm:$0xff]  ;;  %v1858_v51 = vmul.f32 %v4759_v43, %v4596_v35 }
 0x189   : > { %v1905_v55 = vadd.f32 %v1889_v5, %v1872_v7  ;;  %v2481_v56 = vmax.f32 %v2465_v22, %v4846_v31  ;;  %v1792_v7 = vmul.f32 %v4746_v37, %v4627_v8  ;;  %v3435_v21 = vld [vmem:[#allocation2 + $0x35] sm:$0xff]  ;;  %v1826_v43 = vmul.f32 %v4775_v41, %v4512_v12 }
 0x18a   : > { %v2446_v18 = vmax.f32 %v2407_v45, 0.0  ;;  %v2003_v45 = vadd.f32 %v1987_v17, %v1970_v14  ;;  %v2021_v22 = vmul.f32 %v3435_v21, %v4798_v46 }
 0x18b   : > { %v1938_v39 = vadd.f32 %v1922_v27, %v1905_v55  ;;  %v1825_v27 = vmul.f32 %v4744_v11, %v4512_v12  ;;  %v4868_v55 = vld [vmem:[#allocation2 + $0x62] sm:$0xff]  ;;  %v1793_v11 = vmul.f32 %v4777_v52, %v4627_v8 }
 0x18c   : > { %2715 = vrot.lane.b32.xlu1 %v2446_v18, %s3602_s20  ;;  %v2036_v26 = vadd.f32 %v2020_v40, %v2003_v45  ;;  %v1890_v18 = vmul.f32 %v3433_v49, %v4739_v13  ;;  %v4866_v45 = vld [vmem:[#allocation2 + $0x63] sm:$0xff] }
 0x18d   : > { %v2466_v37 = vmax.f32 %v4868_v55, %v4866_v45  ;;  %v1841_v49 = vadd.f32 %v1825_v27, %v1792_v7  ;;  %v3441_v27 = vld [vmem:[#allocation2 + $0x3d] sm:$0xff] }
 0x18e   : > { %v1906_v14 = vadd.f32 %v1890_v18, %v1873_v63  ;;  %v1842_v18 = vadd.f32 %v1826_v43, %v1793_v11  ;;  %v1990_v11 = vmul.f32 %v4823_v33, %v4782_v32  ;;  %v1892_v43 = vmul.f32 %v3441_v27, %v4739_v13 }
 0x18f   : > { %3297 = vmatmul.msk.f32.gmra.mxu1 %vm802_vm1, %v2480_v50  ;;  %3259 = vmatmul.msk.f32.vlgmr.msrb.gmra.mxu2 %vm802_vm1, %v2035_v25  ;;  %v1923_v50 = vmul.f32 %v4777_v52, %v4751_v10  ;;  %v1971_v25 = vadd.f32 %v1955_v47, %v1938_v39  ;;  %v4877_v39 = vld [vmem:[#allocation2 + $0x64] sm:$0xff]  ;;  %v1891_v52 = vmul.f32 %v3435_v21, %v4739_v13 }
 0x190   : > { %v2409_v28 = vpop.f32.mrf.mxu3  ;;  %v2482_v63 = vmax.f32 %v2466_v37, %v4877_v39  ;;  %v4901_v37 = vld [vmem:[#allocation2 + $0x6c] sm:$0xff] }
 0x191   : > { %v2410_v30 = vadd.f32 %v4694_v48, %v2409_v28  ;;  %v2004_v17 = vadd.f32 %v1988_v44, %v1971_v25  ;;  %v1939_v5 = vadd.f32 %v1923_v50, %v1906_v14  ;;  %v1956_v28 = vmul.f32 %v4775_v41, %v4773_v23  ;;  %v4890_v25 = vld [vmem:[#allocation2 + $0x6b] sm:$0xff] }
 0x192   : > { %v1989_v44 = vmul.f32 %v4789_v54, %v4782_v32  ;;  %v1924_v41 = vmul.f32 %v4815_v59, %v4751_v10  ;;  %v1859_v50 = vmul.f32 %v4789_v54, %v4596_v35  ;;  %v4892_v14 = vld [vmem:[#allocation2 + $0x6a] sm:$0xff]  ;;  %v1957_v54 = vmul.f32 %v4813_v53, %v4773_v23 }
 0x193   : > { %v2447_v20 = vmax.f32 %v2410_v30, 0.0  ;;  %v1972_v47 = vadd.f32 %v1956_v28, %v1939_v5  ;;  %v2467_v7 = vmax.f32 %v4892_v14, %v4890_v25 }
 0x194   : > { %v1875_v28 = vadd.f32 %v1859_v50, %v1842_v18  ;;  %v1827_v18 = vmul.f32 %v4813_v53, %v4512_v12  ;;  %v1860_v50 = vmul.f32 %v4823_v33, %v4596_v35  ;;  %v1795_v33 = vmul.f32 %v4838_v60, %v4627_v8 }
 0x195   : > { %2717 = vrot.lane.b32.xlu2 %v2447_v20, %s3602_s20  ;;  %v2037_v20 = vadd.f32 %v2021_v22, %v2004_v17  ;;  %v2005_v17 = vadd.f32 %v1989_v44, %v1972_v47 }
 0x197   : > { %3298 = vmatmul.msk.f32.gmra.mxu1 %vm802_vm1, %v2481_v56  ;;  %3260 = vmatmul.msk.f32.gmra.mxu2 %vm802_vm1, %v2036_v26  ;;  %v1874_v56 = vadd.f32 %v1858_v51, %v1841_v49  ;;  %v2022_v51 = vmul.f32 %v3441_v27, %v4798_v46  ;;  %v4921_v27 = vld [vmem:[#allocation2 + $0x7a] sm:$0xff] }
 0x199   : > { %v1907_v5 = vadd.f32 %v1891_v52, %v1874_v56  ;;  %v2038_v49 = vadd.f32 %v2022_v51, %v2005_v17  ;;  %v1908_v56 = vadd.f32 %v1892_v43, %v1875_v28  ;;  %v1828_v28 = vmul.f32 %v4836_v9, %v4512_v12 }
 0x19a   : > { %v2412_v30 = vpop.f32.mrf.mxu3 }
 0x19b   : > { %v2413_v40 = vadd.f32 %v4694_v48, %v2412_v30  ;;  %v1940_v21 = vadd.f32 %v1924_v41, %v1907_v5  ;;  %v2483_v30 = vmax.f32 %v2467_v7, %v4901_v37  ;;  %v3443_v7 = vld [vmem:[#allocation2 + $0x4d] sm:$0xff]  ;;  %v4919_v5 = vld [vmem:[#allocation2 + $0x7b] sm:$0xff] }
 0x19c   : > { %v2023_v17 = vmul.f32 %v3443_v7, %v4798_v46  ;;  %v2468_v51 = vmax.f32 %v4921_v27, %v4919_v5 }
 0x19d   : > { %v2448_v26 = vmax.f32 %v2413_v40, 0.0  ;;  %v4897_v22 = vpop.f32.mrf.mxu1  ;;  %v1925_v40 = vmul.f32 %v4838_v60, %v4751_v10  ;;  %v1973_v47 = vadd.f32 %v1957_v54, %v1940_v21  ;;  %v4934_v54 = vld [vmem:[#allocation2 + $0x7c] sm:$0xff]  ;;  %v1926_v60 = vmul.f32 %v4868_v55, %v4751_v10 }
 0x19f   : > { %3299 = vmatmul.msk.f32.gmra.mxu1 %vm802_vm1, %v2482_v63  ;;  %3261 = vmatmul.msk.f32.gmra.mxu2 %vm802_vm1, %v2037_v20  ;;  %v2006_v52 = vadd.f32 %v1990_v11, %v1973_v47  ;;  %v1941_v41 = vadd.f32 %v1925_v40, %v1908_v56  ;;  %v1991_v40 = vmul.f32 %v4846_v31, %v4782_v32  ;;  %v4946_v47 = vld [vmem:[#allocation2 + $0x83] sm:$0xff] }
 0x1a0   : > { %2719 = vrot.lane.b32.xlu1 %v2448_v26, %s3602_s20  ;;  %v1794_v26 = vmul.f32 %v4815_v59, %v4627_v8  ;;  %v1958_v59 = vmul.f32 %v4836_v9, %v4773_v23  ;;  %v1844_v9 = vadd.f32 %v1828_v28, %v1795_v33  ;;  %v2469_v56 = vmax.f32 %v4430_v61, %v4946_v47 }
 0x1a1   : > { %v1992_v61 = vmul.f32 %v4877_v39, %v4782_v32 }
 0x1a2   : > { %v1843_v53 = vadd.f32 %v1827_v18, %v1794_v26  ;;  %v1974_v11 = vadd.f32 %v1958_v59, %v1941_v41  ;;  %v3448_v18 = vld [vmem:[#allocation2 + $0x55] sm:$0xff]  ;;  %v1959_v59 = vmul.f32 %v4866_v45, %v4773_v23 }
 0x1a4   : > { %v1876_v43 = vadd.f32 %v1860_v50, %v1843_v53  ;;  %v2024_v50 = vmul.f32 %v3448_v18, %v4798_v46 }
 0x1a5   : > { %v2415_v63 = vpop.f32.mrf.mxu3 }
 0x1a6   : > { %v2416_v20 = vadd.f32 %v4694_v48, %v2415_v63  ;;  %v1893_v63 = vmul.f32 %v3443_v7, %v4739_v13 }
 0x1a7   : > { %3300 = vmatmul.msk.f32.gmra.mxu1 %vm802_vm1, %v2483_v30  ;;  %3262 = vmatmul.msk.f32.gmra.mxu2 %vm802_vm1, %v2038_v49  ;;  %v2484_v30 = vmax.f32 %v2468_v51, %v4934_v54  ;;  %v2039_v49 = vadd.f32 %v2023_v17, %v2006_v52 }
 0x1a8   : > { %v2449_v44 = vmax.f32 %v2416_v20, 0.0  ;;  %v4928_v21 = vpop.f32.mrf.mxu1  ;;  %v1861_v20 = vmul.f32 %v4846_v31, %v4596_v35  ;;  %v1909_v52 = vadd.f32 %v1893_v63, %v1876_v43  ;;  %v4954_v31 = vld [vmem:[#allocation2 + $0x84] sm:$0xff] }
 0x1a9   : > { %v2485_v53 = vmax.f32 %v2469_v56, %v4954_v31  ;;  %v3450_v56 = vld [vmem:[#allocation2 + $0x65] sm:$0xff] }
 0x1aa   : > { %2721 = vrot.lane.b32.xlu2 %v2449_v44, %s3602_s20  ;;  %v2007_v44 = vadd.f32 %v1991_v40, %v1974_v11  ;;  %v1942_v7 = vadd.f32 %v1926_v60, %v1909_v52  ;;  %v1877_v17 = vadd.f32 %v1861_v20, %v1844_v9  ;;  %v1796_v40 = vmul.f32 %v4868_v55, %v4627_v8  ;;  %v4976_v52 = vld [vmem:[#allocation2 + $0x93] sm:$0xff] }
 0x1ab   : > { %v1829_v9 = vmul.f32 %v4866_v45, %v4512_v12  ;;  %v1862_v20 = vmul.f32 %v4877_v39, %v4596_v35  ;;  %v1797_v45 = vmul.f32 %v4892_v14, %v4627_v8  ;;  %v1830_v39 = vmul.f32 %v4890_v25, %v4512_v12 }
 0x1ac   : > { %v2040_v33 = vadd.f32 %v2024_v50, %v2007_v44  ;;  %v1975_v11 = vadd.f32 %v1959_v59, %v1942_v7  ;;  %v1960_v44 = vmul.f32 %v4890_v25, %v4773_v23  ;;  %v4985_v7 = vld [vmem:[#allocation2 + $0x94] sm:$0xff]  ;;  %v1928_v25 = vmul.f32 %v4921_v27, %v4751_v10 }
 0x1ae   : > { %v2008_v63 = vadd.f32 %v1992_v61, %v1975_v11  ;;  %v1895_v61 = vmul.f32 %v3450_v56, %v4739_v13  ;;  %v2471_v11 = vmax.f32 %v4526_v2, %v4468_v0 }
 0x1af   : > { %3301 = vmatmul.msk.f32.gmra.mxu1 %vm802_vm1, %v2484_v30  ;;  %3263 = vmatmul.msk.f32.gmra.mxu2 %vm802_vm1, %v2039_v49  ;;  %v1894_v30 = vmul.f32 %v3448_v18, %v4739_v13  ;;  %v1927_v49 = vmul.f32 %v4892_v14, %v4751_v10  ;;  %v1845_v18 = vadd.f32 %v1829_v9, %v1796_v40 }
 0x1b0   : > { %v2418_v26 = vpop.f32.mrf.mxu3 }
 0x1b1   : > { %v2419_v41 = vadd.f32 %v4694_v48, %v2418_v26  ;;  %v1910_v43 = vadd.f32 %v1894_v30, %v1877_v17  ;;  %v2025_v26 = vmul.f32 %v3450_v56, %v4798_v46  ;;  %v1846_v30 = vadd.f32 %v1830_v39, %v1797_v45 }
 0x1b2   : > { %v2487_v56 = vmax.f32 %v2471_v11, %v4475_v4  ;;  %v1798_v39 = vmul.f32 %v4921_v27, %v4627_v8  ;;  %v1832_v27 = vmul.f32 %v4946_v47, %v4512_v12  ;;  %v1962_v11 = vmul.f32 %v4946_v47, %v4773_v23 }
 0x1b3   : > { %v2450_v51 = vmax.f32 %v2419_v41, 0.0  ;;  %v4959_v28 = vpop.f32.mrf.mxu1  ;;  %v1943_v60 = vadd.f32 %v1927_v49, %v1910_v43  ;;  %v2470_v41 = vmax.f32 %v4486_v58, %v4976_v52  ;;  %v1993_v58 = vmul.f32 %v4901_v37, %v4782_v32 }
 0x1b4   : > { %v1863_v49 = vmul.f32 %v4901_v37, %v4596_v35  ;;  %v1994_v37 = vmul.f32 %v4934_v54, %v4782_v32 }
 0x1b5   : > { %2723 = vrot.lane.b32.xlu1 %v2450_v51, %s3602_s20  ;;  %v2486_v17 = vmax.f32 %v2470_v41, %v4985_v7  ;;  %v2041_v51 = vadd.f32 %v2025_v26, %v2008_v63  ;;  %v1976_v59 = vadd.f32 %v1960_v44, %v1943_v60  ;;  %v3453_v63 = vld [vmem:[#allocation2 + $0x6d] sm:$0xff]  ;;  %v1961_v41 = vmul.f32 %v4919_v5, %v4773_v23 }
 0x1b6   : > { %v2026_v60 = vmul.f32 %v3453_v63, %v4798_v46  ;;  %v1896_v26 = vmul.f32 %v3453_v63, %v4739_v13 }
 0x1b7   : > { %3302 = vmatmul.msk.f32.gmra.mxu1 %vm802_vm1, %v2485_v53  ;;  %3264 = vmatmul.msk.f32.gmra.mxu2 %vm802_vm1, %v2040_v33  ;;  %v1878_v53 = vadd.f32 %v1862_v20, %v1845_v18  ;;  %v2009_v43 = vadd.f32 %v1993_v58, %v1976_v59  ;;  %v1879_v20 = vadd.f32 %v1863_v49, %v1846_v30  ;;  %v3455_v30 = vld [vmem:[#allocation2 + $0x7d] sm:$0xff] }
 0x1b8   : > { %v1864_v58 = vmul.f32 %v4934_v54, %v4596_v35  ;;  %v2027_v49 = vmul.f32 %v3455_v30, %v4798_v46  ;;  %v1897_v47 = vmul.f32 %v3455_v30, %v4739_v13 }
 0x1b9   : > { %v2421_v55 = vpop.f32.mrf.mxu3  ;;  %v1911_v40 = vadd.f32 %v1895_v61, %v1878_v53  ;;  %v2042_v44 = vadd.f32 %v2026_v60, %v2009_v43  ;;  %v1912_v45 = vadd.f32 %v1896_v26, %v1879_v20  ;;  %v2472_v61 = vmax.f32 %v4572_v3, %v4509_v24  ;;  %v5560_v43 = vld [vmem:[#allocation18_spill] sm:$0xff]  ;;  %v3456_v26 = vld [vmem:[#allocation2 + $0x92] sm:$0xff] }
 0x1ba   : > { %v2422_v50 = vadd.f32 %v4694_v48, %v2421_v55  ;;  %v3454_v55 = vld [vmem:[#allocation2 + $0x82] sm:$0xff]  ;;  %v1865_v20 = vmul.f32 %v4954_v31, %v4596_v35 }
 0x1bb   : > { %v1944_v9 = vadd.f32 %v1928_v25, %v1911_v40  ;;  %v1929_v0 = vmul.f32 %v3454_v55, %v4751_v10  ;;  %v1799_v25 = vmul.f32 %v3454_v55, %v4627_v8  ;;  %v2488_v40 = vmax.f32 %v2472_v61, %v5560_v43 }
 0x1bc   : > { %v2451_v33 = vmax.f32 %v2422_v50, 0.0  ;;  %v1866_v43 = vmul.f32 %v4985_v7, %v4596_v35 }
 0x1bd   : > { %v1977_v4 = vadd.f32 %v1961_v41, %v1944_v9  ;;  %v1945_v53 = vadd.f32 %v1929_v0, %v1912_v45  ;;  %v1848_v9 = vadd.f32 %v1832_v27, %v1799_v25  ;;  %v1800_v25 = vmul.f32 %v3456_v26, %v4627_v8  ;;  %v5060_v27 = vld [vmem:[%s5513_s13] ss:$0 sm:$0xff] }
 0x1be   : > { %v4993_v14 = vpop.f32.mrf.mxu1  ;;  %2725 = vrot.lane.b32.xlu1 %v2451_v33, %s3602_s20  ;;  %v1831_v33 = vmul.f32 %v4919_v5, %v4512_v12 }
 0x1bf   : > { %3303 = vmatmul.msk.f32.gmra.mxu1 %vm802_vm1, %v2486_v17  ;;  %3265 = vmatmul.msk.f32.gmra.mxu2 %vm802_vm1, %v2041_v51  ;;  %v2010_v51 = vadd.f32 %v1994_v37, %v1977_v4  ;;  %v1978_v63 = vadd.f32 %v1962_v11, %v1945_v53  ;;  %v2473_v37 = vmax.f32 %v4614_v15, %v4554_v62  ;;  %v3457_v4 = vld [vmem:[#allocation2 + $0x85] sm:$0xff] }
 0x1c0   : > { %v1847_v5 = vadd.f32 %v1831_v33, %v1798_v39  ;;  %v2028_v45 = vmul.f32 %v3457_v4, %v4798_v46  ;;  %v1931_v53 = vmul.f32 %v4751_v10, %v4526_v2  ;;  %v1963_v33 = vmul.f32 %v4976_v52, %v4773_v23 }
 0x1c1   : > { %v2043_v54 = vadd.f32 %v2027_v49, %v2010_v51  ;;  %v1898_v51 = vmul.f32 %v3457_v4, %v4739_v13  ;;  %v1833_v49 = vmul.f32 %v4976_v52, %v4512_v12 }
 0x1c2   : > { %v1880_v60 = vadd.f32 %v1864_v58, %v1847_v5  ;;  %v1996_v58 = vmul.f32 %v4985_v7, %v4782_v32 }
 0x1c4   : > { %v1913_v0 = vadd.f32 %v1897_v47, %v1880_v60  ;;  %v3459_v60 = vld [vmem:[#allocation2 + $0x95] sm:$0xff] }
 0x1c5   : > { %v2424_v18 = vpop.f32.mrf.mxu3 }
 0x1c6   : > { %v2425_v50 = vadd.f32 %v4694_v48, %v2424_v18 }
 0x1c7   : > { %3304 = vmatmul.msk.f32.gmra.mxu1 %vm802_vm1, %v2487_v56  ;;  %3266 = vmatmul.msk.f32.gmra.mxu2 %vm802_vm1, %v2042_v44  ;;  %v1995_v56 = vmul.f32 %v4954_v31, %v4782_v32  ;;  %v1930_v44 = vmul.f32 %v3456_v26, %v4751_v10 }
 0x1c8   : > { %v2452_v17 = vmax.f32 %v2425_v50, 0.0  ;;  %v5015_v59 = vpop.f32.mrf.mxu1  ;;  %v1881_v50 = vadd.f32 %v1865_v20, %v1848_v9 }
 0x1c9   : > { %v2011_v55 = vadd.f32 %v1995_v56, %v1978_v63  ;;  %v1946_v31 = vadd.f32 %v1930_v44, %v1913_v0  ;;  %v1849_v63 = vadd.f32 %v1833_v49, %v1800_v25  ;;  %v3460_v56 = vld [vmem:[#allocation2 + $0x9a] sm:$0xff] }
 0x1ca   : > { %2727 = vrot.lane.b32.xlu2 %v2452_v17, %s3602_s20  ;;  %v2489_v17 = vmax.f32 %v2473_v37, %v4560_v1  ;;  %v1914_v61 = vadd.f32 %v1898_v51, %v1881_v50  ;;  %v1801_v47 = vmul.f32 %v3460_v56, %v4627_v8  ;;  %v1932_v50 = vmul.f32 %v4751_v10, %v4572_v3  ;;  %v3462_v51 = vld [vmem:[#allocation2 + $0x9d] sm:$0xff] }
 0x1cb   : > { %v2044_v62 = vadd.f32 %v2028_v45, %v2011_v55  ;;  %v1979_v1 = vadd.f32 %v1963_v33, %v1946_v31  ;;  %v1882_v7 = vadd.f32 %v1866_v43, %v1849_v63  ;;  %v3461_v55 = vld [vmem:[#allocation2 + $0x9c] sm:$0xff] }
 0x1cc   : > { %v1947_v2 = vadd.f32 %v1931_v53, %v1914_v61  ;;  %v1997_v0 = vmul.f32 %v3461_v55, %v4782_v32  ;;  %v1867_v45 = vmul.f32 %v3461_v55, %v4596_v35  ;;  %v2030_v53 = vmul.f32 %v3462_v51, %v4798_v46 }
 0x1cd   : > { %v2427_v24 = vpop.f32.mrf.mxu3  ;;  %v2012_v11 = vadd.f32 %v1996_v58, %v1979_v1  ;;  %v1803_v55 = vmul.f32 %v4627_v8, %v4614_v15 }
 0x1ce   : > { %v2428_v41 = vadd.f32 %v4694_v48, %v2427_v24  ;;  %v2029_v24 = vmul.f32 %v3459_v60, %v4798_v46 }
 0x1cf   : > { %3305 = vmatmul.msk.f32.gmra.mxu1 %vm802_vm1, %v2488_v40  ;;  %3267 = vmatmul.msk.f32.gmra.mxu2 %vm802_vm1, %v2043_v54  ;;  %v3458_v40 = vld [vmem:[#allocation2 + $0x9b] sm:$0xff] }
 0x1d0   : > { %v2453_v18 = vmax.f32 %v2428_v41, 0.0  ;;  %v1964_v54 = vmul.f32 %v3458_v40, %v4773_v23  ;;  %v1834_v52 = vmul.f32 %v3458_v40, %v4512_v12  ;;  %v2045_v41 = vadd.f32 %v2029_v24, %v2012_v11  ;;  %v3464_v11 = vld [vmem:[#allocation2 + $0xac] sm:$0xff] }
 0x1d1   : > { %v1933_v40 = vmul.f32 %v4751_v10, %v4614_v15 }
 0x1d2   : > { %2729 = vrot.lane.b32.xlu1 %v2453_v18, %s3602_s20  ;;  %v1980_v44 = vadd.f32 %v1964_v54, %v1947_v2  ;;  %v1899_v18 = vmul.f32 %v3459_v60, %v4739_v13  ;;  %v1850_v4 = vadd.f32 %v1834_v52, %v1801_v47  ;;  %v1900_v2 = vmul.f32 %v3462_v51, %v4739_v13  ;;  %v3465_v52 = vld [vmem:[#allocation2 + $0xb3] sm:$0xff] }
 0x1d3   : > { %v5043_v39 = vpop.f32.mrf.mxu1  ;;  %v1802_v54 = vmul.f32 %v4627_v8, %v4572_v3 }
 0x1d4   : > { %v2013_v31 = vadd.f32 %v1997_v0, %v1980_v44  ;;  %v1883_v58 = vadd.f32 %v1867_v45, %v1850_v4  ;;  %v1836_v0 = vmul.f32 %v3465_v52, %v4512_v12 }
 0x1d6   : > { %v2046_v61 = vadd.f32 %v2030_v53, %v2013_v31  ;;  %v1916_v24 = vadd.f32 %v1900_v2, %v1883_v58  ;;  %v3466_v53 = vld [vmem:[#allocation2 + $0xb4] sm:$0xff] }
 0x1d7   : > { %3306 = vmatmul.msk.f32.gmra.mxu1 %vm802_vm1, %v2489_v17  ;;  %3268 = vmatmul.msk.f32.gmra.mxu2 %vm802_vm1, %v2044_v62  ;;  %v2430_v30 = vpop.f32.mrf.mxu3  ;;  %v1915_v17 = vadd.f32 %v1899_v18, %v1882_v7  ;;  %v1999_v15 = vmul.f32 %v3466_v53, %v4782_v32 }
 0x1d8   : > { %v2431_v5 = vadd.f32 %v4694_v48, %v2430_v30  ;;  %v3463_v30 = vld [vmem:[#allocation2 + $0xab] sm:$0xff]  ;;  %v1949_v47 = vadd.f32 %v1933_v40, %v1916_v24  ;;  %v1902_v40 = vmul.f32 %v4739_v13, %v4635_v57 }
 0x1d9   : > { %v1948_v33 = vadd.f32 %v1932_v50, %v1915_v17  ;;  %v1965_v49 = vmul.f32 %v3463_v30, %v4773_v23  ;;  %v1934_v17 = vmul.f32 %v4751_v10, %v4670_v34  ;;  %v2032_v34 = vmul.f32 %v4798_v46, %v4635_v57 }
 0x1da   : > { %v2454_v20 = vmax.f32 %v2431_v5, 0.0  ;;  %v1998_v5 = vmul.f32 %v3464_v11, %v4782_v32  ;;  %v2033_v57 = vmul.f32 %v4798_v46, %v4711_v19  ;;  %v2034_v19 = vmul.f32 %v4798_v46, %v4753_v38 }
 0x1db   : > { %v2563_v9 = vpop.f32.mrf.mxu1  ;;  %v1981_v60 = vadd.f32 %v1965_v49, %v1948_v33  ;;  %v1869_v33 = vmul.f32 %v3466_v53, %v4596_v35 }
 0x1dc   : > { %v2564_v26 = vadd.f32 %v5060_v27, %v2563_v9  ;;  %2731 = vrot.lane.b32.xlu0 %v2454_v20, %s3602_s20  ;;  %v1835_v9 = vmul.f32 %v3463_v30, %v4512_v12  ;;  %v1868_v20 = vmul.f32 %v3464_v11, %v4596_v35  ;;  %v1967_v30 = vmul.f32 %v4773_v23, %v4605_v29 }
 0x1dd   : > { %v2014_v56 = vadd.f32 %v1998_v5, %v1981_v60  ;;  %v1935_v35 = vmul.f32 %v4751_v10, %v4732_v16  ;;  %v1968_v16 = vmul.f32 %v4773_v23, %v4658_v36 }
 0x1de   : > { %v2611_v37 = vmax.f32 %v2564_v26, 0.0  ;;  %v1966_v26 = vmul.f32 %v3465_v52, %v4773_v23  ;;  %v1851_v44 = vadd.f32 %v1835_v9, %v1802_v54 }
 0x1df   : > { %3269 = vmatmul.msk.f32.gmra.mxu2 %vm802_vm1, %v2045_v41  ;;  %v5561_v41 = vld [vmem:[#allocation19_spill] sm:$0xff] }
 0x1e0   : > { %2771 = vrot.lane.b32.xlu2 %v2611_v37, %s3603_s6  ;;  %v2031_v3 = vmul.f32 %v4798_v46, %v5561_v41  ;;  %v1884_v37 = vadd.f32 %v1868_v20, %v1851_v44  ;;  %v1982_v45 = vadd.f32 %v1966_v26, %v1949_v47  ;;  %v1901_v31 = vmul.f32 %v4739_v13, %v5561_v41 }
 0x1e1   : > { %v5087_v43 = vpop.f32.mrf.mxu3 }
 0x1e2   : > { %v5081_v25 = vpop.f32.mrf.mxu2  ;;  %v2047_v4 = vadd.f32 %v2031_v3, %v2014_v56  ;;  %v1917_v12 = vadd.f32 %v1901_v31, %v1884_v37  ;;  %v2015_v58 = vadd.f32 %v1999_v15, %v1982_v45 }
 0x1e3   : > { %v2566_v62 = vpop.f32.mrf.mxu1 }
 0x1e4   : > { %v2567_v1 = vadd.f32 %v5060_v27, %v2566_v62  ;;  %v1852_v62 = vadd.f32 %v1836_v0, %v1803_v55  ;;  %v2048_v11 = vadd.f32 %v2032_v34, %v2015_v58 }
 0x1e6   : > { %v2612_v63 = vmax.f32 %v2567_v1, 0.0  ;;  %v1885_v49 = vadd.f32 %v1869_v33, %v1852_v62 }
 0x1e7   : > { %3270 = vmatmul.msk.f32.gmra.mxu2 %vm802_vm1, %v2046_v61  ;;  %v1950_v61 = vadd.f32 %v1934_v17, %v1917_v12 }
 0x1e8   : > { %2773 = vrot.lane.b32.xlu2 %v2612_v63, %s3603_s6  ;;  %v1918_v60 = vadd.f32 %v1902_v40, %v1885_v49 }
 0x1e9   : > { %v1983_v5 = vadd.f32 %v1967_v30, %v1950_v61 }
 0x1ea   : > { %v1951_v24 = vadd.f32 %v1935_v35, %v1918_v60 }
 0x1eb   : > { %v2569_v7 = vpop.f32.mrf.mxu1  ;;  %v2436_v8 = vpop.f32.mrf.mxu3 }
 0x1ec   : > { %v5103_v18 = vpop.f32.mrf.mxu2  ;;  %v2570_v50 = vadd.f32 %v5060_v27, %v2569_v7  ;;  %v2437_v1 = vadd.f32 %v4694_v48, %v2436_v8  ;;  %v2000_v48 = vmul.f32 %v4782_v32, %v4622_v6  ;;  %v1984_v20 = vadd.f32 %v1968_v16, %v1951_v24  ;;  %v5151_v7 = vld [vmem:[%s5508_s8] ss:$0 sm:$0xff] }
 0x1ed   : > { %v2001_v6 = vmul.f32 %v4782_v32, %v4681_v42 }
 0x1ee   : > { %v2613_v51 = vmax.f32 %v2570_v50, 0.0  ;;  %v2456_v63 = vmax.f32 %v2437_v1, 0.0  ;;  %v2016_v29 = vadd.f32 %v2000_v48, %v1983_v5 }
 0x1ef   : > { %3271 = vmatmul.msk.f32.gmra.mxu2 %vm802_vm1, %v2047_v4  ;;  %v2017_v52 = vadd.f32 %v2001_v6, %v1984_v20 }
 0x1f0   : > { %2775 = vrot.lane.b32.xlu0 %v2613_v51, %s3603_s6  ;;  %v2049_v10 = vadd.f32 %v2033_v57, %v2016_v29 }
 0x1f1   : > { %v2050_v36 = vadd.f32 %v2034_v19, %v2017_v52 }
 0x1f4   : > { %v2572_v2 = vpop.f32.mrf.mxu1  ;;  %v5123_v54 = vpop.f32.mrf.mxu2 }
 0x1f5   : > { %v2573_v9 = vadd.f32 %v5060_v27, %v2572_v2 }
 0x1f7   : > { %3272 = vmatmul.msk.f32.gmra.mxu2 %vm802_vm1, %v2048_v11  ;;  %v2614_v56 = vmax.f32 %v2573_v9, 0.0 }
 0x1f8   : > { %2735 = vrot.lane.b32.xlu0 %v2456_v63, %s3602_s20 }
 0x1fc   : > { %v2575_v13 = vpop.f32.mrf.mxu1 }
 0x1fd   : > { %v2576_v26 = vadd.f32 %v5060_v27, %v2575_v13 }
 0x1ff   : > { %3273 = vmatmul.msk.f32.gmra.mxu2 %vm802_vm1, %v2049_v10  ;;  %v5137_v47 = vpop.f32.mrf.mxu2  ;;  %v2615_v23 = vmax.f32 %v2576_v26, 0.0 }
 0x200   : > { %2777 = vrot.lane.b32.xlu0 %v2614_v56, %s3603_s6 }
 0x204   : > { %v2578_v44 = vpop.f32.mrf.mxu1 }
 0x205   : > { %v2579_v42 = vadd.f32 %v5060_v27, %v2578_v44 }
 0x207   : > { %3274 = vmatmul.msk.f32.gmra.mxu2 %vm802_vm1, %v2050_v36  ;;  %v2616_v3 = vmax.f32 %v2579_v42, 0.0 }
 0x208   : > { %2779 = vrot.lane.b32.xlu0 %v2615_v23, %s3603_s6 }
 0x20a   : > { %v5145_v41 = vpop.f32.mrf.mxu2 }
 0x20c   : > { %v2581_v32 = vpop.f32.mrf.mxu1 }
 0x20d   : > { %v2582_v0 = vadd.f32 %v5060_v27, %v2581_v32  ;;  %v5184_v32 = vpop.permute.xlu2 %2717 }
 0x20f   : > { %v2617_v17 = vmax.f32 %v2582_v0, 0.0 }
 0x210   : > { %2781 = vrot.lane.b32.xlu0 %v2616_v3, %s3603_s6  ;;  %v2710_v3 = vpop.permute.xlu0 %2709 }
 0x212   : > { %v2124_v38 = vpop.f32.mrf.mxu2 }
 0x213   : > { %v2125_v46 = vadd.f32 %v5151_v7, %v2124_v38 }
 0x214   : > { %v2584_v37 = vpop.f32.mrf.mxu1 }
 0x215   : > { %v2172_v55 = vmax.f32 %v2125_v46, 0.0  ;;  %v2585_v51 = vadd.f32 %v5060_v27, %v2584_v37 }
 0x217   : > { %v2618_v12 = vmax.f32 %v2585_v51, 0.0 }
 0x218   : > { %2643 = vrot.lane.b32.xlu0 %v2172_v55, %s3604_s29 }
 0x21a   : > { %v2127_v50 = vpop.f32.mrf.mxu2 }
 0x21b   : > { %v2128_v4 = vadd.f32 %v5151_v7, %v2127_v50  ;;  %v5190_v50 = vpop.permute.xlu2 %2721 }
 0x21c   : > { %v2587_v45 = vpop.f32.mrf.mxu1 }
 0x21d   : > { %v2173_v31 = vmax.f32 %v2128_v4, 0.0  ;;  %v2588_v33 = vadd.f32 %v5060_v27, %v2587_v45  ;;  %v2963_v4 = vld [vmem:[%s5515_s15 + $0x38] sm:$0xff] }
 0x21e   : > { %2982 = vmatpush.msrb.mxu3 %v2963_v4 }
 0x21f   : > { %2645 = vrot.lane.b32.xlu2 %v2173_v31, %s3604_s29  ;;  %v2619_v2 = vmax.f32 %v2588_v33, 0.0 }
 0x220   : > { %2783 = vrot.lane.b32.xlu0 %v2617_v17, %s3603_s6 }
 0x222   : > { %v2130_v53 = vpop.f32.mrf.mxu2 }
 0x223   : > { %v2131_v15 = vadd.f32 %v5151_v7, %v2130_v53 }
 0x224   : > { %v2590_v8 = vpop.f32.mrf.mxu1  ;;  %v5200_v53 = vpop.permute.xlu2 %2727 }
 0x225   : > { %v2174_v62 = vmax.f32 %v2131_v15, 0.0  ;;  %v2591_v11 = vadd.f32 %v5060_v27, %v2590_v8  ;;  %v1722_v15 = vpop.f32.mrf.mxu0 }
 0x227   : > { %2785 = vrot.lane.b32.xlu2 %v2618_v12, %s3603_s6  ;;  %v2620_v48 = vmax.f32 %v2591_v11, 0.0 }
 0x228   : > { %2647 = vrot.lane.b32.xlu0 %v2174_v62, %s3604_s29 }
 0x22a   : > { %v2133_v58 = vpop.f32.mrf.mxu2 }
 0x22b   : > { %v2134_v61 = vadd.f32 %v5151_v7, %v2133_v58 }
 0x22c   : > { %v2593_v1 = vpop.f32.mrf.mxu1 }
 0x22d   : > { %v2594_v34 = vadd.f32 %v5060_v27, %v2593_v1  ;;  %v2175_v30 = vmax.f32 %v2134_v61, 0.0  ;;  %v2962_v61 = vld [vmem:[%s5515_s15 + $0x30] sm:$0xff]  ;;  %v5212_v1 = vpop.permute.xlu1 %2707 }
 0x22e   : > { %2983 = vmatpush.msrb.mxu3 %v2962_v61 }
 0x22f   : > { %v2621_v49 = vmax.f32 %v2594_v34, 0.0  ;;  %2787 = vrot.lane.b32.xlu2 %v2619_v2, %s3603_s6 }
 0x230   : > { %2649 = vrot.lane.b32.xlu0 %v2175_v30, %s3604_s29  ;;  %v1725_v30 = vpop.f32.mrf.mxu0 }
 0x231   : > { %2791 = vrot.lane.b32.xlu1 %v2621_v49, %s3603_s6 }
 0x232   : > { %v2136_v5 = vpop.f32.mrf.mxu2 }
 0x233   : > { %v2137_v40 = vadd.f32 %v5151_v7, %v2136_v5 }
 0x234   : > { %v2596_v35 = vpop.f32.mrf.mxu1 }
 0x235   : > { %v2176_v63 = vmax.f32 %v2137_v40, 0.0  ;;  %v2597_v16 = vadd.f32 %v5060_v27, %v2596_v35  ;;  %v5218_v5 = vpop.permute.xlu1 %2711  ;;  %v5223_v35 = vld [vmem:[%s5562_s5] ss:$0 sm:$0xff] }
 0x236   : > { %v1723_v4 = vadd.f32 %v5223_v35, %v1722_v15 }
 0x237   : > { %2651 = vrot.lane.b32.xlu2 %v2176_v63, %s3604_s29  ;;  %v2622_v52 = vmax.f32 %v2597_v16, 0.0  ;;  %v3467_v16 = vld [vmem:[%s5511_s11] ss:$0 sm:$0xff] }
 0x238   : > { %2789 = vrot.lane.b32.xlu0 %v2620_v48, %s3603_s6 }
 0x23a   : > { %v2139_v60 = vpop.f32.mrf.mxu2  ;;  %v5206_v58 = vpop.permute.xlu2 %2771 }
 0x23b   : > { %v2140_v29 = vadd.f32 %v5151_v7, %v2139_v60 }
 0x23c   : > { %v2599_v24 = vpop.f32.mrf.mxu1 }
 0x23d   : > { %v2600_v9 = vadd.f32 %v5060_v27, %v2599_v24  ;;  %v2177_v57 = vmax.f32 %v2140_v29, 0.0  ;;  %v1726_v29 = vadd.f32 %v5223_v35, %v1725_v30  ;;  %v5230_v24 = vpop.f32.mrf.mxu0 }
 0x23f   : > { %v2623_v13 = vmax.f32 %v2600_v9, 0.0 }
 0x240   : > { %2653 = vrot.lane.b32.xlu0 %v2177_v57, %s3604_s29  ;;  %v2961_v57 = vld [vmem:[%s5515_s15 + $0x28] sm:$0xff] }
 0x241   : > { %2795 = vrot.lane.b32.xlu1 %v2623_v13, %s3603_s6  ;;  %v1771_v13 = vmax.f32 %v1726_v29, 0.0  ;;  %2984 = vmatpush.msrb.mxu3 %v2961_v57 }
 0x242   : > { %v2142_v10 = vpop.f32.mrf.mxu2  ;;  %v2774_v40 = vpop.permute.xlu2 %2773 }
 0x243   : > { %v2143_v20 = vadd.f32 %v5151_v7, %v2142_v10  ;;  %v2434_v10 = vadd.f32 %v3467_v16, %v5087_v43 }
 0x244   : > { %v2602_v56 = vpop.f32.mrf.mxu1 }
 0x245   : > { %v2178_v6 = vmax.f32 %v2143_v20, 0.0  ;;  %v2603_v38 = vadd.f32 %v5060_v27, %v2602_v56 }
 0x247   : > { %2655 = vrot.lane.b32.xlu2 %v2178_v6, %s3604_s29  ;;  %v2624_v0 = vmax.f32 %v2603_v38, 0.0  ;;  %v1731_v38 = vpop.f32.mrf.mxu0 }
 0x248   : > { %2793 = vrot.lane.b32.xlu0 %v2622_v52, %s3603_s6 }
 0x24a   : > { %v2145_v26 = vpop.f32.mrf.mxu2 }
 0x24b   : > { %v2146_v19 = vadd.f32 %v5151_v7, %v2145_v26  ;;  %v5243_v26 = vpop.permute.xlu1 %2713 }
 0x24c   : > { %v2605_v44 = vpop.f32.mrf.mxu1 }
 0x24d   : > { %v2606_v36 = vadd.f32 %v5060_v27, %v2605_v44  ;;  %v2179_v23 = vmax.f32 %v2146_v19, 0.0 }
 0x24e   : > { %v5197_v31 = vpop.permute.xlu0 %2731 }
 0x24f   : > { %v2625_v42 = vmax.f32 %v2606_v36, 0.0  ;;  %2657 = vrot.lane.b32.xlu1 %v2179_v23, %s3604_s29  ;;  %v2455_v23 = vmax.f32 %v2434_v10, 0.0 }
 0x251   : > { %2799 = vrot.lane.b32.xlu0 %v2625_v42, %s3603_s6  ;;  %v2439_v42 = vpop.f32.mrf.mxu3 }
 0x252   : > { %v2148_v46 = vpop.f32.mrf.mxu2 }
 0x253   : > { %v2149_v37 = vadd.f32 %v5151_v7, %v2148_v46 }
 0x255   : > { %v2180_v55 = vmax.f32 %v2149_v37, 0.0 }
 0x257   : > { %2659 = vrot.lane.b32.xlu2 %v2180_v55, %s3604_s29 }
 0x259   : > { %2797 = vrot.lane.b32.xlu0 %v2624_v0, %s3603_s6 }
 0x25a   : > { %v2151_v45 = vpop.f32.mrf.mxu2 }
 0x25b   : > { %v2152_v17 = vadd.f32 %v5151_v7, %v2151_v45 }
 0x25d   : > { %v2181_v51 = vmax.f32 %v2152_v17, 0.0  ;;  %v2716_v17 = vpop.permute.xlu1 %2715 }
 0x25f   : > { %2661 = vrot.lane.b32.xlu1 %v2181_v51, %s3604_s29 }
 0x262   : > { %v2154_v8 = vpop.f32.mrf.mxu2  ;;  %v5203_v12 = vpop.permute.xlu0 %2775 }
 0x263   : > { %v2155_v62 = vadd.f32 %v5151_v7, %v2154_v8  ;;  %v2960_v8 = vld [vmem:[%s5515_s15 + $0x20] sm:$0xff] }
 0x264   : > { %2985 = vmatpush.msrb.mxu3 %v2960_v8 }
 0x265   : > { %v2182_v33 = vmax.f32 %v2155_v62, 0.0  ;;  %v1770_v62 = vmax.f32 %v1723_v4, 0.0 }
 0x267   : > { %2663 = vrot.lane.b32.xlu1 %v2182_v33, %s3604_s29  ;;  %v1734_v33 = vpop.f32.mrf.mxu0 }
 0x26a   : > { %v2157_v34 = vpop.f32.mrf.mxu2  ;;  %v5214_v2 = vpop.permute.xlu0 %2735 }
 0x26b   : > { %v2158_v49 = vadd.f32 %v5151_v7, %v2157_v34 }
 0x26d   : > { %v2183_v11 = vmax.f32 %v2158_v49, 0.0 }
 0x26f   : > { %2665 = vrot.lane.b32.xlu2 %v2183_v11, %s3604_s29  ;;  %v1735_v11 = vadd.f32 %v5223_v35, %v1734_v33 }
 0x271   : > { %v1774_v57 = vmax.f32 %v1735_v11, 0.0 }
 0x272   : > { %v2160_v63 = vpop.f32.mrf.mxu2  ;;  %v5225_v48 = vpop.permute.xlu0 %2777 }
 0x273   : > { %v2161_v60 = vadd.f32 %v5151_v7, %v2160_v63  ;;  %v2720_v63 = vpop.permute.xlu1 %2719 }
 0x275   : > { %v2184_v9 = vmax.f32 %v2161_v60, 0.0 }
 0x277   : > { %2667 = vrot.lane.b32.xlu1 %v2184_v9, %s3604_s29  ;;  %v2608_v9 = vpop.f32.mrf.mxu1 }
 0x279   : > { %v2646_v20 = vpop.permute.xlu2 %2645 }
 0x27a   : > { %v2821_v56 = vsel %vm2819_vm5, %v1771_v13, %v2646_v20  ;;  %v2163_v6 = vpop.f32.mrf.mxu2  ;;  %v2780_v52 = vpop.permute.xlu0 %2779 }
 0x27b   : > { %v2837_v19 = vsel %vm802_vm1, %v2821_v56, %v2710_v3  ;;  %v2164_v44 = vadd.f32 %v5151_v7, %v2163_v6  ;;  %v2440_v3 = vadd.f32 %v3467_v16, %v2439_v42  ;;  %v1729_v56 = vadd.f32 %v5223_v35, %v5230_v24  ;;  %v2959_v24 = vld [vmem:[%s5515_s15 + $0x18] sm:$0xff] }
 0x27c   : > { %v5248_v36 = vsel %vm2852_vm6, %v2837_v19, %v2774_v40  ;;  %v5291_v19 = vld [vmem:[%s5514_s14] sm:$0xff]  ;;  %2986 = vmatpush.msrb.mxu3 %v2959_v24 }
 0x27d   : > { %2870 = vst.msk [vmem:[%s5250_s27 + $0x8] sm:$0xff] %vm672_vm0, %v5248_v36  ;;  %v2185_v43 = vmax.f32 %v2164_v44, 0.0  ;;  %v2457_v45 = vmax.f32 %v2440_v3, 0.0  ;;  %v2887_v44 = vrot.slane %v5291_v19, 1 }
 0x27f   : > { %2733 = vrot.lane.b32.xlu1 %v2455_v23, %s3602_s20  ;;  %2669 = vrot.lane.b32.xlu2 %v2185_v43, %s3604_s29  ;;  %v2894_v23 = vperm.slane %v5291_v19, 0  ;;  %v2895_v42 = vperm.slane %v2887_v44, 0 }
 0x281   : > { %v5257_v46 = vpop.permute.xlu2 %2785 }
 0x282   : > { %v2166_v37 = vpop.f32.mrf.mxu2  ;;  %v5259_v55 = vpop.permute.xlu0 %2781 }
 0x283   : > { %v2167_v0 = vadd.f32 %v5151_v7, %v2166_v37 }
 0x285   : > { %v2186_v51 = vmax.f32 %v2167_v0, 0.0  ;;  %v1741_v0 = vadd.f32 %v5223_v35, %v4928_v21 }
 0x287   : > { %2737 = vrot.lane.b32.xlu1 %v2457_v45, %s3602_s20  ;;  %2671 = vrot.lane.b32.xlu2 %v2186_v51, %s3604_s29  ;;  %v2889_v51 = vrot.slane %v5291_v19, 3  ;;  %s3318_s20 = sshll.u32 %s3728_s1, 7  ;;  %s3548_s1 = scalar_lea.hbm %s5518_s18, 256 }
 0x289   : > { %v5268_v61 = vpop.permute.xlu2 %2787 }
 0x28a   : > { %v2169_v34 = vpop.f32.mrf.mxu2  ;;  %v2644_v30 = vpop.permute.xlu0 %2643 }
 0x28b   : > { %v2170_v15 = vadd.f32 %v5151_v7, %v2169_v34  ;;  %v2820_v49 = vsel %vm2819_vm5, %v1770_v62, %v2644_v30  ;;  %v2609_v7 = vadd.f32 %v5060_v27, %v2608_v9  ;;  %v2888_v27 = vrot.slane %v5291_v19, 2 }
 0x28c   : > { %v2836_v40 = vsel %vm802_vm1, %v2820_v49, %v5212_v1  ;;  %v1776_v30 = vmax.f32 %v1741_v0, 0.0 }
 0x28d   : > { %v2187_v60 = vmax.f32 %v2170_v15, 0.0  ;;  %v2853_v29 = vsel %vm2852_vm6, %v2836_v40, %v5206_v58  ;;  %v5286_v58 = vpop.permute.xlu1 %2723  ;;  %v2626_v6 = vmax.f32 %v2609_v7, 0.0  ;;  %v2896_v43 = vperm.slane %v2888_v27, 0 }
 0x28e   : > { %2869 = vst.msk [vmem:[%s5250_s27] sm:$0xff] %vm672_vm0, %v2853_v29  ;;  %v2910_v4 = vmul.f32 %v2894_v23, %v2853_v29  ;;  %v2911_v7 = vmul.f32 %v2894_v23, %v5248_v36  ;;  %v2890_v23 = vrot.slane %v5291_v19, 4 }
 0x28f   : > { %2673 = vrot.lane.b32.xlu2 %v2187_v60, %s3604_s29 }
 0x290   : > { %v2926_v21 = vsel %vm672_vm0, %v2910_v4, 0.0  ;;  %v2941_v27 = vsel %vm672_vm0, %v2911_v7, 0.0  ;;  %v2898_v0 = vperm.slane %v2890_v23, 0 }
 0x291   : > { %v2652_v13 = vpop.permute.xlu2 %2651 }
 0x292   : > { %v2824_v16 = vsel %vm2819_vm5, %v1774_v57, %v2652_v13  ;;  %v2784_v10 = vpop.permute.xlu0 %2783 }
 0x293   : > { %v2840_v1 = vsel %vm802_vm1, %v2824_v16, %v2716_v17  ;;  %v1732_v17 = vadd.f32 %v5223_v35, %v1731_v38  ;;  %v2897_v38 = vperm.slane %v2889_v51, 0 }
 0x294   : > { %v2857_v20 = vsel %vm2852_vm6, %v2840_v1, %v2780_v52  ;;  %v1772_v52 = vmax.f32 %v1729_v56, 0.0 }
 0x295   : > { %2873 = vst.msk [vmem:[%s5250_s27 + $0x20] sm:$0xff] %vm672_vm0, %v2857_v20  ;;  %v2914_v62 = vmul.f32 %v2896_v43, %v2857_v20  ;;  %v5313_v34 = vpop.permute.xlu1 %2725 }
 0x297   : > { %2801 = vrot.lane.b32.xlu2 %v2626_v6, %s3603_s6  ;;  %v2929_v40 = vsel %vm672_vm0, %v2914_v62, 0.0  ;;  %s3098_s6 = scalar_lea.hbm %s5518_s18, %s3318_s20 }
 0x298   : > { %s3101_s26 = sshll.u32 %s3098_s6, 4  ;;  %s3102_s26 = int_to_ptr.hbm [resolvable:$true] %s3101_s26 }
 0x299   : > { %s3542_s24 = sshra.s32 %s3102_s26, 4  ;;  %s3543_s24 = int_to_ptr.hbm [resolvable:$true] %s3542_s24 }
 0x29a   : > { %v2648_v3 = vpop.permute.xlu0 %2647  ;;  %s3544_s2 = scalar_lea.hbm %s3543_s24, 128  ;;  %p3549_p3 = scmp.lt.s32.totalorder %s3543_s24, %s5518_s18 }
 0x29b   : > { %v2822_v37 = vsel %vm2819_vm5, %v1772_v52, %v2648_v3  ;;  %v1738_v52 = vadd.f32 %v5223_v35, %v4897_v22  ;;  %p3545_p0 = scmp.ne.s32.totalorder %s3543_s24, %s3544_s2  ;;  %p3550_p4 = scmp.lt.s32.totalorder %s3548_s1, %s3544_s2 }
 0x29c   : > { %v2838_v45 = vsel %vm802_vm1, %v2822_v37, %v5218_v5  ;;  %v1773_v5 = vmax.f32 %v1732_v17, 0.0 }
 0x29d   : > { %v2855_v8 = vsel %vm2852_vm6, %v2838_v45, %v5203_v12  ;;  %v1775_v37 = vmax.f32 %v1738_v52, 0.0  ;;  %p3546_p1 = pnand %p3545_p0, %p3745_p5  ;;  %p3551_p7 = por %p3550_p4, %p3549_p3 }
 0x29e   : > { %2871 = vst.msk [vmem:[%s5250_s27 + $0x10] sm:$0xff] %vm672_vm0, %v2855_v8  ;;  %v2912_v33 = vmul.f32 %v2895_v42, %v2855_v8 }
 0x29f   : > { %p3547_p2 = pneg %p3546_p1 }
 0x2a0   : > { %v2927_v15 = vsel %vm672_vm0, %v2912_v33, 0.0 }
 0x2a1   : > { %v2656_v49 = vpop.permute.xlu2 %2655  ;;  %v2928_v11 = vadd.f32 %v2927_v15, %v2926_v21  ;;  %p3552_p8 = pnand %p3551_p7, %p3547_p2 }
 0x2a2   : > { %v2826_v12 = vsel %vm2819_vm5, %v1776_v30, %v2656_v49  ;;  %v2650_v60 = vpop.permute.xlu0 %2649 }
 0x2a3   : > { %v2842_v29 = vsel %vm802_vm1, %v2826_v12, %v2720_v63  ;;  %v2930_v9 = vadd.f32 %v2929_v40, %v2928_v11  ;;  %v2823_v57 = vsel %vm2819_vm5, %v1773_v5, %v2650_v60  ;;  %v2730_v63 = vpop.permute.xlu1 %2729  ;;  %v1756_v12 = vadd.f32 %v5223_v35, %v5081_v25 }
 0x2a4   : > { %v2859_v13 = vsel %vm2852_vm6, %v2842_v29, %v2784_v10  ;;  %v2839_v16 = vsel %vm802_vm1, %v2823_v57, %v5243_v26  ;;  %v2958_v26 = vld [vmem:[%s5515_s15 + $0x10] sm:$0xff] }
 0x2a5   : > { %2875 = vst.msk [vmem:[%s5250_s27 + $0x30] sm:$0xff] %vm672_vm0, %v2859_v13  ;;  %v2916_v1 = vmul.f32 %v2897_v38, %v2859_v13  ;;  %v2856_v20 = vsel %vm2852_vm6, %v2839_v16, %v5225_v48  ;;  %2987 = vmatpush.msrb.mxu3 %v2958_v26  ;;  %v1747_v48 = vadd.f32 %v5223_v35, %v4993_v14  ;;  %v1781_v57 = vmax.f32 %v1756_v12, 0.0 }
 0x2a6   : > { %2872 = vst.msk [vmem:[%s5250_s27 + $0x18] sm:$0xff] %vm672_vm0, %v2856_v20  ;;  %v2913_v56 = vmul.f32 %v2895_v42, %v2856_v20  ;;  %v2891_v20 = vrot.slane %v5291_v19, 5 }
 0x2a7   : > { %v2931_v6 = vsel %vm672_vm0, %v2916_v1, 0.0  ;;  %v1778_v3 = vmax.f32 %v1747_v48, 0.0 }
 0x2a8   : > { %v2942_v36 = vsel %vm672_vm0, %v2913_v56, 0.0  ;;  %v2932_v10 = vadd.f32 %v2931_v6, %v2930_v9 }
 0x2a9   : > { %v2943_v44 = vadd.f32 %v2942_v36, %v2941_v27 }
 0x2aa   : > { %v2790_v24 = vpop.permute.xlu0 %2789 }
 0x2ab   : > { %v5342_v42 = vpop.permute.xlu1 %2791 }
 0x2b1   : > { %v2660_v4 = vpop.permute.xlu2 %2659 }
 0x2b2   : > { %v2828_v45 = vsel %vm2819_vm5, %v1778_v3, %v2660_v4  ;;  %v2654_v17 = vpop.permute.xlu0 %2653 }
 0x2b3   : > { %v2844_v51 = vsel %vm802_vm1, %v2828_v45, %v5286_v58  ;;  %v2825_v14 = vsel %vm2819_vm5, %v1775_v37, %v2654_v17  ;;  %v5359_v21 = vpop.permute.xlu1 %2795 }
 0x2b4   : > { %v2861_v22 = vsel %vm2852_vm6, %v2844_v51, %v5268_v61  ;;  %v2841_v8 = vsel %vm802_vm1, %v2825_v14, %v5184_v32  ;;  %v2957_v61 = vld [vmem:[%s5515_s15 + $0x8] sm:$0xff] }
 0x2b5   : > { %2877 = vst.msk [vmem:[%s5250_s27 + $0x40] sm:$0xff] %vm672_vm0, %v2861_v22  ;;  %v2918_v62 = vmul.f32 %v2898_v0, %v2861_v22  ;;  %v2858_v33 = vsel %vm2852_vm6, %v2841_v8, %v5259_v55  ;;  %2988 = vmatpush.msrb.mxu3 %v2957_v61  ;;  %v1744_v55 = vadd.f32 %v5223_v35, %v4959_v28  ;;  %v2956_v28 = vld [vmem:[%s5515_s15] sm:$0xff] }
 0x2b6   : > { %2874 = vst.msk [vmem:[%s5250_s27 + $0x28] sm:$0xff] %vm672_vm0, %v2858_v33  ;;  %v2915_v30 = vmul.f32 %v2896_v43, %v2858_v33 }
 0x2b7   : > { %v2933_v58 = vsel %vm672_vm0, %v2918_v62, 0.0  ;;  %v1777_v49 = vmax.f32 %v1744_v55, 0.0  ;;  %2989 = vmatpush.msrb.mxu3 %v2956_v28  ;;  %v1759_v62 = vadd.f32 %v5223_v35, %v5103_v18 }
 0x2b8   : > { %v2934_v15 = vadd.f32 %v2933_v58, %v2932_v10  ;;  %v2944_v32 = vsel %vm672_vm0, %v2915_v30, 0.0  ;;  %v2893_v30 = vrot.slane %v5291_v19, 7  ;;  %v2892_v58 = vrot.slane %v5291_v19, 6 }
 0x2b9   : > { %v2945_v5 = vadd.f32 %v2944_v32, %v2943_v44  ;;  %v1782_v61 = vmax.f32 %v1759_v62, 0.0 }
 0x2ba   : > { %v2794_v25 = vpop.permute.xlu0 %2793 }
 0x2c1   : > { %v2658_v11 = vpop.permute.xlu1 %2657 }
 0x2c2   : > { %v2827_v43 = vsel %vm2819_vm5, %v1777_v49, %v2658_v11 }
 0x2c3   : > { %v2843_v40 = vsel %vm802_vm1, %v2827_v43, %v5190_v50 }
 0x2c4   : > { %v2860_v60 = vsel %vm2852_vm6, %v2843_v40, %v5257_v46  ;;  %v1750_v46 = vadd.f32 %v5223_v35, %v5015_v59  ;;  %v2899_v59 = vperm.slane %v2891_v20, 0 }
 0x2c5   : > { %2876 = vst.msk [vmem:[%s5250_s27 + $0x38] sm:$0xff] %vm672_vm0, %v2860_v60  ;;  %v2917_v29 = vmul.f32 %v2897_v38, %v2860_v60 }
 0x2c6   : > { %v1779_v1 = vmax.f32 %v1750_v46, 0.0 }
 0x2c7   : > { %v2946_v9 = vsel %vm672_vm0, %v2917_v29, 0.0 }
 0x2c8   : > { %v2947_v7 = vadd.f32 %v2946_v9, %v2945_v5  ;;  %v2900_v5 = vperm.slane %v2892_v58, 0 }
 0x2c9   : > { %v2666_v50 = vpop.permute.xlu2 %2665 }
 0x2ca   : > { %v2831_v13 = vsel %vm2819_vm5, %v1781_v57, %v2666_v50  ;;  %v1768_v57 = vadd.f32 %v5223_v35, %v5145_v41 }
 0x2cb   : > { %v2847_v16 = vsel %vm802_vm1, %v2831_v13, %v2730_v63  ;;  %v1753_v63 = vadd.f32 %v5223_v35, %v5043_v39  ;;  %v1765_v39 = vadd.f32 %v5223_v35, %v5137_v47  ;;  %v3000_v47 = vld [vmem:[%s5517_s17 + $0x8] sm:$0xff] }
 0x2cc   : > { %v2864_v38 = vsel %vm2852_vm6, %v2847_v16, %v2794_v25  ;;  %3021 = vmatpush.msra.mxu3 %v3000_v47  ;;  %v1785_v25 = vmax.f32 %v1768_v57, 0.0 }
 0x2cd   : > { %2880 = vst.msk [vmem:[%s5250_s27 + $0x58] sm:$0xff] %vm672_vm0, %v2864_v38  ;;  %v1780_v26 = vmax.f32 %v1753_v63, 0.0  ;;  %v2921_v44 = vmul.f32 %v2899_v59, %v2864_v38  ;;  %v1784_v51 = vmax.f32 %v1765_v39, 0.0  ;;  %v3397_v63 = vld [vmem:[%s5516_s16] ss:$0 sm:$0xff] }
 0x2cf   : > { %v2950_v4 = vsel %vm672_vm0, %v2921_v44, 0.0 }
 0x2d1   : > { %v2662_v56 = vpop.permute.xlu1 %2661 }
 0x2d2   : > { %v2829_v6 = vsel %vm2819_vm5, %v1779_v1, %v2662_v56 }
 0x2d3   : > { %v2845_v27 = vsel %vm802_vm1, %v2829_v6, %v5313_v34 }
 0x2d4   : > { %v2862_v36 = vsel %vm2852_vm6, %v2845_v27, %v2790_v24  ;;  %v2999_v27 = vld [vmem:[%s5517_s17] sm:$0xff] }
 0x2d5   : > { %2878 = vst.msk [vmem:[%s5250_s27 + $0x48] sm:$0xff] %vm672_vm0, %v2862_v36  ;;  %v2919_v10 = vmul.f32 %v2898_v0, %v2862_v36  ;;  %3022 = vmatpush.msra.mxu3 %v2999_v27 }
 0x2d7   : > { %v2948_v48 = vsel %vm672_vm0, %v2919_v10, 0.0 }
 0x2d8   : > { %v2949_v37 = vadd.f32 %v2948_v48, %v2947_v7 }
 0x2d9   : > { %v2664_v52 = vpop.permute.xlu1 %2663  ;;  %v2670_v23 = vpop.permute.xlu2 %2669 }
 0x2da   : > { %v2830_v3 = vsel %vm2819_vm5, %v1780_v26, %v2664_v52  ;;  %v2951_v45 = vadd.f32 %v2950_v4, %v2949_v37 }
 0x2db   : > { %v2846_v34 = vsel %vm802_vm1, %v2830_v3, %v5200_v53 }
 0x2dc   : > { %v2863_v24 = vsel %vm2852_vm6, %v2846_v34, %v5342_v42  ;;  %v2800_v42 = vpop.permute.xlu0 %2799 }
 0x2dd   : > { %2879 = vst.msk [vmem:[%s5250_s27 + $0x50] sm:$0xff] %vm672_vm0, %v2863_v24  ;;  %v2920_v0 = vmul.f32 %v2899_v59, %v2863_v24 }
 0x2df   : > { %v2935_v17 = vsel %vm672_vm0, %v2920_v0, 0.0 }
 0x2e0   : > { %v2936_v14 = vadd.f32 %v2935_v17, %v2934_v15  ;;  %v2901_v15 = vperm.slane %v2893_v30, 0 }
 0x2e1   : > { %v2672_v22 = vpop.permute.xlu2 %2671 }
 0x2e2   : > { %v2834_v53 = vsel %vm2819_vm5, %v1784_v51, %v2672_v22 }
 0x2e3   : > { %v2850_v8 = vsel %vm802_vm1, %v2834_v53, %v5214_v2  ;;  %v1762_v2 = vadd.f32 %v5223_v35, %v5123_v54 }
 0x2e4   : > { %v2867_v33 = vsel %vm2852_vm6, %v2850_v8, %v2800_v42  ;;  %v2798_v9 = vpop.permute.xlu0 %2797 }
 0x2e5   : > { %2883 = vst.msk [vmem:[%s5250_s27 + $0x70] sm:$0xff] %vm672_vm0, %v2867_v33  ;;  %v2924_v11 = vmul.f32 %v2901_v15, %v2867_v33  ;;  %v1783_v43 = vmax.f32 %v1762_v2, 0.0 }
 0x2e7   : > { %v2833_v29 = vsel %vm2819_vm5, %v1783_v43, %v2670_v23  ;;  %v2939_v54 = vsel %vm672_vm0, %v2924_v11, 0.0 }
 0x2e9   : > { %v2668_v32 = vpop.permute.xlu1 %2667  ;;  %v2674_v12 = vpop.permute.xlu2 %2673 }
 0x2ea   : > { %v2832_v55 = vsel %vm2819_vm5, %v1782_v61, %v2668_v32  ;;  %v2835_v46 = vsel %vm2819_vm5, %v1785_v25, %v2674_v12 }
 0x2eb   : > { %v2848_v18 = vsel %vm802_vm1, %v2832_v55, %v5197_v31 }
 0x2ec   : > { %v2865_v49 = vsel %vm2852_vm6, %v2848_v18, %v5359_v21 }
 0x2ed   : > { %2881 = vst.msk [vmem:[%s5250_s27 + $0x60] sm:$0xff] %vm672_vm0, %v2865_v49  ;;  %v2922_v19 = vmul.f32 %v2900_v5, %v2865_v49 }
 0x2ef   : > { %v2937_v40 = vsel %vm672_vm0, %v2922_v19, 0.0 }
 0x2f0   : > { %v2938_v60 = vadd.f32 %v2937_v40, %v2936_v14 }
 0x2f1   : > { %v2734_v28 = vpop.permute.xlu1 %2733  ;;  %v2802_v1 = vpop.permute.xlu2 %2801 }
 0x2f2   : > { %v2849_v31 = vsel %vm802_vm1, %v2833_v29, %v2734_v28  ;;  %v2940_v21 = vadd.f32 %v2939_v54, %v2938_v60 }
 0x2f3   : > { %v2866_v7 = vsel %vm2852_vm6, %v2849_v31, %v2798_v9 }
 0x2f4   : > { %2882 = vst.msk [vmem:[%s5250_s27 + $0x68] sm:$0xff] %vm672_vm0, %v2866_v7  ;;  %v2923_v50 = vmul.f32 %v2900_v5, %v2866_v7  ;;  %3307 = vmatmul.msk.f32.vlgmr.msrb.gmra.mxu3 %vm672_vm0, %v2940_v21 }
 0x2f6   : > { %v2952_v13 = vsel %vm672_vm0, %v2923_v50, 0.0 }
 0x2f7   : > { %v2953_v16 = vadd.f32 %v2952_v13, %v2951_v45 }
 0x2f9   : > { %v2738_v38 = vpop.permute.xlu1 %2737 }
 0x2fa   : > { %v2851_v20 = vsel %vm802_vm1, %v2835_v46, %v2738_v38 }
 0x2fb   : > { %v2868_v56 = vsel %vm2852_vm6, %v2851_v20, %v2802_v1 }
 0x2fc   : > { %2884 = vst.msk [vmem:[%s5250_s27 + $0x78] sm:$0xff] %vm672_vm0, %v2868_v56  ;;  %v2925_v41 = vmul.f32 %v2901_v15, %v2868_v56 }
 0x2fe   : > { %v2954_v35 = vsel %vm672_vm0, %v2925_v41, 0.0 }
 0x2ff   : > { %v2955_v6 = vadd.f32 %v2954_v35, %v2953_v16 }
 0x301   : > { %3308 = vmatmul.msk.f32.gmra.mxu3 %vm672_vm0, %v2955_v6 }
 0x377   : > { %v2991_v36 = vpop.f32.mrf.mxu3 }
 0x378   : > { %v2992_v59 = vadd.f32 %v3397_v63, %v2991_v36 }
 0x37a   : > { %v2997_v10 = vmax.f32 %v2992_v59, 0.0 }
 0x37c   : > { %3309 = vmatmul.msk.f32.vlgmr.msra.gmra.mxu3 %vm2819_vm5, %v2997_v10 }
 0x384   : > { %v2994_v26 = vpop.f32.mrf.mxu3 }
 0x385   : > { %v2995_v44 = vadd.f32 %v3397_v63, %v2994_v26 }
 0x387   : > { %v2998_v48 = vmax.f32 %v2995_v44, 0.0 }
 0x389   : > { %3310 = vmatmul.msk.f32.gmra.mxu3 %vm2819_vm5, %v2998_v48 }
 0x3ff   : > { %v3024_v52 = vpop.f32.mrf.mxu3 }
 0x400   : > { %v3031_v23 = vsel %vm3030_vm7, %v3024_v52, -inf }
 0x401   : > { %3032 = vmax.xlane.f32.xlu0 %v3031_v23 }
 0x40c   : > { %v3027_v3 = vpop.f32.mrf.mxu3 }
 0x40d   : > { %v3034_v34 = vsel %vm3030_vm7, %v3027_v3, -inf }
 0x40e   : > { %3035 = vmax.xlane.f32.xlu1 %v3034_v34 }
 0x474   : > { %v3033_v39 = vpop.xlane.xlu0 %3032 }
 0x475   : > { %v3037_v24 = vsub.f32 %v3024_v52, %v3033_v39 }
 0x477   : > { %v3039_v37 = vmul.f32 1.442695, %v3037_v24 }
 0x479   : > { %3398 = vpow2.f32 %v3039_v37 }
 0x47f   : > { %v3399_v0 = vpop.eup %3398 }
 0x480   : > { %v3043_v4 = vsel %vm3030_vm7, %v3399_v0, 0.0 }
 0x481   : > { %3044 = vadd.xlane.f32.xlu2 %v3043_v4  ;;  %v3036_v45 = vpop.xlane.xlu1 %3035 }
 0x482   : > { %v3038_v17 = vsub.f32 %v3027_v3, %v3036_v45 }
 0x484   : > { %v3041_v51 = vmul.f32 1.442695, %v3038_v17 }
 0x486   : > { %3400 = vpow2.f32 %v3041_v51 }
 0x48c   : > { %v3401_v14 = vpop.eup %3400 }
 0x48d   : > { %v3046_v22 = vsel %vm3030_vm7, %v3401_v14, 0.0 }
 0x48e   : > { %3047 = vadd.xlane.f32.xlu2 %v3046_v22 }
 0x48f   : > { %3555 = shalt.err (!%p3552_p8)
}
 0x490   : > { %s3605_s28 = smov 128   ;;  %s3606_s20 = smov 8  }
 0x491   : > { %3335 = dma.vmem_to_hbm [thread:$0]  (%p3745_p5), %s3100_s0, 2048, %s3102_s26, %s3082_s22, %s3605_s28, %s3605_s28, %s3606_s20  }
 0x492   : > { %s3317_s4 = sshll.u32 %s3794_s23, 4 }
 0x493   : > { %s643_s3 = scalar_lea.vmem %s5519_s19, %s3317_s4 }
 0x4f4   : > { %v3045_v47 = vpop.xlane.xlu2 %3044 }
 0x4f5   : > { %3402 = vrcp.f32 %v3045_v47  ;;  %v3060_v62 = vand.u32 2147483648, %v3045_v47  ;;  %v3058_v30 = vand.u32 2147483647, %v3045_v47  ;;  %vm3054_vm9 = vweird.f32 %v3045_v47 }
 0x4f7   : > { %v3061_v15 = vor.u32 1.1754944e-38, %v3060_v62  ;;  %vm3059_vm11 = vcmp.eq.f32.partialorder %v3058_v30, 8.507059e+37 }
 0x4fb   : > { %v3403_v53 = vpop.eup %3402 }
 0x4fc   : > { %v3050_v42 = vmul.f32 %v3403_v53, %v3045_v47  ;;  %vm3055_vm8 = vweird.f32 %v3403_v53 }
 0x4fd   : > { %vm3056_vm10 = vmor %vm3054_vm9, %vm3055_vm8 }
 0x4fe   : > { %v3051_v8 = vsub.f32 1.0, %v3050_v42 }
 0x500   : > { %v3052_v33 = vmul.f32 %v3403_v53, %v3051_v8 }
 0x501   : > { %v3048_v58 = vpop.xlane.xlu2 %3047 }
 0x502   : > { %v3053_v61 = vadd.f32 %v3403_v53, %v3052_v33  ;;  %3404 = vrcp.f32 %v3048_v58  ;;  %v3075_v11 = vand.u32 2147483648, %v3048_v58  ;;  %v3073_v43 = vand.u32 2147483647, %v3048_v58 }
 0x503   : > { %vm3069_vm13 = vweird.f32 %v3048_v58 }
 0x504   : > { %v3057_v32 = vsel %vm3056_vm10, %v3403_v53, %v3053_v61  ;;  %v3076_v12 = vor.u32 1.1754944e-38, %v3075_v11  ;;  %vm3074_vm15 = vcmp.eq.f32.partialorder %v3073_v43, 8.507059e+37 }
 0x505   : > { %v3062_v5 = vsel %vm3059_vm11, %v3061_v15, %v3057_v32 }
 0x506   : > { %v3063_v55 = vmul.f32 %v3399_v0, %v3062_v5 }
 0x508   : > { %v3405_v2 = vpop.eup %3404  ;;  %3079 = vst.msk [vmem:[%s643_s3] sm:$0xff] %vm3030_vm7, %v3063_v55 }
 0x509   : > { %v3065_v18 = vmul.f32 %v3405_v2, %v3048_v58  ;;  %vm3070_vm12 = vweird.f32 %v3405_v2 }
 0x50a   : > { %vm3071_vm14 = vmor %vm3069_vm13, %vm3070_vm12 }
 0x50b   : > { %v3066_v49 = vsub.f32 1.0, %v3065_v18 }
 0x50d   : > { %v3067_v19 = vmul.f32 %v3405_v2, %v3066_v49 }
 0x50f   : > { %v3068_v40 = vadd.f32 %v3405_v2, %v3067_v19 }
 0x511   : > { %v3072_v60 = vsel %vm3071_vm14, %v3405_v2, %v3068_v40 }
 0x512   : > { %v3077_v29 = vsel %vm3074_vm15, %v3076_v12, %v3072_v60 }
 0x513   : > { %v3078_v28 = vmul.f32 %v3401_v14, %v3077_v29 }
 0x515   : > { %3080 = vst.msk [vmem:[%s643_s3 + $0x8] sm:$0xff] %vm3030_vm7, %v3078_v28 }
 0x516 PF: > { %s5563_s2 = sld [smem:[#allocation14_spill]] }
 0x517   : > { %s5564_s23 = sld [smem:[#allocation12_spill]] }
 0x51c   : > { %p3352_p5 = scmp.ge.s32.totalorder %s5563_s2, 2 }
 0x51d   : > { %s3119_s29 = sand.u32 1, %s5564_s23  }
 0x51e   : > { %p3345_p9 = pnand %p3352_p5, %p3749_p6  ;;  %s3120_s21 = scalar_lea.sflag [#allocation5], %s3119_s29 }
 0x520   : > { %p3346_p10 = pneg %p3345_p9 }
 0x522   : > { %3581 = dma.done.wait (%p3346_p10), %s3120_s21, 2048  }
 0x523   : > { %3583 = vsyncadd (%p3346_p10), %s3120_s21, 4294965248  ;;  %s5566_s21 = sld [smem:[#allocation15_spill]]  ;;  %s5569_s0 = smov %s3590_s30 }
 0x524   : > { %s5567_s6 = sld [smem:[#allocation13_spill]] }
 0x525   : > { %s5568_s20 = sld [smem:[#allocation16_spill]] }
 0x529   : > { %p32_p11 = scmp.ge.s32.totalorder %s5566_s21, 4  }
 0x52a   : > { %s5570_s30 = smov %s5567_s6 }
 0x52b   :  { %34 = sbr.rel (!%p32_p11) target bundleno = 14 (0xe), region = 151 }
 0x530   :  { %3134 = vsyncpa [#allocation4], 1 }
 0x531   :  { %3136 = vsyncpa [#allocation4 + $0x1], 1 }
 0x532   :  { %3137 = vsyncpa [#allocation7], 1 }
 0x533   :  { %3138 = vsyncpa [#allocation5], 1 }
 0x534   :  { %3140 = vsyncpa [#allocation5 + $0x1], 1 }

// kernel: _lambda_.2
= control target key start
LH: loop header
LB: loop body
LE: loop exit
PB: predicated region body
PF: predicated region fallthrough
CT: control target
= control target key end

     0   :  { %s6065_s0 = inlined_call_operand.vmem [shape: f32[2,8,16,1], index: 0, kind: input, shape index: {}]   ;;  %s6066_s1 = inlined_call_operand.vmem [shape: f32[16,1], index: 1, kind: input, shape index: {}]   ;;  %s6067_s2 = inlined_call_operand.hbm [shape: f32[1,16], index: 2, kind: input, shape index: {}]   ;;  %s6068_s3 = inlined_call_operand.hbm [shape: f32[1,16], index: 3, kind: input, shape index: {}]   ;;  %s6069_s4 = inlined_call_operand.hbm [shape: f32[8,1], index: 4, kind: input, shape index: {}]   ;;  %s6070_s5 = inlined_call_operand.hbm [shape: f32[1,16], index: 5, kind: input, shape index: {}]   ;;  %s6071_s6 = inlined_call_operand.vmem [shape: f32[1,16], index: 6, kind: input, shape index: {}]   ;;  %s6072_s7 = inlined_call_operand.vmem [shape: f32[4,1], index: 7, kind: input, shape index: {}]   ;;  %s6073_s8 = inlined_call_operand.vmem [shape: f32[1,16], index: 8, kind: input, shape index: {}]   ;;  %s6074_s9 = inlined_call_operand.vmem [shape: f32[1,16], index: 9, kind: input, shape index: {}]   ;;  %s6075_s10 = inlined_call_operand.vmem [shape: f32[1,16], index: 10, kind: input, shape index: {}]   ;;  %s6076_s11 = inlined_call_operand.vmem [shape: f32[1,16], index: 11, kind: input, shape index: {}]   ;;  %s6077_s12 = inlined_call_operand.vmem [shape: f32[8,64], index: 12, kind: input, shape index: {}]   ;;  %s6078_s13 = inlined_call_operand.vmem [shape: f32[64,16], index: 13, kind: input, shape index: {}]   ;;  %s6079_s14 = inlined_call_operand.vmem [shape: f32[1,16], index: 14, kind: input, shape index: {}]   ;;  %s6080_s15 = inlined_call_operand.vmem [shape: f32[16,2], index: 15, kind: input, shape index: {}]   ;;  %s6081_s16 = inlined_call_operand.vmem [shape: f32[2,8,16,64], index: 16, kind: output, shape index: {0}]   ;;  %s6082_s17 = inlined_call_operand.vmem [shape: f32[2,16,2], index: 17, kind: output, shape index: {1}]  }
   0x1   :  { %6205 = sst [smem:[#allocation94_spill]] %s6065_s0 }
   0x2   :  { %6206 = sst [smem:[#allocation95_spill]] %s6066_s1 }
   0x3   :  { %6207 = sst [smem:[#allocation96_spill]] %s6067_s2 }
   0x4   :  { %6208 = sst [smem:[#allocation97_spill]] %s6068_s3 }
   0x5   :  { %23 = vsyncpa [#allocation4], 0 }
   0x6   :  { %24 = vsyncpa [#allocation6], 0 }
   0x7   :  { %25 = vsyncpa [#allocation9], 0  ;;  %s3729_s24 = smov 0  }
   0x8 LB: > { %s6209_s3 = sld [smem:[#allocation97_spill]]  ;;  %s3738_s28 = sadd.s32 4294967295, %s3628_s24   ;;  %s3628_s24 = sphi %s3729_s24, %s31_s24  }
   0x9   : > { %p3348_p0 = scmp.ge.s32.totalorder %s3628_s24, 1  ;;  %p429_p1 = scmp.lt.s32.totalorder %s3628_s24, 3 }
   0xa   : > { %p3411_p2 = scmp.eq.s32.totalorder %s3738_s28, 0  ;;  %s3630_s0 = smov [#allocation5]  }
   0xb   : > { %p3743_p3 = pnand %p3348_p0, %p429_p1  ;;  %s458_s30 = sshll.u32 %s3630_s0, 4  ;;  %s459_s30 = int_to_ptr.vmem [resolvable:$true] %s458_s30 }
   0xc   : > { %s6211_s2 = sld [smem:[#allocation96_spill]]  ;;  %s468_s22 = sshll.u32 %s6069_s4, 4  ;;  %s469_s22 = int_to_ptr.hbm [resolvable:$true] %s468_s22 }
   0xd   : > { %p3398_p4 = pneg %p3743_p3  ;;  %s3631_s25 = smov [#allocation3]  }
   0xe   : > { %s456_s27 = sshll.u32 %s6209_s3, 4  ;;  %s446_s26 = sshll.u32 %s3631_s25, 4  ;;  %s457_s27 = int_to_ptr.hbm [resolvable:$true] %s456_s27  ;;  %s447_s26 = int_to_ptr.vmem [resolvable:$true] %s446_s26 }
   0xf   : > { %p3757_p5 = pnand %p3411_p2, %p3398_p4  ;;  %s3632_s0 = smov [#allocation7]  }
  0x10   : > { %s470_s18 = sshll.u32 %s3632_s0, 4  ;;  %s480_s21 = sshll.u32 %s6070_s5, 4  ;;  %s471_s18 = int_to_ptr.vmem [resolvable:$true] %s470_s18  ;;  %s481_s21 = int_to_ptr.hbm [resolvable:$true] %s480_s21 }
  0x11   : > { %3404 = dma.hbm_to_vmem [thread:$0]  (!%p3757_p5), %s457_s27, 16, %s459_s30, [#allocation6]  }
  0x12   : > { %s444_s1 = sshll.u32 %s6211_s2, 4  ;;  %s3633_s2 = smov [#allocation8]   ;;  %s445_s1 = int_to_ptr.hbm [resolvable:$true] %s444_s1 }
  0x13   : > { %3401 = dma.hbm_to_vmem [thread:$0]  (!%p3757_p5), %s445_s1, 16, %s447_s26, [#allocation4]  }
  0x14   : > { %3407 = dma.hbm_to_vmem [thread:$0]  (!%p3757_p5), %s469_s22, 128, %s471_s18, [#allocation6]  }
  0x15   : > { %s482_s3 = sshll.u32 %s3633_s2, 4  ;;  %533 = sbr.rel (%p3743_p3) target bundleno = 1191 (0x4a7), region = 84  ;;  %s483_s3 = int_to_ptr.vmem [resolvable:$true] %s482_s3 }
  0x16   : > { %3410 = dma.hbm_to_vmem [thread:$0]  (!%p3757_p5), %s481_s21, 16, %s483_s3, [#allocation9]  }
  0x1a   : > { %3615 = dma.done.wait (%p3411_p2), [#allocation4], 16  }
  0x1b   : > { %3617 = vsyncadd (%p3411_p2), [#allocation4], 4294967280 }
  0x1c   : > { %3619 = dma.done.wait (%p3411_p2), [#allocation6], 144  }
  0x1d   : > { %3621 = vsyncadd (%p3411_p2), [#allocation6], 4294967152 }
  0x1e   : > { %3623 = dma.done.wait (%p3411_p2), [#allocation9], 16  }
  0x1f   : > { %3625 = vsyncadd (%p3411_p2), [#allocation9], 4294967280  ;;  %p606_p6 = scmp.lt.s32.totalorder %s3738_s28, 1  ;;  %v3634_v0 = vmov 0   ;;  %v3635_v1 = vmov 16.0   ;;  %s6213_s29 = sld [smem:[#allocation94_spill]] }
  0x20   : > { %3437 = vset.pattern.permute.xlu0 %v3634_v0  ;;  %3436 = vset.pattern.permute.xlu2 %v3634_v0  ;;  %3448 = vrcp.f32 %v3635_v1  ;;  %vm637_vm0 = vcmask 7168   ;;  %vm982_vm10 = vcmask 3072   ;;  %s6215_s23 = sld [smem:[#allocation95_spill]]  ;;  %vm965_vm15 = vcmask 2048   ;;  %s3636_s27 = smov 48  }
  0x21   : > { %s6524_s28 = smov (!%p606_p6, %s3738_s28), 1  ;;  %3438 = vset.pattern.permute.xlu1 %v3634_v0  ;;  %s3637_s25 = smov 32  }
  0x22   : > { %s3371_s2 = sshll.u32 %s6524_s28, 7  ;;  %s3638_s18 = smov 16  }
  0x25   : > { %s3796_s30 = scalar_lea.vmem %s6213_s29, %s3371_s2  ;;  %s5834_s29 = scalar_lea.vmem %s6081_s16, %s3371_s2 }
  0x26   : > { %v3449_v2 = vpop.eup %3448  ;;  %v623_v3 = vld [vmem:[%s3796_s30 + $0x10] sm:$0xff]  ;;  %v624_v4 = vld [vmem:[%s3796_s30 + $0x18] sm:$0xff]  ;;  %v621_v5 = vld [vmem:[%s3796_s30] sm:$0xff] }
  0x27   : > { %v647_v6 = vsel %vm637_vm0, %v623_v3, 0.0  ;;  %v648_v7 = vsel %vm637_vm0, %v624_v4, 0.0  ;;  %v711_v8 = vmul.f32 16.0, %v3449_v2  ;;  %v622_v9 = vld [vmem:[%s3796_s30 + $0x8] sm:$0xff]  ;;  %v625_v10 = vld [vmem:[%s3796_s30 + $0x20] sm:$0xff]  ;;  %v638_v13 = vsel %vm637_vm0, %v621_v5, 0.0 }
  0x28   : > { %v626_v11 = vld [vmem:[%s3796_s30 + $0x28] sm:$0xff]  ;;  %v649_v12 = vadd.f32 %v648_v7, %v647_v6  ;;  %v639_v14 = vsel %vm637_vm0, %v622_v9, 0.0  ;;  %v656_v15 = vsel %vm637_vm0, %v625_v10, 0.0  ;;  %v627_v16 = vld [vmem:[%s3796_s30 + $0x30] sm:$0xff]  ;;  %v628_v17 = vld [vmem:[%s3796_s30 + $0x38] sm:$0xff]  ;;  %vm715_vm1 = vweird.f32 %v3449_v2 }
  0x29   : > { %v712_v18 = vsub.f32 1.0, %v711_v8  ;;  %v640_v19 = vadd.f32 %v639_v14, %v638_v13  ;;  %v657_v20 = vsel %vm637_vm0, %v626_v11, 0.0  ;;  %v665_v21 = vsel %vm637_vm0, %v627_v16, 0.0  ;;  %v3817_v46 = vld [vmem:[%s3796_s30 + $0x40] sm:$0xff]  ;;  %v3820_v47 = vld [vmem:[%s3796_s30 + $0x48] sm:$0xff] }
  0x2a   : > { %v650_v22 = vrot.slane %v649_v12, 4  ;;  %v658_v23 = vadd.f32 %v657_v20, %v656_v15  ;;  %v666_v24 = vsel %vm637_vm0, %v628_v17, 0.0  ;;  %v674_v50 = vsel %vm637_vm0, %v3817_v46, 0.0 }
  0x2b   : > { %v713_v25 = vmul.f32 %v3449_v2, %v712_v18  ;;  %v641_v26 = vrot.slane %v640_v19, 4  ;;  %v667_v27 = vadd.f32 %v666_v24, %v665_v21  ;;  %v675_v51 = vsel %vm637_vm0, %v3820_v47, 0.0 }
  0x2c   : > { %v651_v28 = vadd.f32 %v650_v22, %v649_v12  ;;  %v659_v29 = vrot.slane %v658_v23, 4  ;;  %v676_v54 = vadd.f32 %v675_v51, %v674_v50 }
  0x2d   : > { %v642_v30 = vadd.f32 %v641_v26, %v640_v19  ;;  %v668_v31 = vrot.slane %v667_v27, 4  ;;  %v714_v34 = vadd.f32 %v3449_v2, %v713_v25 }
  0x2e   : > { %v652_v32 = vrot.slane %v651_v28, 2  ;;  %v660_v33 = vadd.f32 %v659_v29, %v658_v23  ;;  %v677_v1 = vrot.slane %v676_v54, 4 }
  0x2f   : > { %v643_v35 = vrot.slane %v642_v30, 2  ;;  %v669_v36 = vadd.f32 %v668_v31, %v667_v27  ;;  %v3814_v43 = vsel %vm715_vm1, %v3449_v2, %v714_v34 }
  0x30   : > { %v653_v37 = vadd.f32 %v652_v32, %v651_v28  ;;  %v661_v38 = vrot.slane %v660_v33, 2  ;;  %6214 = vst [vmem:[#allocation13_spill] sm:$0xff] %v3814_v43 }
  0x31   : > { %v644_v39 = vadd.f32 %v643_v35, %v642_v30  ;;  %v670_v40 = vrot.slane %v669_v36, 2  ;;  %v678_v30 = vadd.f32 %v677_v1, %v676_v54 }
  0x32   : > { %v654_v41 = vrot.slane %v653_v37, 1  ;;  %v662_v42 = vadd.f32 %v661_v38, %v660_v33 }
  0x33   : > { %v645_v44 = vrot.slane %v644_v39, 1  ;;  %v671_v45 = vadd.f32 %v670_v40, %v669_v36 }
  0x34   : > { %v655_v48 = vadd.f32 %v654_v41, %v653_v37  ;;  %v663_v49 = vrot.slane %v662_v42, 1 }
  0x35   : > { %v646_v52 = vadd.f32 %v645_v44, %v644_v39  ;;  %v672_v53 = vrot.slane %v671_v45, 1  ;;  %v679_v39 = vrot.slane %v678_v30, 2 }
  0x36   : > { %v718_v55 = vmul.f32 %v3814_v43, %v655_v48  ;;  %v664_v56 = vadd.f32 %v663_v49, %v662_v42 }
  0x37   : > { %v717_v57 = vmul.f32 %v3814_v43, %v646_v52  ;;  %v673_v58 = vadd.f32 %v672_v53, %v671_v45  ;;  %v680_v51 = vadd.f32 %v679_v39, %v678_v30 }
  0x38   : > { %v3828_v59 = vsub.f32 %v623_v3, %v718_v55  ;;  %v3830_v60 = vsub.f32 %v624_v4, %v718_v55  ;;  %v719_v61 = vmul.f32 %v3814_v43, %v664_v56 }
  0x39   : > { %v3833_v62 = vsub.f32 %v621_v5, %v717_v57  ;;  %v3835_v63 = vsub.f32 %v622_v9, %v717_v57  ;;  %v720_v0 = vmul.f32 %v3814_v43, %v673_v58  ;;  %v681_v58 = vrot.slane %v680_v51, 1 }
  0x3a   : > { %v743_v2 = vmul.f32 %v3828_v59, %v3828_v59  ;;  %v744_v6 = vmul.f32 %v3830_v60, %v3830_v60  ;;  %v3842_v7 = vsub.f32 %v625_v10, %v719_v61  ;;  %v3844_v3 = vsub.f32 %v626_v11, %v719_v61 }
  0x3b   : > { %v741_v4 = vmul.f32 %v3833_v62, %v3833_v62  ;;  %v742_v5 = vmul.f32 %v3835_v63, %v3835_v63  ;;  %v3850_v8 = vsub.f32 %v627_v16, %v720_v0  ;;  %v3852_v9 = vsub.f32 %v628_v17, %v720_v0 }
  0x3c   : > { %v766_v12 = vsel %vm637_vm0, %v743_v2, 0.0  ;;  %v767_v13 = vsel %vm637_vm0, %v744_v6, 0.0  ;;  %v745_v10 = vmul.f32 %v3842_v7, %v3842_v7  ;;  %v746_v11 = vmul.f32 %v3844_v3, %v3844_v3 }
  0x3d   : > { %v768_v14 = vadd.f32 %v767_v13, %v766_v12  ;;  %v757_v15 = vsel %vm637_vm0, %v741_v4, 0.0  ;;  %v758_v18 = vsel %vm637_vm0, %v742_v5, 0.0  ;;  %v747_v16 = vmul.f32 %v3850_v8, %v3850_v8 }
  0x3e   : > { %v759_v17 = vadd.f32 %v758_v18, %v757_v15  ;;  %v775_v19 = vsel %vm637_vm0, %v745_v10, 0.0  ;;  %v776_v20 = vsel %vm637_vm0, %v746_v11, 0.0  ;;  %v748_v21 = vmul.f32 %v3852_v9, %v3852_v9 }
  0x3f   : > { %v769_v22 = vrot.slane %v768_v14, 4  ;;  %v777_v23 = vadd.f32 %v776_v20, %v775_v19  ;;  %v784_v24 = vsel %vm637_vm0, %v747_v16, 0.0  ;;  %v682_v4 = vadd.f32 %v681_v58, %v680_v51 }
  0x40   : > { %v760_v25 = vrot.slane %v759_v17, 4  ;;  %v785_v26 = vsel %vm637_vm0, %v748_v21, 0.0 }
  0x41   : > { %v770_v27 = vadd.f32 %v769_v22, %v768_v14  ;;  %v778_v28 = vrot.slane %v777_v23, 4  ;;  %v786_v29 = vadd.f32 %v785_v26, %v784_v24  ;;  %v721_v13 = vmul.f32 %v3814_v43, %v682_v4 }
  0x42   : > { %v761_v31 = vadd.f32 %v760_v25, %v759_v17 }
  0x43   : > { %v771_v32 = vrot.slane %v770_v27, 2  ;;  %v779_v33 = vadd.f32 %v778_v28, %v777_v23  ;;  %v787_v34 = vrot.slane %v786_v29, 4  ;;  %v3876_v17 = vsub.f32 %v3817_v46, %v721_v13 }
  0x44   : > { %v762_v35 = vrot.slane %v761_v31, 2  ;;  %v3879_v23 = vsub.f32 %v3820_v47, %v721_v13 }
  0x45   : > { %v772_v36 = vadd.f32 %v771_v32, %v770_v27  ;;  %v780_v37 = vrot.slane %v779_v33, 2  ;;  %v788_v38 = vadd.f32 %v787_v34, %v786_v29 }
  0x46   : > { %v763_v40 = vadd.f32 %v762_v35, %v761_v31  ;;  %v749_v31 = vmul.f32 %v3876_v17, %v3876_v17  ;;  %v750_v47 = vmul.f32 %v3879_v23, %v3879_v23 }
  0x47   : > { %v773_v41 = vrot.slane %v772_v36, 1  ;;  %v781_v42 = vadd.f32 %v780_v37, %v779_v33  ;;  %v789_v44 = vrot.slane %v788_v38, 2 }
  0x48   : > { %v764_v45 = vrot.slane %v763_v40, 1 }
  0x49   : > { %v774_v48 = vadd.f32 %v773_v41, %v772_v36  ;;  %v782_v49 = vrot.slane %v781_v42, 1  ;;  %v790_v50 = vadd.f32 %v789_v44, %v788_v38  ;;  %v793_v44 = vsel %vm637_vm0, %v749_v31, 0.0 }
  0x4a   : > { %v765_v52 = vadd.f32 %v764_v45, %v763_v40 }
  0x4b   : > { %v830_v53 = vmul.f32 %v774_v48, %v3814_v43  ;;  %v783_v55 = vadd.f32 %v782_v49, %v781_v42  ;;  %v791_v56 = vrot.slane %v790_v50, 1 }
  0x4c   : > { %v829_v54 = vmul.f32 %v765_v52, %v3814_v43 }
  0x4d   : > { %v838_v57 = vadd.f32 1e-05, %v830_v53  ;;  %v831_v0 = vmul.f32 %v783_v55, %v3814_v43  ;;  %v792_v1 = vadd.f32 %v791_v56, %v790_v50  ;;  %v3900_v50 = vld [vmem:[%s6215_s23] sm:$0xff]  ;;  %v3905_v53 = vld [vmem:[%s3796_s30 + $0x50] sm:$0xff]  ;;  %v3909_v55 = vld [vmem:[%s3796_s30 + $0x58] sm:$0xff] }
  0x4e   : > { %v837_v61 = vadd.f32 1e-05, %v829_v54  ;;  %v3915_v56 = vperm.slane %v3900_v50, 0  ;;  %v683_v58 = vsel %vm637_vm0, %v3905_v53, 0.0  ;;  %v3928_v4 = vperm.slane %v3900_v50, 2 }
  0x4f   : > { %3450 = vrsqrt.f32 %v838_v57  ;;  %v839_v2 = vadd.f32 1e-05, %v831_v0  ;;  %v832_v6 = vmul.f32 %v792_v1, %v3814_v43  ;;  %vm861_vm2 = vweird.f32 %v838_v57 }
  0x50   : > { %3452 = vrsqrt.f32 %v837_v61  ;;  %vm851_vm4 = vweird.f32 %v837_v61  ;;  %6216 = vst [vmem:[#allocation14_spill] sm:$0xff] %v3915_v56 }
  0x51   : > { %3454 = vrsqrt.f32 %v839_v2  ;;  %v840_v5 = vadd.f32 1e-05, %v832_v6  ;;  %vm871_vm7 = vweird.f32 %v839_v2 }
  0x53   : > { %3456 = vrsqrt.f32 %v840_v5  ;;  %vm881_vm11 = vweird.f32 %v840_v5 }
  0x55   : > { %v3451_v12 = vpop.eup %3450 }
  0x56   : > { %v3453_v10 = vpop.eup %3452  ;;  %v856_v11 = vmul.f32 %v3451_v12, %v838_v57  ;;  %vm862_vm3 = vweird.f32 %v3451_v12  ;;  %v3918_v57 = vperm.slane %v3900_v50, 1 }
  0x57   : > { %v846_v14 = vmul.f32 %v3453_v10, %v837_v61  ;;  %v3455_v18 = vpop.eup %3454  ;;  %vm852_vm5 = vweird.f32 %v3453_v10  ;;  %vm863_vm6 = vmor %vm861_vm2, %vm862_vm3 }
  0x58   : > { %v857_v15 = vmul.f32 %v3451_v12, %v856_v11  ;;  %v866_v20 = vmul.f32 %v3455_v18, %v839_v2  ;;  %vm853_vm8 = vmor %vm851_vm4, %vm852_vm5  ;;  %vm872_vm9 = vweird.f32 %v3455_v18  ;;  %6217 = vst [vmem:[#allocation15_spill] sm:$0xff] %v3918_v57  ;;  %v684_v2 = vsel %vm637_vm0, %v3909_v55, 0.0 }
  0x59   : > { %v847_v16 = vmul.f32 %v3453_v10, %v846_v14  ;;  %v3457_v21 = vpop.eup %3456  ;;  %vm873_vm12 = vmor %vm871_vm7, %vm872_vm9  ;;  %v3943_v14 = vperm.slane %v3900_v50, 4 }
  0x5a   : > { %v858_v19 = vmul.f32 0.5, %v857_v15  ;;  %v867_v25 = vmul.f32 %v3455_v18, %v866_v20  ;;  %v876_v26 = vmul.f32 %v3457_v21, %v840_v5  ;;  %vm882_vm13 = vweird.f32 %v3457_v21 }
  0x5b   : > { %v848_v22 = vmul.f32 0.5, %v847_v16  ;;  %vm883_vm14 = vmor %vm881_vm11, %vm882_vm13 }
  0x5c   : > { %v859_v24 = vsub.f32 1.5, %v858_v19  ;;  %v868_v46 = vmul.f32 0.5, %v867_v25  ;;  %v877_v29 = vmul.f32 %v3457_v21, %v876_v26 }
  0x5d   : > { %v849_v27 = vsub.f32 1.5, %v848_v22 }
  0x5e   : > { %v860_v28 = vmul.f32 %v3451_v12, %v859_v24  ;;  %v869_v33 = vsub.f32 1.5, %v868_v46  ;;  %v878_v34 = vmul.f32 0.5, %v877_v29 }
  0x5f   : > { %v850_v30 = vmul.f32 %v3453_v10, %v849_v27 }
  0x60   : > { %v864_v32 = vsel %vm863_vm6, %v3451_v12, %v860_v28  ;;  %v870_v40 = vmul.f32 %v3455_v18, %v869_v33  ;;  %v879_v41 = vsub.f32 1.5, %v878_v34 }
  0x61   : > { %v927_v35 = vmul.f32 %v864_v32, %v3828_v59  ;;  %v928_v36 = vmul.f32 %v864_v32, %v3830_v60  ;;  %v854_v37 = vsel %vm853_vm8, %v3453_v10, %v850_v30  ;;  %v794_v59 = vsel %vm637_vm0, %v750_v47, 0.0 }
  0x62   : > { %v925_v38 = vmul.f32 %v854_v37, %v3833_v62  ;;  %v926_v39 = vmul.f32 %v854_v37, %v3835_v63  ;;  %v874_v45 = vsel %vm873_vm12, %v3455_v18, %v870_v40  ;;  %v880_v48 = vmul.f32 %v3457_v21, %v879_v41 }
  0x63   : > { %943 = vst.msk [vmem:[#allocation2 + $0x1b] sm:$0xff] %vm637_vm0, %v927_v35  ;;  %v975_v42 = vperm.slane %v928_v36, 7  ;;  %v930_v63 = vmul.f32 %v874_v45, %v3844_v3  ;;  %v958_v49 = vperm.slane %v927_v35, 0  ;;  %v929_v51 = vmul.f32 %v874_v45, %v3842_v7  ;;  %v3911_v3 = vld [vmem:[#allocation7] sm:$0xff] }
  0x64   : > { %944 = vst.msk [vmem:[#allocation2 + $0x23] sm:$0xff] %vm637_vm0, %v928_v36  ;;  %v974_v60 = vperm.slane %v926_v39, 7  ;;  %v957_v62 = vperm.slane %v925_v38, 0  ;;  %v795_v52 = vadd.f32 %v794_v59, %v793_v44  ;;  %v884_v54 = vsel %vm883_vm14, %v3457_v21, %v880_v48 }
  0x65   : > { %984 = vst.msk [vmem:[#allocation2 + $0x2b] sm:$0xf] %vm982_vm10, %v975_v42  ;;  %v976_v7 = vperm.slane %v930_v63, 7  ;;  %v959_v61 = vperm.slane %v929_v51, 0  ;;  %v932_v0 = vmul.f32 %v884_v54, %v3852_v9  ;;  %v3933_v12 = vperm.slane %v3911_v3, 1 }
  0x66   : > { %941 = vst.msk [vmem:[#allocation2 + $0x3] sm:$0xff] %vm637_vm0, %v925_v38  ;;  %v796_v1 = vrot.slane %v795_v52, 4  ;;  %v931_v10 = vmul.f32 %v884_v54, %v3850_v8  ;;  %v3938_v9 = vperm.slane %v3900_v50, 3  ;;  %v3949_v16 = vperm.slane %v3911_v3, 0 }
  0x67   : > { %942 = vst.msk [vmem:[#allocation2 + $0xb] sm:$0xff] %vm637_vm0, %v926_v39  ;;  %v3954_v19 = vperm.slane %v3911_v3, 2  ;;  %v685_v21 = vadd.f32 %v684_v2, %v683_v58  ;;  %v977_v25 = vperm.slane %v932_v0, 7  ;;  %v3982_v44 = vperm.slane %v3900_v50, 5 }
  0x68   : > { %983 = vst.msk [vmem:[#allocation2 + $0x13] sm:$0xf] %vm982_vm10, %v974_v60  ;;  %v797_v26 = vadd.f32 %v796_v1, %v795_v52  ;;  %v960_v47 = vperm.slane %v931_v10, 0  ;;  %vm2970_vm14 = vcmask 261120  }
  0x69   : > { %966 = vst.msk [vmem:[#allocation2] sm:$0x7] %vm965_vm15, %v957_v62  ;;  %v686_v38 = vrot.slane %v685_v21, 4 }
  0x6a   : > { %967 = vst.msk [vmem:[#allocation2 + $0x18] sm:$0x7] %vm965_vm15, %v958_v49  ;;  %v798_v45 = vrot.slane %v797_v26, 2 }
  0x6b   : > { %v1103_v6 = vld [vmem:[#allocation2 + $0x22] sm:$0xff]  ;;  %6218 = vst [vmem:[#allocation16_spill] sm:$0xff] %v3933_v12  ;;  %v687_v2 = vadd.f32 %v686_v38, %v685_v21 }
  0x6c   : > { %v3930_v5 = vld [vmem:[#allocation2 + $0x23] sm:$0xff]  ;;  %945 = vst.msk [vmem:[#allocation2 + $0x33] sm:$0xff] %vm637_vm0, %v929_v51  ;;  %v1120_v28 = vmul.f32 %v3928_v4, %v1103_v6  ;;  %v1928_v46 = vmul.f32 %v3949_v16, %v1103_v6 }
  0x6d   : > { %v1005_v13 = vld [vmem:[#allocation2 + $0x20] sm:$0xff]  ;;  %v2596_v15 = vmax.f32 %v1103_v6, %v3930_v5  ;;  %946 = vst.msk [vmem:[#allocation2 + $0x3b] sm:$0xff] %vm637_vm0, %v930_v63  ;;  %v1961_v8 = vmul.f32 %v3933_v12, %v3930_v5  ;;  %v1169_v32 = vmul.f32 %v3938_v9, %v3930_v5 }
  0x6e   : > { %v3940_v11 = vld [vmem:[#allocation2 + $0x24] sm:$0xff]  ;;  %v1022_v18 = vmul.f32 %v3915_v56, %v1005_v13  ;;  %6219 = vst [vmem:[#allocation17_spill] sm:$0xff] %v3949_v16 }
  0x6f   : > { %6220 = vst [vmem:[#allocation18_spill] sm:$0xff] %v3954_v19  ;;  %v1054_v20 = vld [vmem:[#allocation2 + $0x21] sm:$0xff]  ;;  %v2612_v22 = vmax.f32 %v2596_v15, %v3940_v11  ;;  %v1994_v27 = vmul.f32 %v3954_v19, %v3940_v11  ;;  %v3964_v29 = vld [vmem:[#allocation2 + $0xa] sm:$0xff]  ;;  %v1218_v35 = vmul.f32 %v3943_v14, %v3940_v11  ;;  %v1977_v36 = vadd.f32 %v1961_v8, %v1928_v46 }
  0x70   : > { %985 = vst.msk [vmem:[#allocation2 + $0x43] sm:$0xf] %vm982_vm10, %v976_v7  ;;  %v1071_v24 = vmul.f32 %v3918_v57, %v1054_v20  ;;  %v3966_v30 = vld [vmem:[#allocation2 + $0xb] sm:$0xff]  ;;  %v1118_v60 = vmul.f32 %v3928_v4, %v3964_v29  ;;  %v1100_v51 = vld [vmem:[#allocation2 + $0x2] sm:$0xff] }
  0x71   : > { %968 = vst.msk [vmem:[#allocation2 + $0x30] sm:$0x7] %vm965_vm15, %v959_v61  ;;  %v1003_v31 = vld [vmem:[#allocation2 + $0x8] sm:$0xff]  ;;  %2643 = vperm.xlu0 %3437, %v2612_v22   ;;  %v2594_v40 = vmax.f32 %v3964_v29, %v3966_v30  ;;  %v3984_v59 = vadd.f32 %v1994_v27, %v1977_v36  ;;  %v1167_v62 = vmul.f32 %v3938_v9, %v3966_v30  ;;  %v1002_v54 = vld [vmem:[#allocation2] sm:$0xff] }
  0x72   : > { %6221 = vst [vmem:[#allocation19_spill] sm:$0xff] %v3966_v30  ;;  %v1087_v33 = vadd.f32 %v1071_v24, %v1022_v18  ;;  %v1052_v34 = vld [vmem:[#allocation2 + $0x9] sm:$0xff]  ;;  %v1020_v41 = vmul.f32 %v3915_v56, %v1003_v31  ;;  %v1051_v7 = vld [vmem:[#allocation2 + $0x1] sm:$0xff]  ;;  %v1019_v15 = vmul.f32 %v3915_v56, %v1002_v54  ;;  %v799_v18 = vadd.f32 %v798_v45, %v797_v26 }
  0x73   : > { %947 = vst.msk [vmem:[#allocation2 + $0x4b] sm:$0xff] %vm637_vm0, %v931_v10  ;;  %v3973_v37 = vld [vmem:[#allocation2 + $0xc] sm:$0xff]  ;;  %v1069_v42 = vmul.f32 %v3918_v57, %v1052_v34  ;;  %v3992_v52 = vld [vmem:[#allocation2 + $0x3] sm:$0xff]  ;;  %v1068_v22 = vmul.f32 %v3918_v57, %v1051_v7  ;;  %v1117_v24 = vmul.f32 %v3928_v4, %v1100_v51  ;;  %v1925_v27 = vmul.f32 %v3949_v16, %v1100_v51  ;;  %v4025_v45 = vld [vmem:[#allocation2 + $0x1a] sm:$0xff] }
  0x74   : > { %948 = vst.msk [vmem:[#allocation2 + $0x53] sm:$0xff] %vm637_vm0, %v932_v0  ;;  %v1136_v39 = vadd.f32 %v1120_v28, %v1087_v33  ;;  %v2610_v63 = vmax.f32 %v2594_v40, %v3973_v37  ;;  %v1216_v61 = vmul.f32 %v3943_v14, %v3973_v37  ;;  %v1198_v1 = vld [vmem:[#allocation2 + $0x4] sm:$0xff]  ;;  %v3998_v6 = vld [vmem:[#allocation2 + $0xd] sm:$0xff]  ;;  %v1958_v13 = vmul.f32 %v3933_v12, %v3992_v52  ;;  %v4014_v33 = vld [vmem:[#allocation2 + $0x3b] sm:$0xff] }
  0x75   : > { %986 = vst.msk [vmem:[#allocation2 + $0x5b] sm:$0xf] %vm982_vm10, %v977_v25  ;;  %v1085_v49 = vadd.f32 %v1069_v42, %v1020_v41  ;;  %v2593_v10 = vmax.f32 %v1100_v51, %v3992_v52  ;;  %v1265_v8 = vmul.f32 %v3982_v44, %v3998_v6  ;;  %v1991_v21 = vmul.f32 %v3954_v19, %v1198_v1  ;;  %v4032_v51 = vld [vmem:[#allocation2 + $0x1c] sm:$0xff] }
  0x76   : > { %6222 = vst [vmem:[#allocation20_spill] sm:$0xff] %v3982_v44  ;;  %v1185_v48 = vadd.f32 %v1169_v32, %v1136_v39  ;;  %2633 = vperm.xlu2 %3436, %v2610_v63   ;;  %v1166_v46 = vmul.f32 %v3938_v9, %v3992_v52  ;;  %v1084_v31 = vadd.f32 %v1068_v22, %v1019_v15  ;;  %v4012_v32 = vld [vmem:[#allocation2 + $0x3a] sm:$0xff]  ;;  %v800_v38 = vrot.slane %v799_v18, 1 }
  0x77   : > { %6223 = vst [vmem:[#allocation21_spill] sm:$0xff] %v3984_v59  ;;  %v1134_v0 = vadd.f32 %v1118_v60, %v1085_v49  ;;  %v2609_v25 = vmax.f32 %v2593_v10, %v1198_v1  ;;  %v1974_v26 = vadd.f32 %v1958_v13, %v1925_v27  ;;  %v4021_v40 = vld [vmem:[#allocation2 + $0x3c] sm:$0xff]  ;;  %v2598_v42 = vmax.f32 %v4012_v32, %v4014_v33 }
  0x78   : > { %969 = vst.msk [vmem:[#allocation2 + $0x48] sm:$0x7] %vm965_vm15, %v960_v47  ;;  %v3994_v58 = vadd.f32 %v1218_v35, %v1185_v48  ;;  %v688_v47 = vrot.slane %v687_v2, 2  ;;  %v1215_v35 = vmul.f32 %v3943_v14, %v1198_v1  ;;  %v1133_v36 = vadd.f32 %v1117_v24, %v1084_v31  ;;  %v4027_v48 = vld [vmem:[#allocation2 + $0x1b] sm:$0xff] }
  0x79   : > { %6224 = vst [vmem:[#allocation22_spill] sm:$0xff] %v3998_v6  ;;  %v1183_v20 = vadd.f32 %v1167_v62, %v1134_v0  ;;  %2628 = vperm.xlu1 %3438, %v2609_v25   ;;  %v4019_v39 = vadd.f32 %v1991_v21, %v1974_v26  ;;  %v2614_v63 = vmax.f32 %v2598_v42, %v4021_v40  ;;  %v2324_v54 = vld [vmem:[%s6072_s7] sm:$0xf]  ;;  %v4039_v0 = vld [vmem:[#allocation2 + $0x32] sm:$0xff] }
  0x7a   : > { %6225 = vst [vmem:[#allocation23_spill] sm:$0xff] %v4012_v32  ;;  %v1182_v41 = vadd.f32 %v1166_v46, %v1133_v36  ;;  %v689_v60 = vadd.f32 %v688_v47, %v687_v2  ;;  %v801_v49 = vadd.f32 %v800_v38, %v799_v18  ;;  %v2595_v7 = vmax.f32 %v4025_v45, %v4027_v48  ;;  %v4041_v2 = vld [vmem:[#allocation2 + $0x33] sm:$0xff] }
  0x7b   : > { %v1232_v28 = vadd.f32 %v1216_v61, %v1183_v20  ;;  %6226 = vst [vmem:[#allocation24_spill] sm:$0xff] %v4014_v33  ;;  %2653 = vperm.xlu0 %3437, %v2614_v63   ;;  %v1009_v13 = vld [vmem:[#allocation2 + $0x50] sm:$0xff]  ;;  %v2597_v22 = vmax.f32 %v4039_v0, %v4041_v2  ;;  %v4059_v31 = vperm.slane %v2324_v54, 0  ;;  %v4061_v47 = vperm.slane %v2324_v54, 2 }
  0x7c   : > { %6227 = vst [vmem:[#allocation25_spill] sm:$0xff] %v4019_v39  ;;  %v4029_v62 = vadd.f32 %v1215_v35, %v1182_v41  ;;  %v690_v61 = vrot.slane %v689_v60, 1  ;;  %v2611_v10 = vmax.f32 %v2595_v7, %v4032_v51  ;;  %v1058_v15 = vld [vmem:[#allocation2 + $0x51] sm:$0xff]  ;;  %v833_v18 = vmul.f32 %v801_v49, %v3814_v43  ;;  %v1056_v39 = vld [vmem:[#allocation2 + $0x39] sm:$0xff] }
  0x7d   : > { %v4016_v34 = vadd.f32 %v1265_v8, %v1232_v28  ;;  %6228 = vst [vmem:[#allocation26_spill] sm:$0xff] %v4021_v40  ;;  %v4045_v8 = vperm.slane %v2324_v54, 1  ;;  %v4047_v20 = vld [vmem:[#allocation2 + $0x34] sm:$0xff]  ;;  %v1026_v24 = vmul.f32 %v3915_v56, %v1009_v13  ;;  %v1075_v27 = vmul.f32 %v3918_v57, %v1058_v15 }
  0x7e   : > { %6229 = vst [vmem:[#allocation27_spill] sm:$0xff] %v4025_v45  ;;  %2638 = vperm.xlu2 %3436, %v2611_v10   ;;  %v4052_v21 = vld [vmem:[#allocation2 + $0x52] sm:$0xff]  ;;  %v691_v25 = vadd.f32 %v690_v61, %v689_v60  ;;  %v2613_v26 = vmax.f32 %v2597_v22, %v4047_v20  ;;  %v4064_v35 = vadd.f32 1e-05, %v833_v18  ;;  %v2326_v61 = vmul.f32 %v4059_v31, %v3992_v52 }
  0x7f   : > { %6230 = vst [vmem:[#allocation28_spill] sm:$0xff] %v4027_v48  ;;  %v1124_v28 = vmul.f32 %v3928_v4, %v4052_v21  ;;  %v4057_v46 = vld [vmem:[#allocation2 + $0x53] sm:$0xff]  ;;  %v2359_v36 = vmul.f32 %v4045_v8, %v1198_v1  ;;  %v1091_v38 = vadd.f32 %v1075_v27, %v1026_v24  ;;  %v2392_v1 = vmul.f32 %v4061_v47, %v4027_v48  ;;  %v4084_v22 = vld [vmem:[#allocation2 + $0x4a] sm:$0xff] }
  0x80   : > { %6231 = vst [vmem:[#allocation29_spill] sm:$0xff] %v4039_v0  ;;  %v1173_v41 = vmul.f32 %v3938_v9, %v4057_v46  ;;  %v4069_v42 = vld [vmem:[#allocation2 + $0x54] sm:$0xff]  ;;  %v2600_v60 = vmax.f32 %v4052_v21, %v4057_v46  ;;  %v722_v63 = vmul.f32 %v3814_v43, %v691_v25  ;;  %v4081_v10 = vperm.slane %v2324_v54, 3  ;;  %v4086_v24 = vld [vmem:[#allocation2 + $0x4b] sm:$0xff] }
  0x81   : > { %6232 = vst [vmem:[#allocation30_spill] sm:$0xff] %v4041_v2  ;;  %2648 = vperm.xlu1 %3438, %v2613_v26   ;;  %v1140_v49 = vadd.f32 %v1124_v28, %v1091_v38  ;;  %v1222_v7 = vmul.f32 %v3943_v14, %v4069_v42  ;;  %3458 = vrsqrt.f32 %v4064_v35  ;;  %v2375_v18 = vadd.f32 %v2359_v36, %v2326_v61  ;;  %v4095_v54 = vld [vmem:[#allocation2 + $0x4c] sm:$0xff] }
  0x82   : > { %6233 = vst [vmem:[#allocation31_spill] sm:$0xff] %v4045_v8  ;;  %v2616_v13 = vmax.f32 %v2600_v60, %v4069_v42  ;;  %v2425_v25 = vmul.f32 %v4081_v10, %v4032_v51  ;;  %v4091_v52 = vsub.f32 %v3905_v53, %v722_v63  ;;  %v4098_v26 = vsub.f32 %v3909_v55, %v722_v63  ;;  %v1348_v61 = vld [vmem:[#allocation2 + $0x27] sm:$0xff] }
  0x83   : > { %6234 = vst [vmem:[#allocation32_spill] sm:$0xff] %v4047_v20  ;;  %v1189_v15 = vadd.f32 %v1173_v41, %v1140_v49  ;;  %v2408_v28 = vadd.f32 %v2392_v1, %v2375_v18  ;;  %v2599_v36 = vmax.f32 %v4084_v22, %v4086_v24  ;;  %v4103_v38 = vperm.slane %v3900_v50, 6  ;;  %v1297_v43 = vld [vmem:[#allocation2 + $0xe] sm:$0xff] }
  0x84   : > { %6235 = vst [vmem:[#allocation33_spill] sm:$0xff] %v4052_v21  ;;  %2663 = vperm.xlu0 %3437, %v2616_v13   ;;  %v4106_v41 = vperm.slane %v3900_v50, 7  ;;  %v2328_v53 = vmul.f32 %v4059_v31, %v4027_v48  ;;  %v2361_v63 = vmul.f32 %v4045_v8, %v4032_v51  ;;  %v2394_v1 = vmul.f32 %v4061_v47, %v4041_v2 }
  0x85   : > { %6236 = vst [vmem:[#allocation34_spill] sm:$0xff] %v4059_v31  ;;  %v4093_v27 = vadd.f32 %v1222_v7, %v1189_v15  ;;  %v2441_v60 = vadd.f32 %v2425_v25, %v2408_v28  ;;  %v1299_v7 = vld [vmem:[#allocation2 + $0x26] sm:$0xff]  ;;  %v2615_v55 = vmax.f32 %v2599_v36, %v4095_v54  ;;  %v751_v50 = vmul.f32 %v4091_v52, %v4091_v52  ;;  %v1007_v36 = vld [vmem:[#allocation2 + $0x38] sm:$0xff] }
  0x86   : > { %6237 = vst [vmem:[#allocation35_spill] sm:$0xff] %v4061_v47  ;;  %v4121_v13 = vmul.f32 %v3938_v9, %v4027_v48  ;;  %v4125_v15 = vmul.f32 %v3933_v12, %v4027_v48  ;;  %v2427_v18 = vmul.f32 %v4081_v10, %v4047_v20  ;;  %v752_v25 = vmul.f32 %v4098_v26, %v4098_v26  ;;  %v4131_v28 = vld [vmem:[#allocation2 + $0x25] sm:$0xff] }
  0x87   : > { %6238 = vst [vmem:[#allocation36_spill] sm:$0xff] %v4081_v10  ;;  %v4110_v49 = vpop.eup %3458  ;;  %2460 = vperm.xlu2 %3436, %v2441_v60   ;;  %v2377_v59 = vadd.f32 %v2361_v63, %v2328_v53  ;;  %v2396_v60 = vmul.f32 %v4061_v47, %v4086_v24  ;;  %v1267_v48 = vmul.f32 %v3982_v44, %v4131_v28  ;;  %vm891_vm1 = vweird.f32 %v4064_v35 }
  0x88   : > { %6239 = vst [vmem:[#allocation37_spill] sm:$0xff] %v4084_v22  ;;  %v4143_v22 = vmul.f32 %v4106_v41, %v1348_v61  ;;  %v886_v53 = vmul.f32 %v4110_v49, %v4064_v35  ;;  %v2429_v6 = vmul.f32 %v4081_v10, %v4095_v54  ;;  %v1073_v61 = vmul.f32 %v3918_v57, %v1056_v39 }
  0x89   : > { %6240 = vst [vmem:[#allocation38_spill] sm:$0xff] %v4086_v24  ;;  %2658 = vperm.xlu1 %3438, %v2615_v55   ;;  %v2362_v55 = vmul.f32 %v4045_v8, %v3940_v11  ;;  %v2410_v63 = vadd.f32 %v2394_v1, %v2377_v59  ;;  %v2331_v11 = vmul.f32 %v4059_v31, %v4014_v33  ;;  %vm892_vm2 = vweird.f32 %v4110_v49 }
  0x8a   : > { %6241 = vst [vmem:[#allocation39_spill] sm:$0xff] %v4091_v52  ;;  %v2330_v52 = vmul.f32 %v4059_v31, %v4041_v2  ;;  %v2364_v59 = vmul.f32 %v4045_v8, %v4021_v40  ;;  %v1314_v39 = vmul.f32 %v4103_v38, %v1297_v43  ;;  %v2329_v35 = vmul.f32 %v4059_v31, %v3930_v5  ;;  %vm4172_vm3 = vmor %vm891_vm1, %vm892_vm2 }
  0x8b   : > { %6242 = vst [vmem:[#allocation40_spill] sm:$0xff] %v4093_v27  ;;  %v2363_v27 = vmul.f32 %v4045_v8, %v4047_v20  ;;  %v1346_v20 = vld [vmem:[#allocation2 + $0xf] sm:$0xff]  ;;  %v2443_v2 = vadd.f32 %v2427_v18, %v2410_v63  ;;  %v1220_v63 = vmul.f32 %v3943_v14, %v4021_v40  ;;  %vm3004_vm1 = vcmask 523264  }
  0x8c   : > { %6243 = vst [vmem:[#allocation41_spill] sm:$0xff] %v4098_v26  ;;  %v1316_v26 = vmul.f32 %v4103_v38, %v1299_v7  ;;  %v1024_v7 = vmul.f32 %v3915_v56, %v1007_v36  ;;  %v4166_v1 = vmul.f32 %v4106_v41, %v1346_v20  ;;  %v2380_v18 = vadd.f32 %v2364_v59, %v2331_v11 }
  0x8d   : > { %6244 = vst [vmem:[#allocation42_spill] sm:$0xff] %v4103_v38  ;;  %v2379_v21 = vadd.f32 %v2363_v27, %v2330_v52  ;;  %v2397_v27 = vmul.f32 %v4061_v47, %v4057_v46  ;;  %2470 = vperm.xlu0 %3437, %v2443_v2   ;;  %v2430_v2 = vmul.f32 %v4081_v10, %v4069_v42  ;;  %v803_v20 = vsel %vm637_vm0, %v752_v25, 0.0 }
  0x8e   : > { %6245 = vst [vmem:[#allocation43_spill] sm:$0xff] %v4106_v41  ;;  %v1089_v36 = vadd.f32 %v1073_v61, %v1024_v7  ;;  %v1053_v7 = vld [vmem:[#allocation2 + $0x19] sm:$0xff]  ;;  %v4183_v61 = vadd.f32 %v2362_v55, %v2329_v35  ;;  %v1283_v59 = vadd.f32 %v1267_v48, %v3994_v58  ;;  %v1171_v25 = vmul.f32 %v3938_v9, %v4014_v33  ;;  %v4198_v48 = vld [vmem:[#allocation2 + $0x5] sm:$0xff] }
  0x8f   : > { %6246 = vst [vmem:[#allocation44_spill] sm:$0xff] %v4121_v13  ;;  %v887_v13 = vmul.f32 %v4110_v49, %v886_v53  ;;  %v1004_v53 = vld [vmem:[#allocation2 + $0x18] sm:$0xff]  ;;  %v2413_v43 = vadd.f32 %v2397_v27, %v2380_v18  ;;  %v4190_v27 = vmul.f32 %v4045_v8, %v3973_v37  ;;  %vm3166_vm2 = vcmask 15360  }
  0x90   : > { %6247 = vst [vmem:[#allocation45_spill] sm:$0xff] %v4125_v15  ;;  %v2412_v15 = vadd.f32 %v2396_v60, %v2379_v21  ;;  %v1122_v60 = vmul.f32 %v3928_v4, %v4012_v32  ;;  %v1021_v18 = vmul.f32 %v3915_v56, %v1004_v53 }
  0x91   : > { %6248 = vst [vmem:[#allocation46_spill] sm:$0xff] %v4131_v28  ;;  %v1959_v28 = vmul.f32 %v3933_v12, %v3966_v30  ;;  %v888_v52 = vmul.f32 0.5, %v887_v13 }
  0x92   : > { %v2445_v21 = vadd.f32 %v2429_v6, %v2412_v15  ;;  %v802_v6 = vsel %vm637_vm0, %v751_v50, 0.0  ;;  %v1926_v15 = vmul.f32 %v3949_v16, %v3964_v29  ;;  %6251 = vst [vmem:[#allocation47_spill] sm:$0xff] %v4190_v27  ;;  %v1296_v50 = vld [vmem:[#allocation2 + $0x6] sm:$0xff]  ;;  %v1332_v27 = vadd.f32 %v1316_v26, %v1283_v59 }
  0x93   : > { %v889_v13 = vsub.f32 1.5, %v888_v52  ;;  %v804_v11 = vadd.f32 %v803_v20, %v802_v6  ;;  %v1992_v52 = vmul.f32 %v3954_v19, %v3973_v37  ;;  %v1345_v29 = vld [vmem:[#allocation2 + $0x7] sm:$0xff]  ;;  %6252 = vst [vmem:[#allocation48_spill] sm:$0xff] %v4198_v48  ;;  %v2446_v6 = vadd.f32 %v2430_v2, %v2413_v43  ;;  %v1006_v2 = vld [vmem:[#allocation2 + $0x30] sm:$0xff] }
  0x94   : > { %2480 = vperm.xlu2 %3436, %v2445_v21   ;;  %v1138_v21 = vadd.f32 %v1122_v60, %v1089_v36  ;;  %v1975_v20 = vadd.f32 %v1959_v28, %v1926_v15  ;;  %v1264_v36 = vmul.f32 %v3982_v44, %v4198_v48  ;;  %v1313_v60 = vmul.f32 %v4103_v38, %v1296_v50  ;;  %v1055_v15 = vld [vmem:[#allocation2 + $0x31] sm:$0xff] }
  0x95   : > { %v890_v5 = vmul.f32 %v4110_v49, %v889_v13  ;;  %v805_v58 = vrot.slane %v804_v11, 4  ;;  %v1070_v13 = vmul.f32 %v3918_v57, %v1053_v7  ;;  %v1930_v28 = vmul.f32 %v3949_v16, %v4012_v32 }
  0x96   : > { %v1963_v43 = vmul.f32 %v3933_v12, %v4014_v33  ;;  %v1187_v7 = vadd.f32 %v1171_v25, %v1138_v21  ;;  %v1023_v25 = vmul.f32 %v3915_v56, %v1006_v2  ;;  %v1072_v21 = vmul.f32 %v3918_v57, %v1055_v15 }
  0x97   : > { %v894_v55 = vsel %vm4172_vm3, %v4110_v49, %v890_v5  ;;  %v806_v53 = vadd.f32 %v805_v58, %v804_v11  ;;  %v4207_v49 = vmul.f32 %v4106_v41, %v1345_v29  ;;  %v1086_v5 = vadd.f32 %v1070_v13, %v1021_v18  ;;  %v6259_v2 = vld [vmem:[#allocation45_spill] sm:$0xff] }
  0x98   : > { %v933_v37 = vmul.f32 %v894_v55, %v3876_v17  ;;  %v934_v35 = vmul.f32 %v894_v55, %v3879_v23  ;;  %v1330_v23 = vadd.f32 %v1314_v39, %v4016_v34  ;;  %v1119_v11 = vmul.f32 %v3928_v4, %v4025_v45 }
  0x99   : > { %v807_v26 = vrot.slane %v806_v53, 2  ;;  %v2332_v34 = vmul.f32 %v4059_v31, %v4086_v24  ;;  %v2365_v39 = vmul.f32 %v4045_v8, %v4095_v54  ;;  %v4226_v29 = vadd.f32 %v4143_v22, %v1332_v27 }
  0x9a   : > { %949 = vst.msk [vmem:[#allocation2 + $0x63] sm:$0xff] %vm637_vm0, %v933_v37  ;;  %v961_v17 = vperm.slane %v933_v37, 0  ;;  %v978_v50 = vperm.slane %v934_v35, 7  ;;  %v2008_v55 = vadd.f32 %v1992_v52, %v1975_v20  ;;  %v1280_v18 = vadd.f32 %v1264_v36, %v4029_v62 }
  0x9b   : > { %950 = vst.msk [vmem:[#allocation2 + $0x6b] sm:$0xff] %vm637_vm0, %v934_v35  ;;  %v808_v59 = vadd.f32 %v807_v26, %v806_v53  ;;  %v4233_v58 = vmul.f32 %v3954_v19, %v4021_v40  ;;  %v1927_v13 = vmul.f32 %v3949_v16, %v4025_v45  ;;  %v4239_v22 = vadd.f32 %v4166_v1, %v1330_v23  ;;  %v6261_v26 = vld [vmem:[#allocation30_spill] sm:$0xff] }
  0x9c   : > { %970 = vst.msk [vmem:[#allocation2 + $0x60] sm:$0x7] %vm965_vm15, %v961_v17  ;;  %2485 = vperm.xlu2 %3436, %v2446_v6   ;;  %v4241_v52 = vadd.f32 %v1963_v43, %v1930_v28  ;;  %v1135_v27 = vadd.f32 %v1119_v11, %v1086_v5  ;;  %v4245_v35 = vmul.f32 %v3943_v14, %v4032_v51  ;;  %v4252_v53 = vperm.slane %v3911_v3, 3 }
  0x9d   : > { %6253 = vst [vmem:[#allocation49_spill] sm:$0xff] %v4226_v29  ;;  %v809_v37 = vrot.slane %v808_v59, 1  ;;  %v4247_v62 = vadd.f32 %v1220_v63, %v1187_v7  ;;  %v2381_v20 = vadd.f32 %v2365_v39, %v2332_v34  ;;  %v4256_v1 = vmul.f32 %v3954_v19, %v4032_v51  ;;  %v6263_v34 = vld [vmem:[#allocation44_spill] sm:$0xff] }
  0x9e   : > { %987 = vst.msk [vmem:[#allocation2 + $0x73] sm:$0xf] %vm982_vm10, %v978_v50  ;;  %v1088_v17 = vadd.f32 %v1072_v21, %v1023_v25  ;;  %v1121_v23 = vmul.f32 %v3928_v4, %v4039_v0  ;;  %v1329_v43 = vadd.f32 %v1313_v60, %v1280_v18  ;;  %v4265_v15 = vadd.f32 %v6259_v2, %v1927_v13  ;;  %v6265_v13 = vld [vmem:[#allocation13_spill] sm:$0xff] }
  0x9f   : > { %6254 = vst [vmem:[#allocation50_spill] sm:$0xff] %v4239_v22  ;;  %v810_v36 = vadd.f32 %v809_v37, %v808_v59  ;;  %v1170_v7 = vmul.f32 %v3938_v9, %v6261_v26  ;;  %v1184_v39 = vadd.f32 %v6263_v34, %v1135_v27  ;;  %v6264_v59 = vld [vmem:[#allocation32_spill] sm:$0xff]  ;;  %v4280_v60 = vmul.f32 %v3949_v16, %v4039_v0  ;;  %v6266_v27 = vld [vmem:[#allocation22_spill] sm:$0xff] }
  0xa0   : > { %6255 = vst [vmem:[#allocation51_spill] sm:$0xff] %v4247_v62  ;;  %v4276_v50 = vmul.f32 %v3943_v14, %v6264_v59  ;;  %v2395_v25 = vmul.f32 %v4061_v47, %v4014_v33  ;;  %v2025_v34 = vmul.f32 %v4252_v53, %v6266_v27  ;;  %v1137_v29 = vadd.f32 %v1121_v23, %v1088_v17  ;;  %v4305_v17 = vld [vmem:[#allocation2 + $0x22] sm:$0xff] }
  0xa1   : > { %v4249_v6 = vld [vmem:[#allocation2 + $0x63] sm:$0xff]  ;;  %6256 = vst [vmem:[#allocation52_spill] sm:$0xff] %v4252_v53  ;;  %v834_v37 = vmul.f32 %v810_v36, %v6265_v13  ;;  %v1962_v22 = vmul.f32 %v3933_v12, %v6261_v26  ;;  %v2333_v62 = vmul.f32 %v4059_v31, %v4057_v46  ;;  %v4298_v38 = vperm.slane %v3911_v3, 4 }
  0xa2   : > { %6257 = vst [vmem:[#allocation53_spill] sm:$0xff] %v4256_v1  ;;  %v4260_v28 = vld [vmem:[#allocation2 + $0x64] sm:$0xff]  ;;  %v2398_v63 = vmul.f32 %v4061_v47, %v4249_v6  ;;  %v2366_v27 = vmul.f32 %v4045_v8, %v4069_v42  ;;  %v2428_v45 = vmul.f32 %v4081_v10, %v4021_v40  ;;  %v2041_v48 = vadd.f32 %v2025_v34, %v2008_v55 }
  0xa3   : > { %6258 = vst [vmem:[#allocation54_spill] sm:$0xff] %v4260_v28  ;;  %v4269_v5 = vld [vmem:[#allocation2 + $0x62] sm:$0xff]  ;;  %v2431_v11 = vmul.f32 %v4081_v10, %v4260_v28  ;;  %v4287_v2 = vld [vmem:[#allocation2 + $0x6b] sm:$0xff]  ;;  %v1998_v33 = vmul.f32 %v3954_v19, %v4069_v42 }
  0xa4   : > { %6260 = vst [vmem:[#allocation45_spill] sm:$0xff] %v4265_v15  ;;  %v2601_v21 = vmax.f32 %v4269_v5, %v4249_v6  ;;  %v2414_v18 = vadd.f32 %v2398_v63, %v2381_v20  ;;  %v4301_v63 = vadd.f32 1e-05, %v834_v37  ;;  %v6269_v23 = vld [vmem:[#allocation33_spill] sm:$0xff]  ;;  %v2411_v15 = vadd.f32 %v2395_v25, %v4183_v61 }
  0xa5   : > { %6262 = vst [vmem:[#allocation30_spill] sm:$0xff] %v4269_v5  ;;  %v4293_v41 = vld [vmem:[#allocation2 + $0x6c] sm:$0xff]  ;;  %v1932_v13 = vmul.f32 %v3949_v16, %v6269_v23  ;;  %v4317_v37 = vld [vmem:[#allocation2 + $0x23] sm:$0xff]  ;;  %v1965_v61 = vmul.f32 %v3933_v12, %v4057_v46 }
  0xa6   : > { %6267 = vst [vmem:[#allocation44_spill] sm:$0xff] %v4298_v38  ;;  %v2617_v20 = vmax.f32 %v2601_v21, %v4260_v28  ;;  %v2447_v36 = vadd.f32 %v2431_v11, %v2414_v18  ;;  %v1008_v0 = vld [vmem:[#allocation2 + $0x48] sm:$0xff]  ;;  %v2399_v11 = vmul.f32 %v4061_v47, %v4287_v2  ;;  %3460 = vrsqrt.f32 %v4301_v63 }
  0xa7   : > { %6268 = vst [vmem:[#allocation32_spill] sm:$0xff] %v4305_v17  ;;  %v1057_v1 = vld [vmem:[#allocation2 + $0x49] sm:$0xff]  ;;  %v2382_v21 = vadd.f32 %v2366_v27, %v2333_v62  ;;  %v2432_v18 = vmul.f32 %v4081_v10, %v4293_v41  ;;  %v4329_v47 = vperm.slane %v3911_v3, 6  ;;  %v4333_v62 = vmul.f32 %v3954_v19, %v6264_v59  ;;  %v4338_v10 = vld [vmem:[%s3796_s30 + $0x60] sm:$0xff] }
  0xa8   : > { %2668 = vperm.xlu1 %3438, %v2617_v20   ;;  %2490 = vperm.xlu0 %3437, %v2447_v36   ;;  %6270 = vst [vmem:[#allocation22_spill] sm:$0xff] %v4317_v37  ;;  %v4321_v25 = vld [vmem:[#allocation2 + $0x24] sm:$0xff]  ;;  %v2058_v20 = vmul.f32 %v4298_v38, %v4305_v17  ;;  %v4326_v36 = vperm.slane %v3911_v3, 5  ;;  %v1025_v55 = vmul.f32 %v3915_v56, %v1008_v0  ;;  %vm901_vm4 = vweird.f32 %v4301_v63 }
  0xa9   : > { %6271 = vst [vmem:[#allocation55_spill] sm:$0xff] %v4321_v25  ;;  %v1074_v34 = vmul.f32 %v3918_v57, %v1057_v1  ;;  %v2415_v27 = vadd.f32 %v2399_v11, %v2382_v21  ;;  %v4341_v40 = vld [vmem:[%s3796_s30 + $0x68] sm:$0xff]  ;;  %v1186_v17 = vadd.f32 %v1170_v7, %v1137_v29  ;;  %v2444_v8 = vadd.f32 %v2428_v45, %v2411_v15 }
  0xaa   : > { %6272 = vst [vmem:[#allocation56_spill] sm:$0xff] %v4326_v36  ;;  %v2074_v30 = vadd.f32 %v2058_v20, %v2041_v48  ;;  %v2091_v32 = vmul.f32 %v4326_v36, %v4317_v37  ;;  %v2124_v0 = vmul.f32 %v4329_v47, %v4321_v25  ;;  %v4350_v1 = vperm.slane %v3911_v3, 7  ;;  %v4352_v21 = vld [vmem:[#allocation2 + $0x25] sm:$0xff] }
  0xab   : > { %6273 = vst [vmem:[#allocation57_spill] sm:$0xff] %v4329_v47  ;;  %v2448_v28 = vadd.f32 %v2432_v18, %v2415_v27  ;;  %v1981_v11 = vadd.f32 %v1965_v61, %v1932_v13  ;;  %v692_v29 = vsel %vm637_vm0, %v4338_v10, 0.0  ;;  %v693_v48 = vsel %vm637_vm0, %v4341_v40, 0.0  ;;  %v4367_v3 = vld [vmem:[%s6215_s23 + $0x8] sm:$0xff]  ;;  %v4371_v18 = vld [vmem:[#allocation2 + $0x55] sm:$0xff] }
  0xac   : > { %6274 = vst [vmem:[#allocation58_spill] sm:$0xff] %v4333_v62  ;;  %v2107_v62 = vadd.f32 %v2091_v32, %v2074_v30  ;;  %v3461_v7 = vpop.eup %3460  ;;  %v4359_v45 = vadd.f32 %v4207_v49, %v1329_v43  ;;  %v4362_v15 = vadd.f32 %v4245_v35, %v1184_v39  ;;  %v1090_v13 = vadd.f32 %v1074_v34, %v1025_v55  ;;  %v6279_v30 = vld [vmem:[#allocation37_spill] sm:$0xff] }
  0xad   : > { %6275 = vst [vmem:[#allocation59_spill] sm:$0xff] %v4350_v1  ;;  %v1123_v32 = vmul.f32 %v3928_v4, %v6279_v30  ;;  %2495 = vperm.xlu2 %3436, %v2448_v28   ;;  %v4374_v61 = vadd.f32 %v4276_v50, %v1186_v17  ;;  %v4377_v49 = vadd.f32 %v1962_v22, %v4280_v60  ;;  %v4380_v35 = vperm.slane %v4367_v3, 3  ;;  %v4388_v55 = vld [vmem:[#allocation2 + $0x6a] sm:$0xff]  ;;  %v6284_v17 = vld [vmem:[#allocation28_spill] sm:$0xff] }
  0xae   : > { %6276 = vst [vmem:[#allocation60_spill] sm:$0xff] %v4352_v21  ;;  %v896_v43 = vmul.f32 %v3461_v7, %v4301_v63  ;;  %v4384_v39 = vperm.slane %v4367_v3, 4  ;;  %v2140_v20 = vadd.f32 %v2124_v0, %v2107_v62  ;;  %v2157_v28 = vmul.f32 %v4350_v1, %v4352_v21 }
  0xaf   : > { %6277 = vst [vmem:[#allocation61_spill] sm:$0xff] %v4359_v45  ;;  %v694_v50 = vadd.f32 %v693_v48, %v692_v29  ;;  %v4392_v22 = vmul.f32 %v4380_v35, %v6284_v17  ;;  %v2014_v34 = vadd.f32 %v1998_v33, %v1981_v11  ;;  %v2031_v27 = vmul.f32 %v4252_v53, %v4371_v18 }
  0xb0   : > { %6278 = vst [vmem:[#allocation62_spill] sm:$0xff] %v4362_v15  ;;  %2475 = vperm.xlu1 %3438, %v2444_v8   ;;  %v897_v60 = vmul.f32 %v3461_v7, %v896_v43  ;;  %v1139_v45 = vadd.f32 %v1123_v32, %v1090_v13  ;;  %v1172_v8 = vmul.f32 %v3938_v9, %v4086_v24  ;;  %vm902_vm5 = vweird.f32 %v3461_v7  ;;  %v6286_v13 = vld [vmem:[#allocation40_spill] sm:$0xff] }
  0xb1   : > { %6280 = vst [vmem:[#allocation63_spill] sm:$0xff] %v4374_v61  ;;  %v1931_v62 = vmul.f32 %v3949_v16, %v6279_v30  ;;  %v1271_v0 = vmul.f32 %v3982_v44, %v4371_v18  ;;  %v2064_v33 = vmul.f32 %v4298_v38, %v4388_v55  ;;  %v1964_v11 = vmul.f32 %v3933_v12, %v4086_v24  ;;  %vm903_vm6 = vmor %vm901_vm4, %vm902_vm5 }
  0xb2   : > { %6281 = vst [vmem:[#allocation64_spill] sm:$0xff] %v4377_v49  ;;  %v898_v29 = vmul.f32 0.5, %v897_v60  ;;  %v2173_v48 = vadd.f32 %v2157_v28, %v2140_v20  ;;  %v695_v43 = vrot.slane %v694_v50, 4  ;;  %v2047_v60 = vadd.f32 %v2031_v27, %v2014_v34  ;;  %v4416_v49 = vld [vmem:[#allocation2 + $0x3d] sm:$0xff]  ;;  %v4435_v34 = vld [vmem:[#allocation2 + $0x6d] sm:$0xff] }
  0xb3   : > { %6282 = vst [vmem:[#allocation65_spill] sm:$0xff] %v4380_v35  ;;  %v4408_v32 = vadd.f32 %v1271_v0, %v6286_v13  ;;  %v2097_v30 = vmul.f32 %v4326_v36, %v4287_v2  ;;  %v1221_v15 = vmul.f32 %v3943_v14, %v4095_v54  ;;  %v4422_v20 = vmul.f32 %v3954_v19, %v4095_v54 }
  0xb4   : > { %6283 = vst [vmem:[#allocation66_spill] sm:$0xff] %v4384_v39  ;;  %v899_v61 = vsub.f32 1.5, %v898_v29  ;;  %v4426_v28 = vmul.f32 %v4380_v35, %v6261_v26  ;;  %v4430_v0 = vmul.f32 %v4384_v39, %v6264_v59  ;;  %v1188_v27 = vadd.f32 %v1172_v8, %v1139_v45 }
  0xb5   : > { %6285 = vst [vmem:[#allocation28_spill] sm:$0xff] %v4392_v22  ;;  %v4412_v22 = vmul.f32 %v4384_v39, %v4032_v51  ;;  %v2080_v13 = vadd.f32 %v2064_v33, %v2047_v60  ;;  %v2163_v45 = vmul.f32 %v4350_v1, %v4435_v34  ;;  %v4451_v8 = vmul.f32 %v4380_v35, %v4086_v24  ;;  %v1059_v24 = vld [vmem:[#allocation2 + $0x61] sm:$0xff] }
  0xb6   : > { %6287 = vst [vmem:[#allocation40_spill] sm:$0xff] %v4408_v32  ;;  %v900_v29 = vmul.f32 %v3461_v7, %v899_v61  ;;  %v696_v32 = vadd.f32 %v695_v43, %v694_v50  ;;  %v2062_v61 = vmul.f32 %v4298_v38, %v6269_v23  ;;  %v2095_v50 = vmul.f32 %v4326_v36, %v4057_v46 }
  0xb7   : > { %6288 = vst [vmem:[#allocation67_spill] sm:$0xff] %v4412_v22  ;;  %v2130_v22 = vmul.f32 %v4329_v47, %v4293_v41  ;;  %v2113_v21 = vadd.f32 %v2097_v30, %v2080_v13  ;;  %v2128_v13 = vmul.f32 %v4329_v47, %v4069_v42 }
  0xb8   : > { %6289 = vst [vmem:[#allocation68_spill] sm:$0xff] %v4422_v20  ;;  %v4439_v20 = vadd.f32 %v1964_v11, %v1931_v62  ;;  %2196 = vperm.xlu1 %3438, %v2173_v48   ;;  %v904_v63 = vsel %vm903_vm6, %v3461_v7, %v900_v29  ;;  %v6294_v62 = vld [vmem:[#allocation39_spill] sm:$0xff]  ;;  %v6295_v11 = vld [vmem:[#allocation41_spill] sm:$0xff]  ;;  %v4455_v48 = vadd.f32 %v1221_v15, %v1188_v27 }
  0xb9   : > { %6290 = vst [vmem:[#allocation69_spill] sm:$0xff] %v4426_v28  ;;  %v2012_v28 = vadd.f32 %v4233_v58, %v4241_v52  ;;  %v935_v33 = vmul.f32 %v904_v63, %v6294_v62  ;;  %v936_v58 = vmul.f32 %v904_v63, %v6295_v11  ;;  %v4459_v7 = vmul.f32 %v4384_v39, %v4095_v54  ;;  %v6298_v54 = vld [vmem:[#allocation46_spill] sm:$0xff] }
  0xba   : > { %6291 = vst [vmem:[#allocation70_spill] sm:$0xff] %v4430_v0  ;;  %v2029_v0 = vmul.f32 %v4252_v53, %v4416_v49  ;;  %v2146_v30 = vadd.f32 %v2130_v22, %v2113_v21  ;;  %v1966_v15 = vmul.f32 %v3933_v12, %v4249_v6  ;;  %v2027_v21 = vmul.f32 %v4252_v53, %v6298_v54  ;;  %v6299_v63 = vld [vmem:[#allocation54_spill] sm:$0xff] }
  0xbb   : > { %6292 = vst [vmem:[#allocation71_spill] sm:$0xff] %v4439_v20  ;;  %v962_v43 = vperm.slane %v935_v33, 0  ;;  %v979_v60 = vperm.slane %v936_v58, 7  ;;  %v697_v22 = vrot.slane %v696_v32, 2  ;;  %v2334_v27 = vmul.f32 %v4059_v31, %v4249_v6 }
  0xbc   : > { %6293 = vst [vmem:[#allocation72_spill] sm:$0xff] %v4451_v8  ;;  %v2045_v52 = vadd.f32 %v2029_v0, %v2012_v28  ;;  %v2179_v28 = vadd.f32 %v2163_v45, %v2146_v30  ;;  %v1933_v0 = vmul.f32 %v3949_v16, %v4269_v5  ;;  %v2335_v45 = vmul.f32 %v4059_v31, %v4287_v2  ;;  %v6302_v30 = vld [vmem:[#allocation23_spill] sm:$0xff] }
  0xbd   : > { %6296 = vst [vmem:[#allocation39_spill] sm:$0xff] %v4455_v48  ;;  %v2060_v54 = vmul.f32 %v4298_v38, %v6302_v30  ;;  %v2033_v8 = vmul.f32 %v4252_v53, %v4435_v34  ;;  %v6306_v48 = vld [vmem:[#allocation24_spill] sm:$0xff] }
  0xbe   : > { %6297 = vst [vmem:[#allocation41_spill] sm:$0xff] %v4459_v7  ;;  %v2078_v29 = vadd.f32 %v2062_v61, %v2045_v52  ;;  %v6300_v61 = vld [vmem:[#allocation31_spill] sm:$0xff] }
  0xbf   : > { %951 = vst.msk [vmem:[#allocation2 + $0x7b] sm:$0xff] %vm637_vm0, %v935_v33  ;;  %v2367_v62 = vmul.f32 %v6300_v61, %v6299_v63  ;;  %v2368_v11 = vmul.f32 %v6300_v61, %v4293_v41 }
  0xc0   : > { %952 = vst.msk [vmem:[#allocation2 + $0x83] sm:$0xff] %vm637_vm0, %v936_v58  ;;  %v2111_v33 = vadd.f32 %v2095_v50, %v2078_v29  ;;  %v6301_v58 = vld [vmem:[#allocation21_spill] sm:$0xff]  ;;  %2226 = vperm.xlu1 %3438, %v2179_v28   ;;  %v1967_v50 = vmul.f32 %v3933_v12, %v4287_v2  ;;  %v1999_v29 = vmul.f32 %v3954_v19, %v6299_v63  ;;  %v6305_v28 = vld [vmem:[#allocation19_spill] sm:$0xff] }
  0xc1   : > { %971 = vst.msk [vmem:[#allocation2 + $0x78] sm:$0x7] %vm965_vm15, %v962_v43  ;;  %v2043_v52 = vadd.f32 %v2027_v21, %v6301_v58  ;;  %v1934_v43 = vmul.f32 %v3949_v16, %v4388_v55  ;;  %v4498_v21 = vmul.f32 %v4380_v35, %v4057_v46  ;;  %v1982_v58 = vadd.f32 %v1966_v15, %v1933_v0 }
  0xc2   : > { %988 = vst.msk [vmem:[#allocation2 + $0x8b] sm:$0xf] %vm982_vm10, %v979_v60  ;;  %v4486_v7 = vadd.f32 %v2128_v13, %v2111_v33  ;;  %v2000_v60 = vmul.f32 %v3954_v19, %v4293_v41  ;;  %v4502_v13 = vmul.f32 %v4384_v39, %v4069_v42  ;;  %v2327_v33 = vmul.f32 %v4059_v31, %v6305_v28  ;;  %v6308_v28 = vld [vmem:[#allocation26_spill] sm:$0xff] }
  0xc3   : > { %6303 = vst [vmem:[#allocation46_spill] sm:$0xff] %v4498_v21  ;;  %v2383_v30 = vadd.f32 %v2367_v62, %v2334_v27  ;;  %v1983_v61 = vadd.f32 %v1967_v50, %v1934_v43  ;;  %v4510_v19 = vmul.f32 %v4380_v35, %v6306_v48  ;;  %v2384_v46 = vadd.f32 %v2368_v11, %v2335_v45  ;;  %v6310_v27 = vld [vmem:[#allocation35_spill] sm:$0xff]  ;;  %v1010_v45 = vld [vmem:[#allocation2 + $0x60] sm:$0xff] }
  0xc4   : > { %6304 = vst [vmem:[#allocation54_spill] sm:$0xff] %v4502_v13  ;;  %v2076_v21 = vadd.f32 %v2060_v54, %v2043_v52  ;;  %v2093_v42 = vmul.f32 %v4326_v36, %v6306_v48  ;;  %v4516_v13 = vld [vmem:[#allocation2 + $0x65] sm:$0xff]  ;;  %v4520_v15 = vmul.f32 %v4384_v39, %v6308_v28  ;;  %v4528_v31 = vadd.f32 %v697_v22, %v696_v32  ;;  %v6312_v52 = vld [vmem:[#allocation47_spill] sm:$0xff] }
  0xc5   : > { %6307 = vst [vmem:[#allocation21_spill] sm:$0xff] %v4510_v19  ;;  %v2016_v50 = vadd.f32 %v2000_v60, %v1983_v61  ;;  %v6311_v11 = vld [vmem:[#allocation36_spill] sm:$0xff]  ;;  %v2376_v54 = vadd.f32 %v6312_v52, %v2327_v33  ;;  %v2393_v19 = vmul.f32 %v6310_v27, %v4317_v37  ;;  %v2015_v22 = vadd.f32 %v1999_v29, %v1982_v58  ;;  %v4543_v60 = vld [vmem:[#allocation2 + $0x68] sm:$0xff] }
  0xc6   : > { %v4512_v12 = vld [vmem:[#allocation2 + $0x7b] sm:$0xff]  ;;  %6309 = vst [vmem:[#allocation23_spill] sm:$0xff] %v4520_v15  ;;  %v2032_v61 = vmul.f32 %v4252_v53, %v4516_v13  ;;  %v2109_v37 = vadd.f32 %v2093_v42, %v2076_v21  ;;  %v1027_v39 = vmul.f32 %v3915_v56, %v1010_v45  ;;  %v2426_v21 = vmul.f32 %v6311_v11, %v4321_v25  ;;  %v4559_v42 = vld [vmem:[#allocation2 + $0x69] sm:$0xff] }
  0xc7   : > { %v4522_v0 = vld [vmem:[#allocation2 + $0x7c] sm:$0xff]  ;;  %v2400_v62 = vmul.f32 %v6310_v27, %v4512_v12  ;;  %v2049_v32 = vadd.f32 %v2033_v8, %v2016_v50  ;;  %6313 = vst [vmem:[#allocation19_spill] sm:$0xff] %v4543_v60 }
  0xc8   : > { %v4526_v43 = vld [vmem:[#allocation2 + $0x83] sm:$0xff]  ;;  %v2433_v48 = vmul.f32 %v6311_v11, %v4522_v0  ;;  %v4554_v58 = vld [vmem:[#allocation2 + $0x7a] sm:$0xff]  ;;  %6315 = vst [vmem:[#allocation26_spill] sm:$0xff] %v4559_v42 }
  0xc9   : > { %v2401_v15 = vmul.f32 %v6310_v27, %v4526_v43  ;;  %v4537_v16 = vld [vmem:[#allocation2 + $0x82] sm:$0xff]  ;;  %v2416_v20 = vadd.f32 %v2400_v62, %v2383_v30  ;;  %v2126_v27 = vmul.f32 %v4329_v47, %v6308_v28  ;;  %v2099_v29 = vmul.f32 %v4326_v36, %v4526_v43  ;;  %6314 = vst [vmem:[#allocation24_spill] sm:$0xff] %v4554_v58  ;;  %v6319_v25 = vld [vmem:[#allocation27_spill] sm:$0xff] }
  0xca   : > { %v4539_v23 = vld [vmem:[#allocation2 + $0x84] sm:$0xff]  ;;  %v2066_v8 = vmul.f32 %v4298_v38, %v4537_v16 }
  0xcb   : > { %v2417_v33 = vadd.f32 %v2401_v15, %v2384_v46  ;;  %v2434_v52 = vmul.f32 %v6311_v11, %v4539_v23  ;;  %v2449_v30 = vadd.f32 %v2433_v48, %v2416_v20  ;;  %v1076_v46 = vmul.f32 %v3918_v57, %v1059_v24  ;;  %v4561_v62 = vld [vmem:[#allocation2 + $0x85] sm:$0xff] }
  0xcc   : > { %v2409_v15 = vadd.f32 %v2393_v19, %v2376_v54  ;;  %6316 = vst [vmem:[#allocation47_spill] sm:$0xff] %v4561_v62  ;;  %v1028_v20 = vmul.f32 %v3915_v56, %v4543_v60  ;;  %v2082_v50 = vadd.f32 %v2066_v8, %v2049_v32  ;;  %v2132_v45 = vmul.f32 %v4329_v47, %v4539_v23 }
  0xcd   : > { %v2450_v28 = vadd.f32 %v2434_v52, %v2417_v33  ;;  %2500 = vperm.xlu0 %3437, %v2449_v30   ;;  %v2048_v48 = vadd.f32 %v2032_v61, %v2015_v22  ;;  %v2142_v24 = vadd.f32 %v2126_v27, %v2109_v37  ;;  %v2159_v19 = vmul.f32 %v4350_v1, %v4416_v49  ;;  %v6317_v22 = vld [vmem:[#allocation48_spill] sm:$0xff] }
  0xce   : > { %v2065_v54 = vmul.f32 %v4298_v38, %v4554_v58  ;;  %v2098_v33 = vmul.f32 %v4326_v36, %v4512_v12  ;;  %v1077_v52 = vmul.f32 %v3918_v57, %v4559_v42  ;;  %v2115_v30 = vadd.f32 %v2099_v29, %v2082_v50  ;;  %v6318_v29 = vld [vmem:[#allocation25_spill] sm:$0xff] }
  0xcf   : > { %2505 = vperm.xlu2 %3436, %v2450_v28   ;;  %v2165_v32 = vmul.f32 %v4350_v1, %v4561_v62  ;;  %v2024_v37 = vmul.f32 %v4252_v53, %v6317_v22  ;;  %v1092_v27 = vadd.f32 %v1076_v46, %v1027_v39  ;;  %v1125_v61 = vmul.f32 %v3928_v4, %v4269_v5  ;;  %v4581_v28 = vld [vmem:[#allocation2 + $0x1d] sm:$0xff]  ;;  %v6320_v46 = vld [vmem:[#allocation45_spill] sm:$0xff] }
  0xd0   : > { %v2081_v8 = vadd.f32 %v2065_v54, %v2048_v48  ;;  %v699_v11 = vrot.slane %v4528_v31, 1  ;;  %v2442_v60 = vadd.f32 %v2426_v21, %v2409_v15  ;;  %v2148_v42 = vadd.f32 %v2132_v45, %v2115_v30  ;;  %v6321_v22 = vld [vmem:[#allocation53_spill] sm:$0xff]  ;;  %v4592_v54 = vld [vmem:[%s3796_s30 + $0x70] sm:$0xff]  ;;  %v4596_v45 = vld [vmem:[#allocation2 + $0x7d] sm:$0xff] }
  0xd1   : > { %v2040_v50 = vadd.f32 %v2024_v37, %v6318_v29  ;;  %v2057_v57 = vmul.f32 %v4298_v38, %v6319_v25  ;;  %v2175_v56 = vadd.f32 %v2159_v19, %v2142_v24  ;;  %v2131_v39 = vmul.f32 %v4329_v47, %v4522_v0  ;;  %v4601_v24 = vld [vmem:[%s3796_s30 + $0x78] sm:$0xff] }
  0xd2   : > { %v2114_v58 = vadd.f32 %v2098_v33, %v2081_v8  ;;  %v2009_v48 = vadd.f32 %v6321_v22, %v6320_v46  ;;  %v1093_v5 = vadd.f32 %v1077_v52, %v1028_v20  ;;  %v1126_v15 = vmul.f32 %v3928_v4, %v4388_v55  ;;  %v6322_v52 = vld [vmem:[#allocation29_spill] sm:$0xff] }
  0xd3   : > { %v2181_v21 = vadd.f32 %v2165_v32, %v2148_v42  ;;  %v2026_v25 = vmul.f32 %v4252_v53, %v4581_v28  ;;  %v1175_v19 = vmul.f32 %v4287_v2, %v3938_v9  ;;  %v2161_v33 = vmul.f32 %v4350_v1, %v4371_v18 }
  0xd4   : > { %v2090_v20 = vmul.f32 %v4326_v36, %v6284_v17  ;;  %v2059_v30 = vmul.f32 %v4298_v38, %v6322_v52  ;;  %v2073_v42 = vadd.f32 %v2057_v57, %v2040_v50  ;;  %v2092_v37 = vmul.f32 %v4326_v36, %v6261_v26 }
  0xd5   : > { %2465 = vperm.xlu0 %3437, %v2442_v60   ;;  %2236 = vperm.xlu1 %3438, %v2181_v21   ;;  %v2042_v32 = vadd.f32 %v2026_v25, %v2009_v48  ;;  %v701_v8 = vsel %vm637_vm0, %v4592_v54, 0.0  ;;  %v2147_v29 = vadd.f32 %v2131_v39, %v2114_v58  ;;  %v2164_v46 = vmul.f32 %v4350_v1, %v4596_v45  ;;  %v4627_v39 = vld [vmem:[#allocation2 + $0x35] sm:$0xff] }
  0xd6   : > { %v700_v17 = vadd.f32 %v699_v11, %v4528_v31  ;;  %v702_v22 = vsel %vm637_vm0, %v4601_v24, 0.0  ;;  %v1142_v60 = vadd.f32 %v1126_v15, %v1093_v5  ;;  %v2125_v57 = vmul.f32 %v4329_v47, %v6264_v59  ;;  %v6323_v31 = vld [vmem:[#allocation13_spill] sm:$0xff] }
  0xd7   : > { %2206 = vperm.xlu2 %3436, %v2175_v56   ;;  %v2075_v21 = vadd.f32 %v2059_v30, %v2042_v32  ;;  %v703_v50 = vadd.f32 %v702_v22, %v701_v8  ;;  %v1174_v26 = vmul.f32 %v3938_v9, %v4249_v6  ;;  %v2177_v56 = vadd.f32 %v2161_v33, %v4486_v7 }
  0xd8   : > { %v2123_v58 = vmul.f32 %v4329_v47, %v4032_v51  ;;  %v723_v11 = vmul.f32 %v6323_v31, %v700_v17  ;;  %v2106_v48 = vadd.f32 %v2090_v20, %v2073_v42  ;;  %v2158_v5 = vmul.f32 %v4350_v1, %v4627_v39 }
  0xd9   : > { %v2108_v25 = vadd.f32 %v2092_v37, %v2075_v21  ;;  %v704_v15 = vrot.slane %v703_v50, 4  ;;  %v1141_v59 = vadd.f32 %v1125_v61, %v1092_v27  ;;  %v2180_v52 = vadd.f32 %v2164_v46, %v2147_v29  ;;  %v4652_v46 = vld [vmem:[#allocation2 + $0x56] sm:$0xff] }
  0xda   : > { %v4633_v30 = vsub.f32 %v4338_v10, %v723_v11  ;;  %v4636_v7 = vsub.f32 %v4341_v40, %v723_v11  ;;  %v1191_v33 = vadd.f32 %v1175_v19, %v1142_v60  ;;  %v1224_v51 = vmul.f32 %v4293_v41, %v3943_v14  ;;  %6325 = vst [vmem:[#allocation25_spill] sm:$0xff] %v4652_v46 }
  0xdb   : > { %v2141_v32 = vadd.f32 %v2125_v57, %v2108_v25  ;;  %v705_v8 = vadd.f32 %v704_v15, %v703_v50  ;;  %v1223_v20 = vmul.f32 %v3943_v14, %v6299_v63  ;;  %v4644_v42 = vmul.f32 %v4380_v35, %v4249_v6  ;;  %v4661_v57 = vld [vmem:[#allocation2 + $0x3e] sm:$0xff] }
  0xdc   : > { %v753_v10 = vmul.f32 %v4633_v30, %v4633_v30  ;;  %v754_v40 = vmul.f32 %v4636_v7, %v4636_v7  ;;  %v2139_v27 = vadd.f32 %v2123_v58, %v2106_v48  ;;  %v2156_v61 = vmul.f32 %v4350_v1, %v4581_v28  ;;  %6327 = vst [vmem:[#allocation45_spill] sm:$0xff] %v4661_v57  ;;  %v6328_v58 = vld [vmem:[#allocation66_spill] sm:$0xff] }
  0xdd   : > { %6324 = vst [vmem:[#allocation48_spill] sm:$0xff] %v4644_v42  ;;  %2216 = vperm.xlu0 %3437, %v2177_v56   ;;  %v2174_v19 = vadd.f32 %v2158_v5, %v2141_v32  ;;  %v706_v37 = vrot.slane %v705_v8, 2  ;;  %v1190_v29 = vadd.f32 %v1174_v26, %v1141_v59  ;;  %v1269_v17 = vmul.f32 %v3982_v44, %v4416_v49  ;;  %v4676_v5 = vld [vmem:[#allocation2 + $0x6e] sm:$0xff] }
  0xde   : > { %v811_v22 = vsel %vm637_vm0, %v753_v10, 0.0  ;;  %v812_v60 = vsel %vm637_vm0, %v754_v40, 0.0  ;;  %v4659_v21 = vperm.slane %v4367_v3, 2  ;;  %v1240_v50 = vadd.f32 %v1224_v51, %v1191_v33  ;;  %6332 = vst [vmem:[#allocation74_spill] sm:$0xff] %v4676_v5  ;;  %v6335_v40 = vld [vmem:[#allocation51_spill] sm:$0xff] }
  0xdf   : > { %2231 = vperm.xlu2 %3436, %v2180_v52   ;;  %v1273_v56 = vmul.f32 %v4435_v34, %v3982_v44  ;;  %2201 = vperm.xlu1 %3438, %v2174_v19   ;;  %v813_v26 = vadd.f32 %v812_v60, %v811_v22  ;;  %v4667_v11 = vmul.f32 %v6328_v58, %v6299_v63  ;;  %v4674_v25 = vperm.slane %v4367_v3, 5  ;;  %v6334_v52 = vld [vmem:[#allocation42_spill] sm:$0xff]  ;;  %v6336_v60 = vld [vmem:[#allocation32_spill] sm:$0xff] }
  0xe0   : > { %6326 = vst [vmem:[#allocation27_spill] sm:$0xff] %v4659_v21  ;;  %v4671_v48 = vmul.f32 %v4380_v35, %v4287_v2  ;;  %v707_v15 = vadd.f32 %v706_v37, %v705_v8  ;;  %v4680_v59 = vmul.f32 %v6328_v58, %v4293_v41  ;;  %v1320_v33 = vmul.f32 %v6334_v52, %v4652_v46 }
  0xe1   : > { %6329 = vst [vmem:[#allocation53_spill] sm:$0xff] %v4667_v11  ;;  %v2172_v51 = vadd.f32 %v2156_v61, %v2139_v27  ;;  %v814_v32 = vrot.slane %v813_v26, 4  ;;  %v1239_v10 = vadd.f32 %v1223_v20, %v1190_v29  ;;  %v1285_v19 = vadd.f32 %v1269_v17, %v6335_v40  ;;  %v4695_v11 = vld [vmem:[#allocation2 + $0x66] sm:$0xff]  ;;  %v6338_v20 = vld [vmem:[#allocation60_spill] sm:$0xff] }
  0xe2   : > { %6330 = vst [vmem:[#allocation29_spill] sm:$0xff] %v4671_v48  ;;  %v1318_v2 = vmul.f32 %v6334_v52, %v4661_v57  ;;  %v1272_v22 = vmul.f32 %v3982_v44, %v4516_v13  ;;  %v4691_v8 = vmul.f32 %v4659_v21, %v6336_v60  ;;  %v1289_v41 = vadd.f32 %v1273_v56, %v1240_v50  ;;  %v6341_v60 = vld [vmem:[#allocation40_spill] sm:$0xff] }
  0xe3   : > { %6331 = vst [vmem:[#allocation73_spill] sm:$0xff] %v4674_v25  ;;  %v1322_v37 = vmul.f32 %v6334_v52, %v4676_v5  ;;  %v815_v27 = vadd.f32 %v814_v32, %v813_v26  ;;  %v4699_v61 = vmul.f32 %v4674_v25, %v6338_v20  ;;  %v4703_v29 = vmul.f32 %v4659_v21, %v4388_v55  ;;  %v6344_v26 = vld [vmem:[#allocation33_spill] sm:$0xff]  ;;  %v4718_v20 = vld [vmem:[#allocation2 + $0x1e] sm:$0xff] }
  0xe4   : > { %6333 = vst [vmem:[#allocation75_spill] sm:$0xff] %v4680_v59  ;;  %v1266_v17 = vmul.f32 %v4581_v28, %v3982_v44  ;;  %v708_v40 = vrot.slane %v707_v15, 1  ;;  %v4708_v50 = vadd.f32 %v1320_v33, %v6341_v60  ;;  %v4712_v56 = vmul.f32 %v4674_v25, %v4435_v34  ;;  %v3474_v60 = vld [vmem:[#allocation2 + $0x3a] sm:$0xff] }
  0xe5   : > { %6337 = vst [vmem:[#allocation51_spill] sm:$0xff] %v4695_v11  ;;  %v4716_v32 = vmul.f32 %v4659_v21, %v6344_v26  ;;  %2191 = vperm.xlu0 %3437, %v2172_v51   ;;  %v816_v55 = vrot.slane %v815_v27, 2  ;;  %v1334_v42 = vadd.f32 %v1318_v2, %v1285_v19  ;;  %v4722_v5 = vmul.f32 %v4674_v25, %v4371_v18  ;;  %v6349_v18 = vld [vmem:[#allocation62_spill] sm:$0xff]  ;;  %v4844_v57 = vld [vmem:[#allocation2 + $0x80] sm:$0xff] }
  0xe6   : > { %6339 = vst [vmem:[#allocation32_spill] sm:$0xff] %v4699_v61  ;;  %v1288_v59 = vadd.f32 %v1272_v22, %v1239_v10  ;;  %v1321_v33 = vmul.f32 %v6334_v52, %v4695_v11  ;;  %v4727_v34 = vmul.f32 %v3474_v60, %v4659_v21  ;;  %v4731_v26 = vmul.f32 %v4674_v25, %v4416_v49  ;;  %v1396_v61 = vld [vmem:[#allocation2 + $0x20] sm:$0xff] }
  0xe7   : > { %6340 = vst [vmem:[#allocation60_spill] sm:$0xff] %v4703_v29  ;;  %v4733_v51 = vadd.f32 %v1322_v37, %v1289_v41  ;;  %v4737_v19 = vmul.f32 %v4380_v35, %v4512_v12  ;;  %v1282_v10 = vadd.f32 %v1266_v17, %v6349_v18  ;;  %v1315_v2 = vmul.f32 %v6334_v52, %v4718_v20  ;;  %v3475_v18 = vld [vmem:[#allocation2 + $0x1a] sm:$0xff]  ;;  %v6374_v29 = vld [vmem:[#allocation37_spill] sm:$0xff] }
  0xe8   : > { %6342 = vst [vmem:[#allocation40_spill] sm:$0xff] %v4708_v50  ;;  %v709_v22 = vadd.f32 %v708_v40, %v707_v15  ;;  %v4744_v60 = vmul.f32 %v6328_v58, %v4522_v0  ;;  %v4748_v49 = vmul.f32 %v4380_v35, %v4526_v43  ;;  %v4752_v41 = vmul.f32 %v4659_v21, %v4537_v16  ;;  %v6356_v40 = vld [vmem:[#allocation24_spill] sm:$0xff] }
  0xe9   : > { %6343 = vst [vmem:[#allocation76_spill] sm:$0xff] %v4712_v56  ;;  %v817_v56 = vadd.f32 %v816_v55, %v815_v27  ;;  %v4756_v27 = vmul.f32 %v6328_v58, %v4539_v23  ;;  %v4760_v15 = vmul.f32 %v4674_v25, %v4561_v62  ;;  %v4762_v17 = vadd.f32 %v1321_v33, %v1288_v59  ;;  %v3477_v62 = vld [vmem:[#allocation2 + $0x4c] sm:$0xff] }
  0xea   : > { %6345 = vst [vmem:[#allocation33_spill] sm:$0xff] %v4718_v20  ;;  %v4766_v55 = vmul.f32 %v4659_v21, %v6356_v40  ;;  %v4769_v11 = vmul.f32 %v3475_v18, %v4659_v21  ;;  %v4780_v59 = vadd.f32 %v1315_v2, %v1282_v10  ;;  %v4784_v33 = vmul.f32 %v4674_v25, %v4627_v39 }
  0xeb   : > { %6346 = vst [vmem:[#allocation77_spill] sm:$0xff] %v4731_v26  ;;  %v818_v37 = vrot.slane %v817_v56, 1  ;;  %v4790_v18 = vmul.f32 %v6356_v40, %v3928_v4  ;;  %v4800_v10 = vmul.f32 %v4512_v12, %v3938_v9  ;;  %v4804_v2 = vmul.f32 %v4522_v0, %v3943_v14 }
  0xec   : > { %6347 = vst [vmem:[#allocation78_spill] sm:$0xff] %v4733_v51  ;;  %v4831_v50 = vmul.f32 %v4596_v45, %v3982_v44 }
  0xed   : > { %6348 = vst [vmem:[#allocation79_spill] sm:$0xff] %v4737_v19  ;;  %v3476_v19 = vld [vmem:[#allocation2 + $0x32] sm:$0xff]  ;;  %v819_v48 = vadd.f32 %v818_v37, %v817_v56  ;;  %v6367_v37 = vld [vmem:[#allocation64_spill] sm:$0xff] }
  0xee   : > { %6350 = vst [vmem:[#allocation62_spill] sm:$0xff] %v4744_v60  ;;  %v4773_v60 = vmul.f32 %v4674_v25, %v4581_v28  ;;  %v4776_v20 = vmul.f32 %v3476_v19, %v4659_v21  ;;  %v4792_v28 = vld [vmem:[#allocation2 + $0x3f] sm:$0xff]  ;;  %v4795_v19 = vmul.f32 %v6323_v31, %v709_v22  ;;  %v4812_v22 = vld [vmem:[#allocation2 + $0x4d] sm:$0xff]  ;;  %v4819_v25 = vperm.slane %v4367_v3, 0 }
  0xef   : > { %6351 = vst [vmem:[#allocation80_spill] sm:$0xff] %v4748_v49  ;;  %v835_v56 = vmul.f32 %v819_v48, %v6323_v31  ;;  %v2028_v48 = vmul.f32 %v4252_v53, %v4627_v39  ;;  %v6371_v31 = vld [vmem:[#allocation43_spill] sm:$0xff]  ;;  %v2030_v26 = vmul.f32 %v4252_v53, %v4812_v22 }
  0xf0   : > { %6352 = vst [vmem:[#allocation81_spill] sm:$0xff] %v4752_v41  ;;  %v6375_v49 = vld [vmem:[#allocation71_spill] sm:$0xff]  ;;  %v6376_v41 = vld [vmem:[#allocation68_spill] sm:$0xff] }
  0xf1   : > { %6353 = vst [vmem:[#allocation82_spill] sm:$0xff] %v4756_v27  ;;  %v4821_v27 = vadd.f32 1e-05, %v835_v56  ;;  %v2013_v46 = vadd.f32 %v6376_v41, %v6375_v49  ;;  %v1400_v21 = vld [vmem:[#allocation2 + $0x50] sm:$0xff] }
  0xf2   : > { %6354 = vst [vmem:[#allocation83_spill] sm:$0xff] %v4760_v15  ;;  %v4778_v15 = vld [vmem:[#allocation2 + $0x78] sm:$0xff]  ;;  %v6380_v49 = vld [vmem:[#allocation30_spill] sm:$0xff] }
  0xf3   : > { %6355 = vst [vmem:[#allocation84_spill] sm:$0xff] %v4762_v17  ;;  %v6369_v17 = vld [vmem:[#allocation14_spill] sm:$0xff]  ;;  %3462 = vrsqrt.f32 %v4821_v27  ;;  %v2063_v41 = vmul.f32 %v4298_v38, %v6380_v49  ;;  %v2096_v49 = vmul.f32 %v4326_v36, %v4249_v6  ;;  %v1413_v6 = vmul.f32 %v4819_v25, %v1396_v61 }
  0xf4   : > { %6357 = vst [vmem:[#allocation24_spill] sm:$0xff] %v4766_v55  ;;  %v4786_v55 = vld [vmem:[#allocation2 + $0x79] sm:$0xff]  ;;  %vm911_vm7 = vweird.f32 %v4821_v27 }
  0xf5   : > { %6358 = vst [vmem:[#allocation85_spill] sm:$0xff] %v4769_v11  ;;  %v1367_v11 = vmul.f32 %v6371_v31, %v4792_v28  ;;  %v2046_v31 = vadd.f32 %v2030_v26, %v2013_v46 }
  0xf6   : > { %6359 = vst [vmem:[#allocation86_spill] sm:$0xff] %v4773_v60  ;;  %v1029_v60 = vmul.f32 %v6369_v17, %v4778_v15 }
  0xf7   : > { %6360 = vst [vmem:[#allocation87_spill] sm:$0xff] %v4776_v20  ;;  %v1383_v56 = vadd.f32 %v1367_v11, %v1334_v42  ;;  %v1417_v42 = vmul.f32 %v4819_v25, %v1400_v21  ;;  %v1449_v11 = vld [vmem:[#allocation2 + $0x51] sm:$0xff]  ;;  %v2079_v46 = vadd.f32 %v2063_v41, %v2046_v31  ;;  %v1030_v21 = vmul.f32 %v6369_v17, %v4844_v57 }
  0xf8   : > { %6361 = vst [vmem:[#allocation88_spill] sm:$0xff] %v4778_v15  ;;  %v2061_v15 = vmul.f32 %v4298_v38, %v6374_v29  ;;  %v6379_v29 = vld [vmem:[#allocation38_spill] sm:$0xff]  ;;  %v4855_v38 = vperm.slane %v4367_v3, 1 }
  0xf9   : > { %6362 = vst [vmem:[#allocation89_spill] sm:$0xff] %v4780_v59  ;;  %v4810_v59 = vld [vmem:[#allocation2 + $0x7e] sm:$0xff]  ;;  %v2094_v51 = vmul.f32 %v4326_v36, %v6379_v29  ;;  %v2127_v29 = vmul.f32 %v3477_v62, %v4329_v47  ;;  %v1433_v26 = vadd.f32 %v1417_v42, %v1383_v56  ;;  %v2129_v62 = vmul.f32 %v4329_v47, %v6299_v63  ;;  %v6384_v41 = vld [vmem:[#allocation18_spill] sm:$0xff] }
  0xfa   : > { %6363 = vst [vmem:[#allocation90_spill] sm:$0xff] %v4784_v33  ;;  %v6368_v33 = vld [vmem:[#allocation58_spill] sm:$0xff]  ;;  %v1445_v36 = vld [vmem:[#allocation2 + $0x21] sm:$0xff]  ;;  %v2001_v42 = vmul.f32 %v6384_v41, %v4522_v0  ;;  %v2162_v63 = vmul.f32 %v4350_v1, %v4516_v13  ;;  %v4883_v0 = vsub.f32 %v4601_v24, %v4795_v19  ;;  %v1268_v24 = vmul.f32 %v4627_v39, %v3982_v44 }
  0xfb   : > { %6364 = vst [vmem:[#allocation91_spill] sm:$0xff] %v4786_v55  ;;  %v2011_v20 = vadd.f32 %v6368_v33, %v6367_v37  ;;  %v6373_v33 = vld [vmem:[#allocation15_spill] sm:$0xff]  ;;  %v6390_v39 = vld [vmem:[#allocation46_spill] sm:$0xff] }
  0xfc   : > { %6365 = vst [vmem:[#allocation92_spill] sm:$0xff] %v4792_v28  ;;  %v1078_v37 = vmul.f32 %v6373_v33, %v4786_v55  ;;  %v4838_v55 = vmul.f32 %v6334_v52, %v4810_v59 }
  0xfd   : > { %6366 = vst [vmem:[#allocation93_spill] sm:$0xff] %v4804_v2  ;;  %v2044_v28 = vadd.f32 %v2028_v48, %v2011_v20  ;;  %v6381_v20 = vld [vmem:[#allocation17_spill] sm:$0xff] }
  0xfe   : > { %6370 = vst [vmem:[#allocation64_spill] sm:$0xff] %v4810_v59  ;;  %v1935_v48 = vmul.f32 %v6381_v20, %v6356_v40  ;;  %v6382_v59 = vld [vmem:[#allocation16_spill] sm:$0xff]  ;;  %v1466_v40 = vmul.f32 %v4855_v38, %v1449_v11  ;;  %v2112_v20 = vadd.f32 %v2096_v49, %v2079_v46  ;;  %v4875_v11 = vsub.f32 %v4592_v54, %v4795_v19  ;;  %v6386_v49 = vld [vmem:[#allocation50_spill] sm:$0xff] }
  0xff   : > { %6372 = vst [vmem:[#allocation58_spill] sm:$0xff] %v4819_v25  ;;  %v4857_v2 = vld [vmem:[#allocation2 + $0x81] sm:$0xff]  ;;  %v1462_v46 = vmul.f32 %v4855_v38, %v1445_v36 }
 0x100   : > { %6377 = vst [vmem:[#allocation14_spill] sm:$0xff] %v4831_v50  ;;  %v2077_v50 = vadd.f32 %v2061_v15, %v2044_v28  ;;  %v1094_v28 = vadd.f32 %v1078_v37, %v1029_v60  ;;  %v1079_v31 = vmul.f32 %v6373_v33, %v4857_v2  ;;  %v2145_v37 = vadd.f32 %v2129_v62, %v2112_v20 }
 0x101   : > { %6378 = vst [vmem:[#allocation15_spill] sm:$0xff] %v4838_v55  ;;  %v1968_v55 = vmul.f32 %v6382_v59, %v4512_v12  ;;  %v2160_v12 = vmul.f32 %v4350_v1, %v4812_v22  ;;  %v4893_v36 = vmul.f32 %v4875_v11, %v4875_v11 }
 0x102   : > { %6383 = vst [vmem:[#allocation37_spill] sm:$0xff] %v4855_v38  ;;  %v2110_v15 = vadd.f32 %v2094_v51, %v2077_v50  ;;  %v1398_v50 = vld [vmem:[#allocation2 + $0x38] sm:$0xff]  ;;  %v3463_v51 = vpop.eup %3462  ;;  %v1143_v41 = vadd.f32 %v4790_v18, %v1094_v28  ;;  %v1095_v54 = vadd.f32 %v1079_v31, %v1030_v21  ;;  %v6389_v28 = vld [vmem:[#allocation49_spill] sm:$0xff] }
 0x103   : > { %v1984_v56 = vadd.f32 %v1968_v55, %v1935_v48  ;;  %6385 = vst [vmem:[#allocation71_spill] sm:$0xff] %v4875_v11  ;;  %v906_v61 = vmul.f32 %v3463_v51, %v4821_v27  ;;  %v1415_v55 = vmul.f32 %v4819_v25, %v1398_v50  ;;  %vm912_vm8 = vweird.f32 %v3463_v51  ;;  %v4897_v18 = vld [vmem:[#allocation2 + $0x36] sm:$0xff]  ;;  %v6420_v11 = vld [vmem:[#allocation81_spill] sm:$0xff] }
 0x104   : > { %v2143_v59 = vadd.f32 %v2127_v29, %v2110_v15  ;;  %v1482_v29 = vadd.f32 %v1466_v40, %v1433_v26  ;;  %v1429_v15 = vadd.f32 %v1413_v6, %v6386_v49  ;;  %6387 = vst [vmem:[#allocation68_spill] sm:$0xff] %v4883_v0  ;;  %v2178_v26 = vadd.f32 %v2162_v63, %v2145_v37  ;;  %v1447_v21 = vld [vmem:[#allocation2 + $0x39] sm:$0xff]  ;;  %v6388_v40 = vld [vmem:[#allocation22_spill] sm:$0xff]  ;;  %vm913_vm9 = vmor %vm911_vm7, %vm912_vm8 }
 0x105   : > { %v907_v48 = vmul.f32 %v3463_v51, %v906_v61  ;;  %v4889_v20 = vadd.f32 %v2001_v42, %v1984_v56  ;;  %v1560_v6 = vmul.f32 %v4380_v35, %v6388_v40  ;;  %v1431_v50 = vadd.f32 %v1415_v55, %v6389_v28 }
 0x106   : > { %v2176_v60 = vadd.f32 %v2160_v12, %v2143_v59  ;;  %v1128_v59 = vmul.f32 %v4537_v16, %v3928_v4  ;;  %v1531_v19 = vadd.f32 %v4716_v32, %v1482_v29  ;;  %v4902_v16 = vmul.f32 %v4252_v53, %v4596_v45  ;;  %2221 = vperm.xlu1 %3438, %v2178_v26   ;;  %v1690_v29 = vld [vmem:[#allocation2 + $0x26] sm:$0xff] }
 0x107   : > { %v908_v12 = vmul.f32 0.5, %v907_v48  ;;  %v1478_v62 = vadd.f32 %v1462_v46, %v1429_v15  ;;  %v1192_v56 = vadd.f32 %v4800_v10, %v1143_v41  ;;  %v4910_v63 = vperm.slane %v4367_v3, 6  ;;  %v6393_v41 = vld [vmem:[#allocation63_spill] sm:$0xff]  ;;  %v6394_v46 = vld [vmem:[#allocation54_spill] sm:$0xff] }
 0x108   : > { %2211 = vperm.xlu0 %3437, %v2176_v60   ;;  %v1580_v42 = vadd.f32 %v6390_v39, %v1531_v19  ;;  %v1317_v32 = vmul.f32 %v6334_v52, %v4897_v18  ;;  %v6392_v60 = vld [vmem:[#allocation55_spill] sm:$0xff]  ;;  %v1464_v49 = vmul.f32 %v4855_v38, %v1447_v21  ;;  %v1284_v15 = vadd.f32 %v1268_v24, %v6393_v41  ;;  %v1739_v26 = vld [vmem:[#allocation2 + $0x27] sm:$0xff] }
 0x109   : > { %v909_v31 = vsub.f32 1.5, %v908_v12  ;;  %6391 = vst [vmem:[#allocation38_spill] sm:$0xff] %v4910_v63  ;;  %v1527_v61 = vadd.f32 %v4691_v8, %v1478_v62  ;;  %v1609_v37 = vmul.f32 %v6328_v58, %v6392_v60  ;;  %v4923_v48 = vperm.slane %v4367_v3, 7  ;;  %v6397_v39 = vld [vmem:[#allocation47_spill] sm:$0xff] }
 0x10a   : > { %v1629_v55 = vadd.f32 %v6394_v46, %v1580_v42  ;;  %v1480_v12 = vadd.f32 %v1464_v49, %v1431_v50  ;;  %v1144_v19 = vadd.f32 %v1128_v59, %v1095_v54  ;;  %v1177_v8 = vmul.f32 %v4526_v43, %v3938_v9  ;;  %v4936_v54 = vld [vmem:[#allocation2 + $0x86] sm:$0xff]  ;;  %v4938_v59 = vld [vmem:[#allocation2 + $0x6f] sm:$0xff] }
 0x10b   : > { %v910_v10 = vmul.f32 %v3463_v51, %v909_v31  ;;  %6395 = vst [vmem:[#allocation30_spill] sm:$0xff] %v4923_v48  ;;  %v1576_v27 = vadd.f32 %v1560_v6, %v1527_v61  ;;  %v1707_v21 = vmul.f32 %v4910_v63, %v1690_v29  ;;  %v1226_v24 = vmul.f32 %v4539_v23, %v3943_v14  ;;  %v6396_v43 = vld [vmem:[#allocation93_spill] sm:$0xff] }
 0x10c   : > { %v4928_v40 = vadd.f32 %v4722_v5, %v1629_v55  ;;  %v1529_v50 = vadd.f32 %v4727_v34, %v1480_v12  ;;  %v1756_v5 = vmul.f32 %v4923_v48, %v1739_v26  ;;  %v1193_v31 = vadd.f32 %v1177_v8, %v1144_v19  ;;  %v6399_v34 = vld [vmem:[#allocation21_spill] sm:$0xff]  ;;  %v6401_v26 = vld [vmem:[#allocation23_spill] sm:$0xff] }
 0x10d   : > { %v914_v62 = vsel %vm913_vm9, %v3463_v51, %v910_v10  ;;  %v1625_v6 = vadd.f32 %v1609_v37, %v1576_v27  ;;  %v1241_v51 = vadd.f32 %v6396_v43, %v1192_v56  ;;  %v1275_v42 = vmul.f32 %v6397_v39, %v3982_v44  ;;  %v4949_v29 = vld [vmem:[#allocation2 + $0x87] sm:$0xff]  ;;  %v6400_v10 = vld [vmem:[#allocation43_spill] sm:$0xff] }
 0x10e   : > { %v937_v28 = vmul.f32 %v914_v62, %v4633_v30  ;;  %v938_v3 = vmul.f32 %v914_v62, %v4636_v7  ;;  %v4945_v30 = vld [vmem:[#allocation2 + $0x57] sm:$0xff]  ;;  %v1578_v60 = vadd.f32 %v6399_v34, %v1529_v50  ;;  %v1242_v56 = vadd.f32 %v1226_v24, %v1193_v31  ;;  %v6402_v19 = vld [vmem:[#allocation45_spill] sm:$0xff]  ;;  %v4975_v39 = vld [vmem:[#allocation2 + $0x4e] sm:$0xff] }
 0x10f   : > { %v6398_v7 = vld [vmem:[#allocation32_spill] sm:$0xff]  ;;  %v1324_v49 = vmul.f32 %v6334_v52, %v4936_v54  ;;  %v1371_v41 = vmul.f32 %v6400_v10, %v4938_v59  ;;  %v1421_v46 = vmul.f32 %v4819_v25, %v4844_v57  ;;  %v1333_v55 = vadd.f32 %v1317_v32, %v1284_v15  ;;  %v6404_v15 = vld [vmem:[#allocation77_spill] sm:$0xff]  ;;  %v6407_v34 = vld [vmem:[#allocation19_spill] sm:$0xff] }
 0x110   : > { %953 = vst.msk [vmem:[#allocation2 + $0x93] sm:$0xff] %vm637_vm0, %v937_v28  ;;  %v963_v23 = vperm.slane %v937_v28, 0  ;;  %v1674_v61 = vadd.f32 %v6398_v7, %v1625_v6  ;;  %v980_v37 = vperm.slane %v938_v3, 7  ;;  %v1627_v12 = vadd.f32 %v6401_v26, %v1578_v60  ;;  %v6403_v28 = vld [vmem:[#allocation78_spill] sm:$0xff]  ;;  %v4968_v6 = vld [vmem:[#allocation2 + $0x37] sm:$0xff] }
 0x111   : > { %954 = vst.msk [vmem:[#allocation2 + $0x9b] sm:$0xff] %vm637_vm0, %v938_v3  ;;  %v1709_v8 = vmul.f32 %v4910_v63, %v6402_v19  ;;  %v1291_v62 = vadd.f32 %v1275_v42, %v1242_v56  ;;  %v1373_v24 = vmul.f32 %v6400_v10, %v4949_v29  ;;  %v1387_v3 = vadd.f32 %v1371_v41, %v6403_v28  ;;  %v6405_v50 = vld [vmem:[#allocation92_spill] sm:$0xff]  ;;  %v1399_v41 = vld [vmem:[#allocation2 + $0x48] sm:$0xff]  ;;  %v6409_v19 = vld [vmem:[#allocation27_spill] sm:$0xff] }
 0x112   : > { %972 = vst.msk [vmem:[#allocation2 + $0x90] sm:$0x7] %vm965_vm15, %v963_v23  ;;  %v1723_v27 = vadd.f32 %v1707_v21, %v1674_v61  ;;  %v1369_v57 = vmul.f32 %v4945_v30, %v6400_v10  ;;  %v1676_v21 = vadd.f32 %v6404_v15, %v1627_v12  ;;  %v1758_v43 = vmul.f32 %v4923_v48, %v6405_v50  ;;  %v6406_v7 = vld [vmem:[#allocation40_spill] sm:$0xff]  ;;  %v3478_v12 = vld [vmem:[#allocation2 + $0x4a] sm:$0xff] }
 0x113   : > { %989 = vst.msk [vmem:[#allocation2 + $0xa3] sm:$0xf] %vm982_vm10, %v980_v37  ;;  %v1470_v31 = vmul.f32 %v4855_v38, %v4857_v2  ;;  %v1340_v42 = vadd.f32 %v1324_v49, %v1291_v62  ;;  %v1437_v23 = vadd.f32 %v1421_v46, %v1387_v3  ;;  %v1419_v60 = vmul.f32 %v4819_v25, %v6407_v34  ;;  %v6408_v49 = vld [vmem:[#allocation14_spill] sm:$0xff] }
 0x114   : > { %v1772_v32 = vadd.f32 %v1756_v5, %v1723_v27  ;;  %v1385_v61 = vadd.f32 %v1369_v57, %v6406_v7  ;;  %v1270_v5 = vmul.f32 %v4812_v22, %v3982_v44  ;;  %v1725_v37 = vadd.f32 %v1709_v8, %v1676_v21  ;;  %v6411_v15 = vld [vmem:[#allocation26_spill] sm:$0xff] }
 0x115   : > { %v1366_v56 = vmul.f32 %v6400_v10, %v4968_v6  ;;  %v4986_v2 = vmul.f32 %v4883_v0, %v4883_v0  ;;  %v4989_v46 = vadd.f32 %v6408_v49, %v1241_v51  ;;  %v2050_v26 = vadd.f32 %v4902_v16, %v4889_v20  ;;  %v6416_v49 = vld [vmem:[#allocation39_spill] sm:$0xff] }
 0x116   : > { %1795 = vperm.xlu0 %3437, %v1772_v32   ;;  %v1514_v62 = vmul.f32 %v3478_v12, %v6409_v19  ;;  %v1389_v8 = vadd.f32 %v1373_v24, %v1340_v42  ;;  %v5000_v3 = vmul.f32 %v6334_v52, %v4975_v39  ;;  %v1774_v57 = vadd.f32 %v1758_v43, %v1725_v37  ;;  %v6414_v43 = vld [vmem:[#allocation44_spill] sm:$0xff] }
 0x117   : > { %v4991_v27 = vld [vmem:[#allocation2 + $0x93] sm:$0xff]  ;;  %v1486_v51 = vadd.f32 %v1470_v31, %v1437_v23  ;;  %v1468_v21 = vmul.f32 %v4855_v38, %v6411_v15  ;;  %v1435_v42 = vadd.f32 %v1419_v60, %v1385_v61  ;;  %v1382_v7 = vadd.f32 %v1366_v56, %v1333_v55  ;;  %v6415_v31 = vld [vmem:[#allocation56_spill] sm:$0xff]  ;;  %v6418_v55 = vld [vmem:[#allocation25_spill] sm:$0xff] }
 0x118   : > { %v4996_v28 = vld [vmem:[#allocation2 + $0x94] sm:$0xff]  ;;  %v1416_v34 = vmul.f32 %v4819_v25, %v1399_v41  ;;  %v2100_v23 = vmul.f32 %v6415_v31, %v4991_v27  ;;  %v5020_v12 = vadd.f32 %v1270_v5, %v6416_v49  ;;  %1805 = vperm.xlu1 %3438, %v1774_v57   ;;  %v1711_v61 = vmul.f32 %v4910_v63, %v6418_v55  ;;  %v1448_v41 = vld [vmem:[#allocation2 + $0x49] sm:$0xff] }
 0x119   : > { %v5002_v32 = vld [vmem:[#allocation2 + $0x98] sm:$0xff]  ;;  %v5032_v60 = vmul.f32 %v4923_v48, %v4945_v30  ;;  %v2133_v49 = vmul.f32 %v4329_v47, %v4996_v28  ;;  %v1535_v31 = vadd.f32 %v6420_v11, %v1486_v51  ;;  %v1715_v55 = vmul.f32 %v4910_v63, %v4936_v54 }
 0x11a   : > { %6410 = vst [vmem:[#allocation50_spill] sm:$0xff] %v5002_v32  ;;  %v5006_v50 = vld [vmem:[#allocation2 + $0x92] sm:$0xff]  ;;  %v1423_v20 = vmul.f32 %v4819_v25, %v5002_v32  ;;  %v5012_v24 = vld [vmem:[#allocation2 + $0x9a] sm:$0xff]  ;;  %v1465_v44 = vmul.f32 %v4855_v38, %v1448_v41  ;;  %v6424_v41 = vld [vmem:[#allocation29_spill] sm:$0xff] }
 0x11b   : > { %v5010_v16 = vld [vmem:[#allocation2 + $0x99] sm:$0xff]  ;;  %6413 = vst [vmem:[#allocation49_spill] sm:$0xff] %v5012_v24  ;;  %v2067_v37 = vmul.f32 %v6414_v43, %v5006_v50  ;;  %v1521_v5 = vmul.f32 %v6409_v19, %v5012_v24 }
 0x11c   : > { %6412 = vst [vmem:[#allocation22_spill] sm:$0xff] %v5010_v16  ;;  %v1472_v15 = vmul.f32 %v4855_v38, %v5010_v16  ;;  %v5024_v32 = vld [vmem:[#allocation2 + $0x9b] sm:$0xff]  ;;  %v1439_v56 = vadd.f32 %v1423_v20, %v1389_v8  ;;  %v1484_v8 = vadd.f32 %v1468_v21, %v1435_v42  ;;  %v1432_v20 = vadd.f32 %v1416_v34, %v1382_v7  ;;  %v6423_v42 = vld [vmem:[#allocation82_spill] sm:$0xff] }
 0x11d   : > { %6417 = vst [vmem:[#allocation46_spill] sm:$0xff] %v5024_v32  ;;  %v5026_v0 = vld [vmem:[#allocation2 + $0x95] sm:$0xff]  ;;  %v2083_v57 = vadd.f32 %v2067_v37, %v2050_v26  ;;  %v1570_v30 = vmul.f32 %v4380_v35, %v5024_v32  ;;  %v6421_v37 = vld [vmem:[#allocation80_spill] sm:$0xff] }
 0x11e   : > { %v5038_v16 = vld [vmem:[#allocation2 + $0x9c] sm:$0xff]  ;;  %v1488_v53 = vadd.f32 %v1472_v15, %v1439_v56  ;;  %v2166_v26 = vmul.f32 %v4350_v1, %v5026_v0  ;;  %v1584_v47 = vadd.f32 %v6421_v37, %v1535_v31  ;;  %v1481_v34 = vadd.f32 %v1465_v44, %v1432_v20  ;;  %v6427_v44 = vld [vmem:[#allocation73_spill] sm:$0xff] }
 0x11f   : > { %6419 = vst [vmem:[#allocation55_spill] sm:$0xff] %v5038_v16  ;;  %v1395_v43 = vld [vmem:[#allocation2 + $0x18] sm:$0xff]  ;;  %v2116_v52 = vadd.f32 %v2100_v23, %v2083_v57  ;;  %v1619_v54 = vmul.f32 %v6328_v58, %v5038_v16  ;;  %v1727_v31 = vadd.f32 %v1711_v61, %v4928_v40  ;;  %v1397_v16 = vld [vmem:[#allocation2 + $0x30] sm:$0xff] }
 0x120   : > { %v1444_v24 = vld [vmem:[#allocation2 + $0x19] sm:$0xff]  ;;  %v1537_v11 = vadd.f32 %v1521_v5, %v1488_v53  ;;  %v1412_v56 = vmul.f32 %v4819_v25, %v1395_v43  ;;  %v1633_v7 = vadd.f32 %v6423_v42, %v1584_v47  ;;  %v6425_v5 = vld [vmem:[#allocation61_spill] sm:$0xff]  ;;  %v6429_v40 = vld [vmem:[#allocation74_spill] sm:$0xff] }
 0x121   : > { %v6422_v51 = vld [vmem:[#allocation60_spill] sm:$0xff]  ;;  %v2149_v32 = vadd.f32 %v2133_v49, %v2116_v52  ;;  %v1461_v23 = vmul.f32 %v4855_v38, %v1444_v24  ;;  %v1764_v52 = vmul.f32 %v4923_v48, %v4949_v29  ;;  %v1530_v49 = vadd.f32 %v1514_v62, %v1481_v34  ;;  %v6428_v24 = vld [vmem:[#allocation75_spill] sm:$0xff] }
 0x122   : > { %v1533_v15 = vadd.f32 %v6422_v51, %v1484_v8  ;;  %v5053_v21 = vld [vmem:[#allocation2 + $0x9d] sm:$0xff]  ;;  %v1586_v57 = vadd.f32 %v1570_v30, %v1537_v11  ;;  %v1428_v37 = vadd.f32 %v1412_v56, %v6425_v5  ;;  %v1713_v61 = vmul.f32 %v4910_v63, %v6429_v40  ;;  %v1446_v11 = vld [vmem:[#allocation2 + $0x31] sm:$0xff] }
 0x123   : > { %v1738_v1 = vld [vmem:[#allocation2 + $0x1f] sm:$0xff]  ;;  %v2182_v8 = vadd.f32 %v2166_v26, %v2149_v32  ;;  %v6426_v51 = vld [vmem:[#allocation83_spill] sm:$0xff]  ;;  %v1668_v47 = vmul.f32 %v6427_v44, %v5053_v21  ;;  %v1414_v26 = vmul.f32 %v4819_v25, %v1397_v16  ;;  %v1463_v16 = vmul.f32 %v4855_v38, %v1446_v11 }
 0x124   : > { %v1582_v53 = vadd.f32 %v6424_v41, %v1533_v15  ;;  %v1682_v43 = vadd.f32 %v6426_v51, %v1633_v7  ;;  %v1477_v30 = vadd.f32 %v1461_v23, %v1428_v37  ;;  %v1635_v15 = vadd.f32 %v1619_v54, %v1586_v57  ;;  %v6430_v29 = vld [vmem:[#allocation15_spill] sm:$0xff]  ;;  %v5074_v42 = vld [vmem:[#allocation2 + $0x9e] sm:$0xff]  ;;  %v6432_v23 = vld [vmem:[#allocation85_spill] sm:$0xff] }
 0x125   : > { %2241 = vperm.xlu2 %3436, %v2182_v8   ;;  %v1364_v32 = vmul.f32 %v1738_v1, %v6400_v10  ;;  %v5072_v62 = vadd.f32 %v6430_v29, %v4989_v46  ;;  %v6431_v7 = vld [vmem:[#allocation76_spill] sm:$0xff]  ;;  %v1762_v41 = vmul.f32 %v4923_v48, %v4938_v59  ;;  %v6434_v57 = vld [vmem:[#allocation89_spill] sm:$0xff]  ;;  %v1661_v46 = vmul.f32 %v6427_v44, %v4812_v22 }
 0x126   : > { %v1631_v20 = vadd.f32 %v6428_v24, %v1582_v53  ;;  %v1731_v56 = vadd.f32 %v1715_v55, %v1682_v43  ;;  %v1526_v53 = vadd.f32 %v6432_v23, %v1477_v30  ;;  %v6433_v54 = vld [vmem:[#allocation72_spill] sm:$0xff]  ;;  %v5083_v8 = vld [vmem:[#allocation2 + $0x67] sm:$0xff]  ;;  %v1335_v51 = vadd.f32 %v5000_v3, %v5020_v12 }
 0x127   : > { %v1579_v55 = vadd.f32 %v6433_v54, %v1530_v49  ;;  %v1380_v37 = vadd.f32 %v1364_v32, %v6434_v57  ;;  %v1749_v43 = vld [vmem:[#allocation2 + $0x9f] sm:$0xff]  ;;  %v1684_v40 = vadd.f32 %v1668_v47, %v1635_v15  ;;  %v1717_v49 = vmul.f32 %v4910_v63, %v5074_v42  ;;  %v6436_v32 = vld [vmem:[#allocation67_spill] sm:$0xff] }
 0x128   : > { %v1680_v34 = vadd.f32 %v6431_v7, %v1631_v20  ;;  %v1780_v5 = vadd.f32 %v1764_v52, %v1731_v56  ;;  %v6435_v59 = vld [vmem:[#allocation28_spill] sm:$0xff]  ;;  %v1776_v52 = vadd.f32 %v5032_v60, %v1727_v31  ;;  %v1742_v56 = vld [vmem:[#allocation2 + $0x4f] sm:$0xff]  ;;  %v6437_v22 = vld [vmem:[#allocation33_spill] sm:$0xff]  ;;  %v1370_v3 = vmul.f32 %v6400_v10, %v5083_v8 }
 0x129   : > { %v1575_v20 = vadd.f32 %v6435_v59, %v1526_v53  ;;  %v1430_v30 = vadd.f32 %v1414_v26, %v1380_v37  ;;  %v1706_v7 = vmul.f32 %v4910_v63, %v6437_v22  ;;  %v1401_v12 = vld [vmem:[#allocation2 + $0x60] sm:$0xff]  ;;  %v6440_v26 = vld [vmem:[#allocation86_spill] sm:$0xff]  ;;  %v1755_v23 = vmul.f32 %v4923_v48, %v1738_v1  ;;  %v6442_v54 = vld [vmem:[#allocation91_spill] sm:$0xff] }
 0x12a   : > { %v1729_v24 = vadd.f32 %v1713_v61, %v1680_v34  ;;  %1835 = vperm.xlu0 %3437, %v1780_v5   ;;  %v1766_v61 = vmul.f32 %v4923_v48, %v1749_v43  ;;  %v6438_v60 = vld [vmem:[#allocation41_spill] sm:$0xff]  ;;  %v6439_v15 = vld [vmem:[#allocation88_spill] sm:$0xff]  ;;  %v1469_v57 = vmul.f32 %v4855_v38, %v6442_v54  ;;  %v6443_v43 = vld [vmem:[#allocation87_spill] sm:$0xff] }
 0x12b   : > { %v1624_v29 = vadd.f32 %v6436_v32, %v1575_v20  ;;  %v1628_v31 = vadd.f32 %v6438_v60, %v1579_v55  ;;  %v1479_v47 = vadd.f32 %v1463_v16, %v1430_v30  ;;  %v1420_v34 = vmul.f32 %v4819_v25, %v6439_v15  ;;  %v6441_v53 = vld [vmem:[#allocation84_spill] sm:$0xff]  ;;  %v5112_v30 = vld [vmem:[#allocation2 + $0x90] sm:$0xff] }
 0x12c   : > { %v1778_v11 = vadd.f32 %v1762_v41, %v1729_v24  ;;  %v1386_v5 = vadd.f32 %v1370_v3, %v6441_v53  ;;  %v1450_v37 = vld [vmem:[#allocation2 + $0x61] sm:$0xff]  ;;  %v1733_v24 = vadd.f32 %v1717_v49, %v1684_v40  ;;  %v1368_v16 = vmul.f32 %v1742_v56, %v6400_v10 }
 0x12d   : > { %v1673_v41 = vadd.f32 %v6440_v26, %v1624_v29  ;;  %1815 = vperm.xlu2 %3436, %v1776_v52   ;;  %v1528_v59 = vadd.f32 %v6443_v43, %v1479_v47  ;;  %v5108_v55 = vld [vmem:[#allocation2 + $0x7f] sm:$0xff]  ;;  %v1418_v20 = vmul.f32 %v4819_v25, %v1401_v12  ;;  %v1710_v32 = vmul.f32 %v4910_v63, %v4975_v39  ;;  %v1454_v47 = vld [vmem:[#allocation2 + $0x91] sm:$0xff] }
 0x12e   : > { %1825 = vperm.xlu1 %3438, %v1778_v11   ;;  %v3479_v11 = vld [vmem:[#allocation2 + $0x62] sm:$0xff]  ;;  %v1436_v22 = vadd.f32 %v1420_v34, %v1386_v5  ;;  %v1677_v52 = vadd.f32 %v1661_v46, %v1628_v31  ;;  %v1384_v3 = vadd.f32 %v1368_v16, %v1335_v51  ;;  %v1467_v60 = vmul.f32 %v4855_v38, %v1450_v37  ;;  %v6445_v43 = vld [vmem:[#allocation70_spill] sm:$0xff] }
 0x12f   : > { %v1516_v1 = vmul.f32 %v3479_v11, %v6409_v19  ;;  %v1722_v29 = vadd.f32 %v1706_v7, %v1673_v41  ;;  %v6444_v40 = vld [vmem:[#allocation69_spill] sm:$0xff]  ;;  %v1372_v12 = vmul.f32 %v5108_v55, %v6400_v10  ;;  %v1422_v53 = vmul.f32 %v4819_v25, %v5112_v30  ;;  %v6446_v31 = vld [vmem:[#allocation24_spill] sm:$0xff] }
 0x130   : > { %v1577_v49 = vadd.f32 %v6444_v40, %v1528_v59  ;;  %v1485_v26 = vadd.f32 %v1469_v57, %v1436_v22  ;;  %v1782_v54 = vadd.f32 %v1766_v61, %v1733_v24  ;;  %v1708_v46 = vmul.f32 %v4910_v63, %v4897_v18  ;;  %v6447_v61 = vld [vmem:[#allocation90_spill] sm:$0xff]  ;;  %v6448_v59 = vld [vmem:[#allocation79_spill] sm:$0xff] }
 0x131   : > { %v1771_v15 = vadd.f32 %v1755_v23, %v1722_v29  ;;  %v1434_v7 = vadd.f32 %v1418_v20, %v1384_v3  ;;  %v1665_v51 = vmul.f32 %v6427_v44, %v4596_v45  ;;  %v1388_v41 = vadd.f32 %v1372_v12, %v5072_v62  ;;  %v6449_v40 = vld [vmem:[#allocation62_spill] sm:$0xff] }
 0x132   : > { %v1626_v39 = vadd.f32 %v6445_v43, %v1577_v49  ;;  %v1534_v34 = vadd.f32 %v6446_v31, %v1485_v26  ;;  %v1471_v23 = vmul.f32 %v4855_v38, %v1454_v47  ;;  %v1520_v5 = vmul.f32 %v6409_v19, %v5006_v50  ;;  %v6450_v26 = vld [vmem:[#allocation48_spill] sm:$0xff]  ;;  %v6452_v43 = vld [vmem:[#allocation53_spill] sm:$0xff] }
 0x133   : > { %1790 = vperm.xlu0 %3437, %v1771_v15   ;;  %v1757_v37 = vmul.f32 %v4923_v48, %v4968_v6  ;;  %v1483_v18 = vadd.f32 %v1467_v60, %v1434_v7  ;;  %v1759_v24 = vmul.f32 %v4923_v48, %v1742_v56  ;;  %v1438_v16 = vadd.f32 %v1422_v53, %v1388_v41  ;;  %v6451_v53 = vld [vmem:[#allocation64_spill] sm:$0xff] }
 0x134   : > { %v1675_v57 = vadd.f32 %v6447_v61, %v1626_v39  ;;  %v1583_v45 = vadd.f32 %v6448_v59, %v1534_v34  ;;  %v820_v20 = vsel %vm637_vm0, %v4893_v36, 0.0  ;;  %v1726_v62 = vadd.f32 %v1710_v32, %v1677_v52  ;;  %v5157_v34 = vld [vmem:[#allocation2 + $0x97] sm:$0xff] }
 0x135   : > { %1845 = vperm.xlu2 %3436, %v1782_v54   ;;  %v1532_v29 = vadd.f32 %v1516_v1, %v1483_v18  ;;  %v821_v22 = vsel %vm637_vm0, %v4986_v2, 0.0  ;;  %v1487_v3 = vadd.f32 %v1471_v23, %v1438_v16  ;;  %v1569_v6 = vmul.f32 %v4380_v35, %v4991_v27  ;;  %6454 = vst [vmem:[#allocation63_spill] sm:$0xff] %v5157_v34  ;;  %v5166_v16 = vpop.permute.xlu2 %2633 }
 0x136   : > { %v1724_v11 = vadd.f32 %v1708_v46, %v1675_v57  ;;  %v1632_v49 = vadd.f32 %v6449_v40, %v1583_v45  ;;  %v822_v56 = vadd.f32 %v821_v22, %v820_v20  ;;  %v1663_v60 = vmul.f32 %v6427_v44, %v4516_v13  ;;  %v6453_v46 = vld [vmem:[#allocation51_spill] sm:$0xff]  ;;  %6455 = vst [vmem:[#allocation54_spill] sm:$0xff] %v5166_v16 }
 0x137   : > { %v1581_v36 = vadd.f32 %v6450_v26, %v1532_v29  ;;  %v1536_v32 = vadd.f32 %v1520_v5, %v1487_v3  ;;  %v1618_v1 = vmul.f32 %v6328_v58, %v4996_v28  ;;  %v1775_v2 = vadd.f32 %v1759_v24, %v1726_v62  ;;  %v1699_v13 = vld [vmem:[#allocation2 + $0x96] sm:$0xff]  ;;  %v5177_v26 = vld [vmem:[#allocation2 + $0x82] sm:$0xff] }
 0x138   : > { %v1773_v15 = vadd.f32 %v1757_v37, %v1724_v11  ;;  %v1681_v12 = vadd.f32 %v1665_v51, %v1632_v49  ;;  %v823_v52 = vrot.slane %v822_v56, 4  ;;  %v1714_v54 = vmul.f32 %v4910_v63, %v6451_v53 }
 0x139   : > { %v1630_v39 = vadd.f32 %v6452_v43, %v1581_v36  ;;  %v1712_v7 = vmul.f32 %v4910_v63, %v6453_v46  ;;  %v1667_v31 = vmul.f32 %v6427_v44, %v5026_v0  ;;  %v1585_v51 = vadd.f32 %v1569_v6, %v1536_v32  ;;  %v6457_v32 = vld [vmem:[#allocation16_spill] sm:$0xff]  ;;  %v6460_v46 = vld [vmem:[#allocation18_spill] sm:$0xff] }
 0x13a   : > { %1800 = vperm.xlu1 %3438, %v1773_v15   ;;  %v824_v41 = vadd.f32 %v823_v52, %v822_v56  ;;  %v1761_v5 = vmul.f32 %v4923_v48, %v5083_v8  ;;  %v1716_v57 = vmul.f32 %v4910_v63, %v1699_v13  ;;  %v1730_v18 = vadd.f32 %v1714_v54, %v1681_v12  ;;  %v5181_v12 = vld [vmem:[#allocation2 + $0x83] sm:$0xff] }
 0x13b   : > { %v1679_v23 = vadd.f32 %v1663_v60, %v1630_v39  ;;  %v1634_v61 = vadd.f32 %v1618_v1, %v1585_v51  ;;  %v1763_v24 = vmul.f32 %v4923_v48, %v5108_v55  ;;  %v1765_v45 = vmul.f32 %v4923_v48, %v5157_v34  ;;  %v6458_v52 = vld [vmem:[#allocation13_spill] sm:$0xff]  ;;  %v6459_v54 = vld [vmem:[#allocation20_spill] sm:$0xff] }
 0x13c   : > { %v825_v37 = vrot.slane %v824_v41, 2  ;;  %v1031_v8 = vmul.f32 %v5112_v30, %v6369_v17  ;;  %v1080_v11 = vmul.f32 %v1454_v47, %v6373_v33  ;;  %v1129_v22 = vmul.f32 %v5006_v50, %v3928_v4  ;;  %v6456_v47 = vld [vmem:[#allocation17_spill] sm:$0xff] }
 0x13d   : > { %1810 = vperm.xlu2 %3436, %v1775_v2   ;;  %v1728_v59 = vadd.f32 %v1712_v7, %v1679_v23  ;;  %v1683_v20 = vadd.f32 %v1667_v31, %v1634_v61  ;;  %v1178_v3 = vmul.f32 %v4991_v27, %v3938_v9  ;;  %v1779_v6 = vadd.f32 %v1763_v24, %v1730_v18  ;;  %v5188_v39 = vld [vmem:[#allocation2 + $0x84] sm:$0xff]  ;;  %v6461_v23 = vld [vmem:[#allocation42_spill] sm:$0xff]  ;;  %v5194_v24 = vpop.permute.xlu2 %2638 }
 0x13e   : > { %v826_v62 = vadd.f32 %v825_v37, %v824_v41  ;;  %v1096_v55 = vadd.f32 %v1080_v11, %v1031_v8  ;;  %v1227_v30 = vmul.f32 %v4996_v28, %v3943_v14  ;;  %v1936_v36 = vmul.f32 %v5177_v26, %v6456_v47  ;;  %v3483_v61 = vld [vmem:[#allocation2 + $0x85] sm:$0xff]  ;;  %6463 = vst [vmem:[#allocation93_spill] sm:$0xff] %v5194_v24  ;;  %v3485_v8 = vld [vmem:[#allocation2 + $0x7c] sm:$0xff]  ;;  %v5212_v24 = vpop.permute.xlu0 %2643 }
 0x13f   : > { %v1777_v29 = vadd.f32 %v1761_v5, %v1728_v59  ;;  %v1732_v40 = vadd.f32 %v1716_v57, %v1683_v20  ;;  %v1969_v1 = vmul.f32 %v5181_v12, %v6457_v32  ;;  %v1276_v43 = vmul.f32 %v5026_v0, %v6459_v54  ;;  %v6462_v57 = vld [vmem:[#allocation52_spill] sm:$0xff]  ;;  %v6464_v20 = vld [vmem:[#allocation34_spill] sm:$0xff]  ;;  %v6465_v11 = vld [vmem:[#allocation31_spill] sm:$0xff]  ;;  %6476 = vst [vmem:[#allocation32_spill] sm:$0xff] %v5212_v24 }
 0x140   : > { %v827_v49 = vrot.slane %v826_v62, 1  ;;  %v1145_v15 = vadd.f32 %v1129_v22, %v1096_v55  ;;  %v2002_v7 = vmul.f32 %v5188_v39, %v6460_v46  ;;  %v1325_v5 = vmul.f32 %v1699_v13, %v6461_v23  ;;  %v6469_v13 = vld [vmem:[#allocation35_spill] sm:$0xff] }
 0x141   : > { %1820 = vperm.xlu0 %3437, %v1777_v29   ;;  %v1781_v56 = vadd.f32 %v1765_v45, %v1732_v40  ;;  %v1985_v31 = vadd.f32 %v1969_v1, %v1936_v36  ;;  %v2035_v37 = vmul.f32 %v3483_v61, %v6462_v57  ;;  %v3484_v45 = vld [vmem:[#allocation2 + $0x7b] sm:$0xff]  ;;  %v2369_v29 = vmul.f32 %v3485_v8, %v6465_v11  ;;  %v6466_v40 = vld [vmem:[#allocation49_spill] sm:$0xff] }
 0x142   : > { %v828_v60 = vadd.f32 %v827_v49, %v826_v62  ;;  %v1194_v53 = vadd.f32 %v1178_v3, %v1145_v15  ;;  %v2336_v62 = vmul.f32 %v3484_v45, %v6464_v20  ;;  %v6467_v49 = vld [vmem:[#allocation44_spill] sm:$0xff]  ;;  %v2037_v48 = vmul.f32 %v6462_v57, %v5053_v21 }
 0x143   : > { %1840 = vperm.xlu1 %3438, %v1781_v56   ;;  %v2018_v18 = vadd.f32 %v2002_v7, %v1985_v31  ;;  %v2068_v55 = vmul.f32 %v6467_v49, %v6466_v40  ;;  %v6470_v56 = vld [vmem:[#allocation46_spill] sm:$0xff]  ;;  %v6472_v1 = vld [vmem:[#allocation36_spill] sm:$0xff] }
 0x144   : > { %v836_v2 = vmul.f32 %v828_v60, %v6458_v52  ;;  %v1243_v41 = vadd.f32 %v1227_v30, %v1194_v53  ;;  %v6471_v60 = vld [vmem:[#allocation56_spill] sm:$0xff]  ;;  %v2385_v30 = vadd.f32 %v2369_v29, %v2336_v62  ;;  %v2435_v52 = vmul.f32 %v6472_v1, %v4996_v28  ;;  %v6474_v53 = vld [vmem:[#allocation57_spill] sm:$0xff]  ;;  %v5214_v29 = vpop.permute.xlu1 %2628 }
 0x145   : > { %1830 = vperm.xlu2 %3436, %v1779_v6   ;;  %v2051_v22 = vadd.f32 %v2035_v37, %v2018_v18  ;;  %v2402_v6 = vmul.f32 %v6469_v13, %v4991_v27  ;;  %v2101_v15 = vmul.f32 %v6471_v60, %v6470_v56  ;;  %6477 = vst [vmem:[#allocation21_spill] sm:$0xff] %v5214_v29 }
 0x146   : > { %v844_v51 = vadd.f32 1e-05, %v836_v2  ;;  %v1292_v59 = vadd.f32 %v1276_v43, %v1243_v41  ;;  %v6473_v2 = vld [vmem:[#allocation55_spill] sm:$0xff] }
 0x147   : > { %v2084_v36 = vadd.f32 %v2068_v55, %v2051_v22  ;;  %v2134_v43 = vmul.f32 %v6474_v53, %v6473_v2  ;;  %v2418_v7 = vadd.f32 %v2402_v6, %v2385_v30  ;;  %v5216_v22 = vpop.permute.xlu2 %2460  ;;  %v3486_v6 = vld [vmem:[#allocation2 + $0x6b] sm:$0xff] }
 0x148   : > { %3464 = vrsqrt.f32 %v844_v51  ;;  %v5200_v3 = vadd.f32 %v1325_v5, %v1292_v59  ;;  %v6475_v5 = vld [vmem:[#allocation59_spill] sm:$0xff]  ;;  %6478 = vst [vmem:[#allocation23_spill] sm:$0xff] %v5216_v22  ;;  %vm921_vm11 = vweird.f32 %v844_v51 }
 0x149   : > { %v2117_v31 = vadd.f32 %v2101_v15, %v2084_v36  ;;  %v2167_v61 = vmul.f32 %v6475_v5, %v5053_v21  ;;  %v2451_v18 = vadd.f32 %v2435_v52, %v2418_v7  ;;  %v3487_v15 = vld [vmem:[#allocation2 + $0x6a] sm:$0xff]  ;;  %v3489_v7 = vld [vmem:[#allocation2 + $0x7a] sm:$0xff] }
 0x14a   : > { %6468 = vst [vmem:[#allocation47_spill] sm:$0xff] %v5200_v3  ;;  %v2602_v30 = vmax.f32 %v3487_v15, %v3486_v6  ;;  %v3488_v52 = vld [vmem:[#allocation2 + $0x6c] sm:$0xff]  ;;  %v6482_v15 = vld [vmem:[#allocation68_spill] sm:$0xff] }
 0x14b   : > { %v2150_v59 = vadd.f32 %v2134_v43, %v2117_v31  ;;  %2510 = vperm.xlu0 %3437, %v2451_v18   ;;  %v2603_v31 = vmax.f32 %v3489_v7, %v3484_v45  ;;  %v1970_v18 = vmul.f32 %v6457_v32, %v4991_v27  ;;  %v2003_v45 = vmul.f32 %v6460_v46, %v4996_v28 }
 0x14c   : > { %v2618_v43 = vmax.f32 %v2602_v30, %v3488_v52 }
 0x14d   : > { %v2183_v62 = vadd.f32 %v2167_v61, %v2150_v59  ;;  %v1937_v61 = vmul.f32 %v6456_v47, %v5006_v50 }
 0x14e   : > { %v3465_v41 = vpop.eup %3464 }
 0x14f   : > { %v916_v37 = vmul.f32 %v3465_v41, %v844_v51  ;;  %vm922_vm12 = vweird.f32 %v3465_v41  ;;  %2246 = vperm.xlu1 %3438, %v2183_v62   ;;  %v2619_v51 = vmax.f32 %v2603_v31, %v3485_v8  ;;  %v5224_v62 = vpop.permute.xlu1 %2648  ;;  %v1986_v52 = vadd.f32 %v1970_v18, %v1937_v61  ;;  %v5231_v7 = vpop.permute.xlu2 %2480 }
 0x150   : > { %vm923_vm13 = vmor %vm921_vm11, %vm922_vm12  ;;  %6480 = vst [vmem:[#allocation78_spill] sm:$0xff] %v5224_v62  ;;  %v1938_v8 = vmul.f32 %v6456_v47, %v6466_v40  ;;  %v2036_v31 = vmul.f32 %v6462_v57, %v5026_v0  ;;  %v2004_v18 = vmul.f32 %v6460_v46, %v6473_v2 }
 0x151   : > { %v917_v16 = vmul.f32 %v3465_v41, %v916_v37  ;;  %6483 = vst [vmem:[#allocation77_spill] sm:$0xff] %v5231_v7 }
 0x153   : > { %v918_v55 = vmul.f32 0.5, %v917_v16  ;;  %v5222_v16 = vpop.permute.xlu0 %2653  ;;  %2673 = vperm.xlu0 %3437, %v2618_v43   ;;  %v2019_v43 = vadd.f32 %v2003_v45, %v1986_v52  ;;  %v2403_v52 = vmul.f32 %v6469_v13, %v6470_v56 }
 0x154   : > { %6479 = vst [vmem:[#allocation45_spill] sm:$0xff] %v5222_v16 }
 0x155   : > { %v919_v36 = vsub.f32 1.5, %v918_v55  ;;  %v6481_v55 = vld [vmem:[#allocation71_spill] sm:$0xff] }
 0x157   : > { %v920_v37 = vmul.f32 %v3465_v41, %v919_v36  ;;  %2678 = vperm.xlu1 %3438, %v2619_v51   ;;  %v2338_v51 = vmul.f32 %v6464_v20, %v4991_v27  ;;  %v5280_v7 = vpop.permute.xlu2 %2485 }
 0x158   : > { %6488 = vst [vmem:[#allocation26_spill] sm:$0xff] %v5280_v7 }
 0x159   : > { %v924_v59 = vsel %vm923_vm13, %v3465_v41, %v920_v37  ;;  %v1971_v41 = vmul.f32 %v6457_v32, %v6470_v56 }
 0x15a   : > { %v939_v6 = vmul.f32 %v924_v59, %v6481_v55  ;;  %v940_v30 = vmul.f32 %v924_v59, %v6482_v15  ;;  %v2371_v59 = vmul.f32 %v6465_v11, %v4996_v28  ;;  %v5250_v55 = vpop.permute.xlu1 %2658  ;;  %v2052_v15 = vadd.f32 %v2036_v31, %v2019_v43 }
 0x15b   : > { %v5242_v37 = vpop.permute.xlu0 %2663  ;;  %v1987_v61 = vadd.f32 %v1971_v41, %v1938_v8  ;;  %6485 = vst [vmem:[#allocation40_spill] sm:$0xff] %v5250_v55 }
 0x15c   : > { %955 = vst.msk [vmem:[#allocation2 + $0xab] sm:$0xff] %vm637_vm0, %v939_v6  ;;  %v964_v36 = vperm.slane %v939_v6, 0  ;;  %v981_v16 = vperm.slane %v940_v30, 7 }
 0x15d   : > { %956 = vst.msk [vmem:[#allocation2 + $0xb3] sm:$0xff] %vm637_vm0, %v940_v30  ;;  %v2370_v30 = vmul.f32 %v5188_v39, %v6465_v11 }
 0x15e   : > { %973 = vst.msk [vmem:[#allocation2 + $0xa8] sm:$0x7] %vm965_vm15, %v964_v36  ;;  %v2020_v36 = vadd.f32 %v2004_v18, %v1987_v61  ;;  %vm2987_vm15 = vcmask 392192  }
 0x15f   : > { %990 = vst.msk [vmem:[#allocation2 + $0xbb] sm:$0xf] %vm982_vm10, %v981_v16  ;;  %v2337_v16 = vmul.f32 %v5181_v12, %v6464_v20  ;;  %vm998_vm10 = vcmask 6144  }
 0x160   : > { %6484 = vst [vmem:[#allocation92_spill] sm:$0xff] %v5242_v37  ;;  %v2387_v37 = vadd.f32 %v2371_v59, %v2338_v51  ;;  %v2053_v25 = vadd.f32 %v2037_v48, %v2020_v36  ;;  %v6492_v48 = vld [vmem:[#allocation22_spill] sm:$0xff] }
 0x161   : > { %v2386_v38 = vadd.f32 %v2370_v30, %v2337_v16 }
 0x163   : > { %v5252_v6 = vld [vmem:[#allocation2 + $0xab] sm:$0xff] }
 0x164   : > { %v5254_v0 = vld [vmem:[#allocation2 + $0xac] sm:$0xff]  ;;  %v1972_v31 = vmul.f32 %v6457_v32, %v5252_v6  ;;  %v2404_v55 = vmul.f32 %v6469_v13, %v5252_v6  ;;  %v2102_v18 = vmul.f32 %v6471_v60, %v5252_v6  ;;  %v1180_v29 = vmul.f32 %v5252_v6, %v3938_v9 }
 0x165   : > { %v5262_v45 = vld [vmem:[#allocation2 + $0xb0] sm:$0xff]  ;;  %v5266_v41 = vld [vmem:[#allocation2 + $0xa8] sm:$0xff]  ;;  %v2135_v44 = vmul.f32 %v6474_v53, %v5254_v0  ;;  %v2005_v35 = vmul.f32 %v6460_v46, %v5254_v0  ;;  %v2437_v19 = vmul.f32 %v6472_v1, %v5254_v0 }
 0x166   : > { %v5264_v8 = vld [vmem:[#allocation2 + $0xaa] sm:$0xff]  ;;  %6486 = vst [vmem:[#allocation19_spill] sm:$0xff] %v5266_v41  ;;  %v1033_v22 = vmul.f32 %v6369_v17, %v5266_v41  ;;  %v994_v24 = vld [vmem:[#allocation2 + $0xb8] sm:$0x7f]  ;;  %v2420_v34 = vadd.f32 %v2404_v55, %v2387_v37  ;;  %v5317_v37 = vpop.permute.xlu1 %2668 }
 0x167   : > { %997 = vst.msk [vmem:[#allocation2 + $0xc8] sm:$0xff] %vm637_vm0, %v5262_v45  ;;  %v5270_v43 = vld [vmem:[#allocation2 + $0xa9] sm:$0xff]  ;;  %v2069_v61 = vmul.f32 %v6467_v49, %v5264_v8  ;;  %v1131_v62 = vmul.f32 %v5264_v8, %v3928_v4  ;;  %v1939_v7 = vmul.f32 %v6456_v47, %v5264_v8 }
 0x168   : > { %6487 = vst [vmem:[#allocation14_spill] sm:$0xff] %v5270_v43  ;;  %v1082_v51 = vmul.f32 %v6373_v33, %v5270_v43  ;;  %v5288_v59 = vld [vmem:[#allocation2 + $0xad] sm:$0xff]  ;;  %v5302_v43 = vpop.permute.xlu0 %2470 }
 0x169   : > { %996 = vst.msk [vmem:[#allocation2 + $0xc0] sm:$0xff] %vm637_vm0, %v5266_v41  ;;  %v2085_v63 = vadd.f32 %v2069_v61, %v2052_v15  ;;  %v1988_v3 = vadd.f32 %v1972_v31, %v1939_v7  ;;  %v2038_v41 = vmul.f32 %v6462_v57, %v5288_v59  ;;  %v5309_v15 = vld [vmem:[#allocation2 + $0xb2] sm:$0xff]  ;;  %v2453_v7 = vadd.f32 %v2437_v19, %v2420_v34 }
 0x16a   : > { %v1098_v58 = vadd.f32 %v1082_v51, %v1033_v22  ;;  %6489 = vst [vmem:[#allocation39_spill] sm:$0xff] %v5302_v43  ;;  %v2168_v22 = vmul.f32 %v6475_v5, %v5288_v59  ;;  %v1229_v43 = vmul.f32 %v5254_v0, %v3943_v14  ;;  %v5315_v31 = vld [vmem:[#allocation2 + $0xb3] sm:$0xff]  ;;  %v1081_v34 = vmul.f32 %v6492_v48, %v6373_v33 }
 0x16b   : > { %999 = vst.msk [vmem:[#allocation2 + $0xd0] sm:$0x7f] %vm998_vm10, %v994_v24  ;;  %v2118_v61 = vadd.f32 %v2102_v18, %v2085_v63  ;;  %v2021_v24 = vadd.f32 %v2005_v35, %v1988_v3  ;;  %v1278_v63 = vmul.f32 %v5288_v59, %v6459_v54  ;;  %v2070_v18 = vmul.f32 %v6467_v49, %v5309_v15  ;;  %v6491_v35 = vld [vmem:[#allocation50_spill] sm:$0xff] }
 0x16c   : > { %v1147_v51 = vadd.f32 %v1131_v62, %v1098_v58  ;;  %6490 = vst [vmem:[#allocation25_spill] sm:$0xff] %v5317_v37  ;;  %2520 = vperm.xlu0 %3437, %v2453_v7   ;;  %v1032_v19 = vmul.f32 %v6491_v35, %v6369_v17  ;;  %v2103_v36 = vmul.f32 %v6471_v60, %v5315_v31  ;;  %vm2953_vm0 = vcmask 130048  }
 0x16d   : > { %v2151_v55 = vadd.f32 %v2135_v44, %v2118_v61  ;;  %v2054_v16 = vadd.f32 %v2038_v41, %v2021_v24  ;;  %v5331_v44 = vld [vmem:[#allocation2 + $0xb4] sm:$0xff]  ;;  %v2419_v61 = vadd.f32 %v2403_v52, %v2386_v38  ;;  %v2436_v41 = vmul.f32 %v6472_v1, %v6473_v2 }
 0x16e   : > { %v1196_v10 = vadd.f32 %v1180_v29, %v1147_v51  ;;  %v5341_v24 = vld [vmem:[#allocation2 + $0xb5] sm:$0xff]  ;;  %v2136_v38 = vmul.f32 %v6474_v53, %v5331_v44  ;;  %v1097_v35 = vadd.f32 %v1081_v34, %v1032_v19  ;;  %v1130_v48 = vmul.f32 %v6466_v40, %v3928_v4 }
 0x16f   : > { %v2184_v3 = vadd.f32 %v2168_v22, %v2151_v55  ;;  %v2086_v55 = vadd.f32 %v2070_v18, %v2053_v25  ;;  %v2604_v25 = vmax.f32 %v5177_v26, %v5181_v12  ;;  %v2452_v18 = vadd.f32 %v2436_v41, %v2419_v61 }
 0x170   : > { %v5323_v58 = vld [vmem:[#allocation2 + $0xc2] sm:$0xff]  ;;  %v1245_v29 = vadd.f32 %v1229_v43, %v1196_v10  ;;  %v5347_v43 = vpop.permute.xlu2 %2495  ;;  %v5351_v52 = vpop.permute.xlu0 %2490  ;;  %v1179_v19 = vmul.f32 %v6470_v56, %v3938_v9  ;;  %v2372_v12 = vmul.f32 %v6465_v11, %v6473_v2  ;;  %v2373_v61 = vmul.f32 %v6465_v11, %v5254_v0 }
 0x171   : > { %v5325_v62 = vld [vmem:[#allocation2 + $0xc3] sm:$0xff]  ;;  %v2071_v30 = vmul.f32 %v6467_v49, %v5323_v58  ;;  %2251 = vperm.xlu2 %3436, %v2184_v3   ;;  %6493 = vst [vmem:[#allocation81_spill] sm:$0xff] %v5347_v43  ;;  %v2119_v37 = vadd.f32 %v2103_v36, %v2086_v55  ;;  %v1146_v43 = vadd.f32 %v1130_v48, %v1097_v35  ;;  %v5366_v36 = vpop.permute.xlu1 %2475  ;;  %v5384_v48 = vld [vmem:[#allocation2 + $0xb1] sm:$0xff] }
 0x172   : > { %v2104_v51 = vmul.f32 %v6471_v60, %v5325_v62  ;;  %v5343_v7 = vadd.f32 %v1278_v63, %v1245_v29  ;;  %v5345_v22 = vld [vmem:[#allocation2 + $0xc4] sm:$0xff]  ;;  %v2169_v63 = vmul.f32 %v6475_v5, %v5341_v24  ;;  %v2620_v34 = vmax.f32 %v2604_v25, %v5188_v39 }
 0x173   : > { %v2087_v10 = vadd.f32 %v2071_v30, %v2054_v16  ;;  %v2137_v16 = vmul.f32 %v6474_v53, %v5345_v22  ;;  %v5361_v29 = vld [vmem:[#allocation2 + $0xc5] sm:$0xff]  ;;  %v2152_v30 = vadd.f32 %v2136_v38, %v2119_v37  ;;  %v2340_v37 = vmul.f32 %v6464_v20, %v5252_v6 }
 0x174   : > { %v2170_v26 = vmul.f32 %v6475_v5, %v5361_v29  ;;  %2683 = vperm.xlu0 %3437, %v2620_v34   ;;  %v2605_v39 = vmax.f32 %v5006_v50, %v4991_v27  ;;  %v2406_v41 = vmul.f32 %v6469_v13, %v5325_v62  ;;  %v1195_v38 = vadd.f32 %v1179_v19, %v1146_v43 }
 0x175   : > { %v2120_v3 = vadd.f32 %v2104_v51, %v2087_v10  ;;  %v2185_v55 = vadd.f32 %v2169_v63, %v2152_v30  ;;  %v2339_v51 = vmul.f32 %v6464_v20, %v6470_v56  ;;  %v1228_v35 = vmul.f32 %v6473_v2, %v3943_v14 }
 0x176   : > { %v1034_v27 = vmul.f32 %v6369_v17, %v5262_v45  ;;  %v1083_v50 = vmul.f32 %v6373_v33, %v5384_v48  ;;  %v2405_v30 = vmul.f32 %v6469_v13, %v5315_v31  ;;  %v1132_v19 = vmul.f32 %v5309_v15, %v3928_v4 }
 0x177   : > { %v2153_v10 = vadd.f32 %v2137_v16, %v2120_v3  ;;  %2256 = vperm.xlu1 %3438, %v2185_v55   ;;  %v2389_v3 = vadd.f32 %v2373_v61, %v2340_v37  ;;  %v2439_v16 = vmul.f32 %v6472_v1, %v5345_v22  ;;  %v2621_v34 = vmax.f32 %v2605_v39, %v4996_v28 }
 0x178   : > { %v5386_v63 = vpop.permute.xlu2 %2505  ;;  %v5394_v25 = vpop.permute.xlu0 %2500  ;;  %v1099_v37 = vadd.f32 %v1083_v50, %v1034_v27  ;;  %v1181_v17 = vmul.f32 %v5315_v31, %v3938_v9  ;;  %v1244_v61 = vadd.f32 %v1228_v35, %v1195_v38  ;;  %v1277_v33 = vmul.f32 %v5053_v21, %v6459_v54  ;;  %v5429_v27 = vld [vmem:[#allocation2 + $0xcc] sm:$0xff] }
 0x179   : > { %2515 = vperm.xlu2 %3436, %v2452_v18   ;;  %6494 = vst [vmem:[#allocation80_spill] sm:$0xff] %v5386_v63  ;;  %v2186_v43 = vadd.f32 %v2170_v26, %v2153_v10  ;;  %v2388_v18 = vadd.f32 %v2372_v12, %v2339_v51  ;;  %v2422_v55 = vadd.f32 %v2406_v41, %v2389_v3  ;;  %v5415_v12 = vpop.permute.xlu1 %2196  ;;  %v5419_v41 = vld [vmem:[#allocation2 + $0xca] sm:$0xff] }
 0x17a   : > { %v1148_v10 = vadd.f32 %v1132_v19, %v1099_v37  ;;  %v1230_v51 = vmul.f32 %v5331_v44, %v3943_v14  ;;  %v1940_v26 = vmul.f32 %v6456_v47, %v5309_v15  ;;  %v2438_v4 = vmul.f32 %v6472_v1, %v5331_v44  ;;  %v5425_v3 = vld [vmem:[#allocation2 + $0xcb] sm:$0xff] }
 0x17b   : > { %v2455_v63 = vadd.f32 %v2439_v16, %v2422_v55  ;;  %v1973_v28 = vmul.f32 %v6457_v32, %v5315_v31  ;;  %v2006_v9 = vmul.f32 %v6460_v46, %v5331_v44  ;;  %v2421_v21 = vadd.f32 %v2405_v30, %v2388_v18  ;;  %v5442_v37 = vld [vmem:[#allocation2 + $0xcd] sm:$0xff] }
 0x17c   : > { %v1197_v39 = vadd.f32 %v1181_v17, %v1148_v10  ;;  %v1279_v14 = vmul.f32 %v5341_v24, %v6459_v54  ;;  %v1293_v47 = vadd.f32 %v1277_v33, %v1244_v61  ;;  %v1326_v38 = vmul.f32 %v5074_v42, %v6461_v23  ;;  %v6495_v10 = vld [vmem:[#allocation43_spill] sm:$0xff] }
 0x17d   : > { %2530 = vperm.xlu0 %3437, %v2455_v63   ;;  %v1989_v32 = vadd.f32 %v1973_v28, %v1940_v26  ;;  %v2039_v46 = vmul.f32 %v6462_v57, %v5341_v24  ;;  %v2607_v16 = vmax.f32 %v5264_v8, %v5252_v6  ;;  %v2072_v50 = vmul.f32 %v6467_v49, %v5419_v41  ;;  %v1358_v63 = vld [vmem:[#allocation2 + $0x9f] sm:$0xff]  ;;  %v6496_v26 = vld [vmem:[#allocation58_spill] sm:$0xff] }
 0x17e   : > { %v1246_v35 = vadd.f32 %v1230_v51, %v1197_v39  ;;  %v1342_v57 = vadd.f32 %v1326_v38, %v1293_v47  ;;  %v2138_v49 = vmul.f32 %v6474_v53, %v5429_v27  ;;  %v2341_v61 = vmul.f32 %v6464_v20, %v5315_v31  ;;  %v6497_v20 = vld [vmem:[#allocation37_spill] sm:$0xff]  ;;  %v6499_v47 = vld [vmem:[#allocation63_spill] sm:$0xff] }
 0x17f   : > { %2688 = vperm.xlu1 %3438, %v2621_v34   ;;  %v2022_v54 = vadd.f32 %v2006_v9, %v1989_v32  ;;  %v2105_v34 = vmul.f32 %v6471_v60, %v5425_v3  ;;  %v2623_v55 = vmax.f32 %v2607_v16, %v5254_v0  ;;  %v2374_v33 = vmul.f32 %v6465_v11, %v5331_v44  ;;  %v6498_v11 = vld [vmem:[#allocation27_spill] sm:$0xff] }
 0x180   : > { %v5433_v18 = vpop.permute.xlu2 %2206  ;;  %v5435_v42 = vadd.f32 %v1279_v14, %v1246_v35  ;;  %v5437_v30 = vpop.permute.xlu0 %2465  ;;  %v1375_v51 = vmul.f32 %v6495_v10, %v1358_v63  ;;  %v2606_v60 = vmax.f32 %v6466_v40, %v6470_v56  ;;  %v2171_v53 = vmul.f32 %v6475_v5, %v5442_v37  ;;  %v6500_v56 = vld [vmem:[#allocation19_spill] sm:$0xff] }
 0x181   : > { %2261 = vperm.xlu2 %3436, %v2186_v43   ;;  %v2454_v43 = vadd.f32 %v2438_v4, %v2421_v21  ;;  %v2055_v19 = vadd.f32 %v2039_v46, %v2022_v54  ;;  %v1425_v4 = vmul.f32 %v6496_v26, %v5262_v45  ;;  %v1474_v21 = vmul.f32 %v6497_v20, %v5384_v48  ;;  %v5459_v39 = vpop.permute.xlu1 %2226  ;;  %v6501_v48 = vld [vmem:[#allocation47_spill] sm:$0xff]  ;;  %v6502_v54 = vld [vmem:[#allocation14_spill] sm:$0xff] }
 0x182   : > { %v1391_v9 = vadd.f32 %v1375_v51, %v1342_v57  ;;  %v1523_v14 = vmul.f32 %v6498_v11, %v5309_v15  ;;  %v1374_v40 = vmul.f32 %v6499_v47, %v6495_v10  ;;  %v1424_v45 = vmul.f32 %v6496_v26, %v6500_v56  ;;  %v6503_v57 = vld [vmem:[#allocation65_spill] sm:$0xff] }
 0x183   : > { %v2088_v17 = vadd.f32 %v2072_v50, %v2055_v19  ;;  %v2390_v32 = vadd.f32 %v2374_v33, %v2341_v61  ;;  %v2407_v5 = vmul.f32 %v6469_v13, %v5425_v3  ;;  %v2622_v35 = vmax.f32 %v2606_v60, %v6473_v2  ;;  %v6504_v33 = vld [vmem:[#allocation66_spill] sm:$0xff] }
 0x184   : > { %v1441_v46 = vadd.f32 %v1425_v4, %v1391_v9  ;;  %v1390_v16 = vadd.f32 %v1374_v40, %v6501_v48  ;;  %v1473_v50 = vmul.f32 %v6497_v20, %v6502_v54  ;;  %v1572_v19 = vmul.f32 %v6503_v57, %v5315_v31  ;;  %v5496_v9 = vld [vmem:[#allocation2 + $0xb6] sm:$0xff] }
 0x185   : > { %v2121_v28 = vadd.f32 %v2105_v34, %v2088_v17  ;;  %2698 = vperm.xlu0 %3437, %v2623_v55   ;;  %v1522_v34 = vmul.f32 %v6498_v11, %v5264_v8  ;;  %v2423_v2 = vadd.f32 %v2407_v5, %v2390_v32  ;;  %v2440_v17 = vmul.f32 %v6472_v1, %v5429_v27  ;;  %v5510_v5 = vld [vmem:[%s6076_s11] ss:$0 sm:$0xff]  ;;  %v5514_v48 = vld [vmem:[#allocation2 + $0xb7] sm:$0xff] }
 0x186   : > { %v1490_v63 = vadd.f32 %v1474_v21, %v1441_v46  ;;  %v1621_v51 = vmul.f32 %v6504_v33, %v5331_v44  ;;  %v2608_v60 = vmax.f32 %v5309_v15, %v5315_v31  ;;  %v1571_v8 = vmul.f32 %v6503_v57, %v5252_v6  ;;  %v1310_v15 = vld [vmem:[#allocation2 + $0xae] sm:$0xff] }
 0x187   : > { %v2154_v38 = vadd.f32 %v2138_v49, %v2121_v28  ;;  %v1440_v49 = vadd.f32 %v1424_v45, %v1390_v16  ;;  %v5492_v28 = vld [vmem:[%s6075_s10] ss:$0 sm:$0xff]  ;;  %v1620_v47 = vmul.f32 %v6504_v33, %v5254_v0  ;;  %v2456_v31 = vadd.f32 %v2440_v17, %v2423_v2  ;;  %v1750_v16 = vld [vmem:[#allocation2 + $0xaf] sm:$0xff] }
 0x188   : > { %v5477_v55 = vpop.permute.xlu2 %2231  ;;  %v5479_v13 = vpop.permute.xlu0 %2216  ;;  %v1539_v61 = vadd.f32 %v1523_v14, %v1490_v63  ;;  %v2624_v45 = vmax.f32 %v2608_v60, %v5331_v44  ;;  %v6507_v0 = vld [vmem:[#allocation32_spill] sm:$0xff] }
 0x189   : > { %2525 = vperm.xlu2 %3436, %v2454_v43   ;;  %v2187_v43 = vadd.f32 %v2171_v53, %v2154_v38  ;;  %v1489_v4 = vadd.f32 %v1473_v50, %v1440_v49  ;;  %v6505_v53 = vld [vmem:[#allocation73_spill] sm:$0xff]  ;;  %v5500_v56 = vpop.permute.xlu1 %2236  ;;  %v6506_v38 = vld [vmem:[#allocation38_spill] sm:$0xff]  ;;  %v2712_v46 = vmul.f32 %v5492_v28, %v6507_v0 }
 0x18a   : > { %v1670_v1 = vmul.f32 %v6505_v53, %v5341_v24  ;;  %v1588_v21 = vadd.f32 %v1572_v19, %v1539_v61  ;;  %v1669_v6 = vmul.f32 %v6505_v53, %v5288_v59  ;;  %v1719_v24 = vmul.f32 %v6506_v38, %v5496_v9  ;;  %v6508_v50 = vld [vmem:[#allocation30_spill] sm:$0xff] }
 0x18b   : > { %2266 = vperm.xlu1 %3438, %v2187_v43   ;;  %v1538_v14 = vadd.f32 %v1522_v34, %v1489_v4  ;;  %v1718_v59 = vmul.f32 %v6506_v38, %v1310_v15  ;;  %v1768_v43 = vmul.f32 %v6508_v50, %v5514_v48  ;;  %v1767_v19 = vmul.f32 %v6508_v50, %v1750_v16  ;;  %v6509_v61 = vld [vmem:[#allocation54_spill] sm:$0xff] }
 0x18c   : > { %v1637_v40 = vadd.f32 %v1621_v51, %v1588_v21  ;;  %v2732_v2 = vadd.f32 %v5510_v5, %v2712_v46  ;;  %v2710_v51 = vmul.f32 %v5492_v28, %v6509_v61 }
 0x18d   : > { %v1587_v32 = vadd.f32 %v1571_v8, %v1538_v14 }
 0x18e   : > { %v2748_v8 = vmax.f32 %v2732_v2, 0.0 }
 0x18f   : > { %v1636_v54 = vadd.f32 %v1620_v47, %v1587_v32  ;;  %v6511_v47 = vld [vmem:[#allocation93_spill] sm:$0xff]  ;;  %v5541_v32 = vld [vmem:[%s6073_s8] ss:$0 sm:$0xff] }
 0x190   : > { %v5520_v34 = vpop.permute.xlu2 %2241  ;;  %v5522_v49 = vpop.permute.xlu0 %2191 }
 0x191   : > { %2693 = vperm.xlu2 %3436, %v2622_v35   ;;  %v1686_v35 = vadd.f32 %v1670_v1, %v1637_v40  ;;  %v1685_v63 = vadd.f32 %v1669_v6, %v1636_v54  ;;  %v6510_v1 = vld [vmem:[#allocation21_spill] sm:$0xff]  ;;  %v5529_v14 = vpop.permute.xlu1 %2201  ;;  %v1327_v40 = vmul.f32 %v6461_v23, %v1310_v15  ;;  %v2730_v6 = vadd.f32 %v5510_v5, %v2710_v51  ;;  %v6512_v54 = vld [vmem:[#allocation39_spill] sm:$0xff] }
 0x192   : > { %v2709_v21 = vmul.f32 %v5492_v28, %v6510_v1 }
 0x193   : > { %2535 = vperm.xlu1 %3438, %v2456_v31   ;;  %v1735_v44 = vadd.f32 %v1719_v24, %v1686_v35  ;;  %v1734_v17 = vadd.f32 %v1718_v59, %v1685_v63  ;;  %v2711_v31 = vmul.f32 %v5492_v28, %v6511_v47  ;;  %v1343_v0 = vadd.f32 %v1327_v40, %v5343_v7  ;;  %v5556_v7 = vld [vmem:[%s6074_s9] ss:$0 sm:$0xff] }
 0x194   : > { %v2746_v35 = vmax.f32 %v2730_v6, 0.0  ;;  %v2543_v59 = vmul.f32 %v5541_v32, %v6512_v54  ;;  %v2547_v63 = vmul.f32 %v5541_v32, %v5351_v52  ;;  %v1458_v52 = vld [vmem:[#allocation2 + $0xc1] sm:$0xff]  ;;  %v6514_v54 = vld [vmem:[#allocation23_spill] sm:$0xff] }
 0x195   : > { %v1784_v60 = vadd.f32 %v1768_v43, %v1735_v44  ;;  %v1783_v4 = vadd.f32 %v1767_v19, %v1734_v17  ;;  %v2731_v24 = vadd.f32 %v5510_v5, %v2711_v31  ;;  %v1376_v44 = vmul.f32 %v1750_v16, %v6495_v10  ;;  %v1409_v19 = vld [vmem:[#allocation2 + $0xc0] sm:$0xff]  ;;  %v6513_v17 = vld [vmem:[#allocation78_spill] sm:$0xff] }
 0x196   : > { %v2713_v61 = vmul.f32 %v5492_v28, %v6513_v17  ;;  %v2567_v47 = vadd.f32 %v5556_v7, %v2547_v63 }
 0x197   : > { %1850 = vperm.xlu0 %3437, %v1783_v4   ;;  %v2747_v2 = vmax.f32 %v2731_v24, 0.0  ;;  %v1392_v51 = vadd.f32 %v1376_v44, %v1343_v0  ;;  %v1524_v4 = vmul.f32 %v6498_v11, %v5323_v58 }
 0x198   : > { %v5544_v46 = vpop.permute.xlu2 %1815  ;;  %v5546_v15 = vpop.permute.xlu0 %2211  ;;  %v2733_v31 = vadd.f32 %v5510_v5, %v2713_v61  ;;  %v2583_v44 = vmax.f32 %v2567_v47, 0.0  ;;  %v6516_v47 = vld [vmem:[#allocation77_spill] sm:$0xff] }
 0x199   : > { %2703 = vperm.xlu2 %3436, %v2624_v45   ;;  %v2729_v45 = vadd.f32 %v5510_v5, %v2709_v21  ;;  %v5563_v16 = vpop.permute.xlu1 %2221  ;;  %v1475_v21 = vmul.f32 %v6497_v20, %v1458_v52  ;;  %v5600_v52 = vld [vmem:[#allocation8] ss:$0 sm:$0xff] }
 0x19a   : > { %v2749_v63 = vmax.f32 %v2733_v31, 0.0  ;;  %v2545_v31 = vmul.f32 %v5541_v32, %v6516_v47 }
 0x19b   : > { %2911 = vrot.lane.b32.xlu1 %v2748_v8, %s3636_s27  ;;  %v2745_v43 = vmax.f32 %v2729_v45, 0.0  ;;  %v2563_v8 = vadd.f32 %v5556_v7, %v2543_v59  ;;  %v2542_v45 = vmul.f32 %v5541_v32, %v5437_v30  ;;  %v2541_v59 = vmul.f32 %v5541_v32, %v6514_v54 }
 0x19d   : > { %v2579_v6 = vmax.f32 %v2563_v8, 0.0  ;;  %v2562_v17 = vadd.f32 %v5556_v7, %v2542_v45  ;;  %v1377_v45 = vmul.f32 %v5514_v48, %v6495_v10  ;;  %v2565_v10 = vadd.f32 %v5556_v7, %v2545_v31 }
 0x19e   : > { %v1525_v48 = vmul.f32 %v6498_v11, %v5419_v41  ;;  %v1672_v11 = vmul.f32 %v6505_v53, %v5442_v37  ;;  %v2276_v37 = vmul.f32 %v5600_v52, %v5546_v15 }
 0x19f   : > { %2907 = vrot.lane.b32.xlu0 %v2746_v35, %s3636_s27  ;;  %v1573_v35 = vmul.f32 %v6503_v57, %v5325_v62  ;;  %v1328_v62 = vmul.f32 %v6461_v23, %v5496_v9  ;;  %v2578_v9 = vmax.f32 %v2562_v17, 0.0 }
 0x1a0   : > { %v5574_v24 = vpop.permute.xlu2 %1845  ;;  %v5576_v0 = vpop.permute.xlu0 %1795 }
 0x1a1   : > { %1855 = vperm.xlu2 %3436, %v1784_v60   ;;  %v1426_v60 = vmul.f32 %v6496_v26, %v1409_v19  ;;  %v1671_v19 = vmul.f32 %v6505_v53, %v5361_v29  ;;  %v5595_v29 = vpop.permute.xlu1 %1805  ;;  %v1344_v23 = vadd.f32 %v1328_v62, %v5435_v42  ;;  %v5619_v42 = vld [vmem:[%s6071_s6] ss:$0 sm:$0xff] }
 0x1a2   : > { %v2296_v47 = vadd.f32 %v5619_v42, %v2276_v37  ;;  %v2549_v37 = vmul.f32 %v5541_v32, %v5394_v25 }
 0x1a3   : > { %2905 = vrot.lane.b32.xlu1 %v2745_v43, %s3636_s27  ;;  %v1442_v1 = vadd.f32 %v1426_v60, %v1392_v51  ;;  %v2544_v43 = vmul.f32 %v5541_v32, %v5366_v36  ;;  %v2561_v51 = vadd.f32 %v5556_v7, %v2541_v59 }
 0x1a5   : > { %v1491_v40 = vadd.f32 %v1475_v21, %v1442_v1  ;;  %v2564_v61 = vadd.f32 %v5556_v7, %v2544_v43  ;;  %v2273_v1 = vmul.f32 %v5600_v52, %v5415_v12  ;;  %v2577_v21 = vmax.f32 %v2561_v51, 0.0  ;;  %v1410_v12 = vld [vmem:[#allocation2 + $0xc8] sm:$0xff] }
 0x1a6   : > { %v1427_v54 = vmul.f32 %v6496_v26, %v1410_v12  ;;  %v2277_v26 = vmul.f32 %v5600_v52, %v5479_v13 }
 0x1a7   : > { %v1540_v58 = vadd.f32 %v1524_v4, %v1491_v40  ;;  %2845 = vrot.lane.b32.xlu0 %v2579_v6, %s3637_s25  ;;  %v2580_v8 = vmax.f32 %v2564_v61, 0.0  ;;  %v2293_v59 = vadd.f32 %v5619_v42, %v2273_v1  ;;  %v2275_v61 = vmul.f32 %v5600_v52, %v5433_v18 }
 0x1a8   : > { %v5610_v40 = vpop.permute.xlu2 %1810  ;;  %v5612_v6 = vpop.permute.xlu0 %1835 }
 0x1a9   : > { %2909 = vrot.lane.b32.xlu2 %v2747_v2, %s3636_s27  ;;  %v1589_v30 = vadd.f32 %v1573_v35, %v1540_v58  ;;  %v1622_v2 = vmul.f32 %v6504_v33, %v5345_v22  ;;  %v6515_v22 = vld [vmem:[#allocation26_spill] sm:$0xff]  ;;  %v1393_v35 = vadd.f32 %v1377_v45, %v1344_v23  ;;  %v2309_v17 = vmax.f32 %v2293_v59, 0.0 }
 0x1aa   : > { %v2546_v4 = vmul.f32 %v5541_v32, %v6515_v22  ;;  %v1623_v22 = vmul.f32 %v6504_v33, %v5429_v27  ;;  %v2278_v27 = vmul.f32 %v5600_v52, %v5563_v16  ;;  %v1703_v33 = vld [vmem:[#allocation2 + $0xc6] sm:$0xff]  ;;  %v2280_v59 = vmul.f32 %v5600_v52, %v5477_v55 }
 0x1ab   : > { %2853 = vrot.lane.b32.xlu1 %v2583_v44, %s3637_s25  ;;  %v1638_v36 = vadd.f32 %v1622_v2, %v1589_v30  ;;  %v1459_v44 = vld [vmem:[#allocation2 + $0xc9] sm:$0xff]  ;;  %v1443_v43 = vadd.f32 %v1427_v54, %v1393_v35  ;;  %v2272_v2 = vmul.f32 %v5600_v52, %v5522_v49  ;;  %v1720_v45 = vmul.f32 %v6506_v38, %v1703_v33 }
 0x1ac   : > { %v2566_v58 = vadd.f32 %v5556_v7, %v2546_v4  ;;  %v2298_v31 = vadd.f32 %v5619_v42, %v2278_v27  ;;  %v1752_v16 = vld [vmem:[#allocation2 + $0xc7] sm:$0xff]  ;;  %v2279_v35 = vmul.f32 %v5600_v52, %v5459_v39  ;;  %v2300_v39 = vadd.f32 %v5619_v42, %v2280_v59 }
 0x1ad   : > { %v5598_v60 = vadd.f32 %v1671_v19, %v1638_v36  ;;  %v5630_v19 = vpop.permute.xlu1 %1825  ;;  %v2581_v36 = vmax.f32 %v2565_v10, 0.0  ;;  %v2292_v49 = vadd.f32 %v5619_v42, %v2272_v2  ;;  %v6517_v2 = vld [vmem:[#allocation45_spill] sm:$0xff]  ;;  %v2281_v27 = vmul.f32 %v5600_v52, %v5500_v56 }
 0x1ae   : > { %v2582_v30 = vmax.f32 %v2566_v58, 0.0  ;;  %v2312_v58 = vmax.f32 %v2296_v47, 0.0  ;;  %v2282_v56 = vmul.f32 %v5600_v52, %v5520_v34 }
 0x1af   : > { %2843 = vrot.lane.b32.xlu0 %v2578_v9, %s3637_s25  ;;  %v2308_v23 = vmax.f32 %v2292_v49, 0.0  ;;  %v1736_v10 = vadd.f32 %v1720_v45, %v5598_v60  ;;  %v6518_v60 = vld [vmem:[#allocation40_spill] sm:$0xff]  ;;  %v1704_v49 = vld [vmem:[#allocation2 + $0xce] sm:$0xff]  ;;  %v2301_v25 = vadd.f32 %v5619_v42, %v2281_v27 }
 0x1b0   : > { %v5646_v13 = vpop.permute.xlu2 %1830  ;;  %v5648_v51 = vpop.permute.xlu0 %1790 }
 0x1b1   : > { %2913 = vrot.lane.b32.xlu2 %v2749_v63, %s3636_s27  ;;  %v1476_v63 = vmul.f32 %v6497_v20, %v1459_v44  ;;  %v1574_v20 = vmul.f32 %v6503_v57, %v5425_v3  ;;  %v2297_v3 = vadd.f32 %v5619_v42, %v2277_v26  ;;  %v2295_v57 = vadd.f32 %v5619_v42, %v2275_v61  ;;  %v6519_v61 = vld [vmem:[#allocation81_spill] sm:$0xff] }
 0x1b2   : > { %v2314_v44 = vmax.f32 %v2298_v31, 0.0  ;;  %v2715_v26 = vmul.f32 %v5492_v28, %v6518_v60  ;;  %v2317_v59 = vmax.f32 %v2301_v25, 0.0 }
 0x1b3   : > { %2847 = vrot.lane.b32.xlu1 %v2580_v8, %s3637_s25  ;;  %v1492_v62 = vadd.f32 %v1476_v63, %v1443_v43  ;;  %v2313_v9 = vmax.f32 %v2297_v3, 0.0  ;;  %v2274_v8 = vmul.f32 %v5600_v52, %v5529_v14  ;;  %v2299_v63 = vadd.f32 %v5619_v42, %v2279_v35  ;;  %v6520_v35 = vld [vmem:[#allocation92_spill] sm:$0xff] }
 0x1b5   : > { %v1541_v41 = vadd.f32 %v1525_v48, %v1492_v62  ;;  %v5658_v1 = vpop.permute.xlu1 %1800  ;;  %v2294_v15 = vadd.f32 %v5619_v42, %v2274_v8  ;;  %v1769_v48 = vmul.f32 %v6508_v50, %v1752_v16  ;;  %v2714_v62 = vmul.f32 %v5492_v28, %v6517_v2 }
 0x1b7   : > { %2851 = vrot.lane.b32.xlu0 %v2582_v30, %s3637_s25  ;;  %v1590_v18 = vadd.f32 %v1574_v20, %v1541_v41  ;;  %v2310_v54 = vmax.f32 %v2294_v15, 0.0  ;;  %v1785_v55 = vadd.f32 %v1769_v48, %v1736_v10  ;;  %v2548_v41 = vmul.f32 %v5541_v32, %v6519_v61 }
 0x1b8   : > { %v5671_v12 = vpop.permute.xlu0 %1820  ;;  %v2316_v20 = vmax.f32 %v2300_v39, 0.0  ;;  %v6522_v39 = vld [vmem:[#allocation80_spill] sm:$0xff] }
 0x1b9   : > { %2841 = vrot.lane.b32.xlu2 %v2577_v21, %s3637_s25  ;;  %v1639_v4 = vadd.f32 %v1623_v22, %v1590_v18  ;;  %v2311_v21 = vmax.f32 %v2295_v57, 0.0  ;;  %v2735_v18 = vadd.f32 %v5510_v5, %v2715_v26  ;;  %v2568_v3 = vadd.f32 %v5556_v7, %v2548_v41 }
 0x1bb   : > { %2779 = vrot.lane.b32.xlu1 %v2309_v17, %s3638_s18  ;;  %v1688_v53 = vadd.f32 %v1672_v11, %v1639_v4  ;;  %v2734_v11 = vadd.f32 %v5510_v5, %v2714_v62  ;;  %v1721_v4 = vmul.f32 %v6506_v38, %v1704_v49  ;;  %v2751_v8 = vmax.f32 %v2735_v18, 0.0 }
 0x1bc   : > { %v2569_v38 = vadd.f32 %v5556_v7, %v2549_v37 }
 0x1bd   : > { %v5681_v43 = vpop.permute.xlu1 %1840  ;;  %v1737_v47 = vadd.f32 %v1721_v4, %v1688_v53  ;;  %v6521_v53 = vld [vmem:[#allocation25_spill] sm:$0xff] }
 0x1bf   : > { %2777 = vrot.lane.b32.xlu0 %v2308_v23, %s3638_s18  ;;  %v2750_v23 = vmax.f32 %v2734_v11, 0.0 }
 0x1c0   : > { %v2511_v17 = vpop.permute.xlu0 %2510 }
 0x1c1   : > { %2849 = vrot.lane.b32.xlu2 %v2581_v36, %s3637_s25  ;;  %v2315_v36 = vmax.f32 %v2299_v63, 0.0  ;;  %v2551_v60 = vmul.f32 %v5541_v32, %v2511_v17 }
 0x1c3   : > { %2787 = vrot.lane.b32.xlu1 %v2313_v9, %s3638_s18  ;;  %v1753_v9 = vld [vmem:[#allocation2 + $0xcf] sm:$0xff] }
 0x1c4   : > { %v1770_v15 = vmul.f32 %v6508_v50, %v1753_v9  ;;  %v2717_v50 = vmul.f32 %v5492_v28, %v6521_v53 }
 0x1c5   : > { %v2247_v22 = vpop.permute.xlu1 %2246 }
 0x1c6   : > { %v1786_v45 = vadd.f32 %v1770_v15, %v1737_v47  ;;  %v2737_v63 = vadd.f32 %v5510_v5, %v2717_v50  ;;  %v2283_v61 = vmul.f32 %v5600_v52, %v2247_v22 }
 0x1c7   : > { %2785 = vrot.lane.b32.xlu0 %v2312_v58, %s3638_s18  ;;  %v2585_v58 = vmax.f32 %v2569_v38, 0.0 }
 0x1c8   : > { %v2674_v33 = vpop.permute.xlu0 %2673  ;;  %v2303_v11 = vadd.f32 %v5619_v42, %v2283_v61 }
 0x1c9   : > { %2783 = vrot.lane.b32.xlu2 %v2311_v21, %s3638_s18  ;;  %v2584_v21 = vmax.f32 %v2568_v3, 0.0  ;;  %v2718_v4 = vmul.f32 %v5492_v28, %v2674_v33 }
 0x1cb   : > { %v5668_v14 = vpop.permute.xlu2 %2251  ;;  %2781 = vrot.lane.b32.xlu1 %v2310_v54, %s3638_s18  ;;  %v2716_v54 = vmul.f32 %v5492_v28, %v6520_v35 }
 0x1cc   : > { %v2284_v3 = vmul.f32 %v5600_v52, %v5668_v14 }
 0x1cd   : > { %v2679_v16 = vpop.permute.xlu1 %2678  ;;  %v2736_v48 = vadd.f32 %v5510_v5, %v2716_v54 }
 0x1ce   : > { %v2719_v37 = vmul.f32 %v5492_v28, %v2679_v16 }
 0x1cf   : > { %1860 = vperm.xlu0 %3437, %v1785_v55   ;;  %v2550_v55 = vmul.f32 %v5541_v32, %v6522_v39  ;;  %v2752_v62 = vmax.f32 %v2736_v48, 0.0 }
 0x1d0   : > { %v2739_v27 = vadd.f32 %v5510_v5, %v2719_v37 }
 0x1d1   : > { %2789 = vrot.lane.b32.xlu2 %v2314_v44, %s3638_s18  ;;  %v2302_v44 = vadd.f32 %v5619_v42, %v2282_v56  ;;  %v2570_v41 = vadd.f32 %v5556_v7, %v2550_v55 }
 0x1d3   : > { %v5686_v30 = vpop.permute.xlu2 %2515  ;;  %2791 = vrot.lane.b32.xlu1 %v2315_v36, %s3638_s18  ;;  %v2318_v2 = vmax.f32 %v2302_v44, 0.0  ;;  %v2753_v36 = vmax.f32 %v2737_v63, 0.0  ;;  %v2586_v17 = vmax.f32 %v2570_v41, 0.0 }
 0x1d4   : > { %v2552_v33 = vmul.f32 %v5541_v32, %v5686_v30 }
 0x1d7   : > { %2915 = vrot.lane.b32.xlu0 %v2750_v23, %s3636_s27  ;;  %v2319_v23 = vmax.f32 %v2303_v11, 0.0 }
 0x1d9   : > { %2793 = vrot.lane.b32.xlu2 %v2316_v20, %s3638_s18  ;;  %v2571_v20 = vadd.f32 %v5556_v7, %v2551_v60 }
 0x1db   : > { %v5699_v57 = vpop.permute.xlu2 %2261  ;;  %2917 = vrot.lane.b32.xlu1 %v2751_v8, %s3636_s27  ;;  %v2587_v22 = vmax.f32 %v2571_v20, 0.0  ;;  %v2304_v8 = vadd.f32 %v5619_v42, %v2284_v3 }
 0x1dc   : > { %v2286_v50 = vmul.f32 %v5600_v52, %v5699_v57 }
 0x1dd   : > { %v2320_v47 = vmax.f32 %v2304_v8, 0.0 }
 0x1de   : > { %v2521_v10 = vpop.permute.xlu0 %2520  ;;  %v2306_v39 = vadd.f32 %v5619_v42, %v2286_v50  ;;  %v5826_v50 = vld [vmem:[%s6077_s12] sm:$0xff] }
 0x1df   : > { %2857 = vrot.lane.b32.xlu0 %v2585_v58, %s3637_s25  ;;  %v2553_v25 = vmul.f32 %v5541_v32, %v2521_v10  ;;  %v2572_v58 = vadd.f32 %v5556_v7, %v2552_v33 }
 0x1e0   : > { %v2322_v60 = vmax.f32 %v2306_v39, 0.0 }
 0x1e1   : > { %2855 = vrot.lane.b32.xlu2 %v2584_v21, %s3637_s25  ;;  %v2738_v21 = vadd.f32 %v5510_v5, %v2718_v4  ;;  %v2573_v56 = vadd.f32 %v5556_v7, %v2553_v25  ;;  %v2588_v53 = vmax.f32 %v2572_v58, 0.0 }
 0x1e3   : > { %v5712_v31 = vpop.permute.xlu2 %2525  ;;  %1865 = vperm.xlu1 %3438, %v1786_v45   ;;  %v2754_v38 = vmax.f32 %v2738_v21, 0.0  ;;  %v2755_v45 = vmax.f32 %v2739_v27, 0.0 }
 0x1e6   : > { %v2684_v18 = vpop.permute.xlu0 %2683 }
 0x1e7   : > { %2797 = vrot.lane.b32.xlu0 %v2318_v2, %s3638_s18  ;;  %v2720_v44 = vmul.f32 %v5492_v28, %v2684_v18 }
 0x1e9   : > { %2795 = vrot.lane.b32.xlu2 %v2317_v59, %s3638_s18  ;;  %v2257_v26 = vpop.permute.xlu1 %2256  ;;  %v2589_v59 = vmax.f32 %v2573_v56, 0.0  ;;  %v2740_v55 = vadd.f32 %v5510_v5, %v2720_v44  ;;  %v5815_v56 = vld [vmem:[#allocation5] ss:$0 sm:$0xff] }
 0x1ea   : > { %v2285_v16 = vmul.f32 %v5600_v52, %v2257_v26  ;;  %v2554_v26 = vmul.f32 %v5541_v32, %v5712_v31 }
 0x1eb   : > { %v5725_v34 = vpop.permute.xlu2 %2693  ;;  %2919 = vrot.lane.b32.xlu1 %v2752_v62, %s3636_s27 }
 0x1ec   : > { %v2305_v30 = vadd.f32 %v5619_v42, %v2285_v16  ;;  %v2574_v11 = vadd.f32 %v5556_v7, %v2554_v26  ;;  %v3030_v26 = vperm.slane %v5826_v50, 0 }
 0x1ee   : > { %v2321_v10 = vmax.f32 %v2305_v30, 0.0  ;;  %v2590_v4 = vmax.f32 %v2574_v11, 0.0 }
 0x1ef   : > { %2859 = vrot.lane.b32.xlu0 %v2586_v17, %s3637_s25  ;;  %v2531_v15 = vpop.permute.xlu0 %2530 }
 0x1f0   : > { %v2555_v61 = vmul.f32 %v5541_v32, %v2531_v15 }
 0x1f1   : > { %2921 = vrot.lane.b32.xlu2 %v2753_v36, %s3636_s27  ;;  %v2689_v9 = vpop.permute.xlu1 %2688  ;;  %v2756_v36 = vmax.f32 %v2740_v55, 0.0 }
 0x1f2   : > { %v2721_v48 = vmul.f32 %v5492_v28, %v2689_v9  ;;  %v2575_v17 = vadd.f32 %v5556_v7, %v2555_v61 }
 0x1f3   : > { %v5737_v49 = vpop.permute.xlu2 %2703  ;;  %2861 = vrot.lane.b32.xlu1 %v2587_v22, %s3637_s25 }
 0x1f4   : > { %v2741_v57 = vadd.f32 %v5510_v5, %v2721_v48  ;;  %v3023_v48 = vrot.slane %v5826_v50, 1 }
 0x1f6   : > { %v2757_v41 = vmax.f32 %v2741_v57, 0.0 }
 0x1f7   : > { %2801 = vrot.lane.b32.xlu0 %v2320_v47, %s3638_s18  ;;  %v2699_v63 = vpop.permute.xlu0 %2698 }
 0x1f8   : > { %v2723_v37 = vmul.f32 %v5492_v28, %v2699_v63 }
 0x1f9   : > { %2799 = vrot.lane.b32.xlu2 %v2319_v23, %s3638_s18  ;;  %v2591_v23 = vmax.f32 %v2575_v17, 0.0 }
 0x1fa   : > { %v2743_v27 = vadd.f32 %v5510_v5, %v2723_v37 }
 0x1fb   : > { %v5749_v14 = vpop.permute.xlu2 %1855  ;;  %2923 = vrot.lane.b32.xlu1 %v2754_v38, %s3636_s27  ;;  %v5805_v38 = vld [vmem:[#allocation3] ss:$0 sm:$0xff] }
 0x1fc   : > { %v2759_v25 = vmax.f32 %v2743_v27, 0.0  ;;  %v1874_v16 = vmul.f32 %v5805_v38, %v5595_v29  ;;  %v1871_v55 = vmul.f32 %v5805_v38, %v5648_v51  ;;  %v1873_v37 = vmul.f32 %v5805_v38, %v5658_v1 }
 0x1fd   : > { %v2267_v35 = vpop.permute.xlu1 %2266  ;;  %v3024_v1 = vrot.slane %v5826_v50, 2 }
 0x1fe   : > { %v2287_v20 = vmul.f32 %v5600_v52, %v2267_v35  ;;  %v2722_v52 = vmul.f32 %v5492_v28, %v5725_v34  ;;  %v1894_v35 = vadd.f32 %v5815_v56, %v1874_v16 }
 0x1ff   : > { %2863 = vrot.lane.b32.xlu0 %v2588_v53, %s3637_s25 }
 0x200   : > { %v2307_v31 = vadd.f32 %v5619_v42, %v2287_v20  ;;  %v2742_v21 = vadd.f32 %v5510_v5, %v2722_v52  ;;  %v1910_v29 = vmax.f32 %v1894_v35, 0.0 }
 0x201   : > { %2925 = vrot.lane.b32.xlu2 %v2755_v45, %s3636_s27 }
 0x202   : > { %v2323_v9 = vmax.f32 %v2307_v31, 0.0  ;;  %v2758_v15 = vmax.f32 %v2742_v21, 0.0  ;;  %v1875_v31 = vmul.f32 %v5805_v38, %v5610_v40 }
 0x203   : > { %v5761_v54 = vpop.permute.xlu2 %2909  ;;  %2865 = vrot.lane.b32.xlu1 %v2589_v59, %s3637_s25 }
 0x205   : > { %v2536_v2 = vpop.permute.xlu1 %2535 }
 0x206   : > { %v2556_v8 = vmul.f32 %v5541_v32, %v2536_v2  ;;  %v2724_v32 = vmul.f32 %v5492_v28, %v5737_v49  ;;  %v3031_v2 = vperm.slane %v3023_v48, 0 }
 0x207   : > { %2805 = vrot.lane.b32.xlu0 %v2322_v60, %s3638_s18 }
 0x208   : > { %v2576_v34 = vadd.f32 %v5556_v7, %v2556_v8  ;;  %v2744_v58 = vadd.f32 %v5510_v5, %v2724_v32  ;;  %v1872_v5 = vmul.f32 %v5805_v38, %v5576_v0 }
 0x209   : > { %2803 = vrot.lane.b32.xlu2 %v2321_v10, %s3638_s18  ;;  %v5783_v18 = vpop.permute.xlu0 %1850 }
 0x20a   : > { %v2592_v45 = vmax.f32 %v2576_v34, 0.0  ;;  %v2760_v30 = vmax.f32 %v2744_v58, 0.0  ;;  %v1892_v39 = vadd.f32 %v5815_v56, %v1872_v5  ;;  %v1895_v34 = vadd.f32 %v5815_v56, %v1875_v31 }
 0x20b   : > { %v5773_v62 = vpop.permute.xlu2 %2913  ;;  %2927 = vrot.lane.b32.xlu1 %v2756_v36, %s3636_s27 }
 0x20c   : > { %v1908_v57 = vmax.f32 %v1892_v39, 0.0 }
 0x20d   : > { %v2912_v3 = vpop.permute.xlu1 %2911 }
 0x20f   : > { %2867 = vrot.lane.b32.xlu0 %v2590_v4, %s3637_s25 }
 0x211   : > { %2929 = vrot.lane.b32.xlu2 %v2757_v41, %s3636_s27  ;;  %v2908_v42 = vpop.permute.xlu0 %2907  ;;  %v1891_v41 = vadd.f32 %v5815_v56, %v1871_v55 }
 0x213   : > { %v5787_v22 = vpop.permute.xlu2 %2841  ;;  %2869 = vrot.lane.b32.xlu1 %v2591_v23, %s3637_s25  ;;  %v1907_v4 = vmax.f32 %v1891_v41, 0.0  ;;  %v1879_v41 = vmul.f32 %v5805_v38, %v5646_v13 }
 0x215   : > { %v5798_v47 = vpop.permute.xlu1 %2905 }
 0x217   : > { %2931 = vrot.lane.b32.xlu0 %v2758_v15, %s3636_s27  ;;  %v1893_v15 = vadd.f32 %v5815_v56, %v1873_v37 }
 0x219   : > { %2807 = vrot.lane.b32.xlu2 %v2323_v9, %s3638_s18  ;;  %v5813_v7 = vpop.permute.xlu0 %2845 }
 0x21b   : > { %v5801_v33 = vpop.permute.xlu2 %2849  ;;  %2933 = vrot.lane.b32.xlu1 %v2759_v25, %s3636_s27  ;;  %v1911_v25 = vmax.f32 %v1895_v34, 0.0 }
 0x21d   : > { %v5817_v28 = vpop.permute.xlu1 %2853 }
 0x21f   : > { %2935 = vrot.lane.b32.xlu0 %v2760_v30, %s3636_s27  ;;  %v1876_v30 = vmul.f32 %v5805_v38, %v5544_v46 }
 0x221   : > { %2871 = vrot.lane.b32.xlu2 %v2592_v45, %s3637_s25  ;;  %v2844_v53 = vpop.permute.xlu0 %2843  ;;  %v1909_v45 = vmax.f32 %v1893_v15, 0.0  ;;  %v1896_v46 = vadd.f32 %v5815_v56, %v1876_v30 }
 0x223   : > { %v2784_v49 = vpop.permute.xlu2 %2783 }
 0x224   : > { %v2957_v59 = vsel %vm2953_vm0, %v1910_v29, %v2784_v49  ;;  %v3032_v49 = vperm.slane %v3024_v1, 0 }
 0x225   : > { %v2848_v44 = vpop.permute.xlu1 %2847 }
 0x226   : > { %v2974_v0 = vsel %vm2970_vm14, %v2957_v59, %v2848_v44  ;;  %v1877_v59 = vmul.f32 %v5805_v38, %v5671_v12 }
 0x227   : > { %v2991_v63 = vsel %vm2987_vm15, %v2974_v0, %v2912_v3 }
 0x228   : > { %3008 = vst.msk [vmem:[%s5834_s29 + $0x18] sm:$0xff] %vm3004_vm1, %v2991_v63  ;;  %v3049_v20 = vmul.f32 %v3031_v2, %v2991_v63 }
 0x229   : > { %v5846_v60 = vpop.permute.xlu0 %2851 }
 0x22a   : > { %v3078_v52 = vsel %vm3004_vm1, %v3049_v20, 0.0 }
 0x22b   : > { %v5836_v10 = vpop.permute.xlu2 %2789 }
 0x22d   : > { %v2780_v36 = vpop.permute.xlu1 %2779 }
 0x22e   : > { %v2955_v61 = vsel %vm2953_vm0, %v1908_v57, %v2780_v36 }
 0x22f   : > { %v2972_v11 = vsel %vm2970_vm14, %v2955_v61, %v2844_v53 }
 0x230   : > { %v2989_v3 = vsel %vm2987_vm15, %v2972_v11, %v2908_v42 }
 0x231   : > { %3006 = vst.msk [vmem:[%s5834_s29 + $0x8] sm:$0xff] %vm3004_vm1, %v2989_v3  ;;  %v3047_v51 = vmul.f32 %v3030_v26, %v2989_v3  ;;  %v2778_v9 = vpop.permute.xlu0 %2777 }
 0x232   : > { %v2954_v21 = vsel %vm2953_vm0, %v1907_v4, %v2778_v9 }
 0x233   : > { %v5852_v17 = vpop.permute.xlu2 %2793  ;;  %v3077_v23 = vsel %vm3004_vm1, %v3047_v51, 0.0  ;;  %v2971_v27 = vsel %vm2970_vm14, %v2954_v21, %v5787_v22  ;;  %v1878_v21 = vmul.f32 %v5805_v38, %v5630_v19 }
 0x234   : > { %v3079_v8 = vadd.f32 %v3078_v52, %v3077_v23  ;;  %v2988_v40 = vsel %vm2987_vm15, %v2971_v27, %v5798_v47  ;;  %v1899_v23 = vadd.f32 %v5815_v56, %v1879_v41 }
 0x235   : > { %v2788_v42 = vpop.permute.xlu1 %2787  ;;  %3005 = vst.msk [vmem:[%s5834_s29] sm:$0xff] %vm3004_vm1, %v2988_v40  ;;  %v3046_v29 = vmul.f32 %v3030_v26, %v2988_v40  ;;  %v3025_v26 = vrot.slane %v5826_v50, 3  ;;  %v1898_v1 = vadd.f32 %v5815_v56, %v1878_v21 }
 0x236   : > { %v1915_v34 = vmax.f32 %v1899_v23, 0.0 }
 0x237   : > { %v3062_v48 = vsel %vm3004_vm1, %v3046_v29, 0.0  ;;  %v3033_v11 = vperm.slane %v3025_v26, 0 }
 0x239   : > { %v2786_v16 = vpop.permute.xlu0 %2785 }
 0x23a   : > { %v2958_v22 = vsel %vm2953_vm0, %v1911_v25, %v2786_v16  ;;  %v2962_v25 = vsel %vm2953_vm0, %v1915_v34, %v5852_v17  ;;  %v1881_v17 = vmul.f32 %v5805_v38, %v5681_v43 }
 0x23b   : > { %v5873_v32 = vpop.permute.xlu2 %2855  ;;  %v2975_v47 = vsel %vm2970_vm14, %v2958_v22, %v5801_v33 }
 0x23c   : > { %v2992_v5 = vsel %vm2987_vm15, %v2975_v47, %v5773_v62 }
 0x23d   : > { %v2782_v58 = vpop.permute.xlu1 %2781  ;;  %3009 = vst.msk [vmem:[%s5834_s29 + $0x20] sm:$0xff] %vm3004_vm1, %v2992_v5  ;;  %v3050_v0 = vmul.f32 %v3032_v49, %v2992_v5 }
 0x23e   : > { %v2956_v35 = vsel %vm2953_vm0, %v1909_v45, %v2782_v58  ;;  %v1914_v58 = vmax.f32 %v1898_v1, 0.0 }
 0x23f   : > { %v2973_v53 = vsel %vm2970_vm14, %v2956_v35, %v5813_v7  ;;  %v1897_v7 = vadd.f32 %v5815_v56, %v1877_v59 }
 0x240   : > { %v2990_v33 = vsel %vm2987_vm15, %v2973_v53, %v5761_v54  ;;  %v3065_v54 = vsel %vm3004_vm1, %v3050_v0, 0.0  ;;  %v3027_v0 = vrot.slane %v5826_v50, 5 }
 0x241   : > { %3007 = vst.msk [vmem:[%s5834_s29 + $0x10] sm:$0xff] %vm3004_vm1, %v2990_v33  ;;  %v3048_v44 = vmul.f32 %v3031_v2, %v2990_v33  ;;  %v5899_v12 = vpop.permute.xlu0 %1860  ;;  %v1912_v2 = vmax.f32 %v1896_v46, 0.0  ;;  %v1913_v36 = vmax.f32 %v1897_v7, 0.0  ;;  %v1901_v33 = vadd.f32 %v5815_v56, %v1881_v17 }
 0x243   : > { %v3063_v62 = vsel %vm3004_vm1, %v3048_v44, 0.0  ;;  %v5897_v63 = vpop.permute.xlu2 %2795  ;;  %v2959_v61 = vsel %vm2953_vm0, %v1912_v2, %v2788_v42  ;;  %v2960_v20 = vsel %vm2953_vm0, %v1913_v36, %v5836_v10  ;;  %v1917_v7 = vmax.f32 %v1901_v33, 0.0 }
 0x244   : > { %v3064_v39 = vadd.f32 %v3063_v62, %v3062_v48  ;;  %v2976_v3 = vsel %vm2970_vm14, %v2959_v61, %v5846_v60  ;;  %v2977_v52 = vsel %vm2970_vm14, %v2960_v20, %v5817_v28  ;;  %v3026_v60 = vrot.slane %v5826_v50, 4  ;;  %v3097_v61 = vld [vmem:[%s6078_s13 + $0x28] sm:$0xff]  ;;  %v3096_v20 = vld [vmem:[%s6078_s13 + $0x20] sm:$0xff] }
 0x245   : > { %v2792_v55 = vpop.permute.xlu1 %2791  ;;  %v1880_v48 = vmul.f32 %v5805_v38, %v5612_v6  ;;  %v3098_v6 = vld [vmem:[%s6078_s13 + $0x30] sm:$0xff] }
 0x246   : > { %v3066_v57 = vadd.f32 %v3065_v54, %v3064_v39  ;;  %v3034_v15 = vperm.slane %v3026_v60, 0  ;;  %v2961_v35 = vsel %vm2953_vm0, %v1914_v58, %v2792_v55  ;;  %v5949_v39 = vperm.slane %v3027_v0, 0 }
 0x247   : > { %v2978_v5 = vsel %vm2970_vm14, %v2961_v35, %v5873_v32  ;;  %v1900_v2 = vadd.f32 %v5815_v56, %v1880_v48  ;;  %v1884_v0 = vmul.f32 %v5805_v38, %v5749_v14  ;;  %v1885_v48 = vmul.f32 %v5805_v38, %v5899_v12 }
 0x249   : > { %v2916_v51 = vpop.permute.xlu0 %2915 }
 0x24a   : > { %v2993_v31 = vsel %vm2987_vm15, %v2976_v3, %v2916_v51  ;;  %v1883_v51 = vmul.f32 %v5805_v38, %v5783_v18  ;;  %v3095_v18 = vld [vmem:[%s6078_s13 + $0x18] sm:$0xff] }
 0x24b   : > { %v2922_v37 = vpop.permute.xlu2 %2921  ;;  %3010 = vst.msk [vmem:[%s5834_s29 + $0x28] sm:$0xff] %vm3004_vm1, %v2993_v31  ;;  %v3051_v13 = vmul.f32 %v3032_v49, %v2993_v31 }
 0x24d   : > { %v2918_v4 = vpop.permute.xlu1 %2917  ;;  %v3080_v42 = vsel %vm3004_vm1, %v3051_v13, 0.0 }
 0x24e   : > { %v2994_v9 = vsel %vm2987_vm15, %v2977_v52, %v2918_v4  ;;  %v3081_v28 = vadd.f32 %v3080_v42, %v3079_v8  ;;  %v3094_v42 = vld [vmem:[%s6078_s13 + $0x10] sm:$0xff] }
 0x24f   : > { %3011 = vst.msk [vmem:[%s5834_s29 + $0x30] sm:$0xff] %vm3004_vm1, %v2994_v9  ;;  %v3052_v10 = vmul.f32 %v3033_v11, %v2994_v9 }
 0x251   : > { %v3067_v27 = vsel %vm3004_vm1, %v3052_v10, 0.0  ;;  %v2858_v45 = vpop.permute.xlu0 %2857  ;;  %v1903_v10 = vadd.f32 %v5815_v56, %v1883_v51 }
 0x252   : > { %v3068_v40 = vadd.f32 %v3067_v27, %v3066_v57  ;;  %v2979_v16 = vsel %vm2970_vm14, %v2962_v25, %v2858_v45  ;;  %v3099_v57 = vld [vmem:[%s6078_s13 + $0x38] sm:$0xff]  ;;  %v1882_v27 = vmul.f32 %v5805_v38, %v5574_v24 }
 0x253   : > { %v2996_v19 = vsel %vm2987_vm15, %v2979_v16, %v2922_v37  ;;  %v5933_v49 = vpop.permute.xlu2 %2799  ;;  %3118 = vmatpush.msra.mxu0 %v3099_v57  ;;  %3374 = vmatpush.msra.mxu2 %v3099_v57 }
 0x254   : > { %3013 = vst.msk [vmem:[%s5834_s29 + $0x40] sm:$0xff] %vm3004_vm1, %v2996_v19  ;;  %v3054_v8 = vmul.f32 %v3034_v15, %v2996_v19  ;;  %v1902_v19 = vadd.f32 %v5815_v56, %v1882_v27 }
 0x255   : > { %v5928_v22 = vpop.permute.xlu1 %1865  ;;  %3119 = vmatpush.msra.mxu0 %v3098_v6  ;;  %3375 = vmatpush.msra.mxu2 %v3098_v6 }
 0x256   : > { %v3069_v47 = vsel %vm3004_vm1, %v3054_v8, 0.0  ;;  %v1918_v35 = vmax.f32 %v1902_v19, 0.0  ;;  %v1886_v14 = vmul.f32 %v5805_v38, %v5928_v22 }
 0x257   : > { %v3070_v30 = vadd.f32 %v3069_v47, %v3068_v40  ;;  %3120 = vmatpush.msra.mxu0 %v3097_v61  ;;  %3376 = vmatpush.msra.mxu2 %v3097_v61  ;;  %v1919_v40 = vmax.f32 %v1903_v10, 0.0 }
 0x258   : > { %v1906_v61 = vadd.f32 %v5815_v56, %v1886_v14 }
 0x259   : > { %v2798_v29 = vpop.permute.xlu0 %2797  ;;  %3121 = vmatpush.msra.mxu0 %v3096_v20  ;;  %3377 = vmatpush.msra.mxu2 %v3096_v20 }
 0x25a   : > { %v2964_v55 = vsel %vm2953_vm0, %v1917_v7, %v2798_v29  ;;  %v2965_v29 = vsel %vm2953_vm0, %v1918_v35, %v5933_v49  ;;  %v1922_v51 = vmax.f32 %v1906_v61, 0.0 }
 0x25b   : > { %v2926_v43 = vpop.permute.xlu2 %2925  ;;  %3122 = vmatpush.msra.mxu0 %v3095_v18  ;;  %3378 = vmatpush.msra.mxu2 %v3095_v18 }
 0x25d   : > { %v2920_v53 = vpop.permute.xlu1 %2919  ;;  %3123 = vmatpush.msra.mxu0 %v3094_v42  ;;  %3379 = vmatpush.msra.mxu2 %v3094_v42  ;;  %v3447_v42 = vld [vmem:[%s6079_s14] ss:$0 sm:$0xff] }
 0x25e   : > { %v2995_v59 = vsel %vm2987_vm15, %v2978_v5, %v2920_v53 }
 0x25f   : > { %3012 = vst.msk [vmem:[%s5834_s29 + $0x38] sm:$0xff] %vm3004_vm1, %v2995_v59  ;;  %v3053_v44 = vmul.f32 %v3033_v11, %v2995_v59  ;;  %v1916_v11 = vmax.f32 %v1900_v2, 0.0 }
 0x261   : > { %v3082_v46 = vsel %vm3004_vm1, %v3053_v44, 0.0  ;;  %v2860_v32 = vpop.permute.xlu0 %2859  ;;  %v2963_v4 = vsel %vm2953_vm0, %v1916_v11, %v5897_v63  ;;  %v3028_v63 = vrot.slane %v5826_v50, 6 }
 0x262   : > { %v3083_v62 = vadd.f32 %v3082_v46, %v3081_v28  ;;  %v2980_v37 = vsel %vm2970_vm14, %v2963_v4, %v2860_v32  ;;  %v3093_v28 = vld [vmem:[%s6078_s13 + $0x8] sm:$0xff]  ;;  %v1905_v32 = vadd.f32 %v5815_v56, %v1885_v48 }
 0x263   : > { %v2804_v52 = vpop.permute.xlu2 %2803  ;;  %v3036_v25 = vperm.slane %v3028_v63, 0  ;;  %3124 = vmatpush.msra.mxu0 %v3093_v28  ;;  %3380 = vmatpush.msra.mxu2 %v3093_v28  ;;  %v3136_v63 = vld [vmem:[%s6080_s15 + $0x8] sm:$0xff] }
 0x264   : > { %v1921_v57 = vmax.f32 %v1905_v32, 0.0  ;;  %3157 = vmatpush.msra.mxu1 %v3136_v63 }
 0x265   : > { %v2862_v54 = vpop.permute.xlu1 %2861 }
 0x266   : > { %v2981_v26 = vsel %vm2970_vm14, %v2964_v55, %v2862_v54  ;;  %v3029_v54 = vrot.slane %v5826_v50, 7 }
 0x267   : > { %v2998_v36 = vsel %vm2987_vm15, %v2981_v26, %v2926_v43 }
 0x268   : > { %3015 = vst.msk [vmem:[%s5834_s29 + $0x50] sm:$0xff] %vm3004_vm1, %v2998_v36  ;;  %v3056_v41 = vmul.f32 %v5949_v39, %v2998_v36  ;;  %v3037_v12 = vperm.slane %v3029_v54, 0 }
 0x269   : > { %v2802_v23 = vpop.permute.xlu0 %2801 }
 0x26a   : > { %v3071_v3 = vsel %vm3004_vm1, %v3056_v41, 0.0  ;;  %v2966_v45 = vsel %vm2953_vm0, %v1919_v40, %v2802_v23 }
 0x26b   : > { %v3072_v31 = vadd.f32 %v3071_v3, %v3070_v30  ;;  %v2930_v24 = vpop.permute.xlu2 %2929 }
 0x26d   : > { %v2924_v13 = vpop.permute.xlu1 %2923 }
 0x26e   : > { %v2997_v9 = vsel %vm2987_vm15, %v2980_v37, %v2924_v13 }
 0x26f   : > { %3014 = vst.msk [vmem:[%s5834_s29 + $0x48] sm:$0xff] %vm3004_vm1, %v2997_v9  ;;  %v3055_v60 = vmul.f32 %v3034_v15, %v2997_v9  ;;  %v3092_v15 = vld [vmem:[%s6078_s13] sm:$0xff] }
 0x270   : > { %3125 = vmatpush.msra.mxu0 %v3092_v15  ;;  %3381 = vmatpush.msra.mxu2 %v3092_v15 }
 0x271   : > { %v3084_v21 = vsel %vm3004_vm1, %v3055_v60, 0.0  ;;  %v2864_v1 = vpop.permute.xlu0 %2863 }
 0x272   : > { %v3085_v34 = vadd.f32 %v3084_v21, %v3083_v62  ;;  %v2982_v53 = vsel %vm2970_vm14, %v2965_v29, %v2864_v1  ;;  %v1904_v62 = vadd.f32 %v5815_v56, %v1884_v0  ;;  %v3135_v21 = vld [vmem:[%s6080_s15] sm:$0xff] }
 0x273   : > { %v2808_v55 = vpop.permute.xlu2 %2807  ;;  %3158 = vmatpush.msra.mxu1 %v3135_v21 }
 0x274   : > { %v2969_v23 = vsel %vm2953_vm0, %v1922_v51, %v2808_v55 }
 0x275   : > { %v2866_v16 = vpop.permute.xlu1 %2865 }
 0x276   : > { %v2983_v8 = vsel %vm2970_vm14, %v2966_v45, %v2866_v16 }
 0x277   : > { %v3000_v58 = vsel %vm2987_vm15, %v2983_v8, %v2930_v24 }
 0x278   : > { %3017 = vst.msk [vmem:[%s5834_s29 + $0x60] sm:$0xff] %vm3004_vm1, %v3000_v58  ;;  %v3058_v47 = vmul.f32 %v3036_v25, %v3000_v58 }
 0x279   : > { %v2806_v5 = vpop.permute.xlu0 %2805 }
 0x27a   : > { %v3073_v30 = vsel %vm3004_vm1, %v3058_v47, 0.0  ;;  %v2968_v26 = vsel %vm2953_vm0, %v1921_v57, %v2806_v5 }
 0x27b   : > { %v3074_v17 = vadd.f32 %v3073_v30, %v3072_v31  ;;  %v2872_v31 = vpop.permute.xlu2 %2871 }
 0x27c   : > { %v2986_v37 = vsel %vm2970_vm14, %v2969_v23, %v2872_v31 }
 0x27d   : > { %v2928_v59 = vpop.permute.xlu1 %2927 }
 0x27e   : > { %v2999_v33 = vsel %vm2987_vm15, %v2982_v53, %v2928_v59 }
 0x27f   : > { %3016 = vst.msk [vmem:[%s5834_s29 + $0x58] sm:$0xff] %vm3004_vm1, %v2999_v33  ;;  %v3057_v44 = vmul.f32 %v5949_v39, %v2999_v33  ;;  %v1920_v39 = vmax.f32 %v1904_v62, 0.0 }
 0x281   : > { %v3086_v46 = vsel %vm3004_vm1, %v3057_v44, 0.0  ;;  %v2868_v49 = vpop.permute.xlu0 %2867  ;;  %v2967_v2 = vsel %vm2953_vm0, %v1920_v39, %v2804_v52 }
 0x282   : > { %v3087_v43 = vadd.f32 %v3086_v46, %v3085_v34  ;;  %v2984_v6 = vsel %vm2970_vm14, %v2967_v2, %v2868_v49 }
 0x285   : > { %v2870_v7 = vpop.permute.xlu1 %2869 }
 0x286   : > { %v2985_v41 = vsel %vm2970_vm14, %v2968_v26, %v2870_v7 }
 0x289   : > { %v2932_v36 = vpop.permute.xlu0 %2931 }
 0x28a   : > { %v3001_v50 = vsel %vm2987_vm15, %v2984_v6, %v2932_v36 }
 0x28b   : > { %3018 = vst.msk [vmem:[%s5834_s29 + $0x68] sm:$0xff] %vm3004_vm1, %v3001_v50  ;;  %v3059_v38 = vmul.f32 %v3036_v25, %v3001_v50 }
 0x28d   : > { %v2934_v20 = vpop.permute.xlu1 %2933  ;;  %v3088_v3 = vsel %vm3004_vm1, %v3059_v38, 0.0 }
 0x28e   : > { %v3002_v22 = vsel %vm2987_vm15, %v2985_v41, %v2934_v20  ;;  %v3089_v4 = vadd.f32 %v3088_v3, %v3087_v43 }
 0x28f   : > { %3019 = vst.msk [vmem:[%s5834_s29 + $0x70] sm:$0xff] %vm3004_vm1, %v3002_v22  ;;  %v3060_v11 = vmul.f32 %v3037_v12, %v3002_v22 }
 0x291   : > { %v3075_v56 = vsel %vm3004_vm1, %v3060_v11, 0.0  ;;  %v2936_v13 = vpop.permute.xlu0 %2935 }
 0x292   : > { %v3076_v52 = vadd.f32 %v3075_v56, %v3074_v17  ;;  %v3003_v9 = vsel %vm2987_vm15, %v2986_v37, %v2936_v13 }
 0x293   : > { %3020 = vst.msk [vmem:[%s5834_s29 + $0x78] sm:$0xff] %vm3004_vm1, %v3003_v9  ;;  %v3061_v10 = vmul.f32 %v3037_v12, %v3003_v9  ;;  %s3373_s29 = sshll.u32 %s6524_s28, 4 }
 0x294   : > { %3365 = vmatmul.msk.f32.vlgmr.msra.gmra.mxu0 %vm3004_vm1, %v3076_v52  ;;  %s620_s21 = scalar_lea.vmem %s6082_s17, %s3373_s29 }
 0x295   : > { %v3090_v60 = vsel %vm3004_vm1, %v3061_v10, 0.0 }
 0x296   : > { %v3091_v18 = vadd.f32 %v3090_v60, %v3089_v4 }
 0x298   : > { %3366 = vmatmul.msk.f32.vlgmr.msra.gmra.mxu2 %vm3004_vm1, %v3091_v18 }
 0x311   : > { %v3127_v28 = vpop.f32.mrf.mxu0 }
 0x312   : > { %v3128_v27 = vadd.f32 %v3447_v42, %v3127_v28 }
 0x314   : > { %v3133_v34 = vmax.f32 %v3128_v27, 0.0 }
 0x316   : > { %3367 = vmatmul.msk.f32.vlgmr.msra.gmra.mxu1 %vm2953_vm0, %v3133_v34 }
 0x31b   : > { %v3130_v40 = vpop.f32.mrf.mxu2 }
 0x31c   : > { %v3131_v15 = vadd.f32 %v3447_v42, %v3130_v40 }
 0x31e   : > { %v3134_v1 = vmax.f32 %v3131_v15, 0.0 }
 0x320   : > { %3368 = vmatmul.msk.f32.gmra.mxu1 %vm2953_vm0, %v3134_v1 }
 0x393   : > { %v3160_v25 = vpop.f32.mrf.mxu1 }
 0x394   : > { %v3167_v45 = vsel %vm3166_vm2, %v3160_v25, -inf }
 0x395   : > { %3168 = vmax.xlane.f32.xlu1 %v3167_v45 }
 0x39d   : > { %v3163_v16 = vpop.f32.mrf.mxu1 }
 0x39e   : > { %v3170_v19 = vsel %vm3166_vm2, %v3163_v16, -inf }
 0x39f   : > { %3171 = vmax.xlane.f32.xlu2 %v3170_v19 }
 0x408   : > { %v3169_v24 = vpop.xlane.xlu1 %3168 }
 0x409   : > { %v3173_v8 = vsub.f32 %v3160_v25, %v3169_v24 }
 0x40b   : > { %v3175_v58 = vmul.f32 1.442695, %v3173_v8 }
 0x40d   : > { %3466 = vpow2.f32 %v3175_v58 }
 0x412   : > { %v3172_v30 = vpop.xlane.xlu2 %3171 }
 0x413   : > { %v3467_v47 = vpop.eup %3466  ;;  %v3174_v17 = vsub.f32 %v3163_v16, %v3172_v30 }
 0x414   : > { %v3179_v35 = vsel %vm3166_vm2, %v3467_v47, 0.0 }
 0x415   : > { %3180 = vadd.xlane.f32.xlu0 %v3179_v35  ;;  %v3177_v29 = vmul.f32 1.442695, %v3174_v17 }
 0x417   : > { %3468 = vpow2.f32 %v3177_v29 }
 0x41d   : > { %v3469_v5 = vpop.eup %3468 }
 0x41e   : > { %v3182_v53 = vsel %vm3166_vm2, %v3469_v5, 0.0 }
 0x41f   : > { %3183 = vadd.xlane.f32.xlu2 %v3182_v53 }
 0x488   : > { %v3181_v59 = vpop.xlane.xlu0 %3180 }
 0x489   : > { %3470 = vrcp.f32 %v3181_v59  ;;  %v3196_v46 = vand.u32 2147483648, %v3181_v59  ;;  %v3194_v43 = vand.u32 2147483647, %v3181_v59  ;;  %vm3190_vm4 = vweird.f32 %v3181_v59 }
 0x48b   : > { %v3197_v7 = vor.u32 1.1754944e-38, %v3196_v46  ;;  %vm3195_vm6 = vcmp.eq.f32.partialorder %v3194_v43, 8.507059e+37 }
 0x48f   : > { %v3471_v33 = vpop.eup %3470 }
 0x490   : > { %v3186_v44 = vmul.f32 %v3471_v33, %v3181_v59  ;;  %vm3191_vm3 = vweird.f32 %v3471_v33 }
 0x491   : > { %vm3192_vm5 = vmor %vm3190_vm4, %vm3191_vm3 }
 0x492   : > { %v3187_v0 = vsub.f32 1.0, %v3186_v44  ;;  %v3184_v49 = vpop.xlane.xlu2 %3183 }
 0x493   : > { %3472 = vrcp.f32 %v3184_v49  ;;  %v3211_v2 = vand.u32 2147483648, %v3184_v49  ;;  %v3209_v26 = vand.u32 2147483647, %v3184_v49  ;;  %vm3205_vm8 = vweird.f32 %v3184_v49 }
 0x494   : > { %v3188_v48 = vmul.f32 %v3471_v33, %v3187_v0 }
 0x495   : > { %v3212_v36 = vor.u32 1.1754944e-38, %v3211_v2  ;;  %vm3210_vm11 = vcmp.eq.f32.partialorder %v3209_v26, 8.507059e+37 }
 0x496   : > { %v3189_v62 = vadd.f32 %v3471_v33, %v3188_v48 }
 0x498   : > { %v3193_v32 = vsel %vm3192_vm5, %v3471_v33, %v3189_v62 }
 0x499   : > { %v3198_v55 = vsel %vm3195_vm6, %v3197_v7, %v3193_v32  ;;  %v3473_v39 = vpop.eup %3472 }
 0x49a   : > { %v3199_v54 = vmul.f32 %v3467_v47, %v3198_v55  ;;  %v3201_v14 = vmul.f32 %v3473_v39, %v3184_v49  ;;  %vm3206_vm7 = vweird.f32 %v3473_v39 }
 0x49b   : > { %vm3207_vm9 = vmor %vm3205_vm8, %vm3206_vm7 }
 0x49c   : > { %3215 = vst.msk [vmem:[%s620_s21] sm:$0xff] %vm3166_vm2, %v3199_v54  ;;  %v3202_v57 = vsub.f32 1.0, %v3201_v14 }
 0x49e   : > { %v3203_v12 = vmul.f32 %v3473_v39, %v3202_v57 }
 0x4a0   : > { %v3204_v6 = vadd.f32 %v3473_v39, %v3203_v12 }
 0x4a2   : > { %v3208_v61 = vsel %vm3207_vm9, %v3473_v39, %v3204_v6 }
 0x4a3   : > { %v3213_v41 = vsel %vm3210_vm11, %v3212_v36, %v3208_v61 }
 0x4a4   : > { %v3214_v50 = vmul.f32 %v3469_v5, %v3213_v41 }
 0x4a6   : > { %3216 = vst.msk [vmem:[%s620_s21 + $0x8] sm:$0xff] %vm3166_vm2, %v3214_v50 }
 0x4a7 PF: > { %s31_s24 = sadd.s32 1, %s3628_s24  }
 0x4a8   : > { %p28_p7 = scmp.ge.s32.totalorder %s31_s24, 4  }
 0x4aa   :  { %30 = sbr.rel (!%p28_p7) target bundleno = 8 (0x8), region = 146 }
 0x4af   :  { %3254 = vsyncpa [#allocation4], 1 }
 0x4b0   :  { %3256 = vsyncpa [#allocation4 + $0x1], 1 }
 0x4b1   :  { %3257 = vsyncpa [#allocation6], 1 }
 0x4b2   :  { %3258 = vsyncpa [#allocation9], 1 }

</bundles_post_ra>
